<compile_context>
chip_gen: v7x
topology: tpu7x:2x2x1
jax: 0.10.0
libtpu: 0.0.40
codegen_flags: <defaults>
</compile_context>

<pallas_src>
import functools

import jax
import jax.numpy as jnp
from jax.experimental import pallas as pl
from jax.experimental.pallas import tpu as pltpu

LANE = 128          # channel dims padded to the 128-lane width
EPS = 1e-5          # nn.InstanceNorm2d default eps (biased variance, affine=False)
_VMEM_LIMIT = 48 * 1024 * 1024


def _rup(c, m=LANE):
    return ((c + m - 1) // m) * m


def _pick_mblock(total, oc):
    # Largest divisor of `total` whose (M, oc) f32 accumulator stays within ~32 vregs.
    tgt = max(8, 32768 // max(oc, 1))
    best = 1
    for m in range(1, total + 1):
        if total % m == 0 and m <= tgt:
            best = m
    return best


def _pick_rb(oh, ow, oc):
    # Rows per MXU issue.  ow must be a sublane multiple so the (rb,ow,C)->(rb*ow,C)
    # reshape is a layout no-op; otherwise fall back to one row per matmul.
    if ow % 8 != 0:
        return 1
    tgt = max(8, 32768 // max(oc, 1))
    best = 1
    for rb in range(1, oh + 1):
        if oh % rb == 0 and rb * ow <= tgt:
            best = rb
    return best


# ----------------------------------------------------------------------------
# Traced in-kernel helpers
# ----------------------------------------------------------------------------
def _finalize_stats(s1, s2, count, eps):
    mean = s1 / count
    var = jnp.maximum(s2 / count - mean * mean, 0.0)   # one-pass biased variance (f32)
    return mean, jax.lax.rsqrt(var + eps)


def _leaky(y):
    return jnp.where(y >= 0.0, y, 0.2 * y)             # LeakyReLU(0.2)


# ----------------------------------------------------------------------------
# Kernel 1: 7x7 conv as a single im2col matmul (+ InstanceNorm + LeakyReLU)
# Input is pre-im2col'ed and spatially flattened: (1, S=H*W, Kp) bf16.
# ----------------------------------------------------------------------------
def _conv1_kernel(x_ref, w_ref, o_ref, acc_ref, *, s, mb, eps):
    oc = w_ref.shape[-1]
    nmb = s // mb

    def blk(bi, carry):
        s1, s2 = carry
        p0 = pl.multiple_of(bi * mb, mb)
        a = jnp.dot(x_ref[0, pl.ds(p0, mb), :], w_ref[...],
                    preferred_element_type=jnp.float32)          # (mb, OCp)
        acc_ref[pl.ds(p0, mb), :] = a
        return (s1 + jnp.sum(a, axis=0, keepdims=True),
                s2 + jnp.sum(a * a, axis=0, keepdims=True))

    z = jnp.zeros((1, oc), jnp.float32)
    s1, s2 = jax.lax.fori_loop(0, nmb, blk, (z, z))
    mean, inv = _finalize_stats(s1, s2, float(s), eps)

    def norm_blk(bi, c):
        p0 = pl.multiple_of(bi * mb, mb)
        y = (acc_ref[pl.ds(p0, mb), :] - mean) * inv
        o_ref[0, pl.ds(p0, mb), :] = _leaky(y).astype(o_ref.dtype)
        return c

    jax.lax.fori_loop(0, nmb, norm_blk, 0)


# ----------------------------------------------------------------------------
# Kernel 2: stride-2 3x3 conv (zero pad 1, input as 2x2 stride phases) + IN + LeakyReLU
# Row-blocked: each tap issues one (rb*ow, C)@(C, OC) matmul; output is spatially flat.
# ----------------------------------------------------------------------------
def _conv_s2_kernel(ph_ref, w_ref, o_ref, acc_ref, *, oh, ow, hh, rb, eps):
    # ph_ref: (1, 4*hh, wh, C) bf16 -- phase p occupies rows [p*hh, (p+1)*hh)
    oc = w_ref.shape[-1]
    nrb = oh // rb
    mrow = rb * ow

    def blk(bi, carry):
        s1, s2 = carry
        r0 = pl.multiple_of(bi * rb, rb)
        p0 = pl.multiple_of(bi * mrow, mrow)
        a = jnp.zeros((mrow, oc), jnp.float32)
        t = 0
        for i in range(3):
            for j in range(3):
                p = (i % 2) * 2 + (j % 2)
                row0 = p * hh + (i // 2)
                c0 = j // 2
                win = ph_ref[0, pl.ds(row0 + r0, rb), pl.ds(c0, ow), :]   # (rb, ow, C)
                a = a + jnp.dot(win.reshape(mrow, -1), w_ref[t],
                                preferred_element_type=jnp.float32)
                t += 1
        acc_ref[pl.ds(p0, mrow), :] = a
        return (s1 + jnp.sum(a, axis=0, keepdims=True),
                s2 + jnp.sum(a * a, axis=0, keepdims=True))

    z = jnp.zeros((1, oc), jnp.float32)
    s1, s2 = jax.lax.fori_loop(0, nrb, blk, (z, z))
    mean, inv = _finalize_stats(s1, s2, float(oh * ow), eps)

    def norm_blk(bi, c):
        p0 = pl.multiple_of(bi * mrow, mrow)
        y = (acc_ref[pl.ds(p0, mrow), :] - mean) * inv
        o_ref[0, pl.ds(p0, mrow), :] = _leaky(y).astype(o_ref.dtype)
        return c

    jax.lax.fori_loop(0, nrb, norm_blk, 0)


# ----------------------------------------------------------------------------
# Kernel 3: fused ResnetBlock: conv3x3 + IN + ReLU + conv3x3 + IN + residual add.
# Input is UNPADDED; the 1-pixel reflect padding is built in-kernel in a VMEM scratch.
# ----------------------------------------------------------------------------
def _resblock_kernel(x_ref, w1_ref, w2_ref, o_ref, acc_ref, tp_ref, *, h, w, rb, eps):
    # x_ref: (1, h, w, C) bf16; acc_ref: VMEM (h, w, C) f32; tp_ref: VMEM (h+2, w+2, C) bf16
    c = x_ref.shape[-1]
    count = float(h * w)
    nrb = h // rb
    mrow = rb * w
    z = jnp.zeros((1, c), jnp.float32)

    def build_ring():
        # reflect pad=1: rows first, then full columns (corners come out correct)
        tp_ref[0:1, 1:w + 1, :] = tp_ref[2:3, 1:w + 1, :]
        tp_ref[h + 1:h + 2, 1:w + 1, :] = tp_ref[h - 1:h, 1:w + 1, :]
        tp_ref[:, 0:1, :] = tp_ref[:, 2:3, :]
        tp_ref[:, w + 1:w + 2, :] = tp_ref[:, w - 1:w, :]

    # ---- stage 0: copy the block input into the padded scratch + reflect ring ----
    def copy_blk(bi, cst):
        r0 = pl.multiple_of(bi * rb, rb)
        tp_ref[pl.ds(1 + r0, rb), 1:w + 1, :] = x_ref[0, pl.ds(r0, rb), :, :]
        return cst

    jax.lax.fori_loop(0, nrb, copy_blk, 0)
    build_ring()

    # ---- row-blocked 9-tap conv from tp_ref into acc_ref, with one-pass IN stats ----
    def conv_from_tp(wt_ref):
        def blk(bi, carry):
            s1, s2 = carry
            r0 = pl.multiple_of(bi * rb, rb)
            a = jnp.zeros((mrow, c), jnp.float32)
            t = 0
            for i in range(3):
                for j in range(3):
                    win = tp_ref[pl.ds(i + r0, rb), pl.ds(j, w), :]       # (rb, w, C)
                    a = a + jnp.dot(win.reshape(mrow, -1), wt_ref[t],
                                    preferred_element_type=jnp.float32)
                    t += 1
            acc_ref[pl.ds(r0, rb)] = a.reshape(rb, w, c)
            return (s1 + jnp.sum(a, axis=0, keepdims=True),
                    s2 + jnp.sum(a * a, axis=0, keepdims=True))
        return jax.lax.fori_loop(0, nrb, blk, (z, z))

    # ---- conv1 + IN + ReLU back into tp_ref interior ----
    s1, s2 = conv_from_tp(w1_ref)
    mean1, inv1 = _finalize_stats(s1, s2, count, eps)

    def relu_blk(bi, cst):
        r0 = pl.multiple_of(bi * rb, rb)
        y = jnp.maximum((acc_ref[pl.ds(r0, rb)] - mean1) * inv1, 0.0)
        tp_ref[pl.ds(1 + r0, rb), 1:w + 1, :] = y.astype(tp_ref.dtype)
        return cst

    jax.lax.fori_loop(0, nrb, relu_blk, 0)
    build_ring()

    # ---- conv2 + IN + residual add ----
    s1, s2 = conv_from_tp(w2_ref)
    mean2, inv2 = _finalize_stats(s1, s2, count, eps)

    def out_blk(bi, cst):
        r0 = pl.multiple_of(bi * rb, rb)
        y = (acc_ref[pl.ds(r0, rb)] - mean2) * inv2
        res = x_ref[0, pl.ds(r0, rb), :, :].astype(jnp.float32)
        o_ref[0, pl.ds(r0, rb)] = (res + y).astype(o_ref.dtype)
        return cst

    jax.lax.fori_loop(0, nrb, out_blk, 0)


# ----------------------------------------------------------------------------
# Wrappers (channels-last activations, bf16 streams)
# ----------------------------------------------------------------------------
def _conv1_in_lrelu(x, wt, *, eps=EPS):
    # x: (N, H, W, IC) real channels (float32); wt: (Kp, OCp) bf16 (im2col weight)
    n, hgt, wid, ic = x.shape
    kp, ocp = wt.shape
    k = 49 * ic
    assert kp >= k
    xp = jnp.pad(x, ((0, 0), (3, 3), (3, 3), (0, 0)), mode="reflect")
    cols = [xp[:, i:i + hgt, j:j + wid, :] for i in range(7) for j in range(7)]
    xc = jnp.concatenate(cols, axis=-1)                                   # (N,H,W,49*IC)
    xc = jnp.pad(xc, ((0, 0), (0, 0), (0, 0), (0, kp - k))).astype(jnp.bfloat16)
    s = hgt * wid
    xc = xc.reshape(n, s, kp)
    mb = _pick_mblock(s, ocp)
    out = pl.pallas_call(
        functools.partial(_conv1_kernel, s=s, mb=mb, eps=eps),
        out_shape=jax.ShapeDtypeStruct((n, s, ocp), jnp.bfloat16),
        grid=(n,),
        in_specs=[pl.BlockSpec((1, s, kp), lambda b: (b, 0, 0)),
                  pl.BlockSpec((kp, ocp), lambda b: (0, 0))],
        out_specs=pl.BlockSpec((1, s, ocp), lambda b: (b, 0, 0)),
        scratch_shapes=[pltpu.VMEM((s, ocp), jnp.float32)],
        compiler_params=pltpu.CompilerParams(
            dimension_semantics=("parallel",), vmem_limit_bytes=_VMEM_LIMIT),
    )(xc, wt)
    return out.reshape(n, hgt, wid, ocp)


def _conv_in_lrelu_s2(x, wt, *, eps=EPS):
    n, hgt, wid, c = x.shape
    oc = wt.shape[-1]
    assert hgt % 2 == 0 and wid % 2 == 0
    oh, ow = hgt // 2, wid // 2
    hh, wh = oh + 1, ow + 1
    xp = jnp.pad(x, ((0, 0), (1, 1), (1, 1), (0, 0)))          # zero padding
    # 2x2 stride-phase decomposition (same total bytes; avoids strided in-kernel loads)
    ph = jnp.stack([xp[:, 0::2, 0::2, :], xp[:, 0::2, 1::2, :],
                    xp[:, 1::2, 0::2, :], xp[:, 1::2, 1::2, :]], axis=1)
    ph = ph.reshape(n, 4 * hh, wh, c)
    rb = _pick_rb(oh, ow, oc)
    s = oh * ow
    out = pl.pallas_call(
        functools.partial(_conv_s2_kernel, oh=oh, ow=ow, hh=hh, rb=rb, eps=eps),
        out_shape=jax.ShapeDtypeStruct((n, s, oc), jnp.bfloat16),
        grid=(n,),
        in_specs=[pl.BlockSpec((1, 4 * hh, wh, c), lambda b: (b, 0, 0, 0)),
                  pl.BlockSpec((9, c, oc), lambda b: (0, 0, 0))],
        out_specs=pl.BlockSpec((1, s, oc), lambda b: (b, 0, 0)),
        scratch_shapes=[pltpu.VMEM((s, oc), jnp.float32)],
        compiler_params=pltpu.CompilerParams(
            dimension_semantics=("parallel",), vmem_limit_bytes=_VMEM_LIMIT),
    )(ph, wt)
    return out.reshape(n, oh, ow, oc)


def _resblock(hin, wt1, wt2, *, eps=EPS):
    n, hgt, wid, c = hin.shape
    rb = _pick_rb(hgt, wid, c)
    return pl.pallas_call(
        functools.partial(_resblock_kernel, h=hgt, w=wid, rb=rb, eps=eps),
        out_shape=jax.ShapeDtypeStruct((n, hgt, wid, c), jnp.bfloat16),
        grid=(n,),
        in_specs=[pl.BlockSpec((1, hgt, wid, c), lambda b: (b, 0, 0, 0)),
                  pl.BlockSpec((9, c, c), lambda b: (0, 0, 0)),
                  pl.BlockSpec((9, c, c), lambda b: (0, 0, 0))],
        out_specs=pl.BlockSpec((1, hgt, wid, c), lambda b: (b, 0, 0, 0)),
        scratch_shapes=[pltpu.VMEM((hgt, wid, c), jnp.float32),
                        pltpu.VMEM((hgt + 2, wid + 2, c), jnp.bfloat16)],
        compiler_params=pltpu.CompilerParams(
            dimension_semantics=("parallel",), vmem_limit_bytes=_VMEM_LIMIT),
    )(hin, wt1, wt2)


# ----------------------------------------------------------------------------
# Parameters (synthetic, deterministic) + Encoder forward
# ----------------------------------------------------------------------------
def _prep_w_taps(w, icp, ocp):
    # PyTorch (OC, IC, KH, KW) -> per-tap (KH*KW, ICp, OCp), bf16, zero-padded.
    oc, ic, kh, kw = w.shape
    wt = w.transpose(2, 3, 1, 0).reshape(kh * kw, ic, oc)
    wt = jnp.pad(wt, ((0, 0), (0, icp - ic), (0, ocp - oc)))
    return wt.astype(jnp.bfloat16)


def _prep_w_im2col(w, ocp):
    # PyTorch (OC, IC, KH, KW) -> im2col (Kp = rup(KH*KW*IC), OCp), bf16, zero-padded.
    oc, ic, kh, kw = w.shape
    k = kh * kw * ic
    kp = _rup(k)
    wt = w.transpose(2, 3, 1, 0).reshape(k, oc)
    wt = jnp.pad(wt, ((0, kp - k), (0, ocp - oc)))
    return wt.astype(jnp.bfloat16)


def init_encoder_params(key, in_channels=1, nb_channels=64):
    c1, c2, c4 = nb_channels, nb_channels * 2, nb_channels * 4
    c1p, c2p, c4p = _rup(c1), _rup(c2), _rup(c4)
    keys = jax.random.split(key, 15)
    # Conv biases omitted on purpose: InstanceNorm2d(affine=False) cancels them exactly.
    p = {
        "w1": _prep_w_im2col(
            jax.random.normal(keys[0], (c1, in_channels, 7, 7), jnp.float32) * 0.1, c1p),
        "w2": _prep_w_taps(
            jax.random.normal(keys[1], (c2, c1, 3, 3), jnp.float32) * 0.1, c1p, c2p),
        "w3": _prep_w_taps(
            jax.random.normal(keys[2], (c4, c2, 3, 3), jnp.float32) * 0.1, c2p, c4p),
        "res": [],
    }
    for i in range(6):
        wa = _prep_w_taps(jax.random.normal(keys[3 + 2 * i], (c4, c4, 3, 3), jnp.float32) * 0.1,
                          c4p, c4p)
        wb = _prep_w_taps(jax.random.normal(keys[4 + 2 * i], (c4, c4, 3, 3), jnp.float32) * 0.1,
                          c4p, c4p)
        p["res"].append((wa, wb))
    return p


def encoder_forward(x_nchw, params, *, nb_channels):
    c1, c2, c4 = nb_channels, nb_channels * 2, nb_channels * 4

    # NCHW -> channels-last (real channel count; layer 1 does its own im2col packing).
    x = jnp.transpose(x_nchw, (0, 2, 3, 1))

    x1 = _conv1_in_lrelu(x, params["w1"])           # (N, H,   W,   C1p)
    x2 = _conv_in_lrelu_s2(x1, params["w2"])        # (N, H/2, W/2, C2p)
    x3 = _conv_in_lrelu_s2(x2, params["w3"])        # (N, H/4, W/4, C4p)
    h = x3
    for wt1, wt2 in params["res"]:
        h = _resblock(h, wt1, wt2)

    def to_nchw(a, c_real):                         # strip channel padding at the boundary
        return jnp.transpose(a[..., :c_real], (0, 3, 1, 2)).astype(jnp.float32)

    return to_nchw(h, c4), to_nchw(x3, c4), to_nchw(x2, c2), to_nchw(x1, c1)


if __name__ == "__main__":
    key = jax.random.PRNGKey(0)
    k_params, k_x = jax.random.split(key)

    N, IN_CH, NB, H, W = 2, 1, 8, 32, 32
    params = init_encoder_params(k_params, in_channels=IN_CH, nb_channels=NB)
    x = jax.random.normal(k_x, (N, IN_CH, H, W), jnp.float32)

    fwd = jax.jit(functools.partial(encoder_forward, nb_channels=NB))
    out, x3, x2, x1 = fwd(x, params)
    jax.block_until_ready((out, x3, x2, x1))

    assert out.shape == (N, NB * 4, H // 4, W // 4)
    assert x3.shape == (N, NB * 4, H // 4, W // 4)
    assert x2.shape == (N, NB * 2, H // 2, W // 2)
    assert x1.shape == (N, NB, H, W)
    print("KERNEL_OK")
</pallas_src>

<mosaic_0001>
module attributes {stable_mosaic.version = 11 : i64} {
  func.func @_conv1_kernel(%arg0: i32, %arg1: memref<1x1024x128xbf16, #tpu.memory_space<vmem>>, %arg2: memref<128x128xbf16, #tpu.memory_space<vmem>>, %arg3: memref<1x1024x128xbf16, #tpu.memory_space<vmem>>, %arg4: memref<1024x128xf32, #tpu.memory_space<vmem>>) attributes {dimension_semantics = [#tpu.dimension_semantics<parallel>], iteration_bounds = array<i64: 2>, scalar_prefetch = 0 : i64, scratch_operands = 1 : i64, tpu.core_type = #tpu.core_type<tc>, window_params = [{transform_indices = @transform_0, window_bounds = array<i64: 1, 1024, 128>}, {pipeline_mode = #tpu.pipeline_mode<synchronous>, transform_indices = @transform_1, window_bounds = array<i64: 128, 128>}, {transform_indices = @transform_2, window_bounds = array<i64: 1, 1024, 128>}]} {
    %cst = arith.constant 0.000000e+00 : f32
    %0 = vector.broadcast %cst : f32 to vector<1x128xf32>
    %c0_i32 = arith.constant 0 : i32
    %c4_i32 = arith.constant 4 : i32
    %1 = arith.addi %c0_i32, %c4_i32 : i32
    %c1_i32 = arith.constant 1 : i32
    %2:2 = scf.for %arg5 = %c0_i32 to %1 step %c1_i32 iter_args(%arg6 = %0, %arg7 = %0) -> (vector<1x128xf32>, vector<1x128xf32>)  : i32 {
      %c256_i32 = arith.constant 256 : i32
      %15 = arith.muli %arg5, %c256_i32 : i32
      %16 = tpu.assume_multiple %15, 256 : i32
      %c0 = arith.constant 0 : index
      %17 = arith.index_cast %16 : i32 to index
      %c0_9 = arith.constant 0 : index
      %18 = vector.load %arg1[%c0, %17, %c0_9] : memref<1x1024x128xbf16, #tpu.memory_space<vmem>>, vector<1x256x128xbf16>
      %19 = vector.shape_cast %18 : vector<1x256x128xbf16> to vector<256x128xbf16>
      %c0_10 = arith.constant 0 : index
      %c0_11 = arith.constant 0 : index
      %20 = vector.load %arg2[%c0_10, %c0_11] : memref<128x128xbf16, #tpu.memory_space<vmem>>, vector<128x128xbf16>
      %cst_12 = arith.constant dense<0.000000e+00> : vector<256x128xf32>
      %21 = tpu.matmul %19, %20, %cst_12 {dimension_numbers = #tpu.dot_dimension_numbers<[1], [0], [0], [1], [0, 0, 1, 1], [], []>} : vector<256x128xbf16>, vector<128x128xbf16>, vector<256x128xf32> -> vector<256x128xf32>
      %22 = arith.index_cast %16 : i32 to index
      %c0_13 = arith.constant 0 : index
      %23 = vector.load %arg4[%22, %c0_13] : memref<1024x128xf32, #tpu.memory_space<vmem>>, vector<256x128xf32>
      tpu.vector_store %arg4[%22, %c0_13], %21 {strides = array<i32>} : memref<1024x128xf32, #tpu.memory_space<vmem>>, vector<256x128xf32>,
      %cst_14 = arith.constant dense<0.000000e+00> : vector<128xf32>
      %24 = vector.multi_reduction <add>, %21, %cst_14 [0] : vector<256x128xf32> to vector<128xf32>
      %25 = vector.shape_cast %24 : vector<128xf32> to vector<1x128xf32>
      %26 = arith.addf %arg6, %25 : vector<1x128xf32>
      %27 = arith.mulf %21, %21 : vector<256x128xf32>
      %cst_15 = arith.constant dense<0.000000e+00> : vector<128xf32>
      %28 = vector.multi_reduction <add>, %27, %cst_15 [0] : vector<256x128xf32> to vector<128xf32>
      %29 = vector.shape_cast %28 : vector<128xf32> to vector<1x128xf32>
      %30 = arith.addf %arg7, %29 : vector<1x128xf32>
      scf.yield %26, %30 : vector<1x128xf32>, vector<1x128xf32>
    }
    %c4_i32_0 = arith.constant 4 : i32
    %cst_1 = arith.constant 1.024000e+03 : f32
    %3 = vector.broadcast %cst_1 : f32 to vector<1x128xf32>
    %4 = arith.divf %2#0, %3 : vector<1x128xf32>
    %cst_2 = arith.constant 1.024000e+03 : f32
    %5 = vector.broadcast %cst_2 : f32 to vector<1x128xf32>
    %6 = arith.divf %2#1, %5 : vector<1x128xf32>
    %7 = arith.mulf %4, %4 : vector<1x128xf32>
    %8 = arith.subf %6, %7 : vector<1x128xf32>
    %cst_3 = arith.constant 0.000000e+00 : f32
    %9 = vector.broadcast %cst_3 : f32 to vector<1x128xf32>
    %10 = arith.maximumf %8, %9 : vector<1x128xf32>
    %cst_4 = arith.constant 9.99999974E-6 : f32
    %11 = vector.broadcast %cst_4 : f32 to vector<1x128xf32>
    %12 = arith.addf %10, %11 : vector<1x128xf32>
    %13 = math.rsqrt %12 : vector<1x128xf32>
    %c0_i32_5 = arith.constant 0 : i32
    %c4_i32_6 = arith.constant 4 : i32
    %14 = arith.addi %c0_i32_5, %c4_i32_6 : i32
    %c1_i32_7 = arith.constant 1 : i32
    scf.for %arg5 = %c0_i32_5 to %14 step %c1_i32_7  : i32 {
      %c256_i32 = arith.constant 256 : i32
      %15 = arith.muli %arg5, %c256_i32 : i32
      %16 = tpu.assume_multiple %15, 256 : i32
      %17 = arith.index_cast %16 : i32 to index
      %c0 = arith.constant 0 : index
      %18 = vector.load %arg4[%17, %c0] : memref<1024x128xf32, #tpu.memory_space<vmem>>, vector<256x128xf32>
      %19 = vector.broadcast %4 : vector<1x128xf32> to vector<256x128xf32>
      %20 = arith.subf %18, %19 : vector<256x128xf32>
      %21 = vector.broadcast %13 : vector<1x128xf32> to vector<256x128xf32>
      %22 = arith.mulf %20, %21 : vector<256x128xf32>
      %cst_9 = arith.constant 0.000000e+00 : f32
      %23 = vector.broadcast %cst_9 : f32 to vector<256x128xf32>
      %24 = arith.cmpf oge, %22, %23 : vector<256x128xf32>
      %cst_10 = arith.constant 2.000000e-01 : f32
      %25 = vector.broadcast %cst_10 : f32 to vector<256x128xf32>
      %26 = arith.mulf %25, %22 : vector<256x128xf32>
      %27 = arith.select %24, %22, %26 : vector<256x128xi1>, vector<256x128xf32>
      %28 = arith.truncf %27 : vector<256x128xf32> to vector<256x128xbf16>
      %c0_11 = arith.constant 0 : index
      %29 = arith.index_cast %16 : i32 to index
      %c0_12 = arith.constant 0 : index
      %30 = vector.load %arg3[%c0_11, %29, %c0_12] : memref<1x1024x128xbf16, #tpu.memory_space<vmem>>, vector<1x256x128xbf16>
      %31 = vector.shape_cast %30 : vector<1x256x128xbf16> to vector<256x128xbf16>
      %32 = vector.shape_cast %28 : vector<256x128xbf16> to vector<1x256x128xbf16>
      tpu.vector_store %arg3[%c0_11, %29, %c0_12], %32 {strides = array<i32>} : memref<1x1024x128xbf16, #tpu.memory_space<vmem>>, vector<1x256x128xbf16>,
    }
    %c4_i32_8 = arith.constant 4 : i32
    return
  }
  func.func @transform_0(%arg0: i32) -> (i32, i32, i32) {
    %c0_i32 = arith.constant 0 : i32
    %c0_i32_0 = arith.constant 0 : i32
    %c0_i32_1 = arith.constant 0 : i32
    return %arg0, %c0_i32, %c0_i32_0 : i32, i32, i32
  }
  func.func @transform_1(%arg0: i32) -> (i32, i32) {
    %c0_i32 = arith.constant 0 : i32
    %c0_i32_0 = arith.constant 0 : i32
    %c0_i32_1 = arith.constant 0 : i32
    return %c0_i32, %c0_i32_0 : i32, i32
  }
  func.func @transform_2(%arg0: i32) -> (i32, i32, i32) {
    %c0_i32 = arith.constant 0 : i32
    %c0_i32_0 = arith.constant 0 : i32
    %c0_i32_1 = arith.constant 0 : i32
    return %arg0, %c0_i32, %c0_i32_0 : i32, i32, i32
  }
}

module attributes {stable_mosaic.version = 11 : i64} {
  func.func @_conv_s2_kernel(%arg0: i32, %arg1: memref<1x68x17x128xbf16, #tpu.memory_space<vmem>>, %arg2: memref<9x128x128xbf16, #tpu.memory_space<vmem>>, %arg3: memref<1x256x128xbf16, #tpu.memory_space<vmem>>, %arg4: memref<256x128xf32, #tpu.memory_space<vmem>>) attributes {dimension_semantics = [#tpu.dimension_semantics<parallel>], iteration_bounds = array<i64: 2>, scalar_prefetch = 0 : i64, scratch_operands = 1 : i64, tpu.core_type = #tpu.core_type<tc>, window_params = [{transform_indices = @transform_0, window_bounds = array<i64: 1, 68, 17, 128>}, {pipeline_mode = #tpu.pipeline_mode<synchronous>, transform_indices = @transform_1, window_bounds = array<i64: 9, 128, 128>}, {transform_indices = @transform_2, window_bounds = array<i64: 1, 256, 128>}]} {
    %cst = arith.constant 0.000000e+00 : f32
    %0 = vector.broadcast %cst : f32 to vector<1x128xf32>
    %c0_i32 = arith.constant 0 : i32
    %c16_i32 = arith.constant 16 : i32
    %1 = arith.muli %c0_i32, %c16_i32 : i32
    %2 = tpu.assume_multiple %1, 16 : i32
    %c256_i32 = arith.constant 256 : i32
    %3 = arith.muli %c0_i32, %c256_i32 : i32
    %4 = tpu.assume_multiple %3, 256 : i32
    %cst_0 = arith.constant 0.000000e+00 : f32
    %5 = vector.broadcast %cst_0 : f32 to vector<256x128xf32>
    %c0_i32_1 = arith.constant 0 : i32
    %6 = arith.addi %c0_i32_1, %2 : i32
    %c0 = arith.constant 0 : index
    %7 = arith.index_cast %6 : i32 to index
    %c0_2 = arith.constant 0 : index
    %c0_3 = arith.constant 0 : index
    %8 = vector.load %arg1[%c0, %7, %c0_2, %c0_3] : memref<1x68x17x128xbf16, #tpu.memory_space<vmem>>, vector<1x16x16x128xbf16>
    %9 = vector.shape_cast %8 : vector<1x16x16x128xbf16> to vector<16x16x128xbf16>
    %10 = vector.shape_cast %9 : vector<16x16x128xbf16> to vector<256x128xbf16>
    %c0_4 = arith.constant 0 : index
    %c0_5 = arith.constant 0 : index
    %c0_6 = arith.constant 0 : index
    %11 = vector.load %arg2[%c0_4, %c0_5, %c0_6] : memref<9x128x128xbf16, #tpu.memory_space<vmem>>, vector<1x128x128xbf16>
    %12 = vector.shape_cast %11 : vector<1x128x128xbf16> to vector<128x128xbf16>
    %cst_7 = arith.constant dense<0.000000e+00> : vector<256x128xf32>
    %13 = tpu.matmul %10, %12, %cst_7 {dimension_numbers = #tpu.dot_dimension_numbers<[1], [0], [0], [1], [0, 0, 1, 1], [], []>} : vector<256x128xbf16>, vector<128x128xbf16>, vector<256x128xf32> -> vector<256x128xf32>
    %14 = arith.addf %5, %13 : vector<256x128xf32>
    %c17_i32 = arith.constant 17 : i32
    %15 = arith.addi %c17_i32, %2 : i32
    %c0_8 = arith.constant 0 : index
    %16 = arith.index_cast %15 : i32 to index
    %c0_9 = arith.constant 0 : index
    %c0_10 = arith.constant 0 : index
    %17 = vector.load %arg1[%c0_8, %16, %c0_9, %c0_10] : memref<1x68x17x128xbf16, #tpu.memory_space<vmem>>, vector<1x16x16x128xbf16>
    %18 = vector.shape_cast %17 : vector<1x16x16x128xbf16> to vector<16x16x128xbf16>
    %19 = vector.shape_cast %18 : vector<16x16x128xbf16> to vector<256x128xbf16>
    %c1 = arith.constant 1 : index
    %c0_11 = arith.constant 0 : index
    %c0_12 = arith.constant 0 : index
    %20 = vector.load %arg2[%c1, %c0_11, %c0_12] : memref<9x128x128xbf16, #tpu.memory_space<vmem>>, vector<1x128x128xbf16>
    %21 = vector.shape_cast %20 : vector<1x128x128xbf16> to vector<128x128xbf16>
    %cst_13 = arith.constant dense<0.000000e+00> : vector<256x128xf32>
    %22 = tpu.matmul %19, %21, %cst_13 {dimension_numbers = #tpu.dot_dimension_numbers<[1], [0], [0], [1], [0, 0, 1, 1], [], []>} : vector<256x128xbf16>, vector<128x128xbf16>, vector<256x128xf32> -> vector<256x128xf32>
    %23 = arith.addf %14, %22 : vector<256x128xf32>
    %c0_i32_14 = arith.constant 0 : i32
    %24 = arith.addi %c0_i32_14, %2 : i32
    %c0_15 = arith.constant 0 : index
    %25 = arith.index_cast %24 : i32 to index
    %c1_16 = arith.constant 1 : index
    %c0_17 = arith.constant 0 : index
    %26 = vector.load %arg1[%c0_15, %25, %c1_16, %c0_17] : memref<1x68x17x128xbf16, #tpu.memory_space<vmem>>, vector<1x16x16x128xbf16>
    %27 = vector.shape_cast %26 : vector<1x16x16x128xbf16> to vector<16x16x128xbf16>
    %28 = vector.shape_cast %27 : vector<16x16x128xbf16> to vector<256x128xbf16>
    %c2 = arith.constant 2 : index
    %c0_18 = arith.constant 0 : index
    %c0_19 = arith.constant 0 : index
    %29 = vector.load %arg2[%c2, %c0_18, %c0_19] : memref<9x128x128xbf16, #tpu.memory_space<vmem>>, vector<1x128x128xbf16>
    %30 = vector.shape_cast %29 : vector<1x128x128xbf16> to vector<128x128xbf16>
    %cst_20 = arith.constant dense<0.000000e+00> : vector<256x128xf32>
    %31 = tpu.matmul %28, %30, %cst_20 {dimension_numbers = #tpu.dot_dimension_numbers<[1], [0], [0], [1], [0, 0, 1, 1], [], []>} : vector<256x128xbf16>, vector<128x128xbf16>, vector<256x128xf32> -> vector<256x128xf32>
    %32 = arith.addf %23, %31 : vector<256x128xf32>
    %c34_i32 = arith.constant 34 : i32
    %33 = arith.addi %c34_i32, %2 : i32
    %c0_21 = arith.constant 0 : index
    %34 = arith.index_cast %33 : i32 to index
    %c0_22 = arith.constant 0 : index
    %c0_23 = arith.constant 0 : index
    %35 = vector.load %arg1[%c0_21, %34, %c0_22, %c0_23] : memref<1x68x17x128xbf16, #tpu.memory_space<vmem>>, vector<1x16x16x128xbf16>
    %36 = vector.shape_cast %35 : vector<1x16x16x128xbf16> to vector<16x16x128xbf16>
    %37 = vector.shape_cast %36 : vector<16x16x128xbf16> to vector<256x128xbf16>
    %c3 = arith.constant 3 : index
    %c0_24 = arith.constant 0 : index
    %c0_25 = arith.constant 0 : index
    %38 = vector.load %arg2[%c3, %c0_24, %c0_25] : memref<9x128x128xbf16, #tpu.memory_space<vmem>>, vector<1x128x128xbf16>
    %39 = vector.shape_cast %38 : vector<1x128x128xbf16> to vector<128x128xbf16>
    %cst_26 = arith.constant dense<0.000000e+00> : vector<256x128xf32>
    %40 = tpu.matmul %37, %39, %cst_26 {dimension_numbers = #tpu.dot_dimension_numbers<[1], [0], [0], [1], [0, 0, 1, 1], [], []>} : vector<256x128xbf16>, vector<128x128xbf16>, vector<256x128xf32> -> vector<256x128xf32>
    %41 = arith.addf %32, %40 : vector<256x128xf32>
    %c51_i32 = arith.constant 51 : i32
    %42 = arith.addi %c51_i32, %2 : i32
    %c0_27 = arith.constant 0 : index
    %43 = arith.index_cast %42 : i32 to index
    %c0_28 = arith.constant 0 : index
    %c0_29 = arith.constant 0 : index
    %44 = vector.load %arg1[%c0_27, %43, %c0_28, %c0_29] : memref<1x68x17x128xbf16, #tpu.memory_space<vmem>>, vector<1x16x16x128xbf16>
    %45 = vector.shape_cast %44 : vector<1x16x16x128xbf16> to vector<16x16x128xbf16>
    %46 = vector.shape_cast %45 : vector<16x16x128xbf16> to vector<256x128xbf16>
    %c4 = arith.constant 4 : index
    %c0_30 = arith.constant 0 : index
    %c0_31 = arith.constant 0 : index
    %47 = vector.load %arg2[%c4, %c0_30, %c0_31] : memref<9x128x128xbf16, #tpu.memory_space<vmem>>, vector<1x128x128xbf16>
    %48 = vector.shape_cast %47 : vector<1x128x128xbf16> to vector<128x128xbf16>
    %cst_32 = arith.constant dense<0.000000e+00> : vector<256x128xf32>
    %49 = tpu.matmul %46, %48, %cst_32 {dimension_numbers = #tpu.dot_dimension_numbers<[1], [0], [0], [1], [0, 0, 1, 1], [], []>} : vector<256x128xbf16>, vector<128x128xbf16>, vector<256x128xf32> -> vector<256x128xf32>
    %50 = arith.addf %41, %49 : vector<256x128xf32>
    %c34_i32_33 = arith.constant 34 : i32
    %51 = arith.addi %c34_i32_33, %2 : i32
    %c0_34 = arith.constant 0 : index
    %52 = arith.index_cast %51 : i32 to index
    %c1_35 = arith.constant 1 : index
    %c0_36 = arith.constant 0 : index
    %53 = vector.load %arg1[%c0_34, %52, %c1_35, %c0_36] : memref<1x68x17x128xbf16, #tpu.memory_space<vmem>>, vector<1x16x16x128xbf16>
    %54 = vector.shape_cast %53 : vector<1x16x16x128xbf16> to vector<16x16x128xbf16>
    %55 = vector.shape_cast %54 : vector<16x16x128xbf16> to vector<256x128xbf16>
    %c5 = arith.constant 5 : index
    %c0_37 = arith.constant 0 : index
    %c0_38 = arith.constant 0 : index
    %56 = vector.load %arg2[%c5, %c0_37, %c0_38] : memref<9x128x128xbf16, #tpu.memory_space<vmem>>, vector<1x128x128xbf16>
    %57 = vector.shape_cast %56 : vector<1x128x128xbf16> to vector<128x128xbf16>
    %cst_39 = arith.constant dense<0.000000e+00> : vector<256x128xf32>
    %58 = tpu.matmul %55, %57, %cst_39 {dimension_numbers = #tpu.dot_dimension_numbers<[1], [0], [0], [1], [0, 0, 1, 1], [], []>} : vector<256x128xbf16>, vector<128x128xbf16>, vector<256x128xf32> -> vector<256x128xf32>
    %59 = arith.addf %50, %58 : vector<256x128xf32>
    %c1_i32 = arith.constant 1 : i32
    %60 = arith.addi %c1_i32, %2 : i32
    %c0_40 = arith.constant 0 : index
    %61 = arith.index_cast %60 : i32 to index
    %c0_41 = arith.constant 0 : index
    %c0_42 = arith.constant 0 : index
    %62 = vector.load %arg1[%c0_40, %61, %c0_41, %c0_42] : memref<1x68x17x128xbf16, #tpu.memory_space<vmem>>, vector<1x16x16x128xbf16>
    %63 = vector.shape_cast %62 : vector<1x16x16x128xbf16> to vector<16x16x128xbf16>
    %64 = vector.shape_cast %63 : vector<16x16x128xbf16> to vector<256x128xbf16>
    %c6 = arith.constant 6 : index
    %c0_43 = arith.constant 0 : index
    %c0_44 = arith.constant 0 : index
    %65 = vector.load %arg2[%c6, %c0_43, %c0_44] : memref<9x128x128xbf16, #tpu.memory_space<vmem>>, vector<1x128x128xbf16>
    %66 = vector.shape_cast %65 : vector<1x128x128xbf16> to vector<128x128xbf16>
    %cst_45 = arith.constant dense<0.000000e+00> : vector<256x128xf32>
    %67 = tpu.matmul %64, %66, %cst_45 {dimension_numbers = #tpu.dot_dimension_numbers<[1], [0], [0], [1], [0, 0, 1, 1], [], []>} : vector<256x128xbf16>, vector<128x128xbf16>, vector<256x128xf32> -> vector<256x128xf32>
    %68 = arith.addf %59, %67 : vector<256x128xf32>
    %c18_i32 = arith.constant 18 : i32
    %69 = arith.addi %c18_i32, %2 : i32
    %c0_46 = arith.constant 0 : index
    %70 = arith.index_cast %69 : i32 to index
    %c0_47 = arith.constant 0 : index
    %c0_48 = arith.constant 0 : index
    %71 = vector.load %arg1[%c0_46, %70, %c0_47, %c0_48] : memref<1x68x17x128xbf16, #tpu.memory_space<vmem>>, vector<1x16x16x128xbf16>
    %72 = vector.shape_cast %71 : vector<1x16x16x128xbf16> to vector<16x16x128xbf16>
    %73 = vector.shape_cast %72 : vector<16x16x128xbf16> to vector<256x128xbf16>
    %c7 = arith.constant 7 : index
    %c0_49 = arith.constant 0 : index
    %c0_50 = arith.constant 0 : index
    %74 = vector.load %arg2[%c7, %c0_49, %c0_50] : memref<9x128x128xbf16, #tpu.memory_space<vmem>>, vector<1x128x128xbf16>
    %75 = vector.shape_cast %74 : vector<1x128x128xbf16> to vector<128x128xbf16>
    %cst_51 = arith.constant dense<0.000000e+00> : vector<256x128xf32>
    %76 = tpu.matmul %73, %75, %cst_51 {dimension_numbers = #tpu.dot_dimension_numbers<[1], [0], [0], [1], [0, 0, 1, 1], [], []>} : vector<256x128xbf16>, vector<128x128xbf16>, vector<256x128xf32> -> vector<256x128xf32>
    %77 = arith.addf %68, %76 : vector<256x128xf32>
    %c1_i32_52 = arith.constant 1 : i32
    %78 = arith.addi %c1_i32_52, %2 : i32
    %c0_53 = arith.constant 0 : index
    %79 = arith.index_cast %78 : i32 to index
    %c1_54 = arith.constant 1 : index
    %c0_55 = arith.constant 0 : index
    %80 = vector.load %arg1[%c0_53, %79, %c1_54, %c0_55] : memref<1x68x17x128xbf16, #tpu.memory_space<vmem>>, vector<1x16x16x128xbf16>
    %81 = vector.shape_cast %80 : vector<1x16x16x128xbf16> to vector<16x16x128xbf16>
    %82 = vector.shape_cast %81 : vector<16x16x128xbf16> to vector<256x128xbf16>
    %c8 = arith.constant 8 : index
    %c0_56 = arith.constant 0 : index
    %c0_57 = arith.constant 0 : index
    %83 = vector.load %arg2[%c8, %c0_56, %c0_57] : memref<9x128x128xbf16, #tpu.memory_space<vmem>>, vector<1x128x128xbf16>
    %84 = vector.shape_cast %83 : vector<1x128x128xbf16> to vector<128x128xbf16>
    %cst_58 = arith.constant dense<0.000000e+00> : vector<256x128xf32>
    %85 = tpu.matmul %82, %84, %cst_58 {dimension_numbers = #tpu.dot_dimension_numbers<[1], [0], [0], [1], [0, 0, 1, 1], [], []>} : vector<256x128xbf16>, vector<128x128xbf16>, vector<256x128xf32> -> vector<256x128xf32>
    %86 = arith.addf %77, %85 : vector<256x128xf32>
    %87 = arith.index_cast %4 : i32 to index
    %c0_59 = arith.constant 0 : index
    %88 = vector.load %arg4[%87, %c0_59] : memref<256x128xf32, #tpu.memory_space<vmem>>, vector<256x128xf32>
    tpu.vector_store %arg4[%87, %c0_59], %86 {strides = array<i32>} : memref<256x128xf32, #tpu.memory_space<vmem>>, vector<256x128xf32>,
    %cst_60 = arith.constant dense<0.000000e+00> : vector<128xf32>
    %89 = vector.multi_reduction <add>, %86, %cst_60 [0] : vector<256x128xf32> to vector<128xf32>
    %90 = vector.shape_cast %89 : vector<128xf32> to vector<1x128xf32>
    %91 = arith.addf %0, %90 : vector<1x128xf32>
    %92 = arith.mulf %86, %86 : vector<256x128xf32>
    %cst_61 = arith.constant dense<0.000000e+00> : vector<128xf32>
    %93 = vector.multi_reduction <add>, %92, %cst_61 [0] : vector<256x128xf32> to vector<128xf32>
    %94 = vector.shape_cast %93 : vector<128xf32> to vector<1x128xf32>
    %95 = arith.addf %0, %94 : vector<1x128xf32>
    %c1_i32_62 = arith.constant 1 : i32
    %cst_63 = arith.constant 2.560000e+02 : f32
    %96 = vector.broadcast %cst_63 : f32 to vector<1x128xf32>
    %97 = arith.divf %91, %96 : vector<1x128xf32>
    %cst_64 = arith.constant 2.560000e+02 : f32
    %98 = vector.broadcast %cst_64 : f32 to vector<1x128xf32>
    %99 = arith.divf %95, %98 : vector<1x128xf32>
    %100 = arith.mulf %97, %97 : vector<1x128xf32>
    %101 = arith.subf %99, %100 : vector<1x128xf32>
    %cst_65 = arith.constant 0.000000e+00 : f32
    %102 = vector.broadcast %cst_65 : f32 to vector<1x128xf32>
    %103 = arith.maximumf %101, %102 : vector<1x128xf32>
    %cst_66 = arith.constant 9.99999974E-6 : f32
    %104 = vector.broadcast %cst_66 : f32 to vector<1x128xf32>
    %105 = arith.addf %103, %104 : vector<1x128xf32>
    %106 = math.rsqrt %105 : vector<1x128xf32>
    %c0_i32_67 = arith.constant 0 : i32
    %c256_i32_68 = arith.constant 256 : i32
    %107 = arith.muli %c0_i32_67, %c256_i32_68 : i32
    %108 = tpu.assume_multiple %107, 256 : i32
    %109 = arith.index_cast %108 : i32 to index
    %c0_69 = arith.constant 0 : index
    %110 = vector.load %arg4[%109, %c0_69] : memref<256x128xf32, #tpu.memory_space<vmem>>, vector<256x128xf32>
    %111 = vector.broadcast %97 : vector<1x128xf32> to vector<256x128xf32>
    %112 = arith.subf %110, %111 : vector<256x128xf32>
    %113 = vector.broadcast %106 : vector<1x128xf32> to vector<256x128xf32>
    %114 = arith.mulf %112, %113 : vector<256x128xf32>
    %cst_70 = arith.constant 0.000000e+00 : f32
    %115 = vector.broadcast %cst_70 : f32 to vector<256x128xf32>
    %116 = arith.cmpf oge, %114, %115 : vector<256x128xf32>
    %cst_71 = arith.constant 2.000000e-01 : f32
    %117 = vector.broadcast %cst_71 : f32 to vector<256x128xf32>
    %118 = arith.mulf %117, %114 : vector<256x128xf32>
    %119 = arith.select %116, %114, %118 : vector<256x128xi1>, vector<256x128xf32>
    %120 = arith.truncf %119 : vector<256x128xf32> to vector<256x128xbf16>
    %c0_72 = arith.constant 0 : index
    %121 = arith.index_cast %108 : i32 to index
    %c0_73 = arith.constant 0 : index
    %122 = vector.load %arg3[%c0_72, %121, %c0_73] : memref<1x256x128xbf16, #tpu.memory_space<vmem>>, vector<1x256x128xbf16>
    %123 = vector.shape_cast %122 : vector<1x256x128xbf16> to vector<256x128xbf16>
    %124 = vector.shape_cast %120 : vector<256x128xbf16> to vector<1x256x128xbf16>
    tpu.vector_store %arg3[%c0_72, %121, %c0_73], %124 {strides = array<i32>} : memref<1x256x128xbf16, #tpu.memory_space<vmem>>, vector<1x256x128xbf16>,
    %c1_i32_74 = arith.constant 1 : i32
    return
  }
  func.func @transform_0(%arg0: i32) -> (i32, i32, i32, i32) {
    %c0_i32 = arith.constant 0 : i32
    %c0_i32_0 = arith.constant 0 : i32
    %c0_i32_1 = arith.constant 0 : i32
    %c0_i32_2 = arith.constant 0 : i32
    return %arg0, %c0_i32, %c0_i32_0, %c0_i32_1 : i32, i32, i32, i32
  }
  func.func @transform_1(%arg0: i32) -> (i32, i32, i32) {
    %c0_i32 = arith.constant 0 : i32
    %c0_i32_0 = arith.constant 0 : i32
    %c0_i32_1 = arith.constant 0 : i32
    %c0_i32_2 = arith.constant 0 : i32
    return %c0_i32, %c0_i32_0, %c0_i32_1 : i32, i32, i32
  }
  func.func @transform_2(%arg0: i32) -> (i32, i32, i32) {
    %c0_i32 = arith.constant 0 : i32
    %c0_i32_0 = arith.constant 0 : i32
    %c0_i32_1 = arith.constant 0 : i32
    return %arg0, %c0_i32, %c0_i32_0 : i32, i32, i32
  }
}

module attributes {stable_mosaic.version = 11 : i64} {
  func.func @_conv_s2_kernel(%arg0: i32, %arg1: memref<1x36x9x128xbf16, #tpu.memory_space<vmem>>, %arg2: memref<9x128x128xbf16, #tpu.memory_space<vmem>>, %arg3: memref<1x64x128xbf16, #tpu.memory_space<vmem>>, %arg4: memref<64x128xf32, #tpu.memory_space<vmem>>) attributes {dimension_semantics = [#tpu.dimension_semantics<parallel>], iteration_bounds = array<i64: 2>, scalar_prefetch = 0 : i64, scratch_operands = 1 : i64, tpu.core_type = #tpu.core_type<tc>, window_params = [{transform_indices = @transform_0, window_bounds = array<i64: 1, 36, 9, 128>}, {pipeline_mode = #tpu.pipeline_mode<synchronous>, transform_indices = @transform_1, window_bounds = array<i64: 9, 128, 128>}, {transform_indices = @transform_2, window_bounds = array<i64: 1, 64, 128>}]} {
    %cst = arith.constant 0.000000e+00 : f32
    %0 = vector.broadcast %cst : f32 to vector<1x128xf32>
    %c0_i32 = arith.constant 0 : i32
    %c8_i32 = arith.constant 8 : i32
    %1 = arith.muli %c0_i32, %c8_i32 : i32
    %2 = tpu.assume_multiple %1, 8 : i32
    %c64_i32 = arith.constant 64 : i32
    %3 = arith.muli %c0_i32, %c64_i32 : i32
    %4 = tpu.assume_multiple %3, 64 : i32
    %cst_0 = arith.constant 0.000000e+00 : f32
    %5 = vector.broadcast %cst_0 : f32 to vector<64x128xf32>
    %c0_i32_1 = arith.constant 0 : i32
    %6 = arith.addi %c0_i32_1, %2 : i32
    %c0 = arith.constant 0 : index
    %7 = arith.index_cast %6 : i32 to index
    %c0_2 = arith.constant 0 : index
    %c0_3 = arith.constant 0 : index
    %8 = vector.load %arg1[%c0, %7, %c0_2, %c0_3] : memref<1x36x9x128xbf16, #tpu.memory_space<vmem>>, vector<1x8x8x128xbf16>
    %9 = vector.shape_cast %8 : vector<1x8x8x128xbf16> to vector<8x8x128xbf16>
    %10 = vector.shape_cast %9 : vector<8x8x128xbf16> to vector<64x128xbf16>
    %c0_4 = arith.constant 0 : index
    %c0_5 = arith.constant 0 : index
    %c0_6 = arith.constant 0 : index
    %11 = vector.load %arg2[%c0_4, %c0_5, %c0_6] : memref<9x128x128xbf16, #tpu.memory_space<vmem>>, vector<1x128x128xbf16>
    %12 = vector.shape_cast %11 : vector<1x128x128xbf16> to vector<128x128xbf16>
    %cst_7 = arith.constant dense<0.000000e+00> : vector<64x128xf32>
    %13 = tpu.matmul %10, %12, %cst_7 {dimension_numbers = #tpu.dot_dimension_numbers<[1], [0], [0], [1], [0, 0, 1, 1], [], []>} : vector<64x128xbf16>, vector<128x128xbf16>, vector<64x128xf32> -> vector<64x128xf32>
    %14 = arith.addf %5, %13 : vector<64x128xf32>
    %c9_i32 = arith.constant 9 : i32
    %15 = arith.addi %c9_i32, %2 : i32
    %c0_8 = arith.constant 0 : index
    %16 = arith.index_cast %15 : i32 to index
    %c0_9 = arith.constant 0 : index
    %c0_10 = arith.constant 0 : index
    %17 = vector.load %arg1[%c0_8, %16, %c0_9, %c0_10] : memref<1x36x9x128xbf16, #tpu.memory_space<vmem>>, vector<1x8x8x128xbf16>
    %18 = vector.shape_cast %17 : vector<1x8x8x128xbf16> to vector<8x8x128xbf16>
    %19 = vector.shape_cast %18 : vector<8x8x128xbf16> to vector<64x128xbf16>
    %c1 = arith.constant 1 : index
    %c0_11 = arith.constant 0 : index
    %c0_12 = arith.constant 0 : index
    %20 = vector.load %arg2[%c1, %c0_11, %c0_12] : memref<9x128x128xbf16, #tpu.memory_space<vmem>>, vector<1x128x128xbf16>
    %21 = vector.shape_cast %20 : vector<1x128x128xbf16> to vector<128x128xbf16>
    %cst_13 = arith.constant dense<0.000000e+00> : vector<64x128xf32>
    %22 = tpu.matmul %19, %21, %cst_13 {dimension_numbers = #tpu.dot_dimension_numbers<[1], [0], [0], [1], [0, 0, 1, 1], [], []>} : vector<64x128xbf16>, vector<128x128xbf16>, vector<64x128xf32> -> vector<64x128xf32>
    %23 = arith.addf %14, %22 : vector<64x128xf32>
    %c0_i32_14 = arith.constant 0 : i32
    %24 = arith.addi %c0_i32_14, %2 : i32
    %c0_15 = arith.constant 0 : index
    %25 = arith.index_cast %24 : i32 to index
    %c1_16 = arith.constant 1 : index
    %c0_17 = arith.constant 0 : index
    %26 = vector.load %arg1[%c0_15, %25, %c1_16, %c0_17] : memref<1x36x9x128xbf16, #tpu.memory_space<vmem>>, vector<1x8x8x128xbf16>
    %27 = vector.shape_cast %26 : vector<1x8x8x128xbf16> to vector<8x8x128xbf16>
    %28 = vector.shape_cast %27 : vector<8x8x128xbf16> to vector<64x128xbf16>
    %c2 = arith.constant 2 : index
    %c0_18 = arith.constant 0 : index
    %c0_19 = arith.constant 0 : index
    %29 = vector.load %arg2[%c2, %c0_18, %c0_19] : memref<9x128x128xbf16, #tpu.memory_space<vmem>>, vector<1x128x128xbf16>
    %30 = vector.shape_cast %29 : vector<1x128x128xbf16> to vector<128x128xbf16>
    %cst_20 = arith.constant dense<0.000000e+00> : vector<64x128xf32>
    %31 = tpu.matmul %28, %30, %cst_20 {dimension_numbers = #tpu.dot_dimension_numbers<[1], [0], [0], [1], [0, 0, 1, 1], [], []>} : vector<64x128xbf16>, vector<128x128xbf16>, vector<64x128xf32> -> vector<64x128xf32>
    %32 = arith.addf %23, %31 : vector<64x128xf32>
    %c18_i32 = arith.constant 18 : i32
    %33 = arith.addi %c18_i32, %2 : i32
    %c0_21 = arith.constant 0 : index
    %34 = arith.index_cast %33 : i32 to index
    %c0_22 = arith.constant 0 : index
    %c0_23 = arith.constant 0 : index
    %35 = vector.load %arg1[%c0_21, %34, %c0_22, %c0_23] : memref<1x36x9x128xbf16, #tpu.memory_space<vmem>>, vector<1x8x8x128xbf16>
    %36 = vector.shape_cast %35 : vector<1x8x8x128xbf16> to vector<8x8x128xbf16>
    %37 = vector.shape_cast %36 : vector<8x8x128xbf16> to vector<64x128xbf16>
    %c3 = arith.constant 3 : index
    %c0_24 = arith.constant 0 : index
    %c0_25 = arith.constant 0 : index
    %38 = vector.load %arg2[%c3, %c0_24, %c0_25] : memref<9x128x128xbf16, #tpu.memory_space<vmem>>, vector<1x128x128xbf16>
    %39 = vector.shape_cast %38 : vector<1x128x128xbf16> to vector<128x128xbf16>
    %cst_26 = arith.constant dense<0.000000e+00> : vector<64x128xf32>
    %40 = tpu.matmul %37, %39, %cst_26 {dimension_numbers = #tpu.dot_dimension_numbers<[1], [0], [0], [1], [0, 0, 1, 1], [], []>} : vector<64x128xbf16>, vector<128x128xbf16>, vector<64x128xf32> -> vector<64x128xf32>
    %41 = arith.addf %32, %40 : vector<64x128xf32>
    %c27_i32 = arith.constant 27 : i32
    %42 = arith.addi %c27_i32, %2 : i32
    %c0_27 = arith.constant 0 : index
    %43 = arith.index_cast %42 : i32 to index
    %c0_28 = arith.constant 0 : index
    %c0_29 = arith.constant 0 : index
    %44 = vector.load %arg1[%c0_27, %43, %c0_28, %c0_29] : memref<1x36x9x128xbf16, #tpu.memory_space<vmem>>, vector<1x8x8x128xbf16>
    %45 = vector.shape_cast %44 : vector<1x8x8x128xbf16> to vector<8x8x128xbf16>
    %46 = vector.shape_cast %45 : vector<8x8x128xbf16> to vector<64x128xbf16>
    %c4 = arith.constant 4 : index
    %c0_30 = arith.constant 0 : index
    %c0_31 = arith.constant 0 : index
    %47 = vector.load %arg2[%c4, %c0_30, %c0_31] : memref<9x128x128xbf16, #tpu.memory_space<vmem>>, vector<1x128x128xbf16>
    %48 = vector.shape_cast %47 : vector<1x128x128xbf16> to vector<128x128xbf16>
    %cst_32 = arith.constant dense<0.000000e+00> : vector<64x128xf32>
    %49 = tpu.matmul %46, %48, %cst_32 {dimension_numbers = #tpu.dot_dimension_numbers<[1], [0], [0], [1], [0, 0, 1, 1], [], []>} : vector<64x128xbf16>, vector<128x128xbf16>, vector<64x128xf32> -> vector<64x128xf32>
    %50 = arith.addf %41, %49 : vector<64x128xf32>
    %c18_i32_33 = arith.constant 18 : i32
    %51 = arith.addi %c18_i32_33, %2 : i32
    %c0_34 = arith.constant 0 : index
    %52 = arith.index_cast %51 : i32 to index
    %c1_35 = arith.constant 1 : index
    %c0_36 = arith.constant 0 : index
    %53 = vector.load %arg1[%c0_34, %52, %c1_35, %c0_36] : memref<1x36x9x128xbf16, #tpu.memory_space<vmem>>, vector<1x8x8x128xbf16>
    %54 = vector.shape_cast %53 : vector<1x8x8x128xbf16> to vector<8x8x128xbf16>
    %55 = vector.shape_cast %54 : vector<8x8x128xbf16> to vector<64x128xbf16>
    %c5 = arith.constant 5 : index
    %c0_37 = arith.constant 0 : index
    %c0_38 = arith.constant 0 : index
    %56 = vector.load %arg2[%c5, %c0_37, %c0_38] : memref<9x128x128xbf16, #tpu.memory_space<vmem>>, vector<1x128x128xbf16>
    %57 = vector.shape_cast %56 : vector<1x128x128xbf16> to vector<128x128xbf16>
    %cst_39 = arith.constant dense<0.000000e+00> : vector<64x128xf32>
    %58 = tpu.matmul %55, %57, %cst_39 {dimension_numbers = #tpu.dot_dimension_numbers<[1], [0], [0], [1], [0, 0, 1, 1], [], []>} : vector<64x128xbf16>, vector<128x128xbf16>, vector<64x128xf32> -> vector<64x128xf32>
    %59 = arith.addf %50, %58 : vector<64x128xf32>
    %c1_i32 = arith.constant 1 : i32
    %60 = arith.addi %c1_i32, %2 : i32
    %c0_40 = arith.constant 0 : index
    %61 = arith.index_cast %60 : i32 to index
    %c0_41 = arith.constant 0 : index
    %c0_42 = arith.constant 0 : index
    %62 = vector.load %arg1[%c0_40, %61, %c0_41, %c0_42] : memref<1x36x9x128xbf16, #tpu.memory_space<vmem>>, vector<1x8x8x128xbf16>
    %63 = vector.shape_cast %62 : vector<1x8x8x128xbf16> to vector<8x8x128xbf16>
    %64 = vector.shape_cast %63 : vector<8x8x128xbf16> to vector<64x128xbf16>
    %c6 = arith.constant 6 : index
    %c0_43 = arith.constant 0 : index
    %c0_44 = arith.constant 0 : index
    %65 = vector.load %arg2[%c6, %c0_43, %c0_44] : memref<9x128x128xbf16, #tpu.memory_space<vmem>>, vector<1x128x128xbf16>
    %66 = vector.shape_cast %65 : vector<1x128x128xbf16> to vector<128x128xbf16>
    %cst_45 = arith.constant dense<0.000000e+00> : vector<64x128xf32>
    %67 = tpu.matmul %64, %66, %cst_45 {dimension_numbers = #tpu.dot_dimension_numbers<[1], [0], [0], [1], [0, 0, 1, 1], [], []>} : vector<64x128xbf16>, vector<128x128xbf16>, vector<64x128xf32> -> vector<64x128xf32>
    %68 = arith.addf %59, %67 : vector<64x128xf32>
    %c10_i32 = arith.constant 10 : i32
    %69 = arith.addi %c10_i32, %2 : i32
    %c0_46 = arith.constant 0 : index
    %70 = arith.index_cast %69 : i32 to index
    %c0_47 = arith.constant 0 : index
    %c0_48 = arith.constant 0 : index
    %71 = vector.load %arg1[%c0_46, %70, %c0_47, %c0_48] : memref<1x36x9x128xbf16, #tpu.memory_space<vmem>>, vector<1x8x8x128xbf16>
    %72 = vector.shape_cast %71 : vector<1x8x8x128xbf16> to vector<8x8x128xbf16>
    %73 = vector.shape_cast %72 : vector<8x8x128xbf16> to vector<64x128xbf16>
    %c7 = arith.constant 7 : index
    %c0_49 = arith.constant 0 : index
    %c0_50 = arith.constant 0 : index
    %74 = vector.load %arg2[%c7, %c0_49, %c0_50] : memref<9x128x128xbf16, #tpu.memory_space<vmem>>, vector<1x128x128xbf16>
    %75 = vector.shape_cast %74 : vector<1x128x128xbf16> to vector<128x128xbf16>
    %cst_51 = arith.constant dense<0.000000e+00> : vector<64x128xf32>
    %76 = tpu.matmul %73, %75, %cst_51 {dimension_numbers = #tpu.dot_dimension_numbers<[1], [0], [0], [1], [0, 0, 1, 1], [], []>} : vector<64x128xbf16>, vector<128x128xbf16>, vector<64x128xf32> -> vector<64x128xf32>
    %77 = arith.addf %68, %76 : vector<64x128xf32>
    %c1_i32_52 = arith.constant 1 : i32
    %78 = arith.addi %c1_i32_52, %2 : i32
    %c0_53 = arith.constant 0 : index
    %79 = arith.index_cast %78 : i32 to index
    %c1_54 = arith.constant 1 : index
    %c0_55 = arith.constant 0 : index
    %80 = vector.load %arg1[%c0_53, %79, %c1_54, %c0_55] : memref<1x36x9x128xbf16, #tpu.memory_space<vmem>>, vector<1x8x8x128xbf16>
    %81 = vector.shape_cast %80 : vector<1x8x8x128xbf16> to vector<8x8x128xbf16>
    %82 = vector.shape_cast %81 : vector<8x8x128xbf16> to vector<64x128xbf16>
    %c8 = arith.constant 8 : index
    %c0_56 = arith.constant 0 : index
    %c0_57 = arith.constant 0 : index
    %83 = vector.load %arg2[%c8, %c0_56, %c0_57] : memref<9x128x128xbf16, #tpu.memory_space<vmem>>, vector<1x128x128xbf16>
    %84 = vector.shape_cast %83 : vector<1x128x128xbf16> to vector<128x128xbf16>
    %cst_58 = arith.constant dense<0.000000e+00> : vector<64x128xf32>
    %85 = tpu.matmul %82, %84, %cst_58 {dimension_numbers = #tpu.dot_dimension_numbers<[1], [0], [0], [1], [0, 0, 1, 1], [], []>} : vector<64x128xbf16>, vector<128x128xbf16>, vector<64x128xf32> -> vector<64x128xf32>
    %86 = arith.addf %77, %85 : vector<64x128xf32>
    %87 = arith.index_cast %4 : i32 to index
    %c0_59 = arith.constant 0 : index
    %88 = vector.load %arg4[%87, %c0_59] : memref<64x128xf32, #tpu.memory_space<vmem>>, vector<64x128xf32>
    tpu.vector_store %arg4[%87, %c0_59], %86 {strides = array<i32>} : memref<64x128xf32, #tpu.memory_space<vmem>>, vector<64x128xf32>,
    %cst_60 = arith.constant dense<0.000000e+00> : vector<128xf32>
    %89 = vector.multi_reduction <add>, %86, %cst_60 [0] : vector<64x128xf32> to vector<128xf32>
    %90 = vector.shape_cast %89 : vector<128xf32> to vector<1x128xf32>
    %91 = arith.addf %0, %90 : vector<1x128xf32>
    %92 = arith.mulf %86, %86 : vector<64x128xf32>
    %cst_61 = arith.constant dense<0.000000e+00> : vector<128xf32>
    %93 = vector.multi_reduction <add>, %92, %cst_61 [0] : vector<64x128xf32> to vector<128xf32>
    %94 = vector.shape_cast %93 : vector<128xf32> to vector<1x128xf32>
    %95 = arith.addf %0, %94 : vector<1x128xf32>
    %c1_i32_62 = arith.constant 1 : i32
    %cst_63 = arith.constant 6.400000e+01 : f32
    %96 = vector.broadcast %cst_63 : f32 to vector<1x128xf32>
    %97 = arith.divf %91, %96 : vector<1x128xf32>
    %cst_64 = arith.constant 6.400000e+01 : f32
    %98 = vector.broadcast %cst_64 : f32 to vector<1x128xf32>
    %99 = arith.divf %95, %98 : vector<1x128xf32>
    %100 = arith.mulf %97, %97 : vector<1x128xf32>
    %101 = arith.subf %99, %100 : vector<1x128xf32>
    %cst_65 = arith.constant 0.000000e+00 : f32
    %102 = vector.broadcast %cst_65 : f32 to vector<1x128xf32>
    %103 = arith.maximumf %101, %102 : vector<1x128xf32>
    %cst_66 = arith.constant 9.99999974E-6 : f32
    %104 = vector.broadcast %cst_66 : f32 to vector<1x128xf32>
    %105 = arith.addf %103, %104 : vector<1x128xf32>
    %106 = math.rsqrt %105 : vector<1x128xf32>
    %c0_i32_67 = arith.constant 0 : i32
    %c64_i32_68 = arith.constant 64 : i32
    %107 = arith.muli %c0_i32_67, %c64_i32_68 : i32
    %108 = tpu.assume_multiple %107, 64 : i32
    %109 = arith.index_cast %108 : i32 to index
    %c0_69 = arith.constant 0 : index
    %110 = vector.load %arg4[%109, %c0_69] : memref<64x128xf32, #tpu.memory_space<vmem>>, vector<64x128xf32>
    %111 = vector.broadcast %97 : vector<1x128xf32> to vector<64x128xf32>
    %112 = arith.subf %110, %111 : vector<64x128xf32>
    %113 = vector.broadcast %106 : vector<1x128xf32> to vector<64x128xf32>
    %114 = arith.mulf %112, %113 : vector<64x128xf32>
    %cst_70 = arith.constant 0.000000e+00 : f32
    %115 = vector.broadcast %cst_70 : f32 to vector<64x128xf32>
    %116 = arith.cmpf oge, %114, %115 : vector<64x128xf32>
    %cst_71 = arith.constant 2.000000e-01 : f32
    %117 = vector.broadcast %cst_71 : f32 to vector<64x128xf32>
    %118 = arith.mulf %117, %114 : vector<64x128xf32>
    %119 = arith.select %116, %114, %118 : vector<64x128xi1>, vector<64x128xf32>
    %120 = arith.truncf %119 : vector<64x128xf32> to vector<64x128xbf16>
    %c0_72 = arith.constant 0 : index
    %121 = arith.index_cast %108 : i32 to index
    %c0_73 = arith.constant 0 : index
    %122 = vector.load %arg3[%c0_72, %121, %c0_73] : memref<1x64x128xbf16, #tpu.memory_space<vmem>>, vector<1x64x128xbf16>
    %123 = vector.shape_cast %122 : vector<1x64x128xbf16> to vector<64x128xbf16>
    %124 = vector.shape_cast %120 : vector<64x128xbf16> to vector<1x64x128xbf16>
    tpu.vector_store %arg3[%c0_72, %121, %c0_73], %124 {strides = array<i32>} : memref<1x64x128xbf16, #tpu.memory_space<vmem>>, vector<1x64x128xbf16>,
    %c1_i32_74 = arith.constant 1 : i32
    return
  }
  func.func @transform_0(%arg0: i32) -> (i32, i32, i32, i32) {
    %c0_i32 = arith.constant 0 : i32
    %c0_i32_0 = arith.constant 0 : i32
    %c0_i32_1 = arith.constant 0 : i32
    %c0_i32_2 = arith.constant 0 : i32
    return %arg0, %c0_i32, %c0_i32_0, %c0_i32_1 : i32, i32, i32, i32
  }
  func.func @transform_1(%arg0: i32) -> (i32, i32, i32) {
    %c0_i32 = arith.constant 0 : i32
    %c0_i32_0 = arith.constant 0 : i32
    %c0_i32_1 = arith.constant 0 : i32
    %c0_i32_2 = arith.constant 0 : i32
    return %c0_i32, %c0_i32_0, %c0_i32_1 : i32, i32, i32
  }
  func.func @transform_2(%arg0: i32) -> (i32, i32, i32) {
    %c0_i32 = arith.constant 0 : i32
    %c0_i32_0 = arith.constant 0 : i32
    %c0_i32_1 = arith.constant 0 : i32
    return %arg0, %c0_i32, %c0_i32_0 : i32, i32, i32
  }
}

module attributes {stable_mosaic.version = 11 : i64} {
  func.func @_resblock_kernel(%arg0: i32, %arg1: memref<1x8x8x128xbf16, #tpu.memory_space<vmem>>, %arg2: memref<9x128x128xbf16, #tpu.memory_space<vmem>>, %arg3: memref<9x128x128xbf16, #tpu.memory_space<vmem>>, %arg4: memref<1x8x8x128xbf16, #tpu.memory_space<vmem>>, %arg5: memref<8x8x128xf32, #tpu.memory_space<vmem>>, %arg6: memref<10x10x128xbf16, #tpu.memory_space<vmem>>) attributes {dimension_semantics = [#tpu.dimension_semantics<parallel>], iteration_bounds = array<i64: 2>, scalar_prefetch = 0 : i64, scratch_operands = 2 : i64, tpu.core_type = #tpu.core_type<tc>, window_params = [{transform_indices = @transform_0, window_bounds = array<i64: 1, 8, 8, 128>}, {pipeline_mode = #tpu.pipeline_mode<synchronous>, transform_indices = @transform_1, window_bounds = array<i64: 9, 128, 128>}, {pipeline_mode = #tpu.pipeline_mode<synchronous>, transform_indices = @transform_2, window_bounds = array<i64: 9, 128, 128>}, {transform_indices = @transform_3, window_bounds = array<i64: 1, 8, 8, 128>}]} {
    %cst = arith.constant 0.000000e+00 : f32
    %0 = vector.broadcast %cst : f32 to vector<1x128xf32>
    %c0_i32 = arith.constant 0 : i32
    %c8_i32 = arith.constant 8 : i32
    %1 = arith.muli %c0_i32, %c8_i32 : i32
    %2 = tpu.assume_multiple %1, 8 : i32
    %c0 = arith.constant 0 : index
    %3 = arith.index_cast %2 : i32 to index
    %c0_0 = arith.constant 0 : index
    %c0_1 = arith.constant 0 : index
    %4 = vector.load %arg1[%c0, %3, %c0_0, %c0_1] : memref<1x8x8x128xbf16, #tpu.memory_space<vmem>>, vector<1x8x8x128xbf16>
    %5 = vector.shape_cast %4 : vector<1x8x8x128xbf16> to vector<8x8x128xbf16>
    %c1_i32 = arith.constant 1 : i32
    %6 = arith.addi %c1_i32, %2 : i32
    %7 = arith.index_cast %6 : i32 to index
    %c1 = arith.constant 1 : index
    %c0_2 = arith.constant 0 : index
    %8 = vector.load %arg6[%7, %c1, %c0_2] : memref<10x10x128xbf16, #tpu.memory_space<vmem>>, vector<8x8x128xbf16>
    tpu.vector_store %arg6[%7, %c1, %c0_2], %5 {strides = array<i32>} : memref<10x10x128xbf16, #tpu.memory_space<vmem>>, vector<8x8x128xbf16>,
    %c1_i32_3 = arith.constant 1 : i32
    %c2 = arith.constant 2 : index
    %c1_4 = arith.constant 1 : index
    %c0_5 = arith.constant 0 : index
    %9 = vector.load %arg6[%c2, %c1_4, %c0_5] : memref<10x10x128xbf16, #tpu.memory_space<vmem>>, vector<1x8x128xbf16>
    %c0_6 = arith.constant 0 : index
    %c1_7 = arith.constant 1 : index
    %c0_8 = arith.constant 0 : index
    %10 = vector.load %arg6[%c0_6, %c1_7, %c0_8] : memref<10x10x128xbf16, #tpu.memory_space<vmem>>, vector<1x8x128xbf16>
    tpu.vector_store %arg6[%c0_6, %c1_7, %c0_8], %9 {strides = array<i32>} : memref<10x10x128xbf16, #tpu.memory_space<vmem>>, vector<1x8x128xbf16>,
    %c7 = arith.constant 7 : index
    %c1_9 = arith.constant 1 : index
    %c0_10 = arith.constant 0 : index
    %11 = vector.load %arg6[%c7, %c1_9, %c0_10] : memref<10x10x128xbf16, #tpu.memory_space<vmem>>, vector<1x8x128xbf16>
    %c9 = arith.constant 9 : index
    %c1_11 = arith.constant 1 : index
    %c0_12 = arith.constant 0 : index
    %12 = vector.load %arg6[%c9, %c1_11, %c0_12] : memref<10x10x128xbf16, #tpu.memory_space<vmem>>, vector<1x8x128xbf16>
    tpu.vector_store %arg6[%c9, %c1_11, %c0_12], %11 {strides = array<i32>} : memref<10x10x128xbf16, #tpu.memory_space<vmem>>, vector<1x8x128xbf16>,
    %c0_13 = arith.constant 0 : index
    %c2_14 = arith.constant 2 : index
    %c0_15 = arith.constant 0 : index
    %13 = vector.load %arg6[%c0_13, %c2_14, %c0_15] : memref<10x10x128xbf16, #tpu.memory_space<vmem>>, vector<10x1x128xbf16>
    %c0_16 = arith.constant 0 : index
    %c0_17 = arith.constant 0 : index
    %c0_18 = arith.constant 0 : index
    %14 = vector.load %arg6[%c0_16, %c0_17, %c0_18] : memref<10x10x128xbf16, #tpu.memory_space<vmem>>, vector<10x1x128xbf16>
    tpu.vector_store %arg6[%c0_16, %c0_17, %c0_18], %13 {strides = array<i32>} : memref<10x10x128xbf16, #tpu.memory_space<vmem>>, vector<10x1x128xbf16>,
    %c0_19 = arith.constant 0 : index
    %c7_20 = arith.constant 7 : index
    %c0_21 = arith.constant 0 : index
    %15 = vector.load %arg6[%c0_19, %c7_20, %c0_21] : memref<10x10x128xbf16, #tpu.memory_space<vmem>>, vector<10x1x128xbf16>
    %c0_22 = arith.constant 0 : index
    %c9_23 = arith.constant 9 : index
    %c0_24 = arith.constant 0 : index
    %16 = vector.load %arg6[%c0_22, %c9_23, %c0_24] : memref<10x10x128xbf16, #tpu.memory_space<vmem>>, vector<10x1x128xbf16>
    tpu.vector_store %arg6[%c0_22, %c9_23, %c0_24], %15 {strides = array<i32>} : memref<10x10x128xbf16, #tpu.memory_space<vmem>>, vector<10x1x128xbf16>,
    %c0_i32_25 = arith.constant 0 : i32
    %c8_i32_26 = arith.constant 8 : i32
    %17 = arith.muli %c0_i32_25, %c8_i32_26 : i32
    %18 = tpu.assume_multiple %17, 8 : i32
    %cst_27 = arith.constant 0.000000e+00 : f32
    %19 = vector.broadcast %cst_27 : f32 to vector<64x128xf32>
    %c0_i32_28 = arith.constant 0 : i32
    %20 = arith.addi %c0_i32_28, %18 : i32
    %21 = arith.index_cast %20 : i32 to index
    %c0_29 = arith.constant 0 : index
    %c0_30 = arith.constant 0 : index
    %22 = vector.load %arg6[%21, %c0_29, %c0_30] : memref<10x10x128xbf16, #tpu.memory_space<vmem>>, vector<8x8x128xbf16>
    %23 = vector.shape_cast %22 : vector<8x8x128xbf16> to vector<64x128xbf16>
    %c0_31 = arith.constant 0 : index
    %c0_32 = arith.constant 0 : index
    %c0_33 = arith.constant 0 : index
    %24 = vector.load %arg2[%c0_31, %c0_32, %c0_33] : memref<9x128x128xbf16, #tpu.memory_space<vmem>>, vector<1x128x128xbf16>
    %25 = vector.shape_cast %24 : vector<1x128x128xbf16> to vector<128x128xbf16>
    %cst_34 = arith.constant dense<0.000000e+00> : vector<64x128xf32>
    %26 = tpu.matmul %23, %25, %cst_34 {dimension_numbers = #tpu.dot_dimension_numbers<[1], [0], [0], [1], [0, 0, 1, 1], [], []>} : vector<64x128xbf16>, vector<128x128xbf16>, vector<64x128xf32> -> vector<64x128xf32>
    %27 = arith.addf %19, %26 : vector<64x128xf32>
    %c0_i32_35 = arith.constant 0 : i32
    %28 = arith.addi %c0_i32_35, %18 : i32
    %29 = arith.index_cast %28 : i32 to index
    %c1_36 = arith.constant 1 : index
    %c0_37 = arith.constant 0 : index
    %30 = vector.load %arg6[%29, %c1_36, %c0_37] : memref<10x10x128xbf16, #tpu.memory_space<vmem>>, vector<8x8x128xbf16>
    %31 = vector.shape_cast %30 : vector<8x8x128xbf16> to vector<64x128xbf16>
    %c1_38 = arith.constant 1 : index
    %c0_39 = arith.constant 0 : index
    %c0_40 = arith.constant 0 : index
    %32 = vector.load %arg2[%c1_38, %c0_39, %c0_40] : memref<9x128x128xbf16, #tpu.memory_space<vmem>>, vector<1x128x128xbf16>
    %33 = vector.shape_cast %32 : vector<1x128x128xbf16> to vector<128x128xbf16>
    %cst_41 = arith.constant dense<0.000000e+00> : vector<64x128xf32>
    %34 = tpu.matmul %31, %33, %cst_41 {dimension_numbers = #tpu.dot_dimension_numbers<[1], [0], [0], [1], [0, 0, 1, 1], [], []>} : vector<64x128xbf16>, vector<128x128xbf16>, vector<64x128xf32> -> vector<64x128xf32>
    %35 = arith.addf %27, %34 : vector<64x128xf32>
    %c0_i32_42 = arith.constant 0 : i32
    %36 = arith.addi %c0_i32_42, %18 : i32
    %37 = arith.index_cast %36 : i32 to index
    %c2_43 = arith.constant 2 : index
    %c0_44 = arith.constant 0 : index
    %38 = vector.load %arg6[%37, %c2_43, %c0_44] : memref<10x10x128xbf16, #tpu.memory_space<vmem>>, vector<8x8x128xbf16>
    %39 = vector.shape_cast %38 : vector<8x8x128xbf16> to vector<64x128xbf16>
    %c2_45 = arith.constant 2 : index
    %c0_46 = arith.constant 0 : index
    %c0_47 = arith.constant 0 : index
    %40 = vector.load %arg2[%c2_45, %c0_46, %c0_47] : memref<9x128x128xbf16, #tpu.memory_space<vmem>>, vector<1x128x128xbf16>
    %41 = vector.shape_cast %40 : vector<1x128x128xbf16> to vector<128x128xbf16>
    %cst_48 = arith.constant dense<0.000000e+00> : vector<64x128xf32>
    %42 = tpu.matmul %39, %41, %cst_48 {dimension_numbers = #tpu.dot_dimension_numbers<[1], [0], [0], [1], [0, 0, 1, 1], [], []>} : vector<64x128xbf16>, vector<128x128xbf16>, vector<64x128xf32> -> vector<64x128xf32>
    %43 = arith.addf %35, %42 : vector<64x128xf32>
    %c1_i32_49 = arith.constant 1 : i32
    %44 = arith.addi %c1_i32_49, %18 : i32
    %45 = arith.index_cast %44 : i32 to index
    %c0_50 = arith.constant 0 : index
    %c0_51 = arith.constant 0 : index
    %46 = vector.load %arg6[%45, %c0_50, %c0_51] : memref<10x10x128xbf16, #tpu.memory_space<vmem>>, vector<8x8x128xbf16>
    %47 = vector.shape_cast %46 : vector<8x8x128xbf16> to vector<64x128xbf16>
    %c3 = arith.constant 3 : index
    %c0_52 = arith.constant 0 : index
    %c0_53 = arith.constant 0 : index
    %48 = vector.load %arg2[%c3, %c0_52, %c0_53] : memref<9x128x128xbf16, #tpu.memory_space<vmem>>, vector<1x128x128xbf16>
    %49 = vector.shape_cast %48 : vector<1x128x128xbf16> to vector<128x128xbf16>
    %cst_54 = arith.constant dense<0.000000e+00> : vector<64x128xf32>
    %50 = tpu.matmul %47, %49, %cst_54 {dimension_numbers = #tpu.dot_dimension_numbers<[1], [0], [0], [1], [0, 0, 1, 1], [], []>} : vector<64x128xbf16>, vector<128x128xbf16>, vector<64x128xf32> -> vector<64x128xf32>
    %51 = arith.addf %43, %50 : vector<64x128xf32>
    %c1_i32_55 = arith.constant 1 : i32
    %52 = arith.addi %c1_i32_55, %18 : i32
    %53 = arith.index_cast %52 : i32 to index
    %c1_56 = arith.constant 1 : index
    %c0_57 = arith.constant 0 : index
    %54 = vector.load %arg6[%53, %c1_56, %c0_57] : memref<10x10x128xbf16, #tpu.memory_space<vmem>>, vector<8x8x128xbf16>
    %55 = vector.shape_cast %54 : vector<8x8x128xbf16> to vector<64x128xbf16>
    %c4 = arith.constant 4 : index
    %c0_58 = arith.constant 0 : index
    %c0_59 = arith.constant 0 : index
    %56 = vector.load %arg2[%c4, %c0_58, %c0_59] : memref<9x128x128xbf16, #tpu.memory_space<vmem>>, vector<1x128x128xbf16>
    %57 = vector.shape_cast %56 : vector<1x128x128xbf16> to vector<128x128xbf16>
    %cst_60 = arith.constant dense<0.000000e+00> : vector<64x128xf32>
    %58 = tpu.matmul %55, %57, %cst_60 {dimension_numbers = #tpu.dot_dimension_numbers<[1], [0], [0], [1], [0, 0, 1, 1], [], []>} : vector<64x128xbf16>, vector<128x128xbf16>, vector<64x128xf32> -> vector<64x128xf32>
    %59 = arith.addf %51, %58 : vector<64x128xf32>
    %c1_i32_61 = arith.constant 1 : i32
    %60 = arith.addi %c1_i32_61, %18 : i32
    %61 = arith.index_cast %60 : i32 to index
    %c2_62 = arith.constant 2 : index
    %c0_63 = arith.constant 0 : index
    %62 = vector.load %arg6[%61, %c2_62, %c0_63] : memref<10x10x128xbf16, #tpu.memory_space<vmem>>, vector<8x8x128xbf16>
    %63 = vector.shape_cast %62 : vector<8x8x128xbf16> to vector<64x128xbf16>
    %c5 = arith.constant 5 : index
    %c0_64 = arith.constant 0 : index
    %c0_65 = arith.constant 0 : index
    %64 = vector.load %arg2[%c5, %c0_64, %c0_65] : memref<9x128x128xbf16, #tpu.memory_space<vmem>>, vector<1x128x128xbf16>
    %65 = vector.shape_cast %64 : vector<1x128x128xbf16> to vector<128x128xbf16>
    %cst_66 = arith.constant dense<0.000000e+00> : vector<64x128xf32>
    %66 = tpu.matmul %63, %65, %cst_66 {dimension_numbers = #tpu.dot_dimension_numbers<[1], [0], [0], [1], [0, 0, 1, 1], [], []>} : vector<64x128xbf16>, vector<128x128xbf16>, vector<64x128xf32> -> vector<64x128xf32>
    %67 = arith.addf %59, %66 : vector<64x128xf32>
    %c2_i32 = arith.constant 2 : i32
    %68 = arith.addi %c2_i32, %18 : i32
    %69 = arith.index_cast %68 : i32 to index
    %c0_67 = arith.constant 0 : index
    %c0_68 = arith.constant 0 : index
    %70 = vector.load %arg6[%69, %c0_67, %c0_68] : memref<10x10x128xbf16, #tpu.memory_space<vmem>>, vector<8x8x128xbf16>
    %71 = vector.shape_cast %70 : vector<8x8x128xbf16> to vector<64x128xbf16>
    %c6 = arith.constant 6 : index
    %c0_69 = arith.constant 0 : index
    %c0_70 = arith.constant 0 : index
    %72 = vector.load %arg2[%c6, %c0_69, %c0_70] : memref<9x128x128xbf16, #tpu.memory_space<vmem>>, vector<1x128x128xbf16>
    %73 = vector.shape_cast %72 : vector<1x128x128xbf16> to vector<128x128xbf16>
    %cst_71 = arith.constant dense<0.000000e+00> : vector<64x128xf32>
    %74 = tpu.matmul %71, %73, %cst_71 {dimension_numbers = #tpu.dot_dimension_numbers<[1], [0], [0], [1], [0, 0, 1, 1], [], []>} : vector<64x128xbf16>, vector<128x128xbf16>, vector<64x128xf32> -> vector<64x128xf32>
    %75 = arith.addf %67, %74 : vector<64x128xf32>
    %c2_i32_72 = arith.constant 2 : i32
    %76 = arith.addi %c2_i32_72, %18 : i32
    %77 = arith.index_cast %76 : i32 to index
    %c1_73 = arith.constant 1 : index
    %c0_74 = arith.constant 0 : index
    %78 = vector.load %arg6[%77, %c1_73, %c0_74] : memref<10x10x128xbf16, #tpu.memory_space<vmem>>, vector<8x8x128xbf16>
    %79 = vector.shape_cast %78 : vector<8x8x128xbf16> to vector<64x128xbf16>
    %c7_75 = arith.constant 7 : index
    %c0_76 = arith.constant 0 : index
    %c0_77 = arith.constant 0 : index
    %80 = vector.load %arg2[%c7_75, %c0_76, %c0_77] : memref<9x128x128xbf16, #tpu.memory_space<vmem>>, vector<1x128x128xbf16>
    %81 = vector.shape_cast %80 : vector<1x128x128xbf16> to vector<128x128xbf16>
    %cst_78 = arith.constant dense<0.000000e+00> : vector<64x128xf32>
    %82 = tpu.matmul %79, %81, %cst_78 {dimension_numbers = #tpu.dot_dimension_numbers<[1], [0], [0], [1], [0, 0, 1, 1], [], []>} : vector<64x128xbf16>, vector<128x128xbf16>, vector<64x128xf32> -> vector<64x128xf32>
    %83 = arith.addf %75, %82 : vector<64x128xf32>
    %c2_i32_79 = arith.constant 2 : i32
    %84 = arith.addi %c2_i32_79, %18 : i32
    %85 = arith.index_cast %84 : i32 to index
    %c2_80 = arith.constant 2 : index
    %c0_81 = arith.constant 0 : index
    %86 = vector.load %arg6[%85, %c2_80, %c0_81] : memref<10x10x128xbf16, #tpu.memory_space<vmem>>, vector<8x8x128xbf16>
    %87 = vector.shape_cast %86 : vector<8x8x128xbf16> to vector<64x128xbf16>
    %c8 = arith.constant 8 : index
    %c0_82 = arith.constant 0 : index
    %c0_83 = arith.constant 0 : index
    %88 = vector.load %arg2[%c8, %c0_82, %c0_83] : memref<9x128x128xbf16, #tpu.memory_space<vmem>>, vector<1x128x128xbf16>
    %89 = vector.shape_cast %88 : vector<1x128x128xbf16> to vector<128x128xbf16>
    %cst_84 = arith.constant dense<0.000000e+00> : vector<64x128xf32>
    %90 = tpu.matmul %87, %89, %cst_84 {dimension_numbers = #tpu.dot_dimension_numbers<[1], [0], [0], [1], [0, 0, 1, 1], [], []>} : vector<64x128xbf16>, vector<128x128xbf16>, vector<64x128xf32> -> vector<64x128xf32>
    %91 = arith.addf %83, %90 : vector<64x128xf32>
    %92 = vector.shape_cast %91 : vector<64x128xf32> to vector<8x8x128xf32>
    %93 = arith.index_cast %18 : i32 to index
    %c0_85 = arith.constant 0 : index
    %c0_86 = arith.constant 0 : index
    %94 = vector.load %arg5[%93, %c0_85, %c0_86] : memref<8x8x128xf32, #tpu.memory_space<vmem>>, vector<8x8x128xf32>
    tpu.vector_store %arg5[%93, %c0_85, %c0_86], %92 {strides = array<i32>} : memref<8x8x128xf32, #tpu.memory_space<vmem>>, vector<8x8x128xf32>,
    %cst_87 = arith.constant dense<0.000000e+00> : vector<128xf32>
    %95 = vector.multi_reduction <add>, %91, %cst_87 [0] : vector<64x128xf32> to vector<128xf32>
    %96 = vector.shape_cast %95 : vector<128xf32> to vector<1x128xf32>
    %97 = arith.addf %0, %96 : vector<1x128xf32>
    %98 = arith.mulf %91, %91 : vector<64x128xf32>
    %cst_88 = arith.constant dense<0.000000e+00> : vector<128xf32>
    %99 = vector.multi_reduction <add>, %98, %cst_88 [0] : vector<64x128xf32> to vector<128xf32>
    %100 = vector.shape_cast %99 : vector<128xf32> to vector<1x128xf32>
    %101 = arith.addf %0, %100 : vector<1x128xf32>
    %c1_i32_89 = arith.constant 1 : i32
    %cst_90 = arith.constant 6.400000e+01 : f32
    %102 = vector.broadcast %cst_90 : f32 to vector<1x128xf32>
    %103 = arith.divf %97, %102 : vector<1x128xf32>
    %cst_91 = arith.constant 6.400000e+01 : f32
    %104 = vector.broadcast %cst_91 : f32 to vector<1x128xf32>
    %105 = arith.divf %101, %104 : vector<1x128xf32>
    %106 = arith.mulf %103, %103 : vector<1x128xf32>
    %107 = arith.subf %105, %106 : vector<1x128xf32>
    %cst_92 = arith.constant 0.000000e+00 : f32
    %108 = vector.broadcast %cst_92 : f32 to vector<1x128xf32>
    %109 = arith.maximumf %107, %108 : vector<1x128xf32>
    %cst_93 = arith.constant 9.99999974E-6 : f32
    %110 = vector.broadcast %cst_93 : f32 to vector<1x128xf32>
    %111 = arith.addf %109, %110 : vector<1x128xf32>
    %112 = math.rsqrt %111 : vector<1x128xf32>
    %c0_i32_94 = arith.constant 0 : i32
    %c8_i32_95 = arith.constant 8 : i32
    %113 = arith.muli %c0_i32_94, %c8_i32_95 : i32
    %114 = tpu.assume_multiple %113, 8 : i32
    %115 = arith.index_cast %114 : i32 to index
    %c0_96 = arith.constant 0 : index
    %c0_97 = arith.constant 0 : index
    %116 = vector.load %arg5[%115, %c0_96, %c0_97] : memref<8x8x128xf32, #tpu.memory_space<vmem>>, vector<8x8x128xf32>
    %117 = vector.shape_cast %103 : vector<1x128xf32> to vector<1x1x128xf32>
    %118 = vector.broadcast %117 : vector<1x1x128xf32> to vector<8x8x128xf32>
    %119 = arith.subf %116, %118 : vector<8x8x128xf32>
    %120 = vector.shape_cast %112 : vector<1x128xf32> to vector<1x1x128xf32>
    %121 = vector.broadcast %120 : vector<1x1x128xf32> to vector<8x8x128xf32>
    %122 = arith.mulf %119, %121 : vector<8x8x128xf32>
    %cst_98 = arith.constant 0.000000e+00 : f32
    %123 = vector.broadcast %cst_98 : f32 to vector<8x8x128xf32>
    %124 = arith.maximumf %122, %123 : vector<8x8x128xf32>
    %125 = arith.truncf %124 : vector<8x8x128xf32> to vector<8x8x128xbf16>
    %c1_i32_99 = arith.constant 1 : i32
    %126 = arith.addi %c1_i32_99, %114 : i32
    %127 = arith.index_cast %126 : i32 to index
    %c1_100 = arith.constant 1 : index
    %c0_101 = arith.constant 0 : index
    %128 = vector.load %arg6[%127, %c1_100, %c0_101] : memref<10x10x128xbf16, #tpu.memory_space<vmem>>, vector<8x8x128xbf16>
    tpu.vector_store %arg6[%127, %c1_100, %c0_101], %125 {strides = array<i32>} : memref<10x10x128xbf16, #tpu.memory_space<vmem>>, vector<8x8x128xbf16>,
    %c1_i32_102 = arith.constant 1 : i32
    %c2_103 = arith.constant 2 : index
    %c1_104 = arith.constant 1 : index
    %c0_105 = arith.constant 0 : index
    %129 = vector.load %arg6[%c2_103, %c1_104, %c0_105] : memref<10x10x128xbf16, #tpu.memory_space<vmem>>, vector<1x8x128xbf16>
    %c0_106 = arith.constant 0 : index
    %c1_107 = arith.constant 1 : index
    %c0_108 = arith.constant 0 : index
    %130 = vector.load %arg6[%c0_106, %c1_107, %c0_108] : memref<10x10x128xbf16, #tpu.memory_space<vmem>>, vector<1x8x128xbf16>
    tpu.vector_store %arg6[%c0_106, %c1_107, %c0_108], %129 {strides = array<i32>} : memref<10x10x128xbf16, #tpu.memory_space<vmem>>, vector<1x8x128xbf16>,
    %c7_109 = arith.constant 7 : index
    %c1_110 = arith.constant 1 : index
    %c0_111 = arith.constant 0 : index
    %131 = vector.load %arg6[%c7_109, %c1_110, %c0_111] : memref<10x10x128xbf16, #tpu.memory_space<vmem>>, vector<1x8x128xbf16>
    %c9_112 = arith.constant 9 : index
    %c1_113 = arith.constant 1 : index
    %c0_114 = arith.constant 0 : index
    %132 = vector.load %arg6[%c9_112, %c1_113, %c0_114] : memref<10x10x128xbf16, #tpu.memory_space<vmem>>, vector<1x8x128xbf16>
    tpu.vector_store %arg6[%c9_112, %c1_113, %c0_114], %131 {strides = array<i32>} : memref<10x10x128xbf16, #tpu.memory_space<vmem>>, vector<1x8x128xbf16>,
    %c0_115 = arith.constant 0 : index
    %c2_116 = arith.constant 2 : index
    %c0_117 = arith.constant 0 : index
    %133 = vector.load %arg6[%c0_115, %c2_116, %c0_117] : memref<10x10x128xbf16, #tpu.memory_space<vmem>>, vector<10x1x128xbf16>
    %c0_118 = arith.constant 0 : index
    %c0_119 = arith.constant 0 : index
    %c0_120 = arith.constant 0 : index
    %134 = vector.load %arg6[%c0_118, %c0_119, %c0_120] : memref<10x10x128xbf16, #tpu.memory_space<vmem>>, vector<10x1x128xbf16>
    tpu.vector_store %arg6[%c0_118, %c0_119, %c0_120], %133 {strides = array<i32>} : memref<10x10x128xbf16, #tpu.memory_space<vmem>>, vector<10x1x128xbf16>,
    %c0_121 = arith.constant 0 : index
    %c7_122 = arith.constant 7 : index
    %c0_123 = arith.constant 0 : index
    %135 = vector.load %arg6[%c0_121, %c7_122, %c0_123] : memref<10x10x128xbf16, #tpu.memory_space<vmem>>, vector<10x1x128xbf16>
    %c0_124 = arith.constant 0 : index
    %c9_125 = arith.constant 9 : index
    %c0_126 = arith.constant 0 : index
    %136 = vector.load %arg6[%c0_124, %c9_125, %c0_126] : memref<10x10x128xbf16, #tpu.memory_space<vmem>>, vector<10x1x128xbf16>
    tpu.vector_store %arg6[%c0_124, %c9_125, %c0_126], %135 {strides = array<i32>} : memref<10x10x128xbf16, #tpu.memory_space<vmem>>, vector<10x1x128xbf16>,
    %c0_i32_127 = arith.constant 0 : i32
    %c8_i32_128 = arith.constant 8 : i32
    %137 = arith.muli %c0_i32_127, %c8_i32_128 : i32
    %138 = tpu.assume_multiple %137, 8 : i32
    %cst_129 = arith.constant 0.000000e+00 : f32
    %139 = vector.broadcast %cst_129 : f32 to vector<64x128xf32>
    %c0_i32_130 = arith.constant 0 : i32
    %140 = arith.addi %c0_i32_130, %138 : i32
    %141 = arith.index_cast %140 : i32 to index
    %c0_131 = arith.constant 0 : index
    %c0_132 = arith.constant 0 : index
    %142 = vector.load %arg6[%141, %c0_131, %c0_132] : memref<10x10x128xbf16, #tpu.memory_space<vmem>>, vector<8x8x128xbf16>
    %143 = vector.shape_cast %142 : vector<8x8x128xbf16> to vector<64x128xbf16>
    %c0_133 = arith.constant 0 : index
    %c0_134 = arith.constant 0 : index
    %c0_135 = arith.constant 0 : index
    %144 = vector.load %arg3[%c0_133, %c0_134, %c0_135] : memref<9x128x128xbf16, #tpu.memory_space<vmem>>, vector<1x128x128xbf16>
    %145 = vector.shape_cast %144 : vector<1x128x128xbf16> to vector<128x128xbf16>
    %cst_136 = arith.constant dense<0.000000e+00> : vector<64x128xf32>
    %146 = tpu.matmul %143, %145, %cst_136 {dimension_numbers = #tpu.dot_dimension_numbers<[1], [0], [0], [1], [0, 0, 1, 1], [], []>} : vector<64x128xbf16>, vector<128x128xbf16>, vector<64x128xf32> -> vector<64x128xf32>
    %147 = arith.addf %139, %146 : vector<64x128xf32>
    %c0_i32_137 = arith.constant 0 : i32
    %148 = arith.addi %c0_i32_137, %138 : i32
    %149 = arith.index_cast %148 : i32 to index
    %c1_138 = arith.constant 1 : index
    %c0_139 = arith.constant 0 : index
    %150 = vector.load %arg6[%149, %c1_138, %c0_139] : memref<10x10x128xbf16, #tpu.memory_space<vmem>>, vector<8x8x128xbf16>
    %151 = vector.shape_cast %150 : vector<8x8x128xbf16> to vector<64x128xbf16>
    %c1_140 = arith.constant 1 : index
    %c0_141 = arith.constant 0 : index
    %c0_142 = arith.constant 0 : index
    %152 = vector.load %arg3[%c1_140, %c0_141, %c0_142] : memref<9x128x128xbf16, #tpu.memory_space<vmem>>, vector<1x128x128xbf16>
    %153 = vector.shape_cast %152 : vector<1x128x128xbf16> to vector<128x128xbf16>
    %cst_143 = arith.constant dense<0.000000e+00> : vector<64x128xf32>
    %154 = tpu.matmul %151, %153, %cst_143 {dimension_numbers = #tpu.dot_dimension_numbers<[1], [0], [0], [1], [0, 0, 1, 1], [], []>} : vector<64x128xbf16>, vector<128x128xbf16>, vector<64x128xf32> -> vector<64x128xf32>
    %155 = arith.addf %147, %154 : vector<64x128xf32>
    %c0_i32_144 = arith.constant 0 : i32
    %156 = arith.addi %c0_i32_144, %138 : i32
    %157 = arith.index_cast %156 : i32 to index
    %c2_145 = arith.constant 2 : index
    %c0_146 = arith.constant 0 : index
    %158 = vector.load %arg6[%157, %c2_145, %c0_146] : memref<10x10x128xbf16, #tpu.memory_space<vmem>>, vector<8x8x128xbf16>
    %159 = vector.shape_cast %158 : vector<8x8x128xbf16> to vector<64x128xbf16>
    %c2_147 = arith.constant 2 : index
    %c0_148 = arith.constant 0 : index
    %c0_149 = arith.constant 0 : index
    %160 = vector.load %arg3[%c2_147, %c0_148, %c0_149] : memref<9x128x128xbf16, #tpu.memory_space<vmem>>, vector<1x128x128xbf16>
    %161 = vector.shape_cast %160 : vector<1x128x128xbf16> to vector<128x128xbf16>
    %cst_150 = arith.constant dense<0.000000e+00> : vector<64x128xf32>
    %162 = tpu.matmul %159, %161, %cst_150 {dimension_numbers = #tpu.dot_dimension_numbers<[1], [0], [0], [1], [0, 0, 1, 1], [], []>} : vector<64x128xbf16>, vector<128x128xbf16>, vector<64x128xf32> -> vector<64x128xf32>
    %163 = arith.addf %155, %162 : vector<64x128xf32>
    %c1_i32_151 = arith.constant 1 : i32
    %164 = arith.addi %c1_i32_151, %138 : i32
    %165 = arith.index_cast %164 : i32 to index
    %c0_152 = arith.constant 0 : index
    %c0_153 = arith.constant 0 : index
    %166 = vector.load %arg6[%165, %c0_152, %c0_153] : memref<10x10x128xbf16, #tpu.memory_space<vmem>>, vector<8x8x128xbf16>
    %167 = vector.shape_cast %166 : vector<8x8x128xbf16> to vector<64x128xbf16>
    %c3_154 = arith.constant 3 : index
    %c0_155 = arith.constant 0 : index
    %c0_156 = arith.constant 0 : index
    %168 = vector.load %arg3[%c3_154, %c0_155, %c0_156] : memref<9x128x128xbf16, #tpu.memory_space<vmem>>, vector<1x128x128xbf16>
    %169 = vector.shape_cast %168 : vector<1x128x128xbf16> to vector<128x128xbf16>
    %cst_157 = arith.constant dense<0.000000e+00> : vector<64x128xf32>
    %170 = tpu.matmul %167, %169, %cst_157 {dimension_numbers = #tpu.dot_dimension_numbers<[1], [0], [0], [1], [0, 0, 1, 1], [], []>} : vector<64x128xbf16>, vector<128x128xbf16>, vector<64x128xf32> -> vector<64x128xf32>
    %171 = arith.addf %163, %170 : vector<64x128xf32>
    %c1_i32_158 = arith.constant 1 : i32
    %172 = arith.addi %c1_i32_158, %138 : i32
    %173 = arith.index_cast %172 : i32 to index
    %c1_159 = arith.constant 1 : index
    %c0_160 = arith.constant 0 : index
    %174 = vector.load %arg6[%173, %c1_159, %c0_160] : memref<10x10x128xbf16, #tpu.memory_space<vmem>>, vector<8x8x128xbf16>
    %175 = vector.shape_cast %174 : vector<8x8x128xbf16> to vector<64x128xbf16>
    %c4_161 = arith.constant 4 : index
    %c0_162 = arith.constant 0 : index
    %c0_163 = arith.constant 0 : index
    %176 = vector.load %arg3[%c4_161, %c0_162, %c0_163] : memref<9x128x128xbf16, #tpu.memory_space<vmem>>, vector<1x128x128xbf16>
    %177 = vector.shape_cast %176 : vector<1x128x128xbf16> to vector<128x128xbf16>
    %cst_164 = arith.constant dense<0.000000e+00> : vector<64x128xf32>
    %178 = tpu.matmul %175, %177, %cst_164 {dimension_numbers = #tpu.dot_dimension_numbers<[1], [0], [0], [1], [0, 0, 1, 1], [], []>} : vector<64x128xbf16>, vector<128x128xbf16>, vector<64x128xf32> -> vector<64x128xf32>
    %179 = arith.addf %171, %178 : vector<64x128xf32>
    %c1_i32_165 = arith.constant 1 : i32
    %180 = arith.addi %c1_i32_165, %138 : i32
    %181 = arith.index_cast %180 : i32 to index
    %c2_166 = arith.constant 2 : index
    %c0_167 = arith.constant 0 : index
    %182 = vector.load %arg6[%181, %c2_166, %c0_167] : memref<10x10x128xbf16, #tpu.memory_space<vmem>>, vector<8x8x128xbf16>
    %183 = vector.shape_cast %182 : vector<8x8x128xbf16> to vector<64x128xbf16>
    %c5_168 = arith.constant 5 : index
    %c0_169 = arith.constant 0 : index
    %c0_170 = arith.constant 0 : index
    %184 = vector.load %arg3[%c5_168, %c0_169, %c0_170] : memref<9x128x128xbf16, #tpu.memory_space<vmem>>, vector<1x128x128xbf16>
    %185 = vector.shape_cast %184 : vector<1x128x128xbf16> to vector<128x128xbf16>
    %cst_171 = arith.constant dense<0.000000e+00> : vector<64x128xf32>
    %186 = tpu.matmul %183, %185, %cst_171 {dimension_numbers = #tpu.dot_dimension_numbers<[1], [0], [0], [1], [0, 0, 1, 1], [], []>} : vector<64x128xbf16>, vector<128x128xbf16>, vector<64x128xf32> -> vector<64x128xf32>
    %187 = arith.addf %179, %186 : vector<64x128xf32>
    %c2_i32_172 = arith.constant 2 : i32
    %188 = arith.addi %c2_i32_172, %138 : i32
    %189 = arith.index_cast %188 : i32 to index
    %c0_173 = arith.constant 0 : index
    %c0_174 = arith.constant 0 : index
    %190 = vector.load %arg6[%189, %c0_173, %c0_174] : memref<10x10x128xbf16, #tpu.memory_space<vmem>>, vector<8x8x128xbf16>
    %191 = vector.shape_cast %190 : vector<8x8x128xbf16> to vector<64x128xbf16>
    %c6_175 = arith.constant 6 : index
    %c0_176 = arith.constant 0 : index
    %c0_177 = arith.constant 0 : index
    %192 = vector.load %arg3[%c6_175, %c0_176, %c0_177] : memref<9x128x128xbf16, #tpu.memory_space<vmem>>, vector<1x128x128xbf16>
    %193 = vector.shape_cast %192 : vector<1x128x128xbf16> to vector<128x128xbf16>
    %cst_178 = arith.constant dense<0.000000e+00> : vector<64x128xf32>
    %194 = tpu.matmul %191, %193, %cst_178 {dimension_numbers = #tpu.dot_dimension_numbers<[1], [0], [0], [1], [0, 0, 1, 1], [], []>} : vector<64x128xbf16>, vector<128x128xbf16>, vector<64x128xf32> -> vector<64x128xf32>
    %195 = arith.addf %187, %194 : vector<64x128xf32>
    %c2_i32_179 = arith.constant 2 : i32
    %196 = arith.addi %c2_i32_179, %138 : i32
    %197 = arith.index_cast %196 : i32 to index
    %c1_180 = arith.constant 1 : index
    %c0_181 = arith.constant 0 : index
    %198 = vector.load %arg6[%197, %c1_180, %c0_181] : memref<10x10x128xbf16, #tpu.memory_space<vmem>>, vector<8x8x128xbf16>
    %199 = vector.shape_cast %198 : vector<8x8x128xbf16> to vector<64x128xbf16>
    %c7_182 = arith.constant 7 : index
    %c0_183 = arith.constant 0 : index
    %c0_184 = arith.constant 0 : index
    %200 = vector.load %arg3[%c7_182, %c0_183, %c0_184] : memref<9x128x128xbf16, #tpu.memory_space<vmem>>, vector<1x128x128xbf16>
    %201 = vector.shape_cast %200 : vector<1x128x128xbf16> to vector<128x128xbf16>
    %cst_185 = arith.constant dense<0.000000e+00> : vector<64x128xf32>
    %202 = tpu.matmul %199, %201, %cst_185 {dimension_numbers = #tpu.dot_dimension_numbers<[1], [0], [0], [1], [0, 0, 1, 1], [], []>} : vector<64x128xbf16>, vector<128x128xbf16>, vector<64x128xf32> -> vector<64x128xf32>
    %203 = arith.addf %195, %202 : vector<64x128xf32>
    %c2_i32_186 = arith.constant 2 : i32
    %204 = arith.addi %c2_i32_186, %138 : i32
    %205 = arith.index_cast %204 : i32 to index
    %c2_187 = arith.constant 2 : index
    %c0_188 = arith.constant 0 : index
    %206 = vector.load %arg6[%205, %c2_187, %c0_188] : memref<10x10x128xbf16, #tpu.memory_space<vmem>>, vector<8x8x128xbf16>
    %207 = vector.shape_cast %206 : vector<8x8x128xbf16> to vector<64x128xbf16>
    %c8_189 = arith.constant 8 : index
    %c0_190 = arith.constant 0 : index
    %c0_191 = arith.constant 0 : index
    %208 = vector.load %arg3[%c8_189, %c0_190, %c0_191] : memref<9x128x128xbf16, #tpu.memory_space<vmem>>, vector<1x128x128xbf16>
    %209 = vector.shape_cast %208 : vector<1x128x128xbf16> to vector<128x128xbf16>
    %cst_192 = arith.constant dense<0.000000e+00> : vector<64x128xf32>
    %210 = tpu.matmul %207, %209, %cst_192 {dimension_numbers = #tpu.dot_dimension_numbers<[1], [0], [0], [1], [0, 0, 1, 1], [], []>} : vector<64x128xbf16>, vector<128x128xbf16>, vector<64x128xf32> -> vector<64x128xf32>
    %211 = arith.addf %203, %210 : vector<64x128xf32>
    %212 = vector.shape_cast %211 : vector<64x128xf32> to vector<8x8x128xf32>
    %213 = arith.index_cast %138 : i32 to index
    %c0_193 = arith.constant 0 : index
    %c0_194 = arith.constant 0 : index
    %214 = vector.load %arg5[%213, %c0_193, %c0_194] : memref<8x8x128xf32, #tpu.memory_space<vmem>>, vector<8x8x128xf32>
    tpu.vector_store %arg5[%213, %c0_193, %c0_194], %212 {strides = array<i32>} : memref<8x8x128xf32, #tpu.memory_space<vmem>>, vector<8x8x128xf32>,
    %cst_195 = arith.constant dense<0.000000e+00> : vector<128xf32>
    %215 = vector.multi_reduction <add>, %211, %cst_195 [0] : vector<64x128xf32> to vector<128xf32>
    %216 = vector.shape_cast %215 : vector<128xf32> to vector<1x128xf32>
    %217 = arith.addf %0, %216 : vector<1x128xf32>
    %218 = arith.mulf %211, %211 : vector<64x128xf32>
    %cst_196 = arith.constant dense<0.000000e+00> : vector<128xf32>
    %219 = vector.multi_reduction <add>, %218, %cst_196 [0] : vector<64x128xf32> to vector<128xf32>
    %220 = vector.shape_cast %219 : vector<128xf32> to vector<1x128xf32>
    %221 = arith.addf %0, %220 : vector<1x128xf32>
    %c1_i32_197 = arith.constant 1 : i32
    %cst_198 = arith.constant 6.400000e+01 : f32
    %222 = vector.broadcast %cst_198 : f32 to vector<1x128xf32>
    %223 = arith.divf %217, %222 : vector<1x128xf32>
    %cst_199 = arith.constant 6.400000e+01 : f32
    %224 = vector.broadcast %cst_199 : f32 to vector<1x128xf32>
    %225 = arith.divf %221, %224 : vector<1x128xf32>
    %226 = arith.mulf %223, %223 : vector<1x128xf32>
    %227 = arith.subf %225, %226 : vector<1x128xf32>
    %cst_200 = arith.constant 0.000000e+00 : f32
    %228 = vector.broadcast %cst_200 : f32 to vector<1x128xf32>
    %229 = arith.maximumf %227, %228 : vector<1x128xf32>
    %cst_201 = arith.constant 9.99999974E-6 : f32
    %230 = vector.broadcast %cst_201 : f32 to vector<1x128xf32>
    %231 = arith.addf %229, %230 : vector<1x128xf32>
    %232 = math.rsqrt %231 : vector<1x128xf32>
    %c0_i32_202 = arith.constant 0 : i32
    %c8_i32_203 = arith.constant 8 : i32
    %233 = arith.muli %c0_i32_202, %c8_i32_203 : i32
    %234 = tpu.assume_multiple %233, 8 : i32
    %235 = arith.index_cast %234 : i32 to index
    %c0_204 = arith.constant 0 : index
    %c0_205 = arith.constant 0 : index
    %236 = vector.load %arg5[%235, %c0_204, %c0_205] : memref<8x8x128xf32, #tpu.memory_space<vmem>>, vector<8x8x128xf32>
    %237 = vector.shape_cast %223 : vector<1x128xf32> to vector<1x1x128xf32>
    %238 = vector.broadcast %237 : vector<1x1x128xf32> to vector<8x8x128xf32>
    %239 = arith.subf %236, %238 : vector<8x8x128xf32>
    %240 = vector.shape_cast %232 : vector<1x128xf32> to vector<1x1x128xf32>
    %241 = vector.broadcast %240 : vector<1x1x128xf32> to vector<8x8x128xf32>
    %242 = arith.mulf %239, %241 : vector<8x8x128xf32>
    %c0_206 = arith.constant 0 : index
    %243 = arith.index_cast %234 : i32 to index
    %c0_207 = arith.constant 0 : index
    %c0_208 = arith.constant 0 : index
    %244 = vector.load %arg1[%c0_206, %243, %c0_207, %c0_208] : memref<1x8x8x128xbf16, #tpu.memory_space<vmem>>, vector<1x8x8x128xbf16>
    %245 = vector.shape_cast %244 : vector<1x8x8x128xbf16> to vector<8x8x128xbf16>
    %246 = arith.extf %245 : vector<8x8x128xbf16> to vector<8x8x128xf32>
    %247 = arith.addf %246, %242 : vector<8x8x128xf32>
    %248 = arith.truncf %247 : vector<8x8x128xf32> to vector<8x8x128xbf16>
    %c0_209 = arith.constant 0 : index
    %249 = arith.index_cast %234 : i32 to index
    %c0_210 = arith.constant 0 : index
    %c0_211 = arith.constant 0 : index
    %250 = vector.load %arg4[%c0_209, %249, %c0_210, %c0_211] : memref<1x8x8x128xbf16, #tpu.memory_space<vmem>>, vector<1x8x8x128xbf16>
    %251 = vector.shape_cast %250 : vector<1x8x8x128xbf16> to vector<8x8x128xbf16>
    %252 = vector.shape_cast %248 : vector<8x8x128xbf16> to vector<1x8x8x128xbf16>
    tpu.vector_store %arg4[%c0_209, %249, %c0_210, %c0_211], %252 {strides = array<i32>} : memref<1x8x8x128xbf16, #tpu.memory_space<vmem>>, vector<1x8x8x128xbf16>,
    %c1_i32_212 = arith.constant 1 : i32
    return
  }
  func.func @transform_0(%arg0: i32) -> (i32, i32, i32, i32) {
    %c0_i32 = arith.constant 0 : i32
    %c0_i32_0 = arith.constant 0 : i32
    %c0_i32_1 = arith.constant 0 : i32
    %c0_i32_2 = arith.constant 0 : i32
    return %arg0, %c0_i32, %c0_i32_0, %c0_i32_1 : i32, i32, i32, i32
  }
  func.func @transform_1(%arg0: i32) -> (i32, i32, i32) {
    %c0_i32 = arith.constant 0 : i32
    %c0_i32_0 = arith.constant 0 : i32
    %c0_i32_1 = arith.constant 0 : i32
    %c0_i32_2 = arith.constant 0 : i32
    return %c0_i32, %c0_i32_0, %c0_i32_1 : i32, i32, i32
  }
  func.func @transform_2(%arg0: i32) -> (i32, i32, i32) {
    %c0_i32 = arith.constant 0 : i32
    %c0_i32_0 = arith.constant 0 : i32
    %c0_i32_1 = arith.constant 0 : i32
    %c0_i32_2 = arith.constant 0 : i32
    return %c0_i32, %c0_i32_0, %c0_i32_1 : i32, i32, i32
  }
  func.func @transform_3(%arg0: i32) -> (i32, i32, i32, i32) {
    %c0_i32 = arith.constant 0 : i32
    %c0_i32_0 = arith.constant 0 : i32
    %c0_i32_1 = arith.constant 0 : i32
    %c0_i32_2 = arith.constant 0 : i32
    return %arg0, %c0_i32, %c0_i32_0, %c0_i32_1 : i32, i32, i32, i32
  }
}

</mosaic_0001>

<bundles_post_ra>
// kernel: encoder_forward.9
= control target key start
LH: loop header
LB: loop body
LE: loop exit
PB: predicated region body
PF: predicated region fallthrough
CT: control target
= control target key end

     0   :  { %s1512_s9 = smov 0   ;;  %s1853_s0 = inlined_call_operand.vmem [shape: bf16[2,1024,128], index: 0, kind: input, shape index: {}]   ;;  %s1854_s1 = inlined_call_operand.vmem [shape: bf16[128,128], index: 1, kind: input, shape index: {}]   ;;  %s1855_s2 = inlined_call_operand.vmem [shape: bf16[2,1024,128], index: 2, kind: output, shape index: {}]  }
   0x1 LB: > { %s1103_s10 = sadd.s32 4294967295, %s1479_s9   ;;  %p1107_p0 = scmp.ge.s32.totalorder %s1479_s9, 1  ;;  %s1479_s9 = sphi %s1512_s9, %s12_s9  }
   0x2   : > { %p112_p1 = scmp.lt.s32.totalorder %s1479_s9, 3 }
   0x4   : > { %p113_p2 = pnand %p1107_p0, %p112_p1 }
   0x5   : > { %p134_p3 = scmp.lt.s32.totalorder (!%p113_p2), %s1103_s10, 1  ;;  %v1530_v0 = vmov (!%p113_p2), 0.0   ;;  %v1532_v1 = vmov (!%p113_p2), 0.0   ;;  %s1534_s18 = smov (!%p113_p2), 0  }
   0x6   : > { %116 = sbr.rel (%p113_p2) target bundleno = 414 (0x19e), region = 28 }
   0xd   : > { %s1859_s10 = smov (!%p134_p3, %s1103_s10), 1 }
   0xe   : > { %s1174_s11 = sshll.u32 %s1859_s10, 9 }
   0xf   : > { %s1523_s14 = scalar_lea.vmem %s1853_s0, %s1174_s11  ;;  %s1528_s17 = scalar_lea.vmem %s1855_s2, %s1174_s11 }
  0x10 LB: >> { %v1431_v2 = vld [vmem:[%s1854_s1] sm:$0xff]   ;;  %v1432_v3 = vld [vmem:[%s1854_s1 + $0x8] sm:$0xff]   ;;  %s1112_s23 = sshll.u32 %s1491_s18, 8  ;;  %v1433_v4 = vld [vmem:[%s1854_s1 + $0x10] sm:$0xff]   ;;  %s150_s18 = sadd.s32 1, %s1491_s18   ;;  %s1491_s18 = sphi %s1534_s18, %s150_s18   ;;  %v1487_v1 = vphi %v1532_v1, %v1857_v1   ;;  %v1483_v0 = vphi %v1530_v0, %v1856_v0  }
  0x11   : >> { %1327 = vmatprep.subr.bf16.mxu0 %v1431_v2  ;;  %1375 = vmatprep.subr.bf16.mxu1 %v1431_v2  ;;  %s154_s24 = sshra.s32 %s1112_s23, 3  ;;  %v1434_v5 = vld [vmem:[%s1854_s1 + $0x18] sm:$0xff]   ;;  %v1435_v7 = vld [vmem:[%s1854_s1 + $0x20] sm:$0xff]   ;;  %v1436_v8 = vld [vmem:[%s1854_s1 + $0x28] sm:$0xff]   ;;  %s1595_s12 = scalar_lea.vmem [#allocation2], %s1112_s23 }
  0x12   : >> { %1328 = vmatpush3.bf16.msra.mxu0 %v1431_v2  ;;  %1383 = vmatpush3.bf16.msra.mxu1 %v1431_v2  ;;  %s1113_s27 = sshll.u32 %s154_s24, 2  ;;  %v1437_v10 = vld [vmem:[%s1854_s1 + $0x30] sm:$0xff]   ;;  %v1438_v11 = vld [vmem:[%s1854_s1 + $0x38] sm:$0xff]   ;;  %p147_p4 = scmp.ge.s32.totalorder %s150_s18, 4  }
  0x13   : >> { %1329 = vmatprep.subr.bf16.mxu0 %v1432_v3  ;;  %1376 = vmatprep.subr.bf16.mxu1 %v1432_v3  ;;  %s1558_s28 = scalar_lea.vmem %s1523_s14, %s1113_s27  ;;  %s1720_s13 = smov (%p147_p4), 0  }
  0x14   : >> { %v1439_v6 = vld [vmem:[%s1558_s28] sm:$0xff]   ;;  %v1440_v12 = vld [vmem:[%s1558_s28 + $0x8] sm:$0xff]   ;;  %v1441_v14 = vld [vmem:[%s1558_s28 + $0x10] sm:$0xff]  }
  0x15   : >> { %1343 = vmatprep.mubr.bf16.mxu0 %v1439_v6  ;;  %v1447_v9 = vld [vmem:[%s1558_s28 + $0x40] sm:$0xff]   ;;  %v1448_v13 = vld [vmem:[%s1558_s28 + $0x48] sm:$0xff]   ;;  %v1449_v15 = vld [vmem:[%s1558_s28 + $0x50] sm:$0xff]  }
  0x16   : >> { %1330 = vmatpush3.bf16.msra.mxu0 %v1432_v3  ;;  %1384 = vmatpush3.bf16.msra.mxu1 %v1432_v3  ;;  %v1442_v16 = vld [vmem:[%s1558_s28 + $0x18] sm:$0xff]   ;;  %v1443_v18 = vld [vmem:[%s1558_s28 + $0x20] sm:$0xff]   ;;  %v1444_v20 = vld [vmem:[%s1558_s28 + $0x28] sm:$0xff]  }
  0x17   : >> { %1331 = vmatprep.subr.bf16.mxu0 %v1433_v4  ;;  %1377 = vmatprep.subr.bf16.mxu1 %v1433_v4  ;;  %v1450_v17 = vld [vmem:[%s1558_s28 + $0x58] sm:$0xff]   ;;  %v1451_v19 = vld [vmem:[%s1558_s28 + $0x60] sm:$0xff]   ;;  %v1452_v21 = vld [vmem:[%s1558_s28 + $0x68] sm:$0xff]  }
  0x18   : >> { %1359 = vmatprep.mubr.bf16.mxu1 %v1447_v9  ;;  %v1445_v22 = vld [vmem:[%s1558_s28 + $0x30] sm:$0xff]   ;;  %v1446_v24 = vld [vmem:[%s1558_s28 + $0x38] sm:$0xff]  }
  0x19   : >> { %v1453_v23 = vld [vmem:[%s1558_s28 + $0x70] sm:$0xff]   ;;  %v1454_v25 = vld [vmem:[%s1558_s28 + $0x78] sm:$0xff]  }
  0x1a   : >> { %1332 = vmatpush3.bf16.msra.mxu0 %v1433_v4  ;;  %1385 = vmatpush3.bf16.msra.mxu1 %v1433_v4 }
  0x1b   : >> { %1333 = vmatprep.subr.bf16.mxu0 %v1434_v5  ;;  %1378 = vmatprep.subr.bf16.mxu1 %v1434_v5 }
  0x1e   : >> { %1334 = vmatpush3.bf16.msra.mxu0 %v1434_v5  ;;  %1386 = vmatpush3.bf16.msra.mxu1 %v1434_v5 }
  0x1f   : >> { %1335 = vmatprep.subr.bf16.mxu0 %v1435_v7  ;;  %1379 = vmatprep.subr.bf16.mxu1 %v1435_v7 }
  0x22   : >> { %1336 = vmatpush3.bf16.msra.mxu0 %v1435_v7  ;;  %1387 = vmatpush3.bf16.msra.mxu1 %v1435_v7 }
  0x23   : >> { %1337 = vmatprep.subr.bf16.mxu0 %v1436_v8  ;;  %1380 = vmatprep.subr.bf16.mxu1 %v1436_v8 }
  0x26   : >> { %1338 = vmatpush3.bf16.msra.mxu0 %v1436_v8  ;;  %1388 = vmatpush3.bf16.msra.mxu1 %v1436_v8 }
  0x27   : >> { %1339 = vmatprep.subr.bf16.mxu0 %v1437_v10  ;;  %1381 = vmatprep.subr.bf16.mxu1 %v1437_v10 }
  0x2a   : >> { %1340 = vmatpush3.bf16.msra.mxu0 %v1437_v10  ;;  %1389 = vmatpush3.bf16.msra.mxu1 %v1437_v10 }
  0x2b   : >> { %1341 = vmatprep.subr.bf16.mxu0 %v1438_v11  ;;  %1382 = vmatprep.subr.bf16.mxu1 %v1438_v11 }
  0x2e   : >> { %1342 = vmatpush3.bf16.msra.mxu0 %v1438_v11  ;;  %1390 = vmatpush3.bf16.msra.mxu1 %v1438_v11 }
  0x31   : >> { %1344 = vmatmul.mubr.bf16.vlgmr.msra.gmra.mrb[0].mxu0 %v1440_v12  ;;  %1360 = vmatmul.mubr.bf16.vlgmr.msra.gmra.mrb[0].mxu1 %v1448_v13 }
  0x32   : >> { %1347 = vmatprep.mubr.bf16.mxu0 %v1441_v14  ;;  %1363 = vmatprep.mubr.bf16.mxu1 %v1449_v15 }
  0x39   : >> { %1348 = vmatmul.mubr.bf16.gmra.mrb[4].mxu0 %v1442_v16  ;;  %1364 = vmatmul.mubr.bf16.gmra.mrb[4].mxu1 %v1450_v17 }
  0x3a   : >> { %1351 = vmatprep.mubr.bf16.mxu0 %v1443_v18  ;;  %1367 = vmatprep.mubr.bf16.mxu1 %v1451_v19 }
  0x41   : >> { %1352 = vmatmul.mubr.bf16.gmra.mrb[8].mxu0 %v1444_v20  ;;  %1368 = vmatmul.mubr.bf16.gmra.mrb[8].mxu1 %v1452_v21 }
  0x42   : >> { %1355 = vmatprep.mubr.bf16.mxu0 %v1445_v22  ;;  %1371 = vmatprep.mubr.bf16.mxu1 %v1453_v23 }
  0x49   : >> { %1356 = vmatmul.mubr.bf16.gmra.mrb[12].mxu0 %v1446_v24  ;;  %1372 = vmatmul.mubr.bf16.gmra.mrb[12].mxu1 %v1454_v25 }
 0x104   : >> { %v1345_v26 = vpop.f32.mrb[0].mxu0  ;;  %v1591_v27 = vpop.f32.mrb[0].mxu1 }
 0x105   : >> { %514 = vst [vmem:[%s1595_s12 + $0x10] sm:$0xff] %v1345_v26  ;;  %v384_v28 = vpop.f32.mrb[1].mxu0  ;;  %530 = vst [vmem:[%s1595_s12 + $0x90] sm:$0xff] %v1591_v27  ;;  %v1600_v29 = vpop.f32.mrb[1].mxu1  ;;  %v584_v37 = vmul.f32 %v1345_v26, %v1345_v26 }
 0x106   : >> { %512 = vst [vmem:[%s1595_s12] sm:$0xff] %v384_v28  ;;  %v1346_v30 = vpop.f32.mrb[2].mxu0  ;;  %528 = vst [vmem:[%s1595_s12 + $0x80] sm:$0xff] %v1600_v29  ;;  %v1605_v31 = vpop.f32.mrb[2].mxu1  ;;  %v582_v34 = vmul.f32 %v384_v28, %v384_v28 }
 0x107   : >> { %515 = vst [vmem:[%s1595_s12 + $0x18] sm:$0xff] %v1346_v30  ;;  %v387_v32 = vpop.f32.mrb[3].mxu0  ;;  %531 = vst [vmem:[%s1595_s12 + $0x98] sm:$0xff] %v1605_v31  ;;  %v1610_v33 = vpop.f32.mrb[3].mxu1  ;;  %v585_v40 = vmul.f32 %v1346_v30, %v1346_v30 }
 0x108   : >> { %513 = vst [vmem:[%s1595_s12 + $0x8] sm:$0xff] %v387_v32  ;;  %v544_v35 = vadd.f32 %v387_v32, %v384_v28  ;;  %v583_v36 = vmul.f32 %v387_v32, %v387_v32  ;;  %529 = vst [vmem:[%s1595_s12 + $0x88] sm:$0xff] %v1610_v33 }
 0x10a   : >> { %v545_v38 = vadd.f32 %v1345_v26, %v544_v35  ;;  %v614_v39 = vadd.f32 %v583_v36, %v582_v34 }
 0x10c   : >> { %v615_v41 = vadd.f32 %v614_v39, %v584_v37  ;;  %v1349_v42 = vpop.f32.mrb[4].mxu0  ;;  %v546_v43 = vadd.f32 %v1346_v30, %v545_v38  ;;  %v1615_v44 = vpop.f32.mrb[4].mxu1 }
 0x10d   : >> { %518 = vst [vmem:[%s1595_s12 + $0x30] sm:$0xff] %v1349_v42  ;;  %v400_v45 = vpop.f32.mrb[5].mxu0  ;;  %534 = vst [vmem:[%s1595_s12 + $0xb0] sm:$0xff] %v1615_v44  ;;  %v1620_v46 = vpop.f32.mrb[5].mxu1  ;;  %v588_v57 = vmul.f32 %v1349_v42, %v1349_v42 }
 0x10e   : >> { %516 = vst [vmem:[%s1595_s12 + $0x20] sm:$0xff] %v400_v45  ;;  %v547_v47 = vadd.f32 %v546_v43, %v400_v45  ;;  %v586_v48 = vmul.f32 %v400_v45, %v400_v45  ;;  %v616_v49 = vadd.f32 %v615_v41, %v585_v40  ;;  %v1350_v50 = vpop.f32.mrb[6].mxu0  ;;  %532 = vst [vmem:[%s1595_s12 + $0xa0] sm:$0xff] %v1620_v46  ;;  %v1625_v51 = vpop.f32.mrb[6].mxu1 }
 0x10f   : >> { %519 = vst [vmem:[%s1595_s12 + $0x38] sm:$0xff] %v1350_v50  ;;  %v403_v52 = vpop.f32.mrb[7].mxu0  ;;  %535 = vst [vmem:[%s1595_s12 + $0xb8] sm:$0xff] %v1625_v51  ;;  %v1630_v53 = vpop.f32.mrb[7].mxu1  ;;  %v589_v60 = vmul.f32 %v1350_v50, %v1350_v50 }
 0x110   : >> { %v617_v54 = vadd.f32 %v616_v49, %v586_v48  ;;  %517 = vst [vmem:[%s1595_s12 + $0x28] sm:$0xff] %v403_v52  ;;  %v548_v55 = vadd.f32 %v547_v47, %v403_v52  ;;  %v587_v56 = vmul.f32 %v403_v52, %v403_v52  ;;  %533 = vst [vmem:[%s1595_s12 + $0xa8] sm:$0xff] %v1630_v53 }
 0x111   : >> { %v598_v47 = vmul.f32 %v1600_v29, %v1600_v29 }
 0x112   : >> { %v549_v58 = vadd.f32 %v1349_v42, %v548_v55  ;;  %v618_v59 = vadd.f32 %v617_v54, %v587_v56  ;;  %v599_v54 = vmul.f32 %v1610_v33, %v1610_v33  ;;  %v600_v55 = vmul.f32 %v1591_v27, %v1591_v27 }
 0x114   : >> { %v619_v61 = vadd.f32 %v618_v59, %v588_v57  ;;  %v1353_v62 = vpop.f32.mrb[8].mxu0  ;;  %v550_v63 = vadd.f32 %v1350_v50, %v549_v58  ;;  %v1635_v2 = vpop.f32.mrb[8].mxu1  ;;  %v601_v58 = vmul.f32 %v1605_v31, %v1605_v31 }
 0x115   : >> { %522 = vst [vmem:[%s1595_s12 + $0x50] sm:$0xff] %v1353_v62  ;;  %v416_v3 = vpop.f32.mrb[9].mxu0  ;;  %538 = vst [vmem:[%s1595_s12 + $0xd0] sm:$0xff] %v1635_v2  ;;  %v1640_v4 = vpop.f32.mrb[9].mxu1  ;;  %v592_v15 = vmul.f32 %v1353_v62, %v1353_v62 }
 0x116   : >> { %520 = vst [vmem:[%s1595_s12 + $0x40] sm:$0xff] %v416_v3  ;;  %v551_v5 = vadd.f32 %v550_v63, %v416_v3  ;;  %v590_v6 = vmul.f32 %v416_v3, %v416_v3  ;;  %v620_v7 = vadd.f32 %v619_v61, %v589_v60  ;;  %v1354_v8 = vpop.f32.mrb[10].mxu0  ;;  %536 = vst [vmem:[%s1595_s12 + $0xc0] sm:$0xff] %v1640_v4  ;;  %v1645_v9 = vpop.f32.mrb[10].mxu1 }
 0x117   : >> { %523 = vst [vmem:[%s1595_s12 + $0x58] sm:$0xff] %v1354_v8  ;;  %v419_v10 = vpop.f32.mrb[11].mxu0  ;;  %539 = vst [vmem:[%s1595_s12 + $0xd8] sm:$0xff] %v1645_v9  ;;  %v1650_v11 = vpop.f32.mrb[11].mxu1  ;;  %v593_v18 = vmul.f32 %v1354_v8, %v1354_v8  ;;  %v603_v3 = vmul.f32 %v1630_v53, %v1630_v53 }
 0x118   : >> { %v621_v12 = vadd.f32 %v620_v7, %v590_v6  ;;  %521 = vst [vmem:[%s1595_s12 + $0x48] sm:$0xff] %v419_v10  ;;  %v552_v13 = vadd.f32 %v551_v5, %v419_v10  ;;  %v591_v14 = vmul.f32 %v419_v10, %v419_v10  ;;  %537 = vst [vmem:[%s1595_s12 + $0xc8] sm:$0xff] %v1650_v11 }
 0x11a   : >> { %v553_v16 = vadd.f32 %v1353_v62, %v552_v13  ;;  %v622_v17 = vadd.f32 %v621_v12, %v591_v14  ;;  %v607_v14 = vmul.f32 %v1650_v11, %v1650_v11 }
 0x11c   : >> { %v623_v19 = vadd.f32 %v622_v17, %v592_v15  ;;  %v1357_v20 = vpop.f32.mrb[12].mxu0  ;;  %v554_v21 = vadd.f32 %v1354_v8, %v553_v16  ;;  %v1655_v22 = vpop.f32.mrb[12].mxu1 }
 0x11d   : >> { %526 = vst [vmem:[%s1595_s12 + $0x70] sm:$0xff] %v1357_v20  ;;  %v432_v23 = vpop.f32.mrb[13].mxu0  ;;  %542 = vst [vmem:[%s1595_s12 + $0xf0] sm:$0xff] %v1655_v22  ;;  %v496_v24 = vpop.f32.mrb[13].mxu1  ;;  %v596_v39 = vmul.f32 %v1357_v20, %v1357_v20 }
 0x11e   : >> { %524 = vst [vmem:[%s1595_s12 + $0x60] sm:$0xff] %v432_v23  ;;  %v555_v25 = vadd.f32 %v554_v21, %v432_v23  ;;  %v594_v26 = vmul.f32 %v432_v23, %v432_v23  ;;  %v624_v28 = vadd.f32 %v623_v19, %v593_v18  ;;  %v1358_v30 = vpop.f32.mrb[14].mxu0  ;;  %540 = vst [vmem:[%s1595_s12 + $0xe0] sm:$0xff] %v496_v24  ;;  %v1374_v32 = vpop.f32.mrb[14].mxu1 }
 0x11f   : >> { %527 = vst [vmem:[%s1595_s12 + $0x78] sm:$0xff] %v1358_v30  ;;  %v435_v34 = vpop.f32.mrb[15].mxu0  ;;  %543 = vst [vmem:[%s1595_s12 + $0xf8] sm:$0xff] %v1374_v32  ;;  %v499_v35 = vpop.f32.mrb[15].mxu1  ;;  %v597_v42 = vmul.f32 %v1358_v30, %v1358_v30 }
 0x120   : >> { %v625_v36 = vadd.f32 %v624_v28, %v594_v26  ;;  %525 = vst [vmem:[%s1595_s12 + $0x68] sm:$0xff] %v435_v34  ;;  %v556_v37 = vadd.f32 %v555_v25, %v435_v34  ;;  %v595_v38 = vmul.f32 %v435_v34, %v435_v34  ;;  %541 = vst [vmem:[%s1595_s12 + $0xe8] sm:$0xff] %v499_v35 }
 0x121   : >> { %v611_v25 = vmul.f32 %v499_v35, %v499_v35 }
 0x122   : >> { %v557_v40 = vadd.f32 %v1357_v20, %v556_v37  ;;  %v626_v41 = vadd.f32 %v625_v36, %v595_v38 }
 0x124   : >> { %v627_v43 = vadd.f32 %v626_v41, %v596_v39  ;;  %v558_v45 = vadd.f32 %v1358_v30, %v557_v40 }
 0x126   : >> { %v559_v48 = vadd.f32 %v558_v45, %v1600_v29  ;;  %v628_v49 = vadd.f32 %v627_v43, %v597_v42  ;;  %v602_v29 = vmul.f32 %v1620_v46, %v1620_v46 }
 0x128   : >> { %v629_v50 = vadd.f32 %v628_v49, %v598_v47  ;;  %v560_v52 = vadd.f32 %v559_v48, %v1610_v33 }
 0x12a   : >> { %v561_v56 = vadd.f32 %v1591_v27, %v560_v52  ;;  %v630_v57 = vadd.f32 %v629_v50, %v599_v54  ;;  %v604_v27 = vmul.f32 %v1615_v44, %v1615_v44 }
 0x12c   : >> { %v631_v59 = vadd.f32 %v630_v57, %v600_v55  ;;  %v562_v60 = vadd.f32 %v1605_v31, %v561_v56  ;;  %v605_v31 = vmul.f32 %v1625_v51, %v1625_v51 }
 0x12e   : >> { %v563_v61 = vadd.f32 %v562_v60, %v1620_v46  ;;  %v632_v62 = vadd.f32 %v631_v59, %v601_v58  ;;  %v606_v46 = vmul.f32 %v1640_v4, %v1640_v4 }
 0x130   : >> { %v633_v63 = vadd.f32 %v632_v62, %v602_v29  ;;  %v564_v33 = vadd.f32 %v563_v61, %v1630_v53 }
 0x132   : >> { %v565_v5 = vadd.f32 %v1615_v44, %v564_v33  ;;  %v634_v6 = vadd.f32 %v633_v63, %v603_v3  ;;  %v608_v44 = vmul.f32 %v1635_v2, %v1635_v2 }
 0x134   : >> { %v635_v7 = vadd.f32 %v634_v6, %v604_v27  ;;  %v566_v8 = vadd.f32 %v1625_v51, %v565_v5  ;;  %v609_v51 = vmul.f32 %v1645_v9, %v1645_v9 }
 0x136   : >> { %v567_v10 = vadd.f32 %v566_v8, %v1640_v4  ;;  %v636_v12 = vadd.f32 %v635_v7, %v605_v31  ;;  %v610_v4 = vmul.f32 %v496_v24, %v496_v24 }
 0x138   : >> { %v637_v13 = vadd.f32 %v636_v12, %v606_v46  ;;  %v568_v53 = vadd.f32 %v567_v10, %v1650_v11  ;;  %v612_v11 = vmul.f32 %v1655_v22, %v1655_v22 }
 0x13a   : >> { %v569_v15 = vadd.f32 %v1635_v2, %v568_v53  ;;  %v638_v16 = vadd.f32 %v637_v13, %v607_v14  ;;  %v613_v2 = vmul.f32 %v1374_v32, %v1374_v32 }
 0x13c   : >> { %v639_v17 = vadd.f32 %v638_v16, %v608_v44  ;;  %v570_v18 = vadd.f32 %v1645_v9, %v569_v15 }
 0x13e   : >> { %v571_v19 = vadd.f32 %v570_v18, %v496_v24  ;;  %v640_v20 = vadd.f32 %v639_v17, %v609_v51 }
 0x140   : >> { %v641_v21 = vadd.f32 %v640_v20, %v610_v4  ;;  %v572_v23 = vadd.f32 %v571_v19, %v499_v35 }
 0x142   : >> { %v573_v26 = vadd.f32 %v1655_v22, %v572_v23  ;;  %v642_v28 = vadd.f32 %v641_v21, %v611_v25 }
 0x144   : >> { %v574_v30 = vadd.f32 %v1374_v32, %v573_v26  ;;  %v643_v34 = vadd.f32 %v642_v28, %v612_v11 }
 0x146   : >> { %v575_v36 = vrot.slane %v574_v30, 4  ;;  %v644_v37 = vadd.f32 %v643_v34, %v613_v2 }
 0x148   : >> { %v576_v38 = vadd.f32 %v575_v36, %v574_v30  ;;  %v645_v39 = vrot.slane %v644_v37, 4 }
 0x14a   : >> { %v577_v9 = vrot.slane %v576_v38, 2  ;;  %v646_v40 = vadd.f32 %v645_v39, %v644_v37 }
 0x14c   : >> { %v578_v24 = vadd.f32 %v577_v9, %v576_v38  ;;  %v647_v41 = vrot.slane %v646_v40, 2 }
 0x14e   : >> { %v579_v42 = vrot.slane %v578_v24, 1  ;;  %v648_v43 = vadd.f32 %v647_v41, %v646_v40 }
 0x150   : >> { %v580_v35 = vadd.f32 %v579_v42, %v578_v24  ;;  %v649_v45 = vrot.slane %v648_v43, 1  ;;  %149 = sbr.rel (!%p147_p4) target bundleno = 16 (0x10), region = 76 }
 0x152   : >> { %v581_v47 = vadd.f32 %v1487_v1, %v580_v35   ;;  %v650_v48 = vadd.f32 %v649_v45, %v648_v43 }
 0x154   : >> { %v651_v22 = vadd.f32 %v1483_v0, %v650_v48   ;;  %v1857_v1 = vmov %v581_v47  ;;  %v1714_v32 = vmul.f32 (%p147_p4), 0.0009765625, %v581_v47 }
 0x156   : >> { %v1856_v0 = vmov %v651_v22  ;;  %v654_v49 = vmul.f32 (%p147_p4), 0.0009765625, %v651_v22  ;;  %v655_v50 = vmul.f32 (%p147_p4), %v1714_v32, %v1714_v32 }
 0x158   : > { %v656_v1 = vsub.f32 %v654_v49, %v655_v50 }
 0x15a   : > { %v657_v52 = vmax.f32 %v656_v1, 0.0 }
 0x15c   : > { %v658_v54 = vadd.f32 1e-05, %v657_v52 }
 0x15e   : > { %1455 = vrsqrt.f32 %v658_v54 }
 0x168   : > { %v1718_v55 = vpop.eup %1455 }
 0x169 LB: >> { %s1138_s14 = sshll.u32 %s1495_s13, 8  ;;  %s665_s13 = sadd.s32 1, %s1495_s13   ;;  %s1495_s13 = sphi %s1720_s13, %s665_s13  }
 0x16a   : >> { %s1726_s15 = scalar_lea.vmem [#allocation2], %s1138_s14  ;;  %s1733_s16 = sshra.s32 %s1138_s14, 3 }
 0x16b   : >> { %v668_v0 = vld [vmem:[%s1726_s15] sm:$0xff]  ;;  %v669_v56 = vld [vmem:[%s1726_s15 + $0x8] sm:$0xff]  ;;  %v670_v57 = vld [vmem:[%s1726_s15 + $0x10] sm:$0xff]  ;;  %s1171_s18 = sshll.u32 %s1733_s16, 2  ;;  %p662_p5 = scmp.ge.s32.totalorder %s665_s13, 4  }
 0x16c   : >> { %v700_v58 = vsub.f32 %v668_v0, %v1714_v32  ;;  %v701_v59 = vsub.f32 %v669_v56, %v1714_v32  ;;  %v671_v60 = vld [vmem:[%s1726_s15 + $0x18] sm:$0xff]  ;;  %v702_v29 = vsub.f32 %v670_v57, %v1714_v32  ;;  %v672_v61 = vld [vmem:[%s1726_s15 + $0x20] sm:$0xff]  ;;  %v673_v62 = vld [vmem:[%s1726_s15 + $0x28] sm:$0xff]  ;;  %s1754_s19 = scalar_lea.vmem %s1528_s17, %s1171_s18 }
 0x16d   : >> { %v703_v63 = vsub.f32 %v671_v60, %v1714_v32  ;;  %v704_v33 = vsub.f32 %v672_v61, %v1714_v32  ;;  %v705_v3 = vsub.f32 %v673_v62, %v1714_v32  ;;  %v674_v27 = vld [vmem:[%s1726_s15 + $0x30] sm:$0xff]  ;;  %v675_v5 = vld [vmem:[%s1726_s15 + $0x38] sm:$0xff]  ;;  %v676_v17 = vld [vmem:[%s1726_s15 + $0x40] sm:$0xff] }
 0x16e   : >> { %v732_v6 = vmul.f32 %v1718_v55, %v700_v58  ;;  %v733_v31 = vmul.f32 %v1718_v55, %v701_v59  ;;  %v734_v7 = vmul.f32 %v1718_v55, %v702_v29  ;;  %v706_v8 = vsub.f32 %v674_v27, %v1714_v32  ;;  %v677_v18 = vld [vmem:[%s1726_s15 + $0x48] sm:$0xff]  ;;  %v678_v4 = vld [vmem:[%s1726_s15 + $0x50] sm:$0xff]  ;;  %v679_v36 = vld [vmem:[%s1726_s15 + $0x58] sm:$0xff] }
 0x16f   : >> { %v735_v46 = vmul.f32 %v1718_v55, %v703_v63  ;;  %v736_v10 = vmul.f32 %v1718_v55, %v704_v33  ;;  %v737_v12 = vmul.f32 %v1718_v55, %v705_v3  ;;  %v707_v13 = vsub.f32 %v675_v5, %v1714_v32  ;;  %v680_v38 = vld [vmem:[%s1726_s15 + $0x60] sm:$0xff]  ;;  %v681_v47 = vld [vmem:[%s1726_s15 + $0x68] sm:$0xff]  ;;  %v682_v50 = vld [vmem:[%s1726_s15 + $0x70] sm:$0xff] }
 0x170   : >> { %vm764_vm0 = vcmp.ge.f32.partialorder %v732_v6, 0.0  ;;  %vm765_vm1 = vcmp.ge.f32.partialorder %v733_v31, 0.0  ;;  %v796_v53 = vmul.f32 0.2, %v732_v6  ;;  %v797_v14 = vmul.f32 0.2, %v733_v31 }
 0x171   : >> { %vm766_vm2 = vcmp.ge.f32.partialorder %v734_v7, 0.0  ;;  %vm767_vm3 = vcmp.ge.f32.partialorder %v735_v46, 0.0  ;;  %v798_v44 = vmul.f32 0.2, %v734_v7  ;;  %v799_v15 = vmul.f32 0.2, %v735_v46 }
 0x172   : >> { %v828_v16 = vsel %vm764_vm0, %v732_v6, %v796_v53  ;;  %v829_v51 = vsel %vm765_vm1, %v733_v31, %v797_v14  ;;  %vm768_vm4 = vcmp.ge.f32.partialorder %v736_v10, 0.0  ;;  %vm769_vm5 = vcmp.ge.f32.partialorder %v737_v12, 0.0  ;;  %v683_v59 = vld [vmem:[%s1726_s15 + $0x78] sm:$0xff]  ;;  %v684_v62 = vld [vmem:[%s1726_s15 + $0x80] sm:$0xff] }
 0x173   : >> { %v1211_v19 = vpack.c.bf16 %v829_v51, %v828_v16  ;;  %v830_v20 = vsel %vm766_vm2, %v734_v7, %v798_v44  ;;  %v831_v21 = vsel %vm767_vm3, %v735_v46, %v799_v15  ;;  %v800_v23 = vmul.f32 0.2, %v736_v10  ;;  %v685_v7 = vld [vmem:[%s1726_s15 + $0x88] sm:$0xff]  ;;  %v687_v44 = vld [vmem:[%s1726_s15 + $0x98] sm:$0xff] }
 0x174   : >> { %v1216_v25 = vpack.c.bf16 %v831_v21, %v830_v20  ;;  %v801_v11 = vmul.f32 0.2, %v737_v12  ;;  %v738_v26 = vmul.f32 %v1718_v55, %v706_v8  ;;  %v739_v28 = vmul.f32 %v1718_v55, %v707_v13  ;;  %v686_v8 = vld [vmem:[%s1726_s15 + $0x90] sm:$0xff] }
 0x175   : >> { %1212 = vst [vmem:[%s1754_s19] sm:$0xff] %v1211_v19   ;;  %v832_v2 = vsel %vm768_vm4, %v736_v10, %v800_v23  ;;  %v708_v30 = vsub.f32 %v676_v17, %v1714_v32  ;;  %v709_v34 = vsub.f32 %v677_v18, %v1714_v32  ;;  %v710_v37 = vsub.f32 %v678_v4, %v1714_v32  ;;  %v688_v18 = vld [vmem:[%s1726_s15 + $0xa0] sm:$0xff]  ;;  %v689_v4 = vld [vmem:[%s1726_s15 + $0xa8] sm:$0xff] }
 0x176   : >> { %1288 = vst [vmem:[%s1754_s19 + $0x8] sm:$0xff] %v1216_v25   ;;  %v833_v39 = vsel %vm769_vm5, %v737_v12, %v801_v11  ;;  %vm770_vm6 = vcmp.ge.f32.partialorder %v738_v26, 0.0  ;;  %vm771_vm7 = vcmp.ge.f32.partialorder %v739_v28, 0.0  ;;  %v802_v9 = vmul.f32 0.2, %v738_v26 }
 0x177   : >> { %v1221_v40 = vpack.c.bf16 %v833_v39, %v832_v2  ;;  %v803_v24 = vmul.f32 0.2, %v739_v28  ;;  %v740_v41 = vmul.f32 %v1718_v55, %v708_v30  ;;  %v741_v42 = vmul.f32 %v1718_v55, %v709_v34  ;;  %v690_v34 = vld [vmem:[%s1726_s15 + $0xb0] sm:$0xff] }
 0x178   : >> { %v834_v43 = vsel %vm770_vm6, %v738_v26, %v802_v9  ;;  %v711_v35 = vsub.f32 %v679_v36, %v1714_v32  ;;  %v742_v45 = vmul.f32 %v1718_v55, %v710_v37  ;;  %v712_v48 = vsub.f32 %v680_v38, %v1714_v32  ;;  %v691_v36 = vld [vmem:[%s1726_s15 + $0xb8] sm:$0xff] }
 0x179   : >> { %1289 = vst [vmem:[%s1754_s19 + $0x10] sm:$0xff] %v1221_v40   ;;  %v835_v22 = vsel %vm771_vm7, %v739_v28, %v803_v24  ;;  %vm772_vm8 = vcmp.ge.f32.partialorder %v740_v41, 0.0  ;;  %vm773_vm9 = vcmp.ge.f32.partialorder %v741_v42, 0.0  ;;  %v804_v49 = vmul.f32 0.2, %v740_v41 }
 0x17a   : >> { %v1226_v1 = vpack.c.bf16 %v835_v22, %v834_v43  ;;  %v805_v52 = vmul.f32 0.2, %v741_v42  ;;  %v743_v54 = vmul.f32 %v1718_v55, %v711_v35  ;;  %vm774_vm10 = vcmp.ge.f32.partialorder %v742_v45, 0.0 }
 0x17b   : >> { %v836_v0 = vsel %vm772_vm8, %v740_v41, %v804_v49  ;;  %v806_v56 = vmul.f32 0.2, %v742_v45  ;;  %v713_v57 = vsub.f32 %v681_v47, %v1714_v32  ;;  %v744_v58 = vmul.f32 %v1718_v55, %v712_v48  ;;  %v693_v49 = vld [vmem:[%s1726_s15 + $0xc8] sm:$0xff] }
 0x17c   : >> { %1290 = vst [vmem:[%s1754_s19 + $0x18] sm:$0xff] %v1226_v1   ;;  %v837_v60 = vsel %vm773_vm9, %v741_v42, %v805_v52  ;;  %vm775_vm11 = vcmp.ge.f32.partialorder %v743_v54, 0.0  ;;  %v807_v29 = vmul.f32 0.2, %v743_v54  ;;  %v714_v61 = vsub.f32 %v682_v50, %v1714_v32 }
 0x17d   : >> { %v1231_v63 = vpack.c.bf16 %v837_v60, %v836_v0  ;;  %v838_v33 = vsel %vm774_vm10, %v742_v45, %v806_v56  ;;  %v745_v3 = vmul.f32 %v1718_v55, %v713_v57  ;;  %vm776_vm12 = vcmp.ge.f32.partialorder %v744_v58, 0.0  ;;  %v692_v45 = vld [vmem:[%s1726_s15 + $0xc0] sm:$0xff]  ;;  %v694_v57 = vld [vmem:[%s1726_s15 + $0xd0] sm:$0xff] }
 0x17e   : >> { %v839_v27 = vsel %vm775_vm11, %v743_v54, %v807_v29  ;;  %v808_v5 = vmul.f32 0.2, %v744_v58  ;;  %v715_v6 = vsub.f32 %v683_v59, %v1714_v32  ;;  %v746_v31 = vmul.f32 %v1718_v55, %v714_v61  ;;  %v695_v61 = vld [vmem:[%s1726_s15 + $0xd8] sm:$0xff] }
 0x17f   : >> { %1291 = vst [vmem:[%s1754_s19 + $0x20] sm:$0xff] %v1231_v63   ;;  %v1236_v46 = vpack.c.bf16 %v839_v27, %v838_v33  ;;  %vm777_vm13 = vcmp.ge.f32.partialorder %v745_v3, 0.0  ;;  %v809_v10 = vmul.f32 0.2, %v745_v3  ;;  %v716_v12 = vsub.f32 %v684_v62, %v1714_v32  ;;  %v696_v62 = vld [vmem:[%s1726_s15 + $0xe0] sm:$0xff]  ;;  %v697_v63 = vld [vmem:[%s1726_s15 + $0xe8] sm:$0xff] }
 0x180   : >> { %v840_v13 = vsel %vm776_vm12, %v744_v58, %v808_v5  ;;  %v747_v53 = vmul.f32 %v1718_v55, %v715_v6  ;;  %vm778_vm14 = vcmp.ge.f32.partialorder %v746_v31, 0.0  ;;  %v810_v14 = vmul.f32 0.2, %v746_v31 }
 0x181   : >> { %1292 = vst [vmem:[%s1754_s19 + $0x28] sm:$0xff] %v1236_v46   ;;  %v841_v15 = vsel %vm777_vm13, %v745_v3, %v809_v10  ;;  %v717_v16 = vsub.f32 %v685_v7, %v1714_v32  ;;  %v748_v51 = vmul.f32 %v1718_v55, %v716_v12  ;;  %v718_v17 = vsub.f32 %v686_v8, %v1714_v32  ;;  %v698_v12 = vld [vmem:[%s1726_s15 + $0xf0] sm:$0xff] }
 0x182   : >> { %v1241_v19 = vpack.c.bf16 %v841_v15, %v840_v13  ;;  %vm779_vm15 = vcmp.ge.f32.partialorder %v747_v53, 0.0  ;;  %v811_v20 = vmul.f32 0.2, %v747_v53  ;;  %v842_v21 = vsel %vm778_vm14, %v746_v31, %v810_v14 }
 0x183   : >> { %v749_v23 = vmul.f32 %v1718_v55, %v717_v16  ;;  %vm780_vm0 = vcmp.ge.f32.partialorder %v748_v51, 0.0  ;;  %v812_v25 = vmul.f32 0.2, %v748_v51  ;;  %v719_v11 = vsub.f32 %v687_v44, %v1714_v32 }
 0x184   : >> { %1293 = vst [vmem:[%s1754_s19 + $0x30] sm:$0xff] %v1241_v19   ;;  %v843_v26 = vsel %vm779_vm15, %v747_v53, %v811_v20  ;;  %v750_v28 = vmul.f32 %v1718_v55, %v718_v17  ;;  %v720_v2 = vsub.f32 %v688_v18, %v1714_v32  ;;  %v721_v30 = vsub.f32 %v689_v4, %v1714_v32  ;;  %v699_v4 = vld [vmem:[%s1726_s15 + $0xf8] sm:$0xff] }
 0x185   : >> { %v1246_v37 = vpack.c.bf16 %v843_v26, %v842_v21  ;;  %vm781_vm1 = vcmp.ge.f32.partialorder %v749_v23, 0.0  ;;  %v813_v38 = vmul.f32 0.2, %v749_v23  ;;  %v844_v39 = vsel %vm780_vm0, %v748_v51, %v812_v25 }
 0x186   : >> { %v751_v9 = vmul.f32 %v1718_v55, %v719_v11  ;;  %vm782_vm2 = vcmp.ge.f32.partialorder %v750_v28, 0.0  ;;  %v814_v40 = vmul.f32 0.2, %v750_v28  ;;  %v752_v24 = vmul.f32 %v1718_v55, %v720_v2 }
 0x187   : >> { %1294 = vst [vmem:[%s1754_s19 + $0x38] sm:$0xff] %v1246_v37   ;;  %v845_v41 = vsel %vm781_vm1, %v749_v23, %v813_v38  ;;  %v753_v42 = vmul.f32 %v1718_v55, %v721_v30  ;;  %v722_v43 = vsub.f32 %v690_v34, %v1714_v32  ;;  %v723_v35 = vsub.f32 %v691_v36, %v1714_v32 }
 0x188   : >> { %v1251_v47 = vpack.c.bf16 %v845_v41, %v844_v39  ;;  %vm783_vm3 = vcmp.ge.f32.partialorder %v751_v9, 0.0  ;;  %v815_v48 = vmul.f32 0.2, %v751_v9  ;;  %v846_v22 = vsel %vm782_vm2, %v750_v28, %v814_v40 }
 0x189   : >> { %vm784_vm4 = vcmp.ge.f32.partialorder %v752_v24, 0.0  ;;  %vm785_vm5 = vcmp.ge.f32.partialorder %v753_v42, 0.0  ;;  %v816_v50 = vmul.f32 0.2, %v752_v24  ;;  %v817_v1 = vmul.f32 0.2, %v753_v42 }
 0x18a   : >> { %1295 = vst [vmem:[%s1754_s19 + $0x40] sm:$0xff] %v1251_v47   ;;  %v847_v52 = vsel %vm783_vm3, %v751_v9, %v815_v48  ;;  %v754_v54 = vmul.f32 %v1718_v55, %v722_v43  ;;  %v755_v0 = vmul.f32 %v1718_v55, %v723_v35  ;;  %v724_v56 = vsub.f32 %v692_v45, %v1714_v32 }
 0x18b   : >> { %v1256_v58 = vpack.c.bf16 %v847_v52, %v846_v22  ;;  %v848_v59 = vsel %vm784_vm4, %v752_v24, %v816_v50  ;;  %v849_v60 = vsel %vm785_vm5, %v753_v42, %v817_v1  ;;  %v725_v29 = vsub.f32 %v693_v49, %v1714_v32 }
 0x18c   : >> { %v1261_v33 = vpack.c.bf16 %v849_v60, %v848_v59  ;;  %vm786_vm6 = vcmp.ge.f32.partialorder %v754_v54, 0.0  ;;  %vm787_vm7 = vcmp.ge.f32.partialorder %v755_v0, 0.0  ;;  %v818_v3 = vmul.f32 0.2, %v754_v54 }
 0x18d   : >> { %1296 = vst [vmem:[%s1754_s19 + $0x48] sm:$0xff] %v1256_v58   ;;  %v819_v27 = vmul.f32 0.2, %v755_v0  ;;  %v756_v5 = vmul.f32 %v1718_v55, %v724_v56  ;;  %v757_v6 = vmul.f32 %v1718_v55, %v725_v29  ;;  %v726_v31 = vsub.f32 %v694_v57, %v1714_v32 }
 0x18e   : >> { %1297 = vst [vmem:[%s1754_s19 + $0x50] sm:$0xff] %v1261_v33   ;;  %v850_v7 = vsel %vm786_vm6, %v754_v54, %v818_v3  ;;  %v727_v8 = vsub.f32 %v695_v61, %v1714_v32  ;;  %v728_v46 = vsub.f32 %v696_v62, %v1714_v32  ;;  %v729_v10 = vsub.f32 %v697_v63, %v1714_v32 }
 0x18f   : >> { %v851_v13 = vsel %vm787_vm7, %v755_v0, %v819_v27  ;;  %vm788_vm8 = vcmp.ge.f32.partialorder %v756_v5, 0.0  ;;  %vm789_vm9 = vcmp.ge.f32.partialorder %v757_v6, 0.0  ;;  %v820_v53 = vmul.f32 0.2, %v756_v5 }
 0x190   : >> { %v1266_v14 = vpack.c.bf16 %v851_v13, %v850_v7  ;;  %v821_v44 = vmul.f32 0.2, %v757_v6  ;;  %v758_v15 = vmul.f32 %v1718_v55, %v726_v31  ;;  %v759_v16 = vmul.f32 %v1718_v55, %v727_v8 }
 0x191   : >> { %v852_v51 = vsel %vm788_vm8, %v756_v5, %v820_v53  ;;  %v760_v17 = vmul.f32 %v1718_v55, %v728_v46  ;;  %v761_v18 = vmul.f32 %v1718_v55, %v729_v10  ;;  %v730_v19 = vsub.f32 %v698_v12, %v1714_v32 }
 0x192   : >> { %1298 = vst [vmem:[%s1754_s19 + $0x58] sm:$0xff] %v1266_v14   ;;  %v853_v20 = vsel %vm789_vm9, %v757_v6, %v821_v44  ;;  %vm790_vm10 = vcmp.ge.f32.partialorder %v758_v15, 0.0  ;;  %vm791_vm11 = vcmp.ge.f32.partialorder %v759_v16, 0.0  ;;  %v822_v21 = vmul.f32 0.2, %v758_v15 }
 0x193   : >> { %v1271_v23 = vpack.c.bf16 %v853_v20, %v852_v51  ;;  %v823_v25 = vmul.f32 0.2, %v759_v16  ;;  %vm792_vm12 = vcmp.ge.f32.partialorder %v760_v17, 0.0  ;;  %vm793_vm13 = vcmp.ge.f32.partialorder %v761_v18, 0.0 }
 0x194   : >> { %v854_v11 = vsel %vm790_vm10, %v758_v15, %v822_v21  ;;  %v824_v26 = vmul.f32 0.2, %v760_v17  ;;  %v825_v28 = vmul.f32 0.2, %v761_v18  ;;  %v731_v2 = vsub.f32 %v699_v4, %v1714_v32 }
 0x195   : >> { %1299 = vst [vmem:[%s1754_s19 + $0x60] sm:$0xff] %v1271_v23   ;;  %v855_v30 = vsel %vm791_vm11, %v759_v16, %v823_v25  ;;  %v762_v34 = vmul.f32 %v1718_v55, %v730_v19 }
 0x196   : >> { %v1276_v36 = vpack.c.bf16 %v855_v30, %v854_v11  ;;  %v856_v37 = vsel %vm792_vm12, %v760_v17, %v824_v26  ;;  %v857_v38 = vsel %vm793_vm13, %v761_v18, %v825_v28  ;;  %v763_v39 = vmul.f32 %v1718_v55, %v731_v2 }
 0x197   : >> { %v1281_v9 = vpack.c.bf16 %v857_v38, %v856_v37  ;;  %vm794_vm14 = vcmp.ge.f32.partialorder %v762_v34, 0.0  ;;  %v826_v40 = vmul.f32 0.2, %v762_v34  ;;  %664 = sbr.rel (!%p662_p5) target bundleno = 361 (0x169), region = 87 }
 0x198   : >> { %1300 = vst [vmem:[%s1754_s19 + $0x68] sm:$0xff] %v1276_v36   ;;  %vm795_vm15 = vcmp.ge.f32.partialorder %v763_v39, 0.0  ;;  %v827_v24 = vmul.f32 0.2, %v763_v39 }
 0x199   : >> { %1301 = vst [vmem:[%s1754_s19 + $0x70] sm:$0xff] %v1281_v9   ;;  %v858_v41 = vsel %vm794_vm14, %v762_v34, %v826_v40 }
 0x19a   : >> { %v859_v42 = vsel %vm795_vm15, %v763_v39, %v827_v24 }
 0x19b   : >> { %v1286_v43 = vpack.c.bf16 %v859_v42, %v858_v41 }
 0x19d   : >> { %1302 = vst [vmem:[%s1754_s19 + $0x78] sm:$0xff] %v1286_v43  }
 0x19e PF: > { %s12_s9 = sadd.s32 1, %s1479_s9  }
 0x19f   : > { %p9_p6 = scmp.ge.s32.totalorder %s12_s9, 4  }
 0x1a1   :  { %11 = sbr.rel (!%p9_p6) target bundleno = 1 (0x1), region = 98 }

// kernel: encoder_forward.11
= control target key start
LH: loop header
LB: loop body
LE: loop exit
PB: predicated region body
PF: predicated region fallthrough
CT: control target
= control target key end

     0   :  { %s3112_s9 = smov 0   ;;  %s3509_s0 = inlined_call_operand.vmem [shape: bf16[2,36,9,128], index: 0, kind: input, shape index: {}]   ;;  %s3510_s1 = inlined_call_operand.vmem [shape: bf16[9,128,128], index: 1, kind: input, shape index: {}]   ;;  %s3511_s2 = inlined_call_operand.vmem [shape: bf16[2,64,128], index: 2, kind: output, shape index: {}]  }
   0x1 LB: > { %s2220_s10 = sadd.s32 4294967295, %s3095_s9   ;;  %p2224_p0 = scmp.ge.s32.totalorder %s3095_s9, 1  ;;  %s3095_s9 = sphi %s3112_s9, %s12_s9  }
   0x2   : > { %p112_p1 = scmp.lt.s32.totalorder %s3095_s9, 3 }
   0x4   : > { %p113_p2 = pnand %p2224_p0, %p112_p1 }
   0x5   : > { %v2991_v0 = vld [vmem:[%s3510_s1 + $0x40] sm:$0xff] (!%p113_p2)   ;;  %p134_p3 = scmp.lt.s32.totalorder (!%p113_p2), %s2220_s10, 1  ;;  %v2993_v2 = vld [vmem:[%s3510_s1 + $0x48] sm:$0xff] (!%p113_p2)   ;;  %v2995_v4 = vld [vmem:[%s3510_s1 + $0x50] sm:$0xff] (!%p113_p2)   ;;  %vm491_vm0 = vsmask.f32 (!%p113_p2), 3328 }
   0x6   : > { %116 = sbr.rel (%p113_p2) target bundleno = 443 (0x1bb), region = 28  ;;  %v2992_v1 = vld [vmem:[%s3510_s1 + $0x100] sm:$0xff] (!%p113_p2)   ;;  %2686 = vmatprep.subr.bf16.mxu1 (!%p113_p2), %v2991_v0  ;;  %v2994_v3 = vld [vmem:[%s3510_s1 + $0x108] sm:$0xff] (!%p113_p2)   ;;  %v2996_v5 = vld [vmem:[%s3510_s1 + $0x110] sm:$0xff] (!%p113_p2)   ;;  %vm492_vm1 = vsmask.f32 (!%p113_p2), 7440 }
   0x7   : > { %2782 = vmatprep.subr.bf16.mxu0 (!%p113_p2), %v2992_v1  ;;  %2687 = vmatpush3.bf16.msra.mxu1 (!%p113_p2), %v2991_v0  ;;  %v2997_v6 = vld [vmem:[%s3510_s1 + $0x58] sm:$0xff] (!%p113_p2)   ;;  %v2999_v8 = vld [vmem:[%s3510_s1 + $0x60] sm:$0xff] (!%p113_p2)   ;;  %v3001_v10 = vld [vmem:[%s3510_s1 + $0x68] sm:$0xff] (!%p113_p2)  }
   0x8   : > { %2783 = vmatpush3.bf16.msra.mxu0 (!%p113_p2), %v2992_v1  ;;  %2688 = vmatprep.subr.bf16.mxu1 (!%p113_p2), %v2993_v2  ;;  %v2998_v7 = vld [vmem:[%s3510_s1 + $0x118] sm:$0xff] (!%p113_p2)   ;;  %v3000_v9 = vld [vmem:[%s3510_s1 + $0x120] sm:$0xff] (!%p113_p2)   ;;  %v3002_v12 = vld [vmem:[%s3510_s1 + $0x128] sm:$0xff] (!%p113_p2)  }
   0x9   : > { %2784 = vmatprep.subr.bf16.mxu0 (!%p113_p2), %v2994_v3  ;;  %v3003_v14 = vld [vmem:[%s3510_s1 + $0x70] sm:$0xff] (!%p113_p2)   ;;  %v3005_v16 = vld [vmem:[%s3510_s1 + $0x78] sm:$0xff] (!%p113_p2)   ;;  %v3008_v18 = vld [vmem:[%s3510_s1] sm:$0xff] (!%p113_p2)  }
   0xa   : > { %v3004_v15 = vld [vmem:[%s3510_s1 + $0x130] sm:$0xff] (!%p113_p2)   ;;  %v3006_v17 = vld [vmem:[%s3510_s1 + $0x138] sm:$0xff] (!%p113_p2)   ;;  %v3010_v19 = vld [vmem:[%s3510_s1 + $0x140] sm:$0xff] (!%p113_p2)  }
   0xb   : > { %2689 = vmatpush3.bf16.msra.mxu1 (!%p113_p2), %v2993_v2  ;;  %v3013_v22 = vld [vmem:[%s3510_s1 + $0x8] sm:$0xff] (!%p113_p2)   ;;  %v3015_v26 = vld [vmem:[%s3510_s1 + $0x10] sm:$0xff] (!%p113_p2)   ;;  %v3017_v28 = vld [vmem:[%s3510_s1 + $0x18] sm:$0xff] (!%p113_p2)  }
   0xc   : > { %2785 = vmatpush3.bf16.msra.mxu0 (!%p113_p2), %v2994_v3  ;;  %2690 = vmatprep.subr.bf16.mxu1 (!%p113_p2), %v2995_v4  ;;  %v3014_v23 = vld [vmem:[%s3510_s1 + $0x148] sm:$0xff] (!%p113_p2)   ;;  %v3016_v27 = vld [vmem:[%s3510_s1 + $0x150] sm:$0xff] (!%p113_p2)   ;;  %v3018_v31 = vld [vmem:[%s3510_s1 + $0x158] sm:$0xff] (!%p113_p2)  }
   0xd   : > { %s3515_s10 = smov (!%p134_p3, %s2220_s10), 1  ;;  %2786 = vmatprep.subr.bf16.mxu0 %v2996_v5  ;;  %v3019_v38 = vld [vmem:[%s3510_s1 + $0x20] sm:$0xff]   ;;  %v3021_v47 = vld [vmem:[%s3510_s1 + $0x28] sm:$0xff]   ;;  %vm3227_vm2 = vmor %vm491_vm0, %vm492_vm1 }
   0xe   : > { %s2982_s27 = smul.u32 288, %s3515_s10  ;;  %v3020_v43 = vld [vmem:[%s3510_s1 + $0x160] sm:$0xff]   ;;  %v3022_v50 = vld [vmem:[%s3510_s1 + $0x168] sm:$0xff]   ;;  %v3024_v2 = vld [vmem:[%s3510_s1 + $0x30] sm:$0xff]   ;;  %s2546_s4 = sshll.u32 %s3515_s10, 5 }
   0xf   : > { %2691 = vmatpush3.bf16.msra.mxu1 %v2995_v4  ;;  %s143_s10 = scalar_lea.vmem %s3511_s2, %s2546_s4 }
  0x10   : > { %2787 = vmatpush3.bf16.msra.mxu0 %v2996_v5  ;;  %2692 = vmatprep.subr.bf16.mxu1 %v2997_v6  ;;  %s3156_s6 = scalar_lea.vmem %s3509_s0, %s2982_s27 }
  0x11   : > { %2788 = vmatprep.subr.bf16.mxu0 %v2998_v7  ;;  %v3007_v11 = vld [vmem:[%s3156_s6 + $0x48] ss:$8 sps:$4 sm:$0xff]   ;;  %v3009_v13 = vld [vmem:[%s3156_s6 + $0xd8] ss:$8 sps:$4 sm:$0xff]   ;;  %v2377_v34 = vld [vmem:[%s3156_s6 + $0x94] sm:$0x1] }
  0x12   : > { %2702 = vmatprep.mubr.bf16.mxu1 %v3007_v11  ;;  %2798 = vmatprep.mubr.bf16.mxu0 %v3009_v13  ;;  %v3011_v20 = vld [vmem:[%s3156_s6 + $0x58] ss:$8 sps:$4 sm:$0xff]   ;;  %v3012_v21 = vld [vmem:[%s3156_s6 + $0xe8] ss:$8 sps:$4 sm:$0xff]   ;;  %v2379_v39 = vld [vmem:[%s3156_s6 + $0x9c] sm:$0x1] }
  0x13   : > { %2693 = vmatpush3.bf16.msra.mxu1 %v2997_v6  ;;  %v3023_v24 = vld [vmem:[%s3156_s6 + $0x68] ss:$8 sps:$4 sm:$0xff]   ;;  %v3025_v25 = vld [vmem:[%s3156_s6 + $0xf8] ss:$8 sps:$4 sm:$0xff]   ;;  %v1134_v40 = vshll.u32 %v2377_v34, 16  ;;  %v1148_v46 = vshll.u32 %v2379_v39, 16 }
  0x14   : > { %2789 = vmatpush3.bf16.msra.mxu0 %v2998_v7  ;;  %2694 = vmatprep.subr.bf16.mxu1 %v2999_v8  ;;  %v3027_v29 = vld [vmem:[%s3156_s6 + $0x78] ss:$8 sps:$4 sm:$0xff]   ;;  %v3028_v30 = vld [vmem:[%s3156_s6 + $0x108] ss:$8 sps:$4 sm:$0xff]   ;;  %v2381_v57 = vld [vmem:[%s3156_s6 + $0xa4] sm:$0x1] }
  0x15   : > { %2790 = vmatprep.subr.bf16.mxu0 %v3000_v9  ;;  %v3031_v32 = vld [vmem:[%s3156_s6] ss:$8 sps:$4 sm:$0xff]   ;;  %v2376_v33 = vld [vmem:[%s3156_s6 + $0x90] sm:$0xf]  ;;  %v2378_v35 = vld [vmem:[%s3156_s6 + $0x98] sm:$0xf] }
  0x16   : > { %v1125_v36 = vshrl.u32 %v2376_v33, 16  ;;  %v1128_v37 = vshll.u32 %v2376_v33, 16  ;;  %v1139_v41 = vshrl.u32 %v2378_v35, 16  ;;  %v1142_v42 = vshll.u32 %v2378_v35, 16  ;;  %v2380_v56 = vld [vmem:[%s3156_s6 + $0xa0] sm:$0xf] }
  0x17   : > { %2695 = vmatpush3.bf16.msra.mxu1 %v2999_v8  ;;  %v1136_v52 = vrot.slane %v1134_v40, 5  ;;  %v1150_v55 = vrot.slane %v1148_v46, 5  ;;  %v2382_v59 = vld [vmem:[%s3156_s6 + $0xa8] sm:$0xf]  ;;  %v2383_v60 = vld [vmem:[%s3156_s6 + $0xac] sm:$0x1] }
  0x18   : > { %2791 = vmatpush3.bf16.msra.mxu0 %v3000_v9  ;;  %2696 = vmatprep.subr.bf16.mxu1 %v3001_v10  ;;  %v1127_v44 = vrot.slane %v1125_v36, 4  ;;  %v1130_v45 = vrot.slane %v1128_v37, 5  ;;  %v1141_v48 = vrot.slane %v1139_v41, 4  ;;  %v1144_v49 = vrot.slane %v1142_v42, 5  ;;  %v3026_v6 = vld [vmem:[%s3510_s1 + $0x170] sm:$0xff]  }
  0x19   : > { %2792 = vmatprep.subr.bf16.mxu0 %v3002_v12  ;;  %v1153_v61 = vshrl.u32 %v2380_v56, 16  ;;  %v1156_v63 = vshll.u32 %v2380_v56, 16  ;;  %v1162_v0 = vshll.u32 %v2381_v57, 16  ;;  %v1167_v1 = vshrl.u32 %v2382_v59, 16  ;;  %v3045_v37 = vld [vmem:[%s3156_s6 + $0x20] ss:$8 sps:$4 sm:$0xff]  }
  0x1a   : > { %v1131_v51 = vor.u32 %v1130_v45, %v1127_v44  ;;  %v1145_v54 = vor.u32 %v1144_v49, %v1141_v48  ;;  %v1170_v5 = vshll.u32 %v2382_v59, 16  ;;  %v3048_v48 = vld [vmem:[%s3156_s6 + $0x30] ss:$8 sps:$4 sm:$0xff]   ;;  %v2388_v49 = vld [vmem:[%s3156_s6 + $0xc0] sm:$0xf] }
  0x1b   : > { %2697 = vmatpush3.bf16.msra.mxu1 %v3001_v10  ;;  %v1155_v4 = vrot.slane %v1153_v61, 4  ;;  %v1158_v8 = vrot.slane %v1156_v63, 5  ;;  %v1169_v9 = vrot.slane %v1167_v1, 4  ;;  %v1176_v10 = vshll.u32 %v2383_v60, 16  ;;  %v3039_v59 = vld [vmem:[%s3510_s1 + $0x98] sm:$0xff]  }
  0x1c   : > { %2793 = vmatpush3.bf16.msra.mxu0 %v3002_v12  ;;  %2698 = vmatprep.subr.bf16.mxu1 %v3003_v14  ;;  %v1132_v58 = vrot.slane %v1131_v51, 4  ;;  %v1146_v62 = vrot.slane %v1145_v54, 4  ;;  %v1164_v12 = vrot.slane %v1162_v0, 5  ;;  %v1172_v13 = vrot.slane %v1170_v5, 5  ;;  %v2390_v51 = vld [vmem:[%s3156_s6 + $0xc8] sm:$0xf] }
  0x1d   : > { %2794 = vmatprep.subr.bf16.mxu0 %v3004_v15  ;;  %v1209_v56 = vshrl.u32 %v2388_v49, 16  ;;  %v1212_v57 = vshll.u32 %v2388_v49, 16  ;;  %v1223_v61 = vshrl.u32 %v2390_v51, 16 }
  0x1e   : > { %v1137_v3 = vsel %vm3227_vm2, %v1132_v58, %v1136_v52  ;;  %v1151_v7 = vsel %vm3227_vm2, %v1146_v62, %v1150_v55  ;;  %v3038_v52 = vld [vmem:[%s3510_s1 + $0x190] sm:$0xff]   ;;  %v2391_v55 = vld [vmem:[%s3156_s6 + $0xcc] sm:$0x1]  ;;  %v1226_v62 = vshll.u32 %v2390_v51, 16 }
  0x1f   : > { %2699 = vmatpush3.bf16.msra.mxu1 %v3003_v14  ;;  %v2408_v11 = vcombine.low %v1137_v3, %v1151_v7  ;;  %v3029_v14 = vld [vmem:[%s3510_s1 + $0x38] sm:$0xff]   ;;  %v1232_v63 = vshll.u32 %v2391_v55, 16  ;;  %v1211_v1 = vrot.slane %v1209_v56, 4 }
  0x20   : > { %2795 = vmatpush3.bf16.msra.mxu0 %v3004_v15  ;;  %2700 = vmatprep.subr.bf16.mxu1 %v3005_v16  ;;  %v1159_v15 = vor.u32 %v1158_v8, %v1155_v4  ;;  %v3040_v4 = vld [vmem:[%s3510_s1 + $0x198] sm:$0xff]   ;;  %v1228_v7 = vrot.slane %v1226_v62, 5 }
  0x21   : > { %2796 = vmatprep.subr.bf16.mxu0 %v3006_v17  ;;  %v1234_v8 = vrot.slane %v1232_v63, 5 }
  0x23   : > { %2701 = vmatpush3.bf16.msra.mxu1 %v3005_v16  ;;  %v1173_v16 = vor.u32 %v1172_v13, %v1169_v9  ;;  %v3041_v13 = vld [vmem:[%s3510_s1 + $0xa0] sm:$0xff]  }
  0x24   : > { %2797 = vmatpush3.bf16.msra.mxu0 %v3006_v17  ;;  %2710 = vmatprep.subr.bf16.mxu1 %v3008_v18  ;;  %v1160_v17 = vrot.slane %v1159_v15, 4 }
  0x25   : > { %2806 = vmatprep.subr.bf16.mxu0 %v3010_v19 }
  0x26   : > { %2703 = vmatmul.mubr.bf16.vlgmr.msra.gmra.mrb[0].mxu1 %v3011_v20  ;;  %v1174_v20 = vrot.slane %v1173_v16, 4  ;;  %v477_v16 = vld [vmem:[%s3156_s6 + $0x8] sm:$0xf] }
  0x27   : > { %2711 = vmatpush3.bf16.msra.mxu1 %v3008_v18  ;;  %2799 = vmatmul.mubr.bf16.vlgmr.msra.gmra.mrb[0].mxu0 %v3012_v21  ;;  %v1178_v18 = vrot.slane %v1176_v10, 5  ;;  %v3032_v21 = vld [vmem:[%s3510_s1 + $0x80] sm:$0xff]  }
  0x28   : > { %2807 = vmatpush3.bf16.msra.mxu0 %v3010_v19  ;;  %2712 = vmatprep.subr.bf16.mxu1 %v3013_v22  ;;  %v3030_v19 = vld [vmem:[%s3510_s1 + $0x178] sm:$0xff]  }
  0x29   : > { %2808 = vmatprep.subr.bf16.mxu0 %v3014_v23  ;;  %2706 = vmatprep.mubr.bf16.mxu1 %v3023_v24  ;;  %v3033_v24 = vld [vmem:[%s3510_s1 + $0x180] sm:$0xff]  }
  0x2a   : > { %2802 = vmatprep.mubr.bf16.mxu0 %v3025_v25  ;;  %v3034_v25 = vld [vmem:[%s3156_s6 + $0x10] ss:$8 sps:$4 sm:$0xff]  }
  0x2b   : > { %2713 = vmatpush3.bf16.msra.mxu1 %v3013_v22  ;;  %v1165_v22 = vsel %vm3227_vm2, %v1160_v17, %v1164_v12  ;;  %v476_v12 = vld [vmem:[%s3156_s6 + $0x4] sm:$0x1]  ;;  %v478_v17 = vld [vmem:[%s3156_s6 + $0xc] sm:$0x1] }
  0x2c   : > { %2809 = vmatpush3.bf16.msra.mxu0 %v3014_v23  ;;  %2714 = vmatprep.subr.bf16.mxu1 %v3015_v26  ;;  %v1179_v23 = vsel %vm3227_vm2, %v1174_v20, %v1178_v18 }
  0x2d   : > { %2810 = vmatprep.subr.bf16.mxu0 %v3016_v27 }
  0x2e   : > { %2707 = vmatmul.mubr.bf16.gmra.mrb[4].mxu1 %v3027_v29  ;;  %v3036_v29 = vld [vmem:[%s3510_s1 + $0x188] sm:$0xff]  }
  0x2f   : > { %2715 = vmatpush3.bf16.msra.mxu1 %v3015_v26  ;;  %2803 = vmatmul.mubr.bf16.gmra.mrb[4].mxu0 %v3028_v30  ;;  %v3035_v26 = vld [vmem:[%s3510_s1 + $0x88] sm:$0xff]   ;;  %v2385_v30 = vld [vmem:[%s3156_s6 + $0xb4] sm:$0x1] }
  0x30   : > { %2811 = vmatpush3.bf16.msra.mxu0 %v3016_v27  ;;  %2716 = vmatprep.subr.bf16.mxu1 %v3017_v28  ;;  %v2384_v27 = vld [vmem:[%s3156_s6 + $0xb0] sm:$0xf]  ;;  %v1190_v35 = vshll.u32 %v2385_v30, 16 }
  0x31   : > { %2812 = vmatprep.subr.bf16.mxu0 %v3018_v31  ;;  %2726 = vmatprep.mubr.bf16.mxu1 %v3031_v32  ;;  %v2387_v32 = vld [vmem:[%s3156_s6 + $0xbc] sm:$0x1]  ;;  %v1181_v33 = vshrl.u32 %v2384_v27, 16  ;;  %v1184_v34 = vshll.u32 %v2384_v27, 16  ;;  %v518_v27 = vshll.u32 %v478_v17, 16 }
  0x32   : > { %2822 = vmatprep.mubr.bf16.mxu0 %v2408_v11  ;;  %v1204_v39 = vshll.u32 %v2387_v32, 16  ;;  %v1192_v44 = vrot.slane %v1190_v35, 5  ;;  %v475_v11 = vld [vmem:[%s3156_s6] sm:$0xf]  ;;  %v3043_v32 = vld [vmem:[%s3510_s1 + $0xa8] sm:$0xff]  }
  0x33   : > { %2717 = vmatpush3.bf16.msra.mxu1 %v3017_v28  ;;  %v2409_v28 = vcombine.low %v1165_v22, %v1179_v23  ;;  %v1183_v40 = vrot.slane %v1181_v33, 4  ;;  %v1186_v41 = vrot.slane %v1184_v34, 5  ;;  %v495_v18 = vshrl.u32 %v475_v11, 16  ;;  %v486_v17 = vld [vmem:[%s3156_s6 + $0x2c] sm:$0x1] }
  0x34   : > { %2813 = vmatpush3.bf16.msra.mxu0 %v3018_v31  ;;  %2718 = vmatprep.subr.bf16.mxu1 %v3019_v38  ;;  %v2386_v31 = vld [vmem:[%s3156_s6 + $0xb8] sm:$0xf]  ;;  %v1206_v46 = vrot.slane %v1204_v39, 5  ;;  %v509_v22 = vshrl.u32 %v477_v16, 16  ;;  %v512_v23 = vshll.u32 %v477_v16, 16 }
  0x35   : > { %2814 = vmatprep.subr.bf16.mxu0 %v3020_v43  ;;  %v1195_v36 = vshrl.u32 %v2386_v31, 16  ;;  %v485_v16 = vld [vmem:[%s3156_s6 + $0x28] sm:$0xf] }
  0x36   : > { %v511_v30 = vrot.slane %v509_v22, 4  ;;  %v565_v22 = vshrl.u32 %v485_v16, 16 }
  0x37   : > { %2719 = vmatpush3.bf16.msra.mxu1 %v3019_v38  ;;  %v1198_v38 = vshll.u32 %v2386_v31, 16  ;;  %v1197_v42 = vrot.slane %v1195_v36, 4  ;;  %v514_v31 = vrot.slane %v512_v23, 5  ;;  %v520_v36 = vrot.slane %v518_v27, 5 }
  0x38   : > { %2815 = vmatpush3.bf16.msra.mxu0 %v3020_v43  ;;  %2720 = vmatprep.subr.bf16.mxu1 %v3021_v47  ;;  %v3037_v43 = vld [vmem:[%s3510_s1 + $0x90] sm:$0xff]   ;;  %v568_v23 = vshll.u32 %v485_v16, 16  ;;  %v2493_v16 = vld [vmem:[%s3156_s6 + $0xc] sm:$0x1] }
  0x39   : > { %2816 = vmatprep.subr.bf16.mxu0 %v3022_v50  ;;  %v1200_v45 = vrot.slane %v1198_v38, 5  ;;  %v3044_v38 = vld [vmem:[%s3510_s1 + $0x1a8] sm:$0xff]  }
  0x3b   : > { %2721 = vmatpush3.bf16.msra.mxu1 %v3021_v47  ;;  %v1187_v47 = vor.u32 %v1186_v41, %v1183_v40  ;;  %v1201_v54 = vor.u32 %v1200_v45, %v1197_v42  ;;  %v515_v40 = vor.u32 %v514_v31, %v511_v30  ;;  %v479_v41 = vld [vmem:[%s3156_s6 + $0x10] sm:$0xf]  ;;  %v570_v31 = vrot.slane %v568_v23, 5 }
  0x3c   : > { %2817 = vmatpush3.bf16.msra.mxu0 %v3022_v50  ;;  %2722 = vmatprep.subr.bf16.mxu1 %v3024_v2  ;;  %v2389_v50 = vld [vmem:[%s3156_s6 + $0xc4] sm:$0x1]  ;;  %v523_v45 = vshrl.u32 %v479_v41, 16  ;;  %v487_v30 = vld [vmem:[%s3156_s6 + $0x30] sm:$0xf] }
  0x3d   : > { %2818 = vmatprep.subr.bf16.mxu0 %v3026_v6  ;;  %v1218_v58 = vshll.u32 %v2389_v50, 16  ;;  %v1188_v60 = vrot.slane %v1187_v47, 4  ;;  %v1202_v0 = vrot.slane %v1201_v54, 4  ;;  %v482_v47 = vld [vmem:[%s3156_s6 + $0x1c] sm:$0x1] }
  0x3f   : > { %2723 = vmatpush3.bf16.msra.mxu1 %v3024_v2  ;;  %v1214_v2 = vrot.slane %v1212_v57, 5  ;;  %v1220_v3 = vrot.slane %v1218_v58, 5  ;;  %v1193_v5 = vsel %vm3227_vm2, %v1188_v60, %v1192_v44  ;;  %v1207_v9 = vsel %vm3227_vm2, %v1202_v0, %v1206_v46  ;;  %v481_v44 = vld [vmem:[%s3156_s6 + $0x18] sm:$0xf]  ;;  %v3047_v60 = vld [vmem:[%s3510_s1 + $0x1b0] sm:$0xff]  }
  0x40   : > { %2819 = vmatpush3.bf16.msra.mxu0 %v3026_v6  ;;  %2724 = vmatprep.subr.bf16.mxu1 %v3029_v14  ;;  %v1225_v6 = vrot.slane %v1223_v61, 4  ;;  %v516_v46 = vrot.slane %v515_v40, 4  ;;  %v537_v50 = vshrl.u32 %v481_v44, 16  ;;  %v540_v54 = vshll.u32 %v481_v44, 16 }
  0x41   : > { %2820 = vmatprep.subr.bf16.mxu0 %v3030_v19  ;;  %v1215_v10 = vor.u32 %v1214_v2, %v1211_v1  ;;  %v546_v58 = vshll.u32 %v482_v47, 16 }
  0x42   : > { %v1229_v15 = vor.u32 %v1228_v7, %v1225_v6  ;;  %v521_v55 = vsel %vm3227_vm2, %v516_v46, %v520_v36  ;;  %v539_v57 = vrot.slane %v537_v50, 4  ;;  %v542_v63 = vrot.slane %v540_v54, 5  ;;  %v3050_v6 = vld [vmem:[%s3510_s1 + $0x1b8] sm:$0xff]   ;;  %v3051_v7 = vld [vmem:[%s3510_s1 + $0xc0] sm:$0xff]  }
  0x43   : > { %2725 = vmatpush3.bf16.msra.mxu1 %v3029_v14  ;;  %v2410_v14 = vcombine.low %v1193_v5, %v1207_v9  ;;  %v1216_v20 = vrot.slane %v1215_v10, 4  ;;  %v3053_v10 = vld [vmem:[%s3510_s1 + $0x1c0] sm:$0xff]   ;;  %v3059_v50 = vld [vmem:[%s3510_s1 + $0xd8] sm:$0xff]  }
  0x44   : > { %2821 = vmatpush3.bf16.msra.mxu0 %v3030_v19  ;;  %2734 = vmatprep.subr.bf16.mxu1 %v3032_v21  ;;  %v498_v19 = vshll.u32 %v475_v11, 16  ;;  %v543_v1 = vor.u32 %v542_v63, %v539_v57  ;;  %v3054_v11 = vld [vmem:[%s3156_s6 + $0x18] ss:$8 sps:$4 sm:$0xff]  }
  0x45   : > { %2830 = vmatprep.subr.bf16.mxu0 %v3033_v24 }
  0x46   : > { %2727 = vmatmul.mubr.bf16.vlgmr.msra.gmra.mrb[0].mxu1 %v3034_v25  ;;  %v497_v25 = vrot.slane %v495_v18, 4  ;;  %v544_v5 = vrot.slane %v543_v1, 4  ;;  %v3056_v18 = vld [vmem:[%s3510_s1 + $0x1c8] sm:$0xff]   ;;  %v3061_v1 = vld [vmem:[%s3510_s1 + $0xe0] sm:$0xff]  }
  0x47   : > { %2735 = vmatpush3.bf16.msra.mxu1 %v3032_v21  ;;  %2823 = vmatmul.mubr.bf16.vlgmr.msra.gmra.mrb[0].mxu0 %v2409_v28  ;;  %v504_v21 = vshll.u32 %v476_v12, 16  ;;  %v3042_v28 = vld [vmem:[%s3510_s1 + $0x1a0] sm:$0xff]  }
  0x48   : > { %2831 = vmatpush3.bf16.msra.mxu0 %v3033_v24  ;;  %2736 = vmatprep.subr.bf16.mxu1 %v3035_v26  ;;  %v1230_v24 = vrot.slane %v1229_v15, 4  ;;  %v483_v12 = vld [vmem:[%s3156_s6 + $0x20] sm:$0xf]  ;;  %v484_v15 = vld [vmem:[%s3156_s6 + $0x24] sm:$0x1] }
  0x49   : > { %2832 = vmatprep.subr.bf16.mxu0 %v3036_v29  ;;  %2730 = vmatprep.mubr.bf16.mxu1 %v3045_v37  ;;  %v506_v35 = vrot.slane %v504_v21, 5  ;;  %v3052_v37 = vld [vmem:[%s3156_s6 + $0x8] ss:$8 sps:$4 sm:$0xff]   ;;  %v560_v21 = vshll.u32 %v484_v15, 16 }
  0x4a   : > { %2826 = vmatprep.mubr.bf16.mxu0 %v2410_v14  ;;  %v1235_v33 = vsel %vm3227_vm2, %v1230_v24, %v1234_v8  ;;  %v3055_v14 = vld [vmem:[%s3510_s1 + $0xc8] sm:$0xff]   ;;  %v574_v24 = vshll.u32 %v486_v17, 16  ;;  %v2494_v17 = vld [vmem:[%s3156_s6 + $0x10] sm:$0xf] }
  0x4b   : > { %2737 = vmatpush3.bf16.msra.mxu1 %v3035_v26  ;;  %v500_v26 = vrot.slane %v498_v19, 5  ;;  %v551_v19 = vshrl.u32 %v483_v12, 16  ;;  %v2492_v15 = vld [vmem:[%s3156_s6 + $0x8] sm:$0xf]  ;;  %v1772_v23 = vshll.u32 %v2494_v17, 16 }
  0x4c   : > { %2833 = vmatpush3.bf16.msra.mxu0 %v3036_v29  ;;  %2738 = vmatprep.subr.bf16.mxu1 %v3037_v43  ;;  %v1221_v29 = vsel %vm3227_vm2, %v1216_v20, %v1220_v3  ;;  %v548_v3 = vrot.slane %v546_v58, 5  ;;  %v554_v20 = vshll.u32 %v483_v12, 16  ;;  %v3067_v58 = vld [vmem:[%s3156_s6 + $0x38] ss:$8 sps:$4 sm:$0xff]  }
  0x4d   : > { %2834 = vmatprep.subr.bf16.mxu0 %v3038_v52  ;;  %v501_v34 = vor.u32 %v500_v26, %v497_v25  ;;  %v2411_v39 = vcombine.low %v1221_v29, %v1235_v33  ;;  %v3065_v25 = vld [vmem:[%s3156_s6 + $0x28] ss:$8 sps:$4 sm:$0xff]   ;;  %v553_v26 = vrot.slane %v551_v19, 4  ;;  %v567_v29 = vrot.slane %v565_v22, 4  ;;  %v488_v33 = vld [vmem:[%s3156_s6 + $0x34] sm:$0x1] }
  0x4e   : > { %2731 = vmatmul.mubr.bf16.gmra.mrb[4].mxu1 %v3048_v48  ;;  %v526_v48 = vshll.u32 %v479_v41, 16  ;;  %v549_v9 = vsel %vm3227_vm2, %v544_v5, %v548_v3  ;;  %v556_v27 = vrot.slane %v554_v20, 5  ;;  %v588_v40 = vshll.u32 %v488_v33, 16  ;;  %v3058_v41 = vld [vmem:[%s3510_s1 + $0x1d0] sm:$0xff]   ;;  %v3062_v5 = vld [vmem:[%s3510_s1 + $0x1e0] sm:$0xff]   ;;  %v3069_v12 = vld [vmem:[%s3510_s1 + $0xf8] sm:$0xff]  }
  0x4f   : > { %2739 = vmatpush3.bf16.msra.mxu1 %v3037_v43  ;;  %v502_v42 = vrot.slane %v501_v34, 4  ;;  %v480_v43 = vld [vmem:[%s3156_s6 + $0x14] sm:$0x1]  ;;  %2827 = vmatmul.mubr.bf16.gmra.mrb[4].mxu0 %v2411_v39  ;;  %v489_v34 = vld [vmem:[%s3156_s6 + $0x38] sm:$0xf]  ;;  %v582_v39 = vshll.u32 %v487_v30, 16 }
  0x50   : > { %2835 = vmatpush3.bf16.msra.mxu0 %v3038_v52  ;;  %2740 = vmatprep.subr.bf16.mxu1 %v3039_v59  ;;  %v532_v49 = vshll.u32 %v480_v43, 16  ;;  %v525_v52 = vrot.slane %v523_v45, 4  ;;  %v528_v56 = vrot.slane %v526_v48, 5  ;;  %v557_v36 = vor.u32 %v556_v27, %v553_v26  ;;  %v2503_v33 = vld [vmem:[%s3156_s6 + $0x34] sm:$0x1] }
  0x51   : > { %2836 = vmatprep.subr.bf16.mxu0 %v3040_v4  ;;  %v507_v51 = vsel %vm3227_vm2, %v502_v42, %v506_v35  ;;  %2846 = vmatprep.mubr.bf16.mxu0 %v3052_v37  ;;  %v3057_v35 = vld [vmem:[%s3510_s1 + $0xd0] sm:$0xff]   ;;  %v490_v37 = vld [vmem:[%s3156_s6 + $0x3c] sm:$0x1]  ;;  %v571_v42 = vor.u32 %v570_v31, %v567_v29  ;;  %v593_v43 = vshrl.u32 %v489_v34, 16  ;;  %v596_v44 = vshll.u32 %v489_v34, 16 }
  0x52   : > { %v2292_v61 = vcombine.low %v507_v51, %v521_v55  ;;  %v534_v62 = vrot.slane %v532_v49, 5  ;;  %v529_v0 = vor.u32 %v528_v56, %v525_v52  ;;  %v602_v45 = vshll.u32 %v490_v37, 16  ;;  %v2502_v29 = vld [vmem:[%s3156_s6 + $0x30] sm:$0xf]  ;;  %v3074_v34 = vld [vmem:[%s3156_s6 + $0x60] ss:$8 sps:$4 sm:$0xff]  }
  0x53   : > { %2741 = vmatpush3.bf16.msra.mxu1 %v3039_v59  ;;  %v3046_v59 = vld [vmem:[%s3510_s1 + $0xb0] sm:$0xff]   ;;  %v558_v46 = vrot.slane %v557_v36, 4  ;;  %v584_v48 = vrot.slane %v582_v39, 5  ;;  %v590_v49 = vrot.slane %v588_v40, 5  ;;  %v572_v51 = vrot.slane %v571_v42, 4  ;;  %v3076_v39 = vld [vmem:[%s3510_s1 + $0x208] sm:$0xff]  }
  0x54   : > { %2837 = vmatpush3.bf16.msra.mxu0 %v3040_v4  ;;  %2742 = vmatprep.subr.bf16.mxu1 %v3041_v13  ;;  %v530_v2 = vrot.slane %v529_v0, 4  ;;  %v3049_v4 = vld [vmem:[%s3510_s1 + $0xb8] sm:$0xff]   ;;  %v595_v52 = vrot.slane %v593_v43, 4  ;;  %v598_v54 = vrot.slane %v596_v44, 5  ;;  %v604_v55 = vrot.slane %v602_v45, 5 }
  0x55   : > { %2838 = vmatprep.subr.bf16.mxu0 %v3042_v28  ;;  %2750 = vmatprep.mubr.bf16.mxu1 %v2292_v61  ;;  %v3060_v61 = vld [vmem:[%s3510_s1 + $0x1d8] sm:$0xff]   ;;  %v1755_v19 = vshrl.u32 %v2492_v15, 16  ;;  %v1758_v20 = vshll.u32 %v2492_v15, 16  ;;  %v1769_v22 = vshrl.u32 %v2494_v17, 16  ;;  %v1828_v42 = vshll.u32 %v2502_v29, 16  ;;  %v3083_v15 = vld [vmem:[%s3510_s1 + $0x220] sm:$0xff]  }
  0x56   : > { %v535_v8 = vsel %vm3227_vm2, %v530_v2, %v534_v62  ;;  %v1834_v43 = vshll.u32 %v2503_v33, 16  ;;  %v3077_v44 = vld [vmem:[%s3156_s6 + $0xb0] ss:$8 sps:$4 sm:$0xff]  }
  0x57   : > { %2743 = vmatpush3.bf16.msra.mxu1 %v3041_v13  ;;  %v2293_v13 = vcombine.low %v535_v8, %v549_v9  ;;  %v3063_v8 = vld [vmem:[%s3510_s1 + $0xe8] sm:$0xff]   ;;  %v1757_v26 = vrot.slane %v1755_v19, 4  ;;  %v1760_v27 = vrot.slane %v1758_v20, 5  ;;  %v1771_v31 = vrot.slane %v1769_v22, 4 }
  0x58   : > { %2839 = vmatpush3.bf16.msra.mxu0 %v3042_v28  ;;  %2744 = vmatprep.subr.bf16.mxu1 %v3043_v32  ;;  %v562_v28 = vrot.slane %v560_v21, 5  ;;  %v3064_v9 = vld [vmem:[%s3510_s1 + $0x1e8] sm:$0xff]   ;;  %v1764_v21 = vshll.u32 %v2493_v16, 16 }
  0x59   : > { %2840 = vmatprep.subr.bf16.mxu0 %v3044_v38  ;;  %v3084_v20 = vld [vmem:[%s3510_s1 + $0x228] sm:$0xff]  }
  0x5a   : > { %v563_v56 = vsel %vm3227_vm2, %v558_v46, %v562_v28  ;;  %v2501_v28 = vld [vmem:[%s3156_s6 + $0x2c] sm:$0x1]  ;;  %v1766_v45 = vrot.slane %v1764_v21, 5  ;;  %v2505_v21 = vld [vmem:[%s3156_s6 + $0x3c] sm:$0x1] }
  0x5b   : > { %2745 = vmatpush3.bf16.msra.mxu1 %v3043_v32  ;;  %v576_v32 = vrot.slane %v574_v24, 5 }
  0x5c   : > { %2841 = vmatpush3.bf16.msra.mxu0 %v3044_v38  ;;  %2746 = vmatprep.subr.bf16.mxu1 %v3046_v59  ;;  %v579_v38 = vshrl.u32 %v487_v30, 16  ;;  %v3073_v30 = vld [vmem:[%s3156_s6 + $0xa0] ss:$8 sps:$4 sm:$0xff]  }
  0x5d   : > { %2842 = vmatprep.subr.bf16.mxu0 %v3047_v60 }
  0x5e   : > { %v581_v47 = vrot.slane %v579_v38, 4  ;;  %v1820_v38 = vshll.u32 %v2501_v28, 16 }
  0x5f   : > { %2747 = vmatpush3.bf16.msra.mxu1 %v3046_v59  ;;  %v577_v59 = vsel %vm3227_vm2, %v572_v51, %v576_v32  ;;  %v1774_v32 = vrot.slane %v1772_v23, 5 }
  0x60   : > { %2843 = vmatpush3.bf16.msra.mxu0 %v3047_v60  ;;  %2748 = vmatprep.subr.bf16.mxu1 %v3049_v4  ;;  %v585_v57 = vor.u32 %v584_v48, %v581_v47  ;;  %v599_v60 = vor.u32 %v598_v54, %v595_v52  ;;  %v2294_v62 = vcombine.low %v563_v56, %v577_v59  ;;  %v1830_v54 = vrot.slane %v1828_v42, 5 }
  0x61   : > { %2844 = vmatprep.subr.bf16.mxu0 %v3050_v6  ;;  %v1775_v40 = vor.u32 %v1774_v32, %v1771_v31  ;;  %v1822_v56 = vrot.slane %v1820_v38, 5  ;;  %v1836_v59 = vrot.slane %v1834_v43, 5  ;;  %v2497_v31 = vld [vmem:[%s3156_s6 + $0x1c] sm:$0x1]  ;;  %v2499_v32 = vld [vmem:[%s3156_s6 + $0x24] sm:$0x1] }
  0x62   : > { %v586_v63 = vrot.slane %v585_v57, 4  ;;  %v600_v0 = vrot.slane %v599_v60, 4  ;;  %v3081_v57 = vld [vmem:[%s3510_s1 + $0x210] sm:$0xff]  }
  0x63   : > { %2749 = vmatpush3.bf16.msra.mxu1 %v3049_v4  ;;  %v3072_v4 = vld [vmem:[%s3156_s6 + $0x50] ss:$8 sps:$4 sm:$0xff]   ;;  %v1776_v51 = vrot.slane %v1775_v40, 4 }
  0x64   : > { %2845 = vmatpush3.bf16.msra.mxu0 %v3050_v6  ;;  %2758 = vmatprep.subr.bf16.mxu1 %v3051_v7  ;;  %v591_v2 = vsel %vm3227_vm2, %v586_v63, %v590_v49  ;;  %v605_v3 = vsel %vm3227_vm2, %v600_v0, %v604_v55  ;;  %v3078_v49 = vld [vmem:[%s3156_s6 + $0x70] ss:$8 sps:$4 sm:$0xff]  }
  0x65   : > { %2854 = vmatprep.subr.bf16.mxu0 %v3053_v10  ;;  %v2295_v6 = vcombine.low %v591_v2, %v605_v3  ;;  %v3082_v3 = vld [vmem:[%s3510_s1 + $0x218] sm:$0xff]  }
  0x66   : > { %2751 = vmatmul.mubr.bf16.vlgmr.msra.gmra.mrb[0].mxu1 %v2293_v13  ;;  %v3070_v13 = vld [vmem:[%s3510_s1 + $0x1f8] sm:$0xff]  }
  0x67   : > { %2759 = vmatpush3.bf16.msra.mxu1 %v3051_v7  ;;  %2847 = vmatmul.mubr.bf16.vlgmr.msra.gmra.mrb[0].mxu0 %v3054_v11  ;;  %v3071_v7 = vld [vmem:[%s3156_s6 + $0x90] ss:$8 sps:$4 sm:$0xff]  }
  0x68   : > { %2855 = vmatpush3.bf16.msra.mxu0 %v3053_v10  ;;  %2760 = vmatprep.subr.bf16.mxu1 %v3055_v14  ;;  %v3066_v10 = vld [vmem:[%s3510_s1 + $0xf0] sm:$0xff]  }
  0x69   : > { %2856 = vmatprep.subr.bf16.mxu0 %v3056_v18  ;;  %2850 = vmatprep.mubr.bf16.mxu0 %v3065_v25  ;;  %v3068_v11 = vld [vmem:[%s3510_s1 + $0x1f0] sm:$0xff]   ;;  %v2500_v25 = vld [vmem:[%s3156_s6 + $0x28] sm:$0xf] }
  0x6a   : > { %2754 = vmatprep.mubr.bf16.mxu1 %v2294_v62  ;;  %v1811_v36 = vshrl.u32 %v2500_v25, 16  ;;  %v1814_v37 = vshll.u32 %v2500_v25, 16 }
  0x6b   : > { %2761 = vmatpush3.bf16.msra.mxu1 %v3055_v14  ;;  %v3075_v14 = vld [vmem:[%s3510_s1 + $0x200] sm:$0xff]  }
  0x6c   : > { %2857 = vmatpush3.bf16.msra.mxu0 %v3056_v18  ;;  %2762 = vmatprep.subr.bf16.mxu1 %v3057_v35  ;;  %v2495_v18 = vld [vmem:[%s3156_s6 + $0x14] sm:$0x1]  ;;  %v1813_v47 = vrot.slane %v1811_v36, 4  ;;  %v1816_v48 = vrot.slane %v1814_v37, 5 }
  0x6d   : > { %2858 = vmatprep.subr.bf16.mxu0 %v3058_v41  ;;  %v1778_v24 = vshll.u32 %v2495_v18, 16  ;;  %v3085_v37 = vld [vmem:[%s3510_s1 + $0x230] sm:$0xff]  }
  0x6e   : > { %2755 = vmatmul.mubr.bf16.gmra.mrb[4].mxu1 %v2295_v6  ;;  %v1817_v55 = vor.u32 %v1816_v48, %v1813_v47  ;;  %v2506_v6 = vld [vmem:[%s3156_s6 + $0x40] sm:$0xf] }
  0x6f   : > { %2763 = vmatpush3.bf16.msra.mxu1 %v3057_v35  ;;  %2851 = vmatmul.mubr.bf16.gmra.mrb[4].mxu0 %v3067_v58  ;;  %v1761_v35 = vor.u32 %v1760_v27, %v1757_v26  ;;  %v1780_v46 = vrot.slane %v1778_v24, 5 }
  0x70   : > { %2859 = vmatpush3.bf16.msra.mxu0 %v3058_v41  ;;  %2764 = vmatprep.subr.bf16.mxu1 %v3059_v50  ;;  %v1825_v41 = vshrl.u32 %v2502_v29, 16  ;;  %v1818_v60 = vrot.slane %v1817_v55, 4 }
  0x71   : > { %2860 = vmatprep.subr.bf16.mxu0 %v3060_v61  ;;  %2870 = vmatprep.mubr.bf16.mxu0 %v3072_v4  ;;  %v1781_v63 = vsel %vm3227_vm2, %v1776_v51, %v1780_v46  ;;  %v3086_v46 = vld [vmem:[%s3510_s1 + $0x238] sm:$0xff]  }
  0x72   : > { %2774 = vmatprep.mubr.bf16.mxu1 %v3071_v7  ;;  %v1827_v52 = vrot.slane %v1825_v41, 4  ;;  %v1823_v2 = vsel %vm3227_vm2, %v1818_v60, %v1822_v56  ;;  %v1806_v41 = vshll.u32 %v2499_v32, 16 }
  0x73   : > { %2765 = vmatpush3.bf16.msra.mxu1 %v3059_v50  ;;  %v1762_v50 = vrot.slane %v1761_v35, 4 }
  0x74   : > { %2861 = vmatpush3.bf16.msra.mxu0 %v3060_v61  ;;  %2766 = vmatprep.subr.bf16.mxu1 %v3061_v1  ;;  %v1831_v58 = vor.u32 %v1830_v54, %v1827_v52  ;;  %v3079_v61 = vld [vmem:[%s3156_s6 + $0xc0] ss:$8 sps:$4 sm:$0xff]  }
  0x75   : > { %2862 = vmatprep.subr.bf16.mxu0 %v3062_v5  ;;  %v1767_v62 = vsel %vm3227_vm2, %v1762_v50, %v1766_v45  ;;  %v1808_v50 = vrot.slane %v1806_v41, 5 }
  0x76   : > { %v1832_v0 = vrot.slane %v1831_v58, 4  ;;  %v2524_v7 = vcombine.low %v1767_v62, %v1781_v63 }
  0x77   : > { %2767 = vmatpush3.bf16.msra.mxu1 %v3061_v1  ;;  %v3080_v1 = vld [vmem:[%s3156_s6 + $0x80] ss:$8 sps:$4 sm:$0xff]  }
  0x78   : > { %2863 = vmatpush3.bf16.msra.mxu0 %v3062_v5  ;;  %2768 = vmatprep.subr.bf16.mxu1 %v3063_v8  ;;  %v1837_v4 = vsel %vm3227_vm2, %v1832_v0, %v1836_v59  ;;  %v2504_v5 = vld [vmem:[%s3156_s6 + $0x38] sm:$0xf] }
  0x79   : > { %2864 = vmatprep.subr.bf16.mxu0 %v3064_v9 }
  0x7b   : > { %2769 = vmatpush3.bf16.msra.mxu1 %v3063_v8  ;;  %v2496_v8 = vld [vmem:[%s3156_s6 + $0x18] sm:$0xf] }
  0x7c   : > { %2865 = vmatpush3.bf16.msra.mxu0 %v3064_v9  ;;  %2770 = vmatprep.subr.bf16.mxu1 %v3066_v10  ;;  %v2498_v9 = vld [vmem:[%s3156_s6 + $0x20] sm:$0xf]  ;;  %v1783_v16 = vshrl.u32 %v2496_v8, 16  ;;  %v1786_v17 = vshll.u32 %v2496_v8, 16 }
  0x7d   : > { %2866 = vmatprep.subr.bf16.mxu0 %v3068_v11  ;;  %v1797_v18 = vshrl.u32 %v2498_v9, 16  ;;  %v1800_v19 = vshll.u32 %v2498_v9, 16 }
  0x7e   : > { %v1785_v26 = vrot.slane %v1783_v16, 4  ;;  %v1788_v27 = vrot.slane %v1786_v17, 5 }
  0x7f   : > { %2771 = vmatpush3.bf16.msra.mxu1 %v3066_v10  ;;  %v2526_v10 = vcombine.low %v1823_v2, %v1837_v4  ;;  %v1799_v28 = vrot.slane %v1797_v18, 4  ;;  %v1802_v29 = vrot.slane %v1800_v19, 5 }
  0x80   : > { %2867 = vmatpush3.bf16.msra.mxu0 %v3068_v11  ;;  %2772 = vmatprep.subr.bf16.mxu1 %v3069_v12  ;;  %v1839_v11 = vshrl.u32 %v2504_v5, 16  ;;  %v1789_v38 = vor.u32 %v1788_v27, %v1785_v26 }
  0x81   : > { %2868 = vmatprep.subr.bf16.mxu0 %v3070_v13  ;;  %v1803_v40 = vor.u32 %v1802_v29, %v1799_v28 }
  0x82   : > { %v1841_v22 = vrot.slane %v1839_v11, 4  ;;  %v1790_v47 = vrot.slane %v1789_v38, 4 }
  0x83   : > { %2773 = vmatpush3.bf16.msra.mxu1 %v3069_v12  ;;  %v1842_v12 = vshll.u32 %v2504_v5, 16 }
  0x84   : > { %2869 = vmatpush3.bf16.msra.mxu0 %v3070_v13  ;;  %2902 = vmatprep.subr.bf16.mxu1 %v3075_v14  ;;  %v1853_v13 = vshrl.u32 %v2506_v6, 16 }
  0x85   : > { %2878 = vmatprep.subr.bf16.mxu0 %v3075_v14  ;;  %v1844_v23 = vrot.slane %v1842_v12, 5 }
  0x86   : > { %2775 = vmatmul.mubr.bf16.vlgmr.msra.gmra.mrb[0].mxu1 %v3073_v30  ;;  %v1855_v24 = vrot.slane %v1853_v13, 4  ;;  %v2507_v30 = vld [vmem:[%s3156_s6 + $0x44] sm:$0x1] }
  0x87   : > { %2871 = vmatmul.mubr.bf16.vlgmr.msra.gmra.mrb[0].mxu0 %v3074_v34  ;;  %2910 = vmatpush3.bf16.msra.mxu1 %v3075_v14  ;;  %v1845_v33 = vor.u32 %v1844_v23, %v1841_v22  ;;  %v1848_v34 = vshll.u32 %v2505_v21, 16  ;;  %v1862_v36 = vshll.u32 %v2507_v30, 16 }
  0x88   : > { %2879 = vmatpush3.bf16.msra.mxu0 %v3075_v14  ;;  %2903 = vmatprep.subr.bf16.mxu1 %v3076_v39  ;;  %v1856_v14 = vshll.u32 %v2506_v6, 16 }
  0x89   : > { %2880 = vmatprep.subr.bf16.mxu0 %v3076_v39  ;;  %2778 = vmatprep.mubr.bf16.mxu1 %v3077_v44  ;;  %v1846_v42 = vrot.slane %v1845_v33, 4  ;;  %v1850_v43 = vrot.slane %v1848_v34, 5  ;;  %v1864_v45 = vrot.slane %v1862_v36, 5 }
  0x8a   : > { %2874 = vmatprep.mubr.bf16.mxu0 %v3078_v49  ;;  %v1858_v25 = vrot.slane %v1856_v14, 5  ;;  %v1804_v49 = vrot.slane %v1803_v40, 4 }
  0x8b   : > { %2911 = vmatpush3.bf16.msra.mxu1 %v3076_v39  ;;  %v1851_v51 = vsel %vm3227_vm2, %v1846_v42, %v1850_v43 }
  0x8c   : > { %2881 = vmatpush3.bf16.msra.mxu0 %v3076_v39  ;;  %2904 = vmatprep.subr.bf16.mxu1 %v3081_v57  ;;  %v1859_v35 = vor.u32 %v1858_v25, %v1855_v24  ;;  %v1792_v39 = vshll.u32 %v2497_v31, 16  ;;  %v1809_v55 = vsel %vm3227_vm2, %v1804_v49, %v1808_v50 }
  0x8d   : > { %2882 = vmatprep.subr.bf16.mxu0 %v3081_v57 }
  0x8e   : > { %2779 = vmatmul.mubr.bf16.gmra.mrb[4].mxu1 %v3079_v61  ;;  %v1860_v44 = vrot.slane %v1859_v35, 4  ;;  %v1794_v48 = vrot.slane %v1792_v39, 5 }
  0x8f   : > { %2875 = vmatmul.mubr.bf16.gmra.mrb[4].mxu0 %v3080_v1  ;;  %2912 = vmatpush3.bf16.msra.mxu1 %v3081_v57 }
  0x90   : > { %2883 = vmatpush3.bf16.msra.mxu0 %v3081_v57  ;;  %2905 = vmatprep.subr.bf16.mxu1 %v3082_v3  ;;  %v1865_v52 = vsel %vm3227_vm2, %v1860_v44, %v1864_v45  ;;  %v1795_v54 = vsel %vm3227_vm2, %v1790_v47, %v1794_v48 }
  0x91   : > { %2884 = vmatprep.subr.bf16.mxu0 %v3082_v3  ;;  %2894 = vmatprep.mubr.bf16.mxu0 %v2524_v7  ;;  %v2527_v56 = vcombine.low %v1851_v51, %v1865_v52  ;;  %v2525_v57 = vcombine.low %v1795_v54, %v1809_v55 }
  0x92   : > { %2898 = vmatprep.mubr.bf16.mxu1 %v2526_v10 }
  0x93   : > { %2913 = vmatpush3.bf16.msra.mxu1 %v3082_v3 }
  0x94   : > { %2885 = vmatpush3.bf16.msra.mxu0 %v3082_v3  ;;  %2906 = vmatprep.subr.bf16.mxu1 %v3083_v15 }
  0x95   : > { %2886 = vmatprep.subr.bf16.mxu0 %v3083_v15 }
  0x97   : > { %2914 = vmatpush3.bf16.msra.mxu1 %v3083_v15 }
  0x98   : > { %2887 = vmatpush3.bf16.msra.mxu0 %v3083_v15  ;;  %2907 = vmatprep.subr.bf16.mxu1 %v3084_v20 }
  0x99   : > { %2888 = vmatprep.subr.bf16.mxu0 %v3084_v20 }
  0x9b   : > { %2915 = vmatpush3.bf16.msra.mxu1 %v3084_v20 }
  0x9c   : > { %2889 = vmatpush3.bf16.msra.mxu0 %v3084_v20  ;;  %2908 = vmatprep.subr.bf16.mxu1 %v3085_v37 }
  0x9d   : > { %2890 = vmatprep.subr.bf16.mxu0 %v3085_v37 }
  0x9f   : > { %2916 = vmatpush3.bf16.msra.mxu1 %v3085_v37 }
  0xa0   : > { %2891 = vmatpush3.bf16.msra.mxu0 %v3085_v37  ;;  %2909 = vmatprep.subr.bf16.mxu1 %v3086_v46 }
  0xa1   : > { %2892 = vmatprep.subr.bf16.mxu0 %v3086_v46 }
  0xa3   : > { %2917 = vmatpush3.bf16.msra.mxu1 %v3086_v46 }
  0xa4   : > { %2893 = vmatpush3.bf16.msra.mxu0 %v3086_v46 }
  0xa6   : > { %2899 = vmatmul.mubr.bf16.vlgmr.msra.gmra.mrb[8].mxu1 %v2527_v56 }
  0xa7   : > { %2895 = vmatmul.mubr.bf16.vlgmr.msra.gmra.mrb[0].mxu0 %v2525_v57 }
 0x159   : > { %v2776_v58 = vpop.f32.mrb[0].mxu1 }
 0x15a   : > { %v895_v59 = vpop.f32.mrb[1].mxu1 }
 0x15b   : > { %v2777_v60 = vpop.f32.mrb[2].mxu1 }
 0x15c   : > { %v898_v61 = vpop.f32.mrb[3].mxu1 }
 0x161   : > { %v2780_v62 = vpop.f32.mrb[4].mxu1 }
 0x162   : > { %v2876_v63 = vpop.f32.mrb[4].mxu0  ;;  %v911_v0 = vpop.f32.mrb[5].mxu1 }
 0x163   : > { %v2922_v1 = vadd.f32 %v2876_v63, %v2780_v62  ;;  %v1715_v2 = vpop.f32.mrb[5].mxu0  ;;  %v2781_v3 = vpop.f32.mrb[6].mxu1 }
 0x164   : > { %v2924_v4 = vadd.f32 %v1715_v2, %v911_v0  ;;  %v2877_v53 = vpop.f32.mrb[6].mxu0  ;;  %v914_v5 = vpop.f32.mrb[7].mxu1 }
 0x165   : > { %v2926_v6 = vadd.f32 %v2877_v53, %v2781_v3  ;;  %v1718_v7 = vpop.f32.mrb[7].mxu0 }
 0x166   : > { %v2928_v8 = vadd.f32 %v1718_v7, %v914_v5 }
 0x179   : > { %v2900_v9 = vpop.f32.mrb[8].mxu1 }
 0x17a   : > { %v2896_v10 = vpop.f32.mrb[0].mxu0  ;;  %v3470_v11 = vadd.f32 %v2922_v1, %v2900_v9  ;;  %v1997_v12 = vpop.f32.mrb[9].mxu1 }
 0x17b   : > { %v3472_v13 = vadd.f32 %v2896_v10, %v2776_v58  ;;  %v1981_v14 = vpop.f32.mrb[1].mxu0  ;;  %v3474_v15 = vadd.f32 %v2924_v4, %v1997_v12  ;;  %v2901_v16 = vpop.f32.mrb[10].mxu1 }
 0x17c   : > { %v2919_v17 = vadd.f32 %v1981_v14, %v895_v59  ;;  %v2897_v18 = vpop.f32.mrb[2].mxu0  ;;  %v3476_v19 = vadd.f32 %v2926_v6, %v2901_v16  ;;  %v2000_v20 = vpop.f32.mrb[11].mxu1  ;;  %v2048_v40 = vmul.f32 %v3470_v11, %v3470_v11 }
 0x17d   : > { %v2920_v21 = vadd.f32 %v2897_v18, %v2777_v60  ;;  %v1984_v22 = vpop.f32.mrb[3].mxu0  ;;  %v2929_v23 = vadd.f32 %v2928_v8, %v2000_v20  ;;  %v2044_v28 = vmul.f32 %v3472_v13, %v3472_v13  ;;  %v2046_v34 = vmul.f32 %v3474_v15, %v3474_v15 }
 0x17e   : > { %v2921_v24 = vadd.f32 %v1984_v22, %v898_v61  ;;  %v2042_v25 = vmul.f32 %v2919_v17, %v2919_v17  ;;  %v2049_v43 = vmul.f32 %v3476_v19, %v3476_v19 }
 0x17f   : > { %v2045_v31 = vmul.f32 %v2920_v21, %v2920_v21  ;;  %v2047_v38 = vmul.f32 %v2929_v23, %v2929_v23 }
 0x180   : > { %v2028_v26 = vadd.f32 %v2921_v24, %v2919_v17  ;;  %v2043_v27 = vmul.f32 %v2921_v24, %v2921_v24 }
 0x182   : > { %v2029_v29 = vadd.f32 %v3472_v13, %v2028_v26  ;;  %v2050_v30 = vadd.f32 %v2043_v27, %v2042_v25 }
 0x184   : > { %v2051_v32 = vadd.f32 %v2050_v30, %v2044_v28  ;;  %v2030_v33 = vadd.f32 %v2920_v21, %v2029_v29 }
 0x186   : > { %v2031_v35 = vadd.f32 %v3474_v15, %v2030_v33  ;;  %v2052_v36 = vadd.f32 %v2051_v32, %v2045_v31 }
 0x188   : > { %v2032_v37 = vadd.f32 %v2929_v23, %v2031_v35  ;;  %v2053_v39 = vadd.f32 %v2052_v36, %v2046_v34 }
 0x18a   : > { %v2033_v41 = vadd.f32 %v3470_v11, %v2032_v37  ;;  %v2054_v42 = vadd.f32 %v2053_v39, %v2047_v38 }
 0x18c   : > { %v2034_v44 = vadd.f32 %v3476_v19, %v2033_v41  ;;  %v2055_v45 = vadd.f32 %v2054_v42, %v2048_v40 }
 0x18e   : > { %v2035_v46 = vrot.slane %v2034_v44, 4  ;;  %v2056_v47 = vadd.f32 %v2055_v45, %v2049_v43 }
 0x190   : > { %v2036_v48 = vadd.f32 %v2035_v46, %v2034_v44  ;;  %v2057_v49 = vrot.slane %v2056_v47, 4 }
 0x192   : > { %v2037_v50 = vrot.slane %v2036_v48, 2  ;;  %v2058_v51 = vadd.f32 %v2057_v49, %v2056_v47 }
 0x194   : > { %v2038_v52 = vadd.f32 %v2037_v50, %v2036_v48  ;;  %v2059_v54 = vrot.slane %v2058_v51, 2 }
 0x196   : > { %v2039_v55 = vrot.slane %v2038_v52, 1  ;;  %v2060_v56 = vadd.f32 %v2059_v54, %v2058_v51 }
 0x198   : > { %v2040_v57 = vadd.f32 %v2039_v55, %v2038_v52  ;;  %v2061_v58 = vrot.slane %v2060_v56, 1 }
 0x19a   : > { %v2062_v59 = vadd.f32 %v2061_v58, %v2060_v56  ;;  %v2065_v60 = vmul.f32 0.015625, %v2040_v57 }
 0x19c   : > { %v2066_v61 = vmul.f32 0.015625, %v2062_v59  ;;  %v2067_v62 = vmul.f32 %v2065_v60, %v2065_v60  ;;  %v2080_v63 = vsub.f32 %v2919_v17, %v2065_v60  ;;  %v2081_v0 = vsub.f32 %v2921_v24, %v2065_v60 }
 0x19d   : > { %v2082_v1 = vsub.f32 %v3472_v13, %v2065_v60  ;;  %v2083_v2 = vsub.f32 %v2920_v21, %v2065_v60  ;;  %v2084_v3 = vsub.f32 %v3474_v15, %v2065_v60  ;;  %v2085_v4 = vsub.f32 %v2929_v23, %v2065_v60 }
 0x19e   : > { %v2068_v53 = vsub.f32 %v2066_v61, %v2067_v62  ;;  %v2086_v5 = vsub.f32 %v3470_v11, %v2065_v60  ;;  %v2087_v6 = vsub.f32 %v3476_v19, %v2065_v60 }
 0x1a0   : > { %v2069_v7 = vmax.f32 %v2068_v53, 0.0 }
 0x1a2   : > { %v2070_v8 = vadd.f32 1e-05, %v2069_v7 }
 0x1a4   : > { %3087 = vrsqrt.f32 %v2070_v8 }
 0x1ae   : > { %v3088_v9 = vpop.eup %3087 }
 0x1af   : > { %v2088_v10 = vmul.f32 %v3088_v9, %v2080_v63  ;;  %v2089_v12 = vmul.f32 %v3088_v9, %v2081_v0  ;;  %v2090_v14 = vmul.f32 %v3088_v9, %v2082_v1  ;;  %v2091_v16 = vmul.f32 %v3088_v9, %v2083_v2 }
 0x1b0   : > { %v2092_v17 = vmul.f32 %v3088_v9, %v2084_v3  ;;  %v2093_v13 = vmul.f32 %v3088_v9, %v2085_v4  ;;  %v2094_v18 = vmul.f32 %v3088_v9, %v2086_v5  ;;  %v2095_v20 = vmul.f32 %v3088_v9, %v2087_v6 }
 0x1b1   : > { %vm2096_vm3 = vcmp.ge.f32.partialorder %v2088_v10, 0.0  ;;  %vm2097_vm4 = vcmp.ge.f32.partialorder %v2089_v12, 0.0  ;;  %vm2098_vm5 = vcmp.ge.f32.partialorder %v2090_v14, 0.0  ;;  %vm2099_vm6 = vcmp.ge.f32.partialorder %v2091_v16, 0.0 }
 0x1b2   : > { %vm2100_vm7 = vcmp.ge.f32.partialorder %v2092_v17, 0.0  ;;  %vm2101_vm8 = vcmp.ge.f32.partialorder %v2093_v13, 0.0  ;;  %vm2102_vm9 = vcmp.ge.f32.partialorder %v2094_v18, 0.0  ;;  %vm2103_vm10 = vcmp.ge.f32.partialorder %v2095_v20, 0.0 }
 0x1b3   : > { %v2104_v11 = vmul.f32 0.2, %v2088_v10  ;;  %v2105_v15 = vmul.f32 0.2, %v2089_v12  ;;  %v2106_v19 = vmul.f32 0.2, %v2090_v14 }
 0x1b4   : > { %v2107_v21 = vmul.f32 0.2, %v2091_v16  ;;  %v2108_v22 = vmul.f32 0.2, %v2092_v17  ;;  %v2109_v23 = vmul.f32 0.2, %v2093_v13 }
 0x1b5   : > { %v2110_v24 = vmul.f32 0.2, %v2094_v18  ;;  %v2111_v25 = vmul.f32 0.2, %v2095_v20  ;;  %v2112_v26 = vsel %vm2096_vm3, %v2088_v10, %v2104_v11  ;;  %v2113_v27 = vsel %vm2097_vm4, %v2089_v12, %v2105_v15 }
 0x1b6   : > { %v2114_v28 = vsel %vm2098_vm5, %v2090_v14, %v2106_v19  ;;  %v2115_v29 = vsel %vm2099_vm6, %v2091_v16, %v2107_v21  ;;  %v2116_v30 = vsel %vm2100_vm7, %v2092_v17, %v2108_v22  ;;  %v2117_v31 = vsel %vm2101_vm8, %v2093_v13, %v2109_v23 }
 0x1b7   : > { %v2118_v32 = vsel %vm2102_vm9, %v2094_v18, %v2110_v24  ;;  %v2119_v33 = vsel %vm2103_vm10, %v2095_v20, %v2111_v25  ;;  %v2558_v34 = vpack.c.bf16 %v2113_v27, %v2112_v26  ;;  %v2563_v35 = vpack.c.bf16 %v2115_v29, %v2114_v28 }
 0x1b8   : > { %v2568_v36 = vpack.c.bf16 %v2117_v31, %v2116_v30  ;;  %v2573_v37 = vpack.c.bf16 %v2119_v33, %v2118_v32 }
 0x1b9   : > { %2559 = vst [vmem:[%s143_s10] sm:$0xff] %v2558_v34   ;;  %2575 = vst [vmem:[%s143_s10 + $0x8] sm:$0xff] %v2563_v35  }
 0x1ba   : > { %2576 = vst [vmem:[%s143_s10 + $0x10] sm:$0xff] %v2568_v36   ;;  %2577 = vst [vmem:[%s143_s10 + $0x18] sm:$0xff] %v2573_v37  }
 0x1bb PF: > { %s12_s9 = sadd.s32 1, %s3095_s9  }
 0x1bc   : > { %p9_p4 = scmp.ge.s32.totalorder %s12_s9, 4  }
 0x1be   :  { %11 = sbr.rel (!%p9_p4) target bundleno = 1 (0x1), region = 72 }

// kernel: encoder_forward.10
= control target key start
LH: loop header
LB: loop body
LE: loop exit
PB: predicated region body
PF: predicated region fallthrough
CT: control target
= control target key end

     0   :  { %s7144_s9 = smov 0   ;;  %s8346_s0 = inlined_call_operand.vmem [shape: bf16[2,68,17,128], index: 0, kind: input, shape index: {}]   ;;  %s8347_s1 = inlined_call_operand.vmem [shape: bf16[9,128,128], index: 1, kind: input, shape index: {}]   ;;  %s8348_s2 = inlined_call_operand.vmem [shape: bf16[2,256,128], index: 2, kind: output, shape index: {}]  }
   0x1 LB: > { %s5244_s10 = sadd.s32 4294967295, %s7127_s9   ;;  %p5248_p0 = scmp.ge.s32.totalorder %s7127_s9, 1  ;;  %s7127_s9 = sphi %s7144_s9, %s12_s9  }
   0x2   : > { %p112_p1 = scmp.lt.s32.totalorder %s7127_s9, 3 }
   0x4   : > { %p113_p2 = pnand %p5248_p0, %p112_p1 }
   0x5   : > { %v6943_v0 = vld [vmem:[%s8347_s1 + $0x40] sm:$0xff] (!%p113_p2)   ;;  %p134_p3 = scmp.lt.s32.totalorder (!%p113_p2), %s5244_s10, 1  ;;  %v6945_v2 = vld [vmem:[%s8347_s1 + $0x48] sm:$0xff] (!%p113_p2)   ;;  %v6947_v4 = vld [vmem:[%s8347_s1 + $0x50] sm:$0xff] (!%p113_p2)   ;;  %vm907_vm0 = vsmask.f32 (!%p113_p2), 3328 }
   0x6   : > { %116 = sbr.rel (%p113_p2) target bundleno = 618 (0x26a), region = 28  ;;  %v6944_v1 = vld [vmem:[%s8347_s1 + $0x100] sm:$0xff] (!%p113_p2)   ;;  %6230 = vmatprep.subr.bf16.mxu1 (!%p113_p2), %v6943_v0  ;;  %v6946_v3 = vld [vmem:[%s8347_s1 + $0x108] sm:$0xff] (!%p113_p2)   ;;  %v6948_v5 = vld [vmem:[%s8347_s1 + $0x110] sm:$0xff] (!%p113_p2)   ;;  %vm908_vm1 = vsmask.f32 (!%p113_p2), 7440 }
   0x7   : > { %6422 = vmatprep.subr.bf16.mxu0 (!%p113_p2), %v6944_v1  ;;  %6231 = vmatpush3.bf16.msra.mxu1 (!%p113_p2), %v6943_v0  ;;  %v6949_v6 = vld [vmem:[%s8347_s1 + $0x58] sm:$0xff] (!%p113_p2)   ;;  %v6951_v8 = vld [vmem:[%s8347_s1 + $0x60] sm:$0xff] (!%p113_p2)   ;;  %v6953_v10 = vld [vmem:[%s8347_s1 + $0x68] sm:$0xff] (!%p113_p2)  }
   0x8   : > { %6423 = vmatpush3.bf16.msra.mxu0 (!%p113_p2), %v6944_v1  ;;  %6232 = vmatprep.subr.bf16.mxu1 (!%p113_p2), %v6945_v2  ;;  %v6950_v7 = vld [vmem:[%s8347_s1 + $0x118] sm:$0xff] (!%p113_p2)   ;;  %v6952_v9 = vld [vmem:[%s8347_s1 + $0x120] sm:$0xff] (!%p113_p2)   ;;  %v6954_v11 = vld [vmem:[%s8347_s1 + $0x128] sm:$0xff] (!%p113_p2)  }
   0x9   : > { %6424 = vmatprep.subr.bf16.mxu0 (!%p113_p2), %v6946_v3  ;;  %v6955_v14 = vld [vmem:[%s8347_s1 + $0x70] sm:$0xff] (!%p113_p2)   ;;  %v6957_v16 = vld [vmem:[%s8347_s1 + $0x78] sm:$0xff] (!%p113_p2)   ;;  %v6962_v19 = vld [vmem:[%s8347_s1] sm:$0xff] (!%p113_p2)  }
   0xa   : > { %v6956_v15 = vld [vmem:[%s8347_s1 + $0x130] sm:$0xff] (!%p113_p2)   ;;  %v6958_v17 = vld [vmem:[%s8347_s1 + $0x138] sm:$0xff] (!%p113_p2)   ;;  %v6964_v20 = vld [vmem:[%s8347_s1 + $0x140] sm:$0xff] (!%p113_p2)  }
   0xb   : > { %6233 = vmatpush3.bf16.msra.mxu1 (!%p113_p2), %v6945_v2  ;;  %v6965_v22 = vld [vmem:[%s8347_s1 + $0x148] sm:$0xff] (!%p113_p2)   ;;  %v6976_v27 = vld [vmem:[%s8347_s1 + $0x10] sm:$0xff] (!%p113_p2)   ;;  %v6972_v32 = vld [vmem:[%s8347_s1 + $0x158] sm:$0xff] (!%p113_p2)  }
   0xc   : > { %6425 = vmatpush3.bf16.msra.mxu0 (!%p113_p2), %v6946_v3  ;;  %6234 = vmatprep.subr.bf16.mxu1 (!%p113_p2), %v6947_v4  ;;  %v6969_v25 = vld [vmem:[%s8347_s1 + $0x8] sm:$0xff] (!%p113_p2)   ;;  %v6971_v28 = vld [vmem:[%s8347_s1 + $0x150] sm:$0xff] (!%p113_p2)   ;;  %v6983_v33 = vld [vmem:[%s8347_s1 + $0x18] sm:$0xff] (!%p113_p2)  }
   0xd   : > { %s8366_s10 = smov (!%p134_p3, %s5244_s10), 1  ;;  %6426 = vmatprep.subr.bf16.mxu0 %v6948_v5  ;;  %v6978_v35 = vld [vmem:[%s8347_s1 + $0x160] sm:$0xff]   ;;  %v6979_v43 = vld [vmem:[%s8347_s1 + $0x168] sm:$0xff]   ;;  %vm7263_vm2 = vmor %vm907_vm0, %vm908_vm1 }
   0xe   : > { %s6934_s27 = smul.u32 816, %s8366_s10  ;;  %v6989_v53 = vld [vmem:[%s8347_s1 + $0x20] sm:$0xff]   ;;  %v6985_v0 = vld [vmem:[%s8347_s1 + $0x170] sm:$0xff]  }
   0xf   : > { %6235 = vmatpush3.bf16.msra.mxu1 %v6947_v4 }
  0x10   : > { %6427 = vmatpush3.bf16.msra.mxu0 %v6948_v5  ;;  %6236 = vmatprep.subr.bf16.mxu1 %v6949_v6  ;;  %s7188_s6 = scalar_lea.vmem %s8346_s0, %s6934_s27 }
  0x11   : > { %6428 = vmatprep.subr.bf16.mxu0 %v6950_v7  ;;  %v6959_v12 = vld [vmem:[%s7188_s6 + $0xcc] sm:$0xff]   ;;  %v6960_v13 = vld [vmem:[%s7188_s6 + $0x264] sm:$0xff]   ;;  %v6961_v18 = vld [vmem:[%s7188_s6 + $0xd8] sm:$0xff]  }
  0x12   : > { %6246 = vmatprep.mubr.bf16.mxu1 %v6959_v12  ;;  %6438 = vmatprep.mubr.bf16.mxu0 %v6960_v13  ;;  %v6963_v21 = vld [vmem:[%s7188_s6 + $0x270] sm:$0xff]   ;;  %v6966_v23 = vld [vmem:[%s7188_s6 + $0xe4] sm:$0xff]   ;;  %v6967_v24 = vld [vmem:[%s7188_s6 + $0x27c] sm:$0xff]  }
  0x13   : > { %6237 = vmatpush3.bf16.msra.mxu1 %v6949_v6  ;;  %v6968_v26 = vld [vmem:[%s7188_s6 + $0xf0] sm:$0xff]   ;;  %v6970_v29 = vld [vmem:[%s7188_s6 + $0x288] sm:$0xff]   ;;  %v6973_v30 = vld [vmem:[%s7188_s6 + $0xfc] sm:$0xff]  }
  0x14   : > { %6429 = vmatpush3.bf16.msra.mxu0 %v6950_v7  ;;  %6238 = vmatprep.subr.bf16.mxu1 %v6951_v8  ;;  %v6974_v31 = vld [vmem:[%s7188_s6 + $0x294] sm:$0xff]   ;;  %v6975_v34 = vld [vmem:[%s7188_s6 + $0x108] sm:$0xff]   ;;  %v6977_v36 = vld [vmem:[%s7188_s6 + $0x2a0] sm:$0xff]  }
  0x15   : > { %6430 = vmatprep.subr.bf16.mxu0 %v6952_v9  ;;  %v6980_v37 = vld [vmem:[%s7188_s6 + $0x114] sm:$0xff]   ;;  %v5533_v39 = vld [vmem:[%s7188_s6 + $0x19c] sm:$0xf]  ;;  %v5534_v40 = vld [vmem:[%s7188_s6 + $0x1a0] sm:$0x1] }
  0x16   : > { %v5532_v38 = vld [vmem:[%s7188_s6 + $0x198] sm:$0xf]  ;;  %v6981_v44 = vld [vmem:[%s7188_s6 + $0x2ac] sm:$0xff]   ;;  %v2454_v45 = vshll.u32 %v5533_v39, 16  ;;  %v2458_v46 = vshrl.u32 %v5533_v39, 16  ;;  %v2464_v47 = vshll.u32 %v5534_v40, 16 }
  0x17   : > { %6239 = vmatpush3.bf16.msra.mxu1 %v6951_v8  ;;  %v2445_v41 = vshrl.u32 %v5532_v38, 16  ;;  %v2448_v42 = vshll.u32 %v5532_v38, 16  ;;  %v5535_v55 = vld [vmem:[%s7188_s6 + $0x1a4] sm:$0xf]  ;;  %v5536_v56 = vld [vmem:[%s7188_s6 + $0x1a8] sm:$0xf] }
  0x18   : > { %6431 = vmatpush3.bf16.msra.mxu0 %v6952_v9  ;;  %6240 = vmatprep.subr.bf16.mxu1 %v6953_v10  ;;  %v2456_v50 = vrot.slane %v2454_v45, 5  ;;  %v2460_v51 = vrot.slane %v2458_v46, 4  ;;  %v2466_v52 = vrot.slane %v2464_v47, 5  ;;  %v5537_v57 = vld [vmem:[%s7188_s6 + $0x1ac] sm:$0x1]  ;;  %v2469_v60 = vshrl.u32 %v5535_v55, 16 }
  0x19   : > { %6432 = vmatprep.subr.bf16.mxu0 %v6954_v11  ;;  %v2447_v48 = vrot.slane %v2445_v41, 4  ;;  %v2450_v49 = vrot.slane %v2448_v42, 5  ;;  %v2472_v61 = vshll.u32 %v5535_v55, 16  ;;  %v2478_v62 = vshll.u32 %v5536_v56, 16  ;;  %v6982_v63 = vld [vmem:[%s7188_s6 + $0x120] sm:$0xff]   ;;  %v6984_v4 = vld [vmem:[%s7188_s6 + $0x2b8] sm:$0xff]  }
  0x1a   : > { %v2461_v59 = vor.u32 %v2460_v51, %v2456_v50  ;;  %v2482_v2 = vshrl.u32 %v5536_v56, 16  ;;  %v2488_v3 = vshll.u32 %v5537_v57, 16  ;;  %v6987_v5 = vld [vmem:[%s7188_s6 + $0x12c] sm:$0xff]   ;;  %v2471_v7 = vrot.slane %v2469_v60, 4  ;;  %v6988_v38 = vld [vmem:[%s7188_s6 + $0x138] sm:$0xff]   ;;  %v6991_v45 = vld [vmem:[%s7188_s6 + $0x144] sm:$0xff]  }
  0x1b   : > { %6241 = vmatpush3.bf16.msra.mxu1 %v6953_v10  ;;  %v2451_v54 = vor.u32 %v2450_v49, %v2447_v48  ;;  %v2474_v8 = vrot.slane %v2472_v61, 5  ;;  %v2480_v9 = vrot.slane %v2478_v62, 5  ;;  %v5538_v13 = vld [vmem:[%s7188_s6 + $0x1b0] sm:$0xf]  ;;  %v5542_v41 = vld [vmem:[%s7188_s6 + $0x1c0] sm:$0xf] }
  0x1c   : > { %6433 = vmatpush3.bf16.msra.mxu0 %v6954_v11  ;;  %6242 = vmatprep.subr.bf16.mxu1 %v6955_v14  ;;  %v2462_v6 = vrot.slane %v2461_v59, 4  ;;  %v2484_v11 = vrot.slane %v2482_v2, 4  ;;  %v2490_v12 = vrot.slane %v2488_v3, 5  ;;  %v5543_v42 = vld [vmem:[%s7188_s6 + $0x1c4] sm:$0x1]  ;;  %v2526_v47 = vshll.u32 %v5542_v41, 16 }
  0x1d   : > { %6434 = vmatprep.subr.bf16.mxu0 %v6956_v15  ;;  %v2452_v1 = vrot.slane %v2451_v54, 4  ;;  %v2530_v48 = vshrl.u32 %v5542_v41, 16  ;;  %v6994_v57 = vld [vmem:[%s8347_s1 + $0x188] sm:$0xff]   ;;  %v5546_v3 = vld [vmem:[%s7188_s6 + $0x1d0] sm:$0x1]  ;;  %v7001_v41 = vld [vmem:[%s8347_s1 + $0x38] sm:$0xff]  }
  0x1e   : > { %v2528_v55 = vrot.slane %v2526_v47, 5  ;;  %v5544_v62 = vld [vmem:[%s7188_s6 + $0x1c8] sm:$0xf] }
  0x1f   : > { %6243 = vmatpush3.bf16.msra.mxu1 %v6955_v14  ;;  %v2457_v10 = vsel %vm7263_vm2, %v2452_v1, %v2456_v50  ;;  %v2467_v14 = vsel %vm7263_vm2, %v2462_v6, %v2466_v52  ;;  %v2536_v52 = vshll.u32 %v5543_v42, 16  ;;  %v2532_v56 = vrot.slane %v2530_v48, 4 }
  0x20   : > { %6435 = vmatpush3.bf16.msra.mxu0 %v6956_v15  ;;  %6244 = vmatprep.subr.bf16.mxu1 %v6957_v16  ;;  %v2475_v15 = vor.u32 %v2474_v8, %v2471_v7 }
  0x21   : > { %6436 = vmatprep.subr.bf16.mxu0 %v6958_v17  ;;  %v2538_v61 = vrot.slane %v2536_v52, 5  ;;  %v2533_v2 = vor.u32 %v2532_v56, %v2528_v55  ;;  %v6996_v52 = vld [vmem:[%s7188_s6 + $0x168] sm:$0xff]  }
  0x23   : > { %6245 = vmatpush3.bf16.msra.mxu1 %v6957_v16  ;;  %v5539_v16 = vld [vmem:[%s7188_s6 + $0x1b4] sm:$0xf] }
  0x24   : > { %6437 = vmatpush3.bf16.msra.mxu0 %v6958_v17  ;;  %6278 = vmatprep.subr.bf16.mxu1 %v6962_v19  ;;  %v5540_v17 = vld [vmem:[%s7188_s6 + $0x1b8] sm:$0x1] }
  0x25   : > { %6470 = vmatprep.subr.bf16.mxu0 %v6964_v20 }
  0x26   : > { %6247 = vmatmul.mubr.bf16.vlgmr.msra.gmra.mrb[0].mxu1 %v6961_v18  ;;  %v2493_v18 = vshrl.u32 %v5538_v13, 16 }
  0x27   : > { %6439 = vmatmul.mubr.bf16.vlgmr.msra.gmra.mrb[0].mxu0 %v6963_v21  ;;  %6279 = vmatpush3.bf16.msra.mxu1 %v6962_v19  ;;  %v2496_v19 = vshll.u32 %v5538_v13, 16  ;;  %v2485_v21 = vor.u32 %v2484_v11, %v2480_v9  ;;  %v6992_v13 = vld [vmem:[%s7188_s6 + $0x150] sm:$0xff]  }
  0x28   : > { %6471 = vmatpush3.bf16.msra.mxu0 %v6964_v20  ;;  %6250 = vmatprep.mubr.bf16.mxu1 %v6966_v23  ;;  %v5596_v20 = vcombine.low %v2457_v10, %v2467_v14  ;;  %v2506_v23 = vshrl.u32 %v5539_v16, 16  ;;  %v2534_v10 = vrot.slane %v2533_v2, 4  ;;  %v5553_v2 = vld [vmem:[%s7188_s6 + $0x1ec] sm:$0xf] }
  0x29   : > { %6472 = vmatprep.subr.bf16.mxu0 %v6965_v22  ;;  %6442 = vmatprep.mubr.bf16.mxu0 %v6967_v24  ;;  %v6986_v24 = vld [vmem:[%s8347_s1 + $0x178] sm:$0xff]  }
  0x2a   : > { %6280 = vmatprep.subr.bf16.mxu1 %v6969_v25 }
  0x2b   : > { %6281 = vmatpush3.bf16.msra.mxu1 %v6969_v25  ;;  %v2476_v25 = vrot.slane %v2475_v15, 4 }
  0x2c   : > { %6473 = vmatpush3.bf16.msra.mxu0 %v6965_v22  ;;  %6282 = vmatprep.subr.bf16.mxu1 %v6976_v27  ;;  %v2502_v22 = vshll.u32 %v5539_v16, 16 }
  0x2d   : > { %6474 = vmatprep.subr.bf16.mxu0 %v6971_v28 }
  0x2e   : > { %6251 = vmatmul.mubr.bf16.gmra.mrb[4].mxu1 %v6968_v26  ;;  %v2495_v26 = vrot.slane %v2493_v18, 4  ;;  %v6998_v18 = vld [vmem:[%s8347_s1 + $0x190] sm:$0xff]  }
  0x2f   : > { %6443 = vmatmul.mubr.bf16.gmra.mrb[4].mxu0 %v6970_v29  ;;  %6254 = vmatprep.mubr.bf16.mxu1 %v6973_v30  ;;  %v6993_v29 = vld [vmem:[%s8347_s1 + $0x28] sm:$0xff]   ;;  %v2486_v30 = vrot.slane %v2485_v21, 4 }
  0x30   : > { %6475 = vmatpush3.bf16.msra.mxu0 %v6971_v28  ;;  %6446 = vmatprep.mubr.bf16.mxu0 %v6974_v31  ;;  %v2512_v28 = vshll.u32 %v5540_v17, 16  ;;  %v2504_v31 = vrot.slane %v2502_v22, 5  ;;  %v5547_v22 = vld [vmem:[%s7188_s6 + $0x1d4] sm:$0xf] }
  0x31   : > { %6476 = vmatprep.subr.bf16.mxu0 %v6972_v32  ;;  %6283 = vmatpush3.bf16.msra.mxu1 %v6976_v27  ;;  %v2498_v27 = vrot.slane %v2496_v19, 5  ;;  %v2491_v39 = vsel %vm7263_vm2, %v2486_v30, %v2490_v12  ;;  %v2539_v19 = vsel %vm7263_vm2, %v2534_v10, %v2538_v61  ;;  %v7002_v61 = vld [vmem:[%s8347_s1 + $0x198] sm:$0xff]  }
  0x32   : > { %6284 = vmatprep.subr.bf16.mxu1 %v6983_v33 }
  0x34   : > { %6477 = vmatpush3.bf16.msra.mxu0 %v6972_v32  ;;  %v2508_v32 = vrot.slane %v2506_v23, 4  ;;  %v5548_v23 = vld [vmem:[%s7188_s6 + $0x1d8] sm:$0xf] }
  0x35   : > { %6478 = vmatprep.subr.bf16.mxu0 %v6978_v35  ;;  %6285 = vmatpush3.bf16.msra.mxu1 %v6983_v33  ;;  %v2481_v33 = vsel %vm7263_vm2, %v2476_v25, %v2480_v9  ;;  %v2560_v9 = vshll.u32 %v5546_v3, 16  ;;  %v2574_v30 = vshll.u32 %v5548_v23, 16  ;;  %v5554_v3 = vld [vmem:[%s7188_s6 + $0x1f0] sm:$0xf] }
  0x36   : > { %6255 = vmatmul.mubr.bf16.gmra.mrb[8].mxu1 %v6975_v34  ;;  %6286 = vmatprep.subr.bf16.mxu1 %v6989_v53  ;;  %v6990_v34 = vld [vmem:[%s8347_s1 + $0x180] sm:$0xff]   ;;  %v2509_v40 = vor.u32 %v2508_v32, %v2504_v31 }
  0x37   : > { %6447 = vmatmul.mubr.bf16.gmra.mrb[8].mxu0 %v6977_v36  ;;  %6258 = vmatprep.mubr.bf16.mxu1 %v6980_v37  ;;  %v2514_v36 = vrot.slane %v2512_v28, 5  ;;  %v5541_v37 = vld [vmem:[%s7188_s6 + $0x1bc] sm:$0xf]  ;;  %v2562_v17 = vrot.slane %v2560_v9, 5  ;;  %v2568_v28 = vshll.u32 %v5547_v22, 16 }
  0x38   : > { %6479 = vmatpush3.bf16.msra.mxu0 %v6978_v35  ;;  %6450 = vmatprep.mubr.bf16.mxu0 %v6981_v44  ;;  %v2499_v35 = vor.u32 %v2498_v27, %v2495_v26  ;;  %v2520_v44 = vshll.u32 %v5541_v37, 16  ;;  %v2510_v49 = vrot.slane %v2509_v40, 4  ;;  %v2565_v27 = vshrl.u32 %v5547_v22, 16  ;;  %v5550_v40 = vld [vmem:[%s7188_s6 + $0x1e0] sm:$0xf] }
  0x39   : > { %6480 = vmatprep.subr.bf16.mxu0 %v6979_v43  ;;  %6287 = vmatpush3.bf16.msra.mxu1 %v6989_v53  ;;  %v5597_v53 = vcombine.low %v2481_v33, %v2491_v39  ;;  %v2592_v47 = vshll.u32 %v5550_v40, 16 }
  0x3a   : > { %v2500_v46 = vrot.slane %v2499_v35, 4  ;;  %6288 = vmatprep.subr.bf16.mxu1 %v6993_v29  ;;  %v2522_v51 = vrot.slane %v2520_v44, 5  ;;  %v2515_v59 = vsel %vm7263_vm2, %v2510_v49, %v2514_v36  ;;  %v2570_v35 = vrot.slane %v2568_v28, 5  ;;  %v5551_v44 = vld [vmem:[%s7188_s6 + $0x1e4] sm:$0xf] }
  0x3b   : > { %v7000_v28 = vld [vmem:[%s7188_s6 + $0x180] sm:$0xff]  }
  0x3c   : > { %6481 = vmatpush3.bf16.msra.mxu0 %v6979_v43  ;;  %v2517_v43 = vshrl.u32 %v5541_v37, 16  ;;  %v2505_v54 = vsel %vm7263_vm2, %v2500_v46, %v2504_v31  ;;  %v2578_v31 = vshrl.u32 %v5548_v23, 16  ;;  %v2576_v37 = vrot.slane %v2574_v30, 5 }
  0x3d   : > { %6482 = vmatprep.subr.bf16.mxu0 %v6985_v0  ;;  %6289 = vmatpush3.bf16.msra.mxu1 %v6993_v29  ;;  %v5598_v1 = vcombine.low %v2505_v54, %v2515_v59  ;;  %v2589_v46 = vshrl.u32 %v5550_v40, 16  ;;  %v7357_v40 = vld [vmem:[%s8347_s1 + $0x80] sm:$0xff]  }
  0x3e   : > { %6259 = vmatmul.mubr.bf16.gmra.mrb[12].mxu1 %v6982_v63  ;;  %v2519_v50 = vrot.slane %v2517_v43, 4  ;;  %v5545_v63 = vld [vmem:[%s7188_s6 + $0x1cc] sm:$0xf] }
  0x3f   : > { %6451 = vmatmul.mubr.bf16.gmra.mrb[12].mxu0 %v6984_v4  ;;  %6262 = vmatprep.mubr.bf16.mxu1 %v6987_v5  ;;  %v2541_v4 = vshrl.u32 %v5544_v62, 16  ;;  %v2544_v5 = vshll.u32 %v5544_v62, 16  ;;  %v2550_v7 = vshll.u32 %v5545_v63, 16  ;;  %v2554_v8 = vshrl.u32 %v5545_v63, 16  ;;  %v6999_v63 = vld [vmem:[%s7188_s6 + $0x174] sm:$0xff]  }
  0x40   : > { %6483 = vmatpush3.bf16.msra.mxu0 %v6985_v0  ;;  %6486 = vmatprep.mubr.bf16.mxu0 %v5596_v20  ;;  %v2523_v60 = vor.u32 %v2522_v51, %v2519_v50  ;;  %v6997_v0 = vld [vmem:[%s8347_s1 + $0x30] sm:$0xff]   ;;  %v6995_v20 = vld [vmem:[%s7188_s6 + $0x15c] sm:$0xff]   ;;  %v2598_v50 = vshll.u32 %v5551_v44, 16  ;;  %v2602_v51 = vshrl.u32 %v5551_v44, 16  ;;  %v2591_v54 = vrot.slane %v2589_v46, 4 }
  0x41   : > { %6484 = vmatprep.subr.bf16.mxu0 %v6986_v24  ;;  %6290 = vmatprep.subr.bf16.mxu1 %v6997_v0  ;;  %v2543_v11 = vrot.slane %v2541_v4, 4  ;;  %v2546_v12 = vrot.slane %v2544_v5, 5  ;;  %v2552_v15 = vrot.slane %v2550_v7, 5  ;;  %v2556_v16 = vrot.slane %v2554_v8, 4  ;;  %v5559_v44 = vld [vmem:[%s7188_s6 + $0x204] sm:$0xf] }
  0x42   : > { %v2524_v6 = vrot.slane %v2523_v60, 4  ;;  %6291 = vmatpush3.bf16.msra.mxu1 %v6997_v0  ;;  %v2600_v59 = vrot.slane %v2598_v50, 5  ;;  %v2604_v60 = vrot.slane %v2602_v51, 4  ;;  %v2613_v7 = vshrl.u32 %v5553_v2, 16 }
  0x43   : > { %v2547_v21 = vor.u32 %v2546_v12, %v2543_v11  ;;  %v2557_v26 = vor.u32 %v2556_v16, %v2552_v15  ;;  %6292 = vmatprep.subr.bf16.mxu1 %v7001_v41  ;;  %v2616_v8 = vshll.u32 %v5553_v2, 16  ;;  %v2622_v11 = vshll.u32 %v5554_v3, 16 }
  0x44   : > { %6485 = vmatpush3.bf16.msra.mxu0 %v6986_v24  ;;  %v2529_v14 = vsel %vm7263_vm2, %v2524_v6, %v2528_v55  ;;  %v5549_v24 = vld [vmem:[%s7188_s6 + $0x1dc] sm:$0x1]  ;;  %v2594_v55 = vrot.slane %v2592_v47, 5  ;;  %v2605_v5 = vor.u32 %v2604_v60, %v2600_v59  ;;  %v5555_v6 = vld [vmem:[%s7188_s6 + $0x1f4] sm:$0x1]  ;;  %v2626_v12 = vshrl.u32 %v5554_v3, 16 }
  0x45   : > { %6518 = vmatprep.subr.bf16.mxu0 %v6990_v34  ;;  %v5599_v25 = vcombine.low %v2529_v14, %v2539_v19  ;;  %v2548_v29 = vrot.slane %v2547_v21, 4  ;;  %v2584_v32 = vshll.u32 %v5549_v24, 16  ;;  %v2558_v33 = vrot.slane %v2557_v26, 4  ;;  %v5557_v24 = vld [vmem:[%s7188_s6 + $0x1fc] sm:$0xf] }
  0x46   : > { %6263 = vmatmul.mubr.bf16.gmra.mrb[16].mxu1 %v6988_v38  ;;  %v2580_v38 = vrot.slane %v2578_v31, 4  ;;  %v2595_v0 = vor.u32 %v2594_v55, %v2591_v54  ;;  %v2615_v14 = vrot.slane %v2613_v7, 4  ;;  %v2632_v16 = vshll.u32 %v5555_v6, 16  ;;  %v7006_v55 = vld [vmem:[%s8347_s1 + $0x1a0] sm:$0xff]  }
  0x47   : > { %6487 = vmatmul.mubr.bf16.vlgmr.msra.gmra.mrb[0].mxu0 %v5597_v53  ;;  %6266 = vmatprep.mubr.bf16.mxu1 %v6991_v45  ;;  %v2553_v36 = vsel %vm7263_vm2, %v2548_v29, %v2552_v15  ;;  %v2586_v39 = vrot.slane %v2584_v32, 5  ;;  %v2563_v42 = vsel %vm7263_vm2, %v2558_v33, %v2562_v17  ;;  %v5552_v45 = vld [vmem:[%s7188_s6 + $0x1e8] sm:$0x1]  ;;  %v2618_v15 = vrot.slane %v2616_v8, 5  ;;  %v7003_v33 = vld [vmem:[%s7188_s6] sm:$0xff]   ;;  %v7007_v8 = vld [vmem:[%s7188_s6 + $0x18] sm:$0xff]  }
  0x48   : > { %6519 = vmatpush3.bf16.msra.mxu0 %v6990_v34  ;;  %6490 = vmatprep.mubr.bf16.mxu0 %v5598_v1  ;;  %v2567_v34 = vrot.slane %v2565_v27, 4  ;;  %v5600_v48 = vcombine.low %v2553_v36, %v2563_v42  ;;  %v2581_v49 = vor.u32 %v2580_v38, %v2576_v37  ;;  %v2608_v56 = vshll.u32 %v5552_v45, 16  ;;  %v5560_v45 = vld [vmem:[%s7188_s6 + $0x208] sm:$0xf] }
  0x49   : > { %6520 = vmatprep.subr.bf16.mxu0 %v6994_v57  ;;  %6293 = vmatpush3.bf16.msra.mxu1 %v7001_v41  ;;  %v2596_v10 = vrot.slane %v2595_v0, 4  ;;  %v2628_v19 = vrot.slane %v2626_v12, 4  ;;  %v2619_v22 = vor.u32 %v2618_v15, %v2615_v14  ;;  %v2634_v23 = vrot.slane %v2632_v16, 5  ;;  %v7009_v16 = vld [vmem:[%s8347_s1 + $0x88] sm:$0xff]  }
  0x4a   : > { %v2571_v43 = vor.u32 %v2570_v35, %v2567_v34  ;;  %v2610_v1 = vrot.slane %v2608_v56, 5  ;;  %v2646_v31 = vshll.u32 %v5557_v24, 16  ;;  %v2650_v35 = vshrl.u32 %v5557_v24, 16  ;;  %6326 = vmatprep.subr.bf16.mxu1 %v7357_v40 }
  0x4b   : > { %v2601_v17 = vsel %vm7263_vm2, %v2596_v10, %v2600_v59  ;;  %v2620_v32 = vrot.slane %v2619_v22, 4  ;;  %v2664_v50 = vshll.u32 %v5559_v44, 16  ;;  %v2674_v54 = vshrl.u32 %v5560_v45, 16 }
  0x4c   : > { %6521 = vmatpush3.bf16.msra.mxu0 %v6994_v57  ;;  %v2572_v53 = vrot.slane %v2571_v43, 4  ;;  %v2582_v57 = vrot.slane %v2581_v49, 4  ;;  %v2652_v42 = vrot.slane %v2650_v35, 4  ;;  %v2661_v49 = vshrl.u32 %v5559_v44, 16 }
  0x4d   : > { %6522 = vmatprep.subr.bf16.mxu0 %v6998_v18  ;;  %v2666_v59 = vrot.slane %v2664_v50, 5 }
  0x4e   : > { %6267 = vmatmul.mubr.bf16.gmra.mrb[20].mxu1 %v6992_v13  ;;  %v2577_v62 = vsel %vm7263_vm2, %v2572_v53, %v2576_v37  ;;  %v2587_v4 = vsel %vm7263_vm2, %v2582_v57, %v2586_v39  ;;  %v2606_v13 = vrot.slane %v2605_v5, 4  ;;  %v2648_v39 = vrot.slane %v2646_v31, 5  ;;  %v5563_v5 = vld [vmem:[%s7188_s6 + $0x214] sm:$0xf] }
  0x4f   : > { %6491 = vmatmul.mubr.bf16.gmra.mrb[4].mxu0 %v5599_v25  ;;  %6270 = vmatprep.mubr.bf16.mxu1 %v6995_v20  ;;  %v5601_v9 = vcombine.low %v2577_v62, %v2587_v4  ;;  %v5556_v20 = vld [vmem:[%s7188_s6 + $0x1f8] sm:$0xf]  ;;  %v5558_v25 = vld [vmem:[%s7188_s6 + $0x200] sm:$0x1]  ;;  %v2670_v53 = vshll.u32 %v5560_v45, 16  ;;  %v2663_v57 = vrot.slane %v2661_v49, 4 }
  0x50   : > { %6523 = vmatpush3.bf16.msra.mxu0 %v6998_v18  ;;  %6494 = vmatprep.mubr.bf16.mxu0 %v5600_v48  ;;  %v2624_v18 = vrot.slane %v2622_v11, 5  ;;  %v2611_v21 = vsel %vm7263_vm2, %v2606_v13, %v2610_v1  ;;  %v2637_v26 = vshrl.u32 %v5556_v20, 16  ;;  %v2640_v30 = vshll.u32 %v5556_v20, 16  ;;  %v5561_v48 = vld [vmem:[%s7188_s6 + $0x20c] sm:$0x1] }
  0x51   : > { %6524 = vmatprep.subr.bf16.mxu0 %v7002_v61  ;;  %v5602_v27 = vcombine.low %v2601_v17, %v2611_v21  ;;  %v2656_v36 = vshll.u32 %v5558_v25, 16  ;;  %v2680_v60 = vshll.u32 %v5561_v48, 16  ;;  %v2672_v62 = vrot.slane %v2670_v53, 5  ;;  %v7004_v1 = vld [vmem:[%s7188_s6 + $0xc] sm:$0xff]   ;;  %v5565_v25 = vld [vmem:[%s7188_s6 + $0x21c] sm:$0xf] }
  0x52   : > { %v2629_v29 = vor.u32 %v2628_v19, %v2624_v18  ;;  %v2639_v34 = vrot.slane %v2637_v26, 4  ;;  %v2642_v38 = vrot.slane %v2640_v30, 5  ;;  %v2625_v41 = vsel %vm7263_vm2, %v2620_v32, %v2624_v18  ;;  %v5562_v4 = vld [vmem:[%s7188_s6 + $0x210] sm:$0xf]  ;;  %v7010_v17 = vld [vmem:[%s8347_s1 + $0x1a8] sm:$0xff]  }
  0x53   : > { %v2658_v43 = vrot.slane %v2656_v36, 5  ;;  %v2667_v2 = vor.u32 %v2666_v59, %v2663_v57  ;;  %v2682_v3 = vrot.slane %v2680_v60, 5  ;;  %v2685_v10 = vshrl.u32 %v5562_v4, 16  ;;  %v5567_v30 = vld [vmem:[%s7188_s6 + $0x224] sm:$0x1]  ;;  %v7013_v60 = vld [vmem:[%s8347_s1 + $0x90] sm:$0xff]  }
  0x54   : > { %6525 = vmatpush3.bf16.msra.mxu0 %v7002_v61  ;;  %v2630_v37 = vrot.slane %v2629_v29, 4  ;;  %v2643_v47 = vor.u32 %v2642_v38, %v2639_v34  ;;  %v2688_v11 = vshll.u32 %v5562_v4, 16  ;;  %v2694_v14 = vshll.u32 %v5563_v5, 16  ;;  %v5566_v29 = vld [vmem:[%s7188_s6 + $0x220] sm:$0xf]  ;;  %v7014_v4 = vld [vmem:[%s8347_s1 + $0x1b0] sm:$0xff]  }
  0x55   : > { %6526 = vmatprep.subr.bf16.mxu0 %v7006_v55  ;;  %v2668_v13 = vrot.slane %v2667_v2, 4  ;;  %v2698_v15 = vshrl.u32 %v5563_v5, 16  ;;  %v2687_v19 = vrot.slane %v2685_v10, 4  ;;  %v2709_v31 = vshrl.u32 %v5565_v25, 16  ;;  %v5569_v48 = vld [vmem:[%s7188_s6 + $0x22c] sm:$0xf] }
  0x56   : > { %6271 = vmatmul.mubr.bf16.gmra.mrb[24].mxu1 %v6996_v52  ;;  %v2635_v46 = vsel %vm7263_vm2, %v2630_v37, %v2634_v23  ;;  %v2653_v52 = vor.u32 %v2652_v42, %v2648_v39  ;;  %v2644_v56 = vrot.slane %v2643_v47, 4  ;;  %v2690_v20 = vrot.slane %v2688_v11, 5  ;;  %v7008_v42 = vld [vmem:[%s7188_s6 + $0x24] sm:$0xff]  }
  0x57   : > { %6495 = vmatmul.mubr.bf16.gmra.mrb[8].mxu0 %v5601_v9  ;;  %6274 = vmatprep.mubr.bf16.mxu1 %v6999_v63  ;;  %v5603_v51 = vcombine.low %v2625_v41, %v2635_v46  ;;  %v2676_v63 = vrot.slane %v2674_v54, 4  ;;  %v5564_v9 = vld [vmem:[%s7188_s6 + $0x218] sm:$0x1]  ;;  %v2673_v22 = vsel %vm7263_vm2, %v2668_v13, %v2672_v62  ;;  %v2696_v23 = vrot.slane %v2694_v14, 5 }
  0x58   : > { %6498 = vmatprep.mubr.bf16.mxu0 %v5602_v27  ;;  %v2654_v61 = vrot.slane %v2653_v52, 4  ;;  %v2649_v0 = vsel %vm7263_vm2, %v2644_v56, %v2648_v39  ;;  %6527 = vmatpush3.bf16.msra.mxu0 %v7006_v55  ;;  %v2704_v21 = vshll.u32 %v5564_v9, 16  ;;  %v2700_v24 = vrot.slane %v2698_v15, 4  ;;  %v7011_v56 = vld [vmem:[%s7188_s6 + $0x30] sm:$0xff]   ;;  %v5572_v9 = vld [vmem:[%s7188_s6 + $0x238] sm:$0xf] }
  0x59   : > { %v2677_v7 = vor.u32 %v2676_v63, %v2672_v62  ;;  %6528 = vmatprep.subr.bf16.mxu0 %v7010_v17  ;;  %v2691_v27 = vor.u32 %v2690_v20, %v2687_v19  ;;  %v2712_v34 = vshll.u32 %v5565_v25, 16  ;;  %v2718_v35 = vshll.u32 %v5566_v29, 16 }
  0x5a   : > { %v2659_v6 = vsel %vm7263_vm2, %v2654_v61, %v2658_v43  ;;  %v2711_v37 = vrot.slane %v2709_v31, 4  ;;  %v2722_v38 = vshrl.u32 %v5566_v29, 16  ;;  %v2728_v39 = vshll.u32 %v5567_v30, 16 }
  0x5b   : > { %v5604_v12 = vcombine.low %v2649_v0, %v2659_v6  ;;  %v2678_v18 = vrot.slane %v2677_v7, 4  ;;  %v2692_v36 = vrot.slane %v2691_v27, 4  ;;  %v2714_v43 = vrot.slane %v2712_v34, 5 }
  0x5c   : > { %6529 = vmatpush3.bf16.msra.mxu0 %v7010_v17  ;;  %v2720_v44 = vrot.slane %v2718_v35, 5  ;;  %v2724_v46 = vrot.slane %v2722_v38, 4  ;;  %v2730_v47 = vrot.slane %v2728_v39, 5  ;;  %v2742_v57 = vshll.u32 %v5569_v48, 16  ;;  %v7012_v17 = vld [vmem:[%s7188_s6 + $0x3c] sm:$0xff]  }
  0x5d   : > { %v2683_v26 = vsel %vm7263_vm2, %v2678_v18, %v2682_v3  ;;  %v2697_v45 = vsel %vm7263_vm2, %v2692_v36, %v2696_v23  ;;  %v2715_v50 = vor.u32 %v2714_v43, %v2711_v37  ;;  %v2746_v59 = vshrl.u32 %v5569_v48, 16  ;;  %6530 = vmatprep.subr.bf16.mxu0 %v7014_v4 }
  0x5e   : > { %6275 = vmatmul.mubr.bf16.gmra.mrb[28].mxu1 %v7000_v28  ;;  %v2706_v28 = vrot.slane %v2704_v21, 5  ;;  %v5605_v32 = vcombine.low %v2673_v22, %v2683_v26  ;;  %v2725_v55 = vor.u32 %v2724_v46, %v2720_v44  ;;  %v2744_v2 = vrot.slane %v2742_v57, 5 }
  0x5f   : > { %6499 = vmatmul.mubr.bf16.gmra.mrb[12].mxu0 %v5603_v51  ;;  %6294 = vmatprep.mubr.bf16.mxu1 %v7003_v33  ;;  %v2701_v33 = vor.u32 %v2700_v24, %v2696_v23  ;;  %v5570_v51 = vld [vmem:[%s7188_s6 + $0x230] sm:$0x1]  ;;  %v2716_v61 = vrot.slane %v2715_v50, 4  ;;  %v2748_v3 = vrot.slane %v2746_v59, 4  ;;  %v2766_v18 = vshll.u32 %v5572_v9, 16  ;;  %v7015_v24 = vld [vmem:[%s7188_s6 + $0x48] sm:$0xff]  }
  0x60   : > { %6502 = vmatprep.mubr.bf16.mxu0 %v5604_v12  ;;  %v2752_v0 = vshll.u32 %v5570_v51, 16  ;;  %v5573_v12 = vld [vmem:[%s7188_s6 + $0x23c] sm:$0x1]  ;;  %v2770_v19 = vshrl.u32 %v5572_v9, 16  ;;  %6531 = vmatpush3.bf16.msra.mxu0 %v7014_v4  ;;  %v5577_v50 = vld [vmem:[%s7188_s6 + $0x24c] sm:$0xf] }
  0x61   : > { %v2702_v41 = vrot.slane %v2701_v33, 4  ;;  %v2721_v5 = vsel %vm7263_vm2, %v2716_v61, %v2720_v44  ;;  %v2749_v11 = vor.u32 %v2748_v3, %v2744_v2  ;;  %v2776_v23 = vshll.u32 %v5573_v12, 16  ;;  %v5576_v33 = vld [vmem:[%s7188_s6 + $0x248] sm:$0x1]  ;;  %v5578_v51 = vld [vmem:[%s7188_s6 + $0x250] sm:$0xf] }
  0x62   : > { %v2754_v7 = vrot.slane %v2752_v0, 5  ;;  %v2768_v26 = vrot.slane %v2766_v18, 5  ;;  %v2772_v27 = vrot.slane %v2770_v19, 4  ;;  %v2800_v43 = vshll.u32 %v5576_v33, 16  ;;  %v7024_v18 = vld [vmem:[%s8347_s1 + $0x1c0] sm:$0xff]  }
  0x63   : > { %v2707_v49 = vsel %vm7263_vm2, %v2702_v41, %v2706_v28  ;;  %v2750_v20 = vrot.slane %v2749_v11, 4  ;;  %v5574_v28 = vld [vmem:[%s7188_s6 + $0x240] sm:$0xf]  ;;  %v2778_v31 = vrot.slane %v2776_v23, 5  ;;  %v2814_v61 = vshll.u32 %v5578_v51, 16  ;;  %v7025_v23 = vld [vmem:[%s7188_s6 + $0x78] sm:$0xff]  }
  0x64   : > { %v5606_v54 = vcombine.low %v2697_v45, %v2707_v49  ;;  %v2781_v34 = vshrl.u32 %v5574_v28, 16  ;;  %v2773_v36 = vor.u32 %v2772_v27, %v2768_v26  ;;  %v2784_v37 = vshll.u32 %v5574_v28, 16  ;;  %v7027_v27 = vld [vmem:[%s7188_s6 + $0x84] sm:$0xff]   ;;  %v7032_v33 = vld [vmem:[%s7188_s6 + $0x3c] sm:$0xff]  }
  0x65   : > { %v2755_v29 = vsel %vm7263_vm2, %v2750_v20, %v2754_v7  ;;  %v2802_v49 = vrot.slane %v2800_v43, 5  ;;  %v7019_v7 = vld [vmem:[%s7188_s6 + $0x60] sm:$0xff]   ;;  %v7020_v20 = vld [vmem:[%s7188_s6 + $0xc] sm:$0xff]  }
  0x66   : > { %6295 = vmatmul.mubr.bf16.vlgmr.msra.gmra.mrb[0].mxu1 %v7004_v1  ;;  %v2726_v1 = vrot.slane %v2725_v55, 4  ;;  %v2783_v41 = vrot.slane %v2781_v34, 4  ;;  %v2774_v44 = vrot.slane %v2773_v36, 4  ;;  %v2786_v45 = vrot.slane %v2784_v37, 5  ;;  %v7030_v28 = vld [vmem:[%s8347_s1 + $0x1c8] sm:$0xff]   ;;  %v7033_v34 = vld [vmem:[%s7188_s6 + $0x9c] sm:$0xff]  }
  0x67   : > { %6327 = vmatpush3.bf16.msra.mxu1 %v7357_v40  ;;  %6298 = vmatprep.mubr.bf16.mxu1 %v7007_v8  ;;  %v5568_v40 = vld [vmem:[%s7188_s6 + $0x228] sm:$0xf]  ;;  %v5571_v8 = vld [vmem:[%s7188_s6 + $0x234] sm:$0xf]  ;;  %v2805_v55 = vshrl.u32 %v5577_v50, 16  ;;  %v7042_v37 = vld [vmem:[%s8347_s1 + $0x1d8] sm:$0xff]  }
  0x68   : > { %6503 = vmatmul.mubr.bf16.gmra.mrb[16].mxu0 %v5605_v32  ;;  %6328 = vmatprep.subr.bf16.mxu1 %v7009_v16  ;;  %v2733_v52 = vshrl.u32 %v5568_v40, 16  ;;  %v2736_v53 = vshll.u32 %v5568_v40, 16  ;;  %v2731_v10 = vsel %vm7263_vm2, %v2726_v1, %v2730_v47  ;;  %v2757_v13 = vshrl.u32 %v5571_v8, 16  ;;  %v5575_v32 = vld [vmem:[%s7188_s6 + $0x244] sm:$0xf]  ;;  %v7017_v47 = vld [vmem:[%s8347_s1 + $0x98] sm:$0xff]  }
  0x69   : > { %6506 = vmatprep.mubr.bf16.mxu0 %v5606_v54  ;;  %v2760_v14 = vshll.u32 %v5571_v8, 16  ;;  %v5607_v15 = vcombine.low %v2721_v5, %v2731_v10  ;;  %v2790_v38 = vshll.u32 %v5575_v32, 16  ;;  %v5579_v54 = vld [vmem:[%s7188_s6 + $0x254] sm:$0x1]  ;;  %v2807_v1 = vrot.slane %v2805_v55, 4  ;;  %v7037_v36 = vld [vmem:[%s7188_s6 + $0xa8] sm:$0xff]  }
  0x6a   : > { %v2735_v62 = vrot.slane %v2733_v52, 4  ;;  %v2738_v63 = vrot.slane %v2736_v53, 5  ;;  %v2759_v21 = vrot.slane %v2757_v13, 4  ;;  %v2779_v52 = vsel %vm7263_vm2, %v2774_v44, %v2778_v31  ;;  %v7029_v31 = vld [vmem:[%s7188_s6 + $0x30] sm:$0xff]  }
  0x6b   : > { %6329 = vmatpush3.bf16.msra.mxu1 %v7009_v16  ;;  %v2762_v22 = vrot.slane %v2760_v14, 5  ;;  %v2792_v46 = vrot.slane %v2790_v38, 5  ;;  %v2787_v53 = vor.u32 %v2786_v45, %v2783_v41  ;;  %v2824_v3 = vshll.u32 %v5579_v54, 16  ;;  %v859_v38 = vld [vmem:[%s7188_s6] sm:$0xf]  ;;  %v7038_v55 = vld [vmem:[%s7188_s6 + $0x54] sm:$0xff]  }
  0x6c   : > { %6330 = vmatprep.subr.bf16.mxu1 %v7013_v60  ;;  %v2739_v6 = vor.u32 %v2738_v63, %v2735_v62  ;;  %v2818_v62 = vshrl.u32 %v5578_v51, 16  ;;  %v7018_v63 = vld [vmem:[%s8347_s1 + $0x1b8] sm:$0xff]   ;;  %v2816_v5 = vrot.slane %v2814_v61, 5  ;;  %v861_v41 = vld [vmem:[%s7188_s6 + $0x8] sm:$0x1]  ;;  %v914_v43 = vshll.u32 %v859_v38, 16 }
  0x6d   : > { %v2763_v30 = vor.u32 %v2762_v22, %v2759_v21  ;;  %v2788_v0 = vrot.slane %v2787_v53, 4  ;;  %6532 = vmatprep.subr.bf16.mxu0 %v7018_v63  ;;  %v2826_v10 = vrot.slane %v2824_v3, 5  ;;  %v7021_v22 = vld [vmem:[%s7188_s6 + $0x6c] sm:$0xff]  }
  0x6e   : > { %6299 = vmatmul.mubr.bf16.gmra.mrb[4].mxu1 %v7008_v42  ;;  %v2740_v16 = vrot.slane %v2739_v6, 4  ;;  %v2794_v42 = vshrl.u32 %v5575_v32, 16  ;;  %v2820_v6 = vrot.slane %v2818_v62, 4  ;;  %6533 = vmatpush3.bf16.msra.mxu0 %v7018_v63  ;;  %v7036_v32 = vld [vmem:[%s8347_s1 + $0x1d0] sm:$0xff]   ;;  %v7493_v62 = vld [vmem:[%s8347_s1 + $0xc0] sm:$0xff]  }
  0x6f   : > { %6302 = vmatprep.mubr.bf16.mxu1 %v7011_v56  ;;  %6331 = vmatpush3.bf16.msra.mxu1 %v7013_v60  ;;  %v2764_v39 = vrot.slane %v2763_v30, 4  ;;  %v2808_v56 = vshll.u32 %v5577_v50, 16  ;;  %v7016_v60 = vld [vmem:[%s7188_s6 + $0x54] sm:$0xff]   ;;  %v2793_v8 = vsel %vm7263_vm2, %v2788_v0, %v2792_v46  ;;  %v863_v53 = vld [vmem:[%s7188_s6 + $0x10] sm:$0xf] }
  0x70   : > { %6507 = vmatmul.mubr.bf16.gmra.mrb[20].mxu0 %v5607_v15  ;;  %v2745_v25 = vsel %vm7263_vm2, %v2740_v16, %v2744_v2  ;;  %v2796_v48 = vrot.slane %v2794_v42, 4  ;;  %6332 = vmatprep.subr.bf16.mxu1 %v7017_v47  ;;  %v2821_v12 = vor.u32 %v2820_v6, %v2816_v5  ;;  %v7022_v15 = vld [vmem:[%s8347_s1 + $0xa0] sm:$0xff]   ;;  %v7031_v30 = vld [vmem:[%s7188_s6 + $0x90] sm:$0xff]   ;;  %v911_v42 = vshrl.u32 %v859_v38, 16 }
  0x71   : > { %v5608_v35 = vcombine.low %v2745_v25, %v2755_v29  ;;  %v2769_v40 = vsel %vm7263_vm2, %v2764_v39, %v2768_v26  ;;  %v2810_v2 = vrot.slane %v2808_v56, 5  ;;  %6566 = vmatprep.subr.bf16.mxu0 %v7024_v18  ;;  %v7023_v25 = vld [vmem:[%s7188_s6 + $0x18] sm:$0xff]   ;;  %v7026_v26 = vld [vmem:[%s7188_s6 + $0x24] sm:$0xff]   ;;  %v7034_v29 = vld [vmem:[%s8347_s1 + $0xb0] sm:$0xff]   ;;  %v948_v61 = vshrl.u32 %v863_v53, 16 }
  0x72   : > { %v5609_v57 = vcombine.low %v2769_v40, %v2779_v52  ;;  %v2797_v59 = vor.u32 %v2796_v48, %v2792_v46  ;;  %v2822_v16 = vrot.slane %v2821_v12, 4  ;;  %v860_v39 = vld [vmem:[%s7188_s6 + $0x4] sm:$0xf]  ;;  %v930_v46 = vshll.u32 %v861_v41, 16  ;;  %v862_v48 = vld [vmem:[%s7188_s6 + $0xc] sm:$0xf] }
  0x73   : > { %6510 = vmatprep.mubr.bf16.mxu0 %v5608_v35  ;;  %6333 = vmatpush3.bf16.msra.mxu1 %v7017_v47  ;;  %v2811_v9 = vor.u32 %v2810_v2, %v2807_v1  ;;  %v7040_v35 = vld [vmem:[%s8347_s1 + $0xb8] sm:$0xff]   ;;  %v920_v44 = vshll.u32 %v860_v39, 16  ;;  %v924_v45 = vshrl.u32 %v860_v39, 16  ;;  %v913_v47 = vrot.slane %v911_v42, 4 }
  0x74   : > { %v2798_v4 = vrot.slane %v2797_v59, 4  ;;  %6334 = vmatprep.subr.bf16.mxu1 %v7022_v15  ;;  %v2827_v19 = vsel %vm7263_vm2, %v2822_v16, %v2826_v10  ;;  %v916_v40 = vrot.slane %v914_v43, 5  ;;  %v932_v52 = vrot.slane %v930_v46, 5  ;;  %v7039_v6 = vld [vmem:[%s7188_s6 + $0xb4] sm:$0xff]   ;;  %v867_v16 = vld [vmem:[%s7188_s6 + $0x20] sm:$0x1] }
  0x75   : > { %v2812_v14 = vrot.slane %v2811_v9, 4  ;;  %v922_v50 = vrot.slane %v920_v44, 5  ;;  %v926_v51 = vrot.slane %v924_v45, 4  ;;  %v935_v54 = vshrl.u32 %v862_v48, 16  ;;  %v7046_v9 = vld [vmem:[%s8347_s1 + $0x1e0] sm:$0xff]  }
  0x76   : > { %6303 = vmatmul.mubr.bf16.gmra.mrb[8].mxu1 %v7012_v17  ;;  %v2803_v11 = vsel %vm7263_vm2, %v2798_v4, %v2802_v49  ;;  %v7035_v49 = vld [vmem:[%s7188_s6 + $0x48] sm:$0xff]   ;;  %v917_v56 = vor.u32 %v916_v40, %v913_v47  ;;  %v938_v59 = vshll.u32 %v862_v48, 16 }
  0x77   : > { %6306 = vmatprep.mubr.bf16.mxu1 %v7015_v24  ;;  %v5610_v13 = vcombine.low %v2793_v8, %v2803_v11  ;;  %v2817_v17 = vsel %vm7263_vm2, %v2812_v14, %v2816_v5  ;;  %6335 = vmatpush3.bf16.msra.mxu1 %v7022_v15  ;;  %v7028_v24 = vld [vmem:[%s8347_s1 + $0xa8] sm:$0xff]   ;;  %v927_v63 = vor.u32 %v926_v51, %v922_v50  ;;  %v937_v0 = vrot.slane %v935_v54, 4  ;;  %v866_v15 = vld [vmem:[%s7188_s6 + $0x1c] sm:$0xf] }
  0x78   : > { %6511 = vmatmul.mubr.bf16.gmra.mrb[24].mxu0 %v5609_v57  ;;  %v5611_v21 = vcombine.low %v2817_v17, %v2827_v19  ;;  %6336 = vmatprep.subr.bf16.mxu1 %v7028_v24  ;;  %v864_v57 = vld [vmem:[%s7188_s6 + $0x14] sm:$0x1]  ;;  %v918_v2 = vrot.slane %v917_v56, 4  ;;  %v940_v3 = vrot.slane %v938_v59, 5  ;;  %v950_v5 = vrot.slane %v948_v61, 4  ;;  %v7050_v51 = vld [vmem:[%s8347_s1 + $0x1e8] sm:$0xff]  }
  0x79   : > { %6514 = vmatprep.mubr.bf16.mxu0 %v5610_v13  ;;  %v954_v1 = vshll.u32 %v864_v57, 16  ;;  %v865_v13 = vld [vmem:[%s7188_s6 + $0x18] sm:$0xf]  ;;  %v871_v57 = vld [vmem:[%s7188_s6 + $0x30] sm:$0xf] }
  0x7a   : > { %v923_v10 = vsel %vm7263_vm2, %v918_v2, %v922_v50  ;;  %v941_v11 = vor.u32 %v940_v3, %v937_v0  ;;  %v959_v17 = vshrl.u32 %v865_v13, 16  ;;  %v7048_v50 = vld [vmem:[%s8347_s1 + $0xc8] sm:$0xff]   ;;  %v872_v59 = vld [vmem:[%s7188_s6 + $0x34] sm:$0xf]  ;;  %v7045_v61 = vld [vmem:[%s7188_s6 + $0x78] sm:$0xff]   ;;  %v1007_v0 = vshrl.u32 %v871_v57, 16 }
  0x7b   : > { %6337 = vmatpush3.bf16.msra.mxu1 %v7028_v24  ;;  %v956_v8 = vrot.slane %v954_v1, 5  ;;  %v1010_v1 = vshll.u32 %v871_v57, 16  ;;  %v1016_v2 = vshll.u32 %v872_v59, 16 }
  0x7c   : > { %6338 = vmatprep.subr.bf16.mxu1 %v7034_v29  ;;  %v961_v24 = vrot.slane %v959_v17, 4  ;;  %v876_v17 = vld [vmem:[%s7188_s6 + $0x44] sm:$0x1] }
  0x7e   : > { %6307 = vmatmul.mubr.bf16.gmra.mrb[12].mxu1 %v7016_v60  ;;  %v944_v60 = vshll.u32 %v863_v53, 16 }
  0x7f   : > { %6310 = vmatprep.mubr.bf16.mxu1 %v7019_v7  ;;  %6339 = vmatpush3.bf16.msra.mxu1 %v7034_v29  ;;  %v928_v7 = vrot.slane %v927_v63, 4 }
  0x80   : > { %6515 = vmatmul.mubr.bf16.gmra.mrb[28].mxu0 %v5611_v21  ;;  %6340 = vmatprep.subr.bf16.mxu1 %v7040_v35  ;;  %v946_v4 = vrot.slane %v944_v60, 5  ;;  %v873_v60 = vld [vmem:[%s7188_s6 + $0x38] sm:$0x1] }
  0x81   : > { %6534 = vmatprep.mubr.bf16.mxu0 %v7020_v20  ;;  %v933_v14 = vsel %vm7263_vm2, %v928_v7, %v932_v52  ;;  %v942_v20 = vrot.slane %v941_v11, 4  ;;  %v1020_v7 = vshrl.u32 %v872_v59, 16  ;;  %v1018_v11 = vrot.slane %v1016_v2, 5  ;;  %v880_v59 = vld [vmem:[%s7188_s6 + $0x54] sm:$0xf] }
  0x82   : > { %v951_v12 = vor.u32 %v950_v5, %v946_v4  ;;  %v5364_v19 = vcombine.low %v923_v10, %v933_v14  ;;  %v1012_v10 = vrot.slane %v1010_v1, 5  ;;  %v882_v1 = vld [vmem:[%s7188_s6 + $0x5c] sm:$0x1]  ;;  %v1079_v2 = vshrl.u32 %v880_v59, 16 }
  0x83   : > { %6341 = vmatpush3.bf16.msra.mxu1 %v7040_v35  ;;  %v947_v29 = vsel %vm7263_vm2, %v942_v20, %v946_v4  ;;  %v7047_v4 = vld [vmem:[%s7188_s6 + $0x84] sm:$0xff]  }
  0x84   : > { %6374 = vmatprep.subr.bf16.mxu1 %v7493_v62  ;;  %v952_v21 = vrot.slane %v951_v12, 4  ;;  %v1026_v12 = vshll.u32 %v873_v60, 16  ;;  %v881_v60 = vld [vmem:[%s7188_s6 + $0x58] sm:$0xf] }
  0x86   : > { %6311 = vmatmul.mubr.bf16.gmra.mrb[16].mxu1 %v7021_v22  ;;  %v968_v22 = vshll.u32 %v866_v15, 16 }
  0x87   : > { %6314 = vmatprep.mubr.bf16.mxu1 %v7025_v23  ;;  %v7041_v23 = vld [vmem:[%s7188_s6 + $0x60] sm:$0xff]  }
  0x88   : > { %6535 = vmatmul.mubr.bf16.vlgmr.msra.gmra.mrb[0].mxu0 %v7023_v25 }
  0x89   : > { %6567 = vmatpush3.bf16.msra.mxu0 %v7024_v18  ;;  %6538 = vmatprep.mubr.bf16.mxu0 %v7026_v26  ;;  %v962_v18 = vshll.u32 %v865_v13, 16  ;;  %v972_v26 = vshrl.u32 %v866_v15, 16  ;;  %v874_v13 = vld [vmem:[%s7188_s6 + $0x3c] sm:$0xf]  ;;  %v1022_v15 = vrot.slane %v1020_v7, 4 }
  0x8a   : > { %6568 = vmatprep.subr.bf16.mxu0 %v7030_v28 }
  0x8b   : > { %v964_v25 = vrot.slane %v962_v18, 5  ;;  %v974_v35 = vrot.slane %v972_v26, 4  ;;  %v1031_v18 = vshrl.u32 %v874_v13, 16 }
  0x8d   : > { %6569 = vmatpush3.bf16.msra.mxu0 %v7030_v28  ;;  %v7043_v28 = vld [vmem:[%s7188_s6 + $0x6c] sm:$0xff]  }
  0x8e   : > { %6315 = vmatmul.mubr.bf16.gmra.mrb[20].mxu1 %v7027_v27  ;;  %6570 = vmatprep.subr.bf16.mxu0 %v7036_v32  ;;  %v978_v27 = vshll.u32 %v867_v16, 16  ;;  %v875_v16 = vld [vmem:[%s7188_s6 + $0x40] sm:$0xf] }
  0x8f   : > { %6318 = vmatprep.mubr.bf16.mxu1 %v7031_v30  ;;  %v957_v30 = vsel %vm7263_vm2, %v952_v21, %v956_v8  ;;  %v7052_v8 = vld [vmem:[%s8347_s1 + $0xd0] sm:$0xff]   ;;  %v1028_v21 = vrot.slane %v1026_v12, 5  ;;  %v1044_v26 = vshrl.u32 %v875_v16, 16 }
  0x90   : > { %6539 = vmatmul.mubr.bf16.gmra.mrb[4].mxu0 %v7029_v31  ;;  %v970_v31 = vrot.slane %v968_v22, 5  ;;  %v5365_v43 = vcombine.low %v947_v29, %v957_v30  ;;  %v1034_v22 = vshll.u32 %v874_v13, 16  ;;  %v1050_v29 = vshll.u32 %v876_v17, 16  ;;  %v7054_v30 = vld [vmem:[%s8347_s1 + $0x1f0] sm:$0xff]  }
  0x91   : > { %6542 = vmatprep.mubr.bf16.mxu0 %v7032_v33  ;;  %6571 = vmatpush3.bf16.msra.mxu0 %v7036_v32  ;;  %v868_v32 = vld [vmem:[%s7188_s6 + $0x24] sm:$0xf]  ;;  %v869_v33 = vld [vmem:[%s7188_s6 + $0x28] sm:$0xf] }
  0x92   : > { %6572 = vmatprep.subr.bf16.mxu0 %v7042_v37  ;;  %v983_v38 = vshrl.u32 %v868_v32, 16  ;;  %v986_v39 = vshll.u32 %v868_v32, 16  ;;  %v992_v41 = vshll.u32 %v869_v33, 16  ;;  %v996_v42 = vshrl.u32 %v869_v33, 16 }
  0x93   : > { %v975_v45 = vor.u32 %v974_v35, %v970_v31  ;;  %v1046_v33 = vrot.slane %v1044_v26, 4 }
  0x94   : > { %v985_v47 = vrot.slane %v983_v38, 4  ;;  %v988_v40 = vrot.slane %v986_v39, 5  ;;  %v994_v48 = vrot.slane %v992_v41, 5  ;;  %v877_v38 = vld [vmem:[%s7188_s6 + $0x48] sm:$0xf]  ;;  %v7056_v39 = vld [vmem:[%s8347_s1 + $0xd8] sm:$0xff]  }
  0x95   : > { %6573 = vmatpush3.bf16.msra.mxu0 %v7042_v37  ;;  %v870_v37 = vld [vmem:[%s7188_s6 + $0x2c] sm:$0x1]  ;;  %v976_v53 = vrot.slane %v975_v45, 4  ;;  %v1055_v45 = vshrl.u32 %v877_v38, 16 }
  0x96   : > { %6319 = vmatmul.mubr.bf16.gmra.mrb[24].mxu1 %v7033_v34  ;;  %6574 = vmatprep.subr.bf16.mxu0 %v7046_v9  ;;  %v965_v34 = vor.u32 %v964_v25, %v961_v24  ;;  %v1002_v46 = vshll.u32 %v870_v37, 16  ;;  %v1033_v24 = vrot.slane %v1031_v18, 4  ;;  %v1040_v25 = vshll.u32 %v875_v16, 16  ;;  %v7055_v16 = vld [vmem:[%s7188_s6 + $0xb4] sm:$0xff]  }
  0x97   : > { %6322 = vmatprep.mubr.bf16.mxu1 %v7037_v36  ;;  %v980_v36 = vrot.slane %v978_v27, 5  ;;  %v1052_v37 = vrot.slane %v1050_v29, 5 }
  0x98   : > { %6543 = vmatmul.mubr.bf16.gmra.mrb[8].mxu0 %v7035_v49  ;;  %v966_v44 = vrot.slane %v965_v34, 4  ;;  %v998_v49 = vrot.slane %v996_v42, 4  ;;  %v1004_v54 = vrot.slane %v1002_v46, 5  ;;  %v1042_v32 = vrot.slane %v1040_v25, 5  ;;  %v7049_v34 = vld [vmem:[%s7188_s6 + $0x90] sm:$0xff]  }
  0x99   : > { %6546 = vmatprep.mubr.bf16.mxu0 %v7038_v55  ;;  %6575 = vmatpush3.bf16.msra.mxu0 %v7046_v9  ;;  %v989_v55 = vor.u32 %v988_v40, %v985_v47  ;;  %v981_v63 = vsel %vm7263_vm2, %v976_v53, %v980_v36  ;;  %v1009_v9 = vrot.slane %v1007_v0, 4  ;;  %v1058_v46 = vshll.u32 %v877_v38, 16  ;;  %v7051_v40 = vld [vmem:[%s7188_s6 + $0x9c] sm:$0xff]   ;;  %v886_v38 = vld [vmem:[%s7188_s6 + $0x6c] sm:$0xf] }
  0x9a   : > { %v971_v52 = vsel %vm7263_vm2, %v966_v44, %v970_v31  ;;  %v999_v56 = vor.u32 %v998_v49, %v994_v48  ;;  %6576 = vmatprep.subr.bf16.mxu0 %v7050_v51  ;;  %v1047_v42 = vor.u32 %v1046_v33, %v1042_v32  ;;  %v879_v44 = vld [vmem:[%s7188_s6 + $0x50] sm:$0x1] }
  0x9b   : > { %v5366_v3 = vcombine.low %v971_v52, %v981_v63  ;;  %v990_v5 = vrot.slane %v989_v55, 4  ;;  %v1013_v20 = vor.u32 %v1012_v10, %v1009_v9  ;;  %v1057_v52 = vrot.slane %v1055_v45, 4 }
  0x9c   : > { %v1060_v53 = vrot.slane %v1058_v46, 5  ;;  %v1092_v9 = vshrl.u32 %v881_v60, 16  ;;  %v1098_v10 = vshll.u32 %v882_v1, 16  ;;  %v1127_v45 = vshrl.u32 %v886_v38, 16 }
  0x9d   : > { %6577 = vmatpush3.bf16.msra.mxu0 %v7050_v51  ;;  %v1014_v27 = vrot.slane %v1013_v20, 4  ;;  %v1048_v51 = vrot.slane %v1047_v42, 4 }
  0x9e   : > { %6323 = vmatmul.mubr.bf16.gmra.mrb[28].mxu1 %v7039_v6  ;;  %v1000_v6 = vrot.slane %v999_v56, 4  ;;  %6578 = vmatprep.subr.bf16.mxu0 %v7054_v30  ;;  %v1061_v63 = vor.u32 %v1060_v53, %v1057_v52  ;;  %v1094_v17 = vrot.slane %v1092_v9, 4  ;;  %v1100_v18 = vrot.slane %v1098_v10, 5 }
  0x9f   : > { %6342 = vmatprep.mubr.bf16.mxu1 %v5364_v19  ;;  %v1019_v35 = vsel %vm7263_vm2, %v1014_v27, %v1018_v11  ;;  %v1129_v52 = vrot.slane %v1127_v45, 4 }
  0xa0   : > { %6547 = vmatmul.mubr.bf16.gmra.mrb[12].mxu0 %v7041_v23  ;;  %v1005_v14 = vsel %vm7263_vm2, %v1000_v6, %v1004_v54  ;;  %v1023_v23 = vor.u32 %v1022_v15, %v1018_v11  ;;  %v1074_v54 = vshll.u32 %v879_v44, 16  ;;  %v1088_v6 = vshll.u32 %v881_v60, 16  ;;  %v7053_v11 = vld [vmem:[%s7188_s6 + $0xa8] sm:$0xff]   ;;  %v888_v44 = vld [vmem:[%s7188_s6 + $0x74] sm:$0x1] }
  0xa1   : > { %6550 = vmatprep.mubr.bf16.mxu0 %v7043_v28  ;;  %v1036_v28 = vrot.slane %v1034_v22, 5  ;;  %6579 = vmatpush3.bf16.msra.mxu0 %v7054_v30  ;;  %v1062_v7 = vrot.slane %v1061_v63, 4  ;;  %v884_v22 = vld [vmem:[%s7188_s6 + $0x64] sm:$0xf] }
  0xa2   : > { %v1024_v31 = vrot.slane %v1023_v23, 4  ;;  %v1076_v0 = vrot.slane %v1074_v54, 5  ;;  %v885_v23 = vld [vmem:[%s7188_s6 + $0x68] sm:$0x1]  ;;  %v1116_v29 = vshrl.u32 %v884_v22, 16  ;;  %v7590_v54 = vld [vmem:[%s8347_s1 + $0x200] sm:$0xff]  }
  0xa3   : > { %v1037_v36 = vor.u32 %v1036_v28, %v1033_v24  ;;  %v1112_v28 = vshll.u32 %v884_v22, 16  ;;  %v1122_v33 = vshll.u32 %v885_v23, 16  ;;  %v893_v22 = vld [vmem:[%s7188_s6 + $0x88] sm:$0xf] }
  0xa4   : > { %v1029_v41 = vsel %vm7263_vm2, %v1024_v31, %v1028_v21 }
  0xa5   : > { %v5368_v47 = vcombine.low %v1019_v35, %v1029_v41  ;;  %v1124_v42 = vrot.slane %v1122_v33, 5  ;;  %v1188_v33 = vshrl.u32 %v893_v22, 16 }
  0xa6   : > { %6343 = vmatmul.mubr.bf16.vlgmr.msra.gmra.mrb[0].mxu1 %v5365_v43  ;;  %v878_v43 = vld [vmem:[%s7188_s6 + $0x4c] sm:$0xf] }
  0xa7   : > { %6375 = vmatpush3.bf16.msra.mxu1 %v7493_v62  ;;  %6346 = vmatprep.mubr.bf16.mxu1 %v5366_v3  ;;  %v995_v62 = vsel %vm7263_vm2, %v990_v5, %v994_v48  ;;  %v1038_v48 = vrot.slane %v1037_v36, 4  ;;  %v1064_v49 = vshll.u32 %v878_v43, 16  ;;  %v1082_v5 = vshll.u32 %v880_v59, 16 }
  0xa8   : > { %6376 = vmatprep.subr.bf16.mxu1 %v7048_v50  ;;  %v5367_v19 = vcombine.low %v995_v62, %v1005_v14  ;;  %6551 = vmatmul.mubr.bf16.gmra.mrb[16].mxu0 %v7045_v61  ;;  %v1053_v61 = vsel %vm7263_vm2, %v1048_v51, %v1052_v37  ;;  %v1090_v62 = vrot.slane %v1088_v6, 5  ;;  %v7058_v14 = vld [vmem:[%s8347_s1 + $0x1f8] sm:$0xff]   ;;  %v1114_v36 = vrot.slane %v1112_v28, 5 }
  0xa9   : > { %6554 = vmatprep.mubr.bf16.mxu0 %v7047_v4  ;;  %v1043_v55 = vsel %vm7263_vm2, %v1038_v48, %v1042_v32  ;;  %v1066_v56 = vrot.slane %v1064_v49, 5  ;;  %v1084_v13 = vrot.slane %v1082_v5, 5  ;;  %6580 = vmatprep.subr.bf16.mxu0 %v7058_v14  ;;  %v1118_v37 = vrot.slane %v1116_v29, 4  ;;  %v7064_v5 = vld [vmem:[%s8347_s1 + $0xe8] sm:$0xff]  }
  0xaa   : > { %v5369_v3 = vcombine.low %v1043_v55, %v1053_v61  ;;  %v1095_v27 = vor.u32 %v1094_v17, %v1090_v62  ;;  %6581 = vmatpush3.bf16.msra.mxu0 %v7058_v14  ;;  %v1146_v59 = vshll.u32 %v888_v44, 16  ;;  %v7059_v61 = vld [vmem:[%s7188_s6 + $0xd8] sm:$0xff]   ;;  %v892_v17 = vld [vmem:[%s7188_s6 + $0x84] sm:$0xf] }
  0xab   : > { %6377 = vmatpush3.bf16.msra.mxu1 %v7048_v50  ;;  %v1068_v50 = vshrl.u32 %v878_v43, 16  ;;  %v1067_v15 = vsel %vm7263_vm2, %v1062_v7, %v1066_v56  ;;  %v887_v43 = vld [vmem:[%s7188_s6 + $0x70] sm:$0xf]  ;;  %6614 = vmatprep.subr.bf16.mxu0 %v7590_v54  ;;  %v1178_v28 = vshll.u32 %v892_v17, 16 }
  0xac   : > { %6378 = vmatprep.subr.bf16.mxu1 %v7052_v8  ;;  %v1096_v35 = vrot.slane %v1095_v27, 4  ;;  %v1136_v48 = vshll.u32 %v887_v43, 16  ;;  %v1140_v53 = vshrl.u32 %v887_v43, 16  ;;  %v1175_v27 = vshrl.u32 %v892_v17, 16 }
  0xad   : > { %v1070_v57 = vrot.slane %v1068_v50, 4  ;;  %v7057_v50 = vld [vmem:[%s7188_s6 + $0xc0] sm:$0xff]  }
  0xae   : > { %6347 = vmatmul.mubr.bf16.gmra.mrb[4].mxu1 %v5367_v19  ;;  %v883_v19 = vld [vmem:[%s7188_s6 + $0x60] sm:$0xf]  ;;  %v1101_v46 = vsel %vm7263_vm2, %v1096_v35, %v1100_v18  ;;  %v1142_v63 = vrot.slane %v1140_v53, 4  ;;  %v1177_v35 = vrot.slane %v1175_v27, 4 }
  0xaf   : > { %6379 = vmatpush3.bf16.msra.mxu1 %v7052_v8  ;;  %6350 = vmatprep.mubr.bf16.mxu1 %v5368_v47  ;;  %v1071_v4 = vor.u32 %v1070_v57, %v1066_v56  ;;  %v1081_v8 = vrot.slane %v1079_v2, 4  ;;  %v1103_v24 = vshrl.u32 %v883_v19, 16  ;;  %v1106_v25 = vshll.u32 %v883_v19, 16 }
  0xb0   : > { %6380 = vmatprep.subr.bf16.mxu1 %v7056_v39  ;;  %6555 = vmatmul.mubr.bf16.gmra.mrb[20].mxu0 %v7049_v34  ;;  %v7060_v34 = vld [vmem:[%s8347_s1 + $0xe0] sm:$0xff]   ;;  %v1119_v47 = vor.u32 %v1118_v37, %v1114_v36  ;;  %v1138_v57 = vrot.slane %v1136_v48, 5  ;;  %v1148_v2 = vrot.slane %v1146_v59, 5 }
  0xb1   : > { %6558 = vmatprep.mubr.bf16.mxu0 %v7051_v40  ;;  %v1072_v12 = vrot.slane %v1071_v4, 4  ;;  %v1085_v21 = vor.u32 %v1084_v13, %v1081_v8  ;;  %v1105_v31 = vrot.slane %v1103_v24, 4  ;;  %v1108_v32 = vrot.slane %v1106_v25, 5  ;;  %v890_v4 = vld [vmem:[%s7188_s6 + $0x7c] sm:$0xf]  ;;  %v7061_v24 = vld [vmem:[%s7188_s6 + $0xe4] sm:$0xff]  }
  0xb2   : > { %v1130_v40 = vshll.u32 %v886_v38, 16  ;;  %v1120_v55 = vrot.slane %v1119_v47, 4  ;;  %v1143_v7 = vor.u32 %v1142_v63, %v1138_v57  ;;  %v891_v8 = vld [vmem:[%s7188_s6 + $0x80] sm:$0x1]  ;;  %v1164_v13 = vshrl.u32 %v890_v4, 16  ;;  %v7068_v47 = vld [vmem:[%s8347_s1 + $0xf0] sm:$0xff]  }
  0xb3   : > { %6381 = vmatpush3.bf16.msra.mxu1 %v7056_v39  ;;  %v1077_v20 = vsel %vm7263_vm2, %v1072_v12, %v1076_v0  ;;  %v1086_v30 = vrot.slane %v1085_v21, 4  ;;  %v1109_v41 = vor.u32 %v1108_v32, %v1105_v31  ;;  %v1160_v12 = vshll.u32 %v890_v4, 16  ;;  %v7063_v31 = vld [vmem:[%s7188_s6 + $0xf0] sm:$0xff]   ;;  %v898_v4 = vld [vmem:[%s7188_s6 + $0x9c] sm:$0xf] }
  0xb4   : > { %v5370_v26 = vcombine.low %v1067_v15, %v1077_v20  ;;  %6382 = vmatprep.subr.bf16.mxu1 %v7060_v34  ;;  %v1132_v56 = vrot.slane %v1130_v40, 5  ;;  %v1125_v0 = vsel %vm7263_vm2, %v1120_v55, %v1124_v42  ;;  %v1144_v14 = vrot.slane %v1143_v7, 4  ;;  %v7066_v42 = vld [vmem:[%s8347_s1 + $0x208] sm:$0xff]  }
  0xb5   : > { %v1091_v39 = vsel %vm7263_vm2, %v1086_v30, %v1090_v62  ;;  %v1110_v51 = vrot.slane %v1109_v41, 4  ;;  %v1170_v62 = vshll.u32 %v891_v8, 16  ;;  %v1162_v19 = vrot.slane %v1160_v12, 5  ;;  %v7067_v8 = vld [vmem:[%s7188_s6 + $0x108] sm:$0xff]  }
  0xb6   : > { %6351 = vmatmul.mubr.bf16.gmra.mrb[8].mxu1 %v5369_v3  ;;  %v5371_v49 = vcombine.low %v1091_v39, %v1101_v46  ;;  %v1133_v1 = vor.u32 %v1132_v56, %v1129_v52  ;;  %v889_v3 = vld [vmem:[%s7188_s6 + $0x78] sm:$0xf]  ;;  %v1166_v20 = vrot.slane %v1164_v13, 4  ;;  %v1149_v23 = vsel %vm7263_vm2, %v1144_v14, %v1148_v2  ;;  %v895_v46 = vld [vmem:[%s7188_s6 + $0x90] sm:$0xf] }
  0xb7   : > { %6354 = vmatprep.mubr.bf16.mxu1 %v5370_v26  ;;  %6383 = vmatpush3.bf16.msra.mxu1 %v7060_v34  ;;  %v1115_v60 = vsel %vm7263_vm2, %v1110_v51, %v1114_v36  ;;  %v1151_v9 = vshrl.u32 %v889_v3, 16  ;;  %v1154_v10 = vshll.u32 %v889_v3, 16  ;;  %v1172_v21 = vrot.slane %v1170_v62, 5  ;;  %v894_v26 = vld [vmem:[%s7188_s6 + $0x8c] sm:$0x1] }
  0xb8   : > { %6559 = vmatmul.mubr.bf16.gmra.mrb[24].mxu0 %v7053_v11  ;;  %v5372_v6 = vcombine.low %v1115_v60, %v1125_v0  ;;  %v1134_v11 = vrot.slane %v1133_v1, 4  ;;  %6384 = vmatprep.subr.bf16.mxu1 %v7064_v5  ;;  %v1167_v30 = vor.u32 %v1166_v20, %v1162_v19  ;;  %v1184_v32 = vshll.u32 %v893_v22, 16  ;;  %v7065_v1 = vld [vmem:[%s7188_s6 + $0xfc] sm:$0xff]  }
  0xb9   : > { %6562 = vmatprep.mubr.bf16.mxu0 %v7055_v16  ;;  %v1153_v15 = vrot.slane %v1151_v9, 4  ;;  %v1156_v16 = vrot.slane %v1154_v10, 5  ;;  %v1180_v36 = vrot.slane %v1178_v28, 5  ;;  %v1194_v37 = vshll.u32 %v894_v26, 16  ;;  %v900_v9 = vld [vmem:[%s7188_s6 + $0xa4] sm:$0x1] }
  0xba   : > { %v1139_v18 = vsel %vm7263_vm2, %v1134_v11, %v1138_v57  ;;  %v1168_v38 = vrot.slane %v1167_v30, 4  ;;  %v1186_v39 = vrot.slane %v1184_v32, 5  ;;  %v1190_v41 = vrot.slane %v1188_v33, 4  ;;  %v902_v28 = vld [vmem:[%s7188_s6 + $0xac] sm:$0xf] }
  0xbb   : > { %6385 = vmatpush3.bf16.msra.mxu1 %v7064_v5  ;;  %v1157_v25 = vor.u32 %v1156_v16, %v1153_v15  ;;  %v5373_v29 = vcombine.low %v1139_v18, %v1149_v23  ;;  %v1181_v44 = vor.u32 %v1180_v36, %v1177_v35  ;;  %v1196_v45 = vrot.slane %v1194_v37, 5  ;;  %v899_v5 = vld [vmem:[%s7188_s6 + $0xa0] sm:$0xf]  ;;  %v7069_v37 = vld [vmem:[%s7188_s6 + $0x114] sm:$0xff]  }
  0xbc   : > { %v1173_v40 = vsel %vm7263_vm2, %v1168_v38, %v1172_v21  ;;  %v1191_v48 = vor.u32 %v1190_v41, %v1186_v39  ;;  %v1199_v51 = vshrl.u32 %v895_v46, 16  ;;  %v1202_v52 = vshll.u32 %v895_v46, 16  ;;  %6386 = vmatprep.subr.bf16.mxu1 %v7068_v47  ;;  %v7070_v21 = vld [vmem:[%s8347_s1 + $0x210] sm:$0xff]   ;;  %v7071_v46 = vld [vmem:[%s7188_s6 + $0x120] sm:$0xff]  }
  0xbd   : > { %v1158_v34 = vrot.slane %v1157_v25, 4  ;;  %v1182_v55 = vrot.slane %v1181_v44, 4  ;;  %v1223_v10 = vshrl.u32 %v898_v4, 16  ;;  %v1226_v13 = vshll.u32 %v898_v4, 16  ;;  %v901_v25 = vld [vmem:[%s7188_s6 + $0xa8] sm:$0xf] }
  0xbe   : > { %6355 = vmatmul.mubr.bf16.gmra.mrb[12].mxu1 %v5371_v49  ;;  %v896_v49 = vld [vmem:[%s7188_s6 + $0x94] sm:$0xf]  ;;  %v1192_v59 = vrot.slane %v1191_v48, 4  ;;  %v1201_v60 = vrot.slane %v1199_v51, 4  ;;  %v1232_v62 = vshll.u32 %v899_v5, 16  ;;  %v1236_v16 = vshrl.u32 %v899_v5, 16 }
  0xbf   : > { %6358 = vmatprep.mubr.bf16.mxu1 %v5372_v6  ;;  %v1163_v43 = vsel %vm7263_vm2, %v1158_v34, %v1162_v19  ;;  %v1208_v56 = vshll.u32 %v896_v49, 16  ;;  %v1212_v57 = vshrl.u32 %v896_v49, 16  ;;  %v1187_v0 = vsel %vm7263_vm2, %v1182_v55, %v1186_v39  ;;  %6387 = vmatpush3.bf16.msra.mxu1 %v7068_v47  ;;  %v904_v47 = vld [vmem:[%s7188_s6 + $0xb4] sm:$0xf]  ;;  %v906_v51 = vld [vmem:[%s7188_s6 + $0xbc] sm:$0x1] }
  0xc0   : > { %6563 = vmatmul.mubr.bf16.gmra.mrb[28].mxu0 %v7057_v50  ;;  %v897_v50 = vld [vmem:[%s7188_s6 + $0x98] sm:$0x1]  ;;  %v5374_v53 = vcombine.low %v1163_v43, %v1173_v40  ;;  %v1225_v15 = vrot.slane %v1223_v10, 4  ;;  %v1242_v17 = vshll.u32 %v900_v9, 16  ;;  %v1228_v19 = vrot.slane %v1226_v13, 5  ;;  %v7073_v13 = vld [vmem:[%s7188_s6 + $0x12c] sm:$0xff]  }
  0xc1   : > { %6582 = vmatprep.mubr.bf16.mxu0 %v7059_v61  ;;  %v1204_v61 = vrot.slane %v1202_v52, 5  ;;  %v1218_v63 = vshll.u32 %v897_v50, 16  ;;  %v1210_v2 = vrot.slane %v1208_v56, 5  ;;  %v1214_v3 = vrot.slane %v1212_v57, 4  ;;  %v905_v50 = vld [vmem:[%s7188_s6 + $0xb8] sm:$0xf] }
  0xc2   : > { %v1234_v20 = vrot.slane %v1232_v62, 5  ;;  %v1238_v23 = vrot.slane %v1236_v16, 4  ;;  %v1229_v27 = vor.u32 %v1228_v19, %v1225_v15  ;;  %v1247_v30 = vshrl.u32 %v901_v25, 16  ;;  %v7079_v16 = vld [vmem:[%s8347_s1 + $0x220] sm:$0xff]  }
  0xc3   : > { %v1205_v6 = vor.u32 %v1204_v61, %v1201_v60  ;;  %v1220_v7 = vrot.slane %v1218_v63, 5  ;;  %v1215_v12 = vor.u32 %v1214_v3, %v1210_v2  ;;  %v1256_v34 = vshll.u32 %v902_v28, 16 }
  0xc4   : > { %v1239_v33 = vor.u32 %v1238_v23, %v1234_v20  ;;  %v1260_v35 = vshrl.u32 %v902_v28, 16  ;;  %v1230_v36 = vrot.slane %v1229_v27, 4  ;;  %v1249_v38 = vrot.slane %v1247_v30, 4  ;;  %v7081_v23 = vld [vmem:[%s7188_s6 + $0x150] sm:$0xff]   ;;  %v7114_v27 = vld [vmem:[%s8347_s1 + $0x108] sm:$0xff]   ;;  %v7083_v28 = vld [vmem:[%s7188_s6 + $0x15c] sm:$0xff]  }
  0xc5   : > { %v1206_v14 = vrot.slane %v1205_v6, 4  ;;  %v1216_v18 = vrot.slane %v1215_v12, 4  ;;  %v1258_v44 = vrot.slane %v1256_v34, 5  ;;  %v1271_v52 = vshrl.u32 %v904_v47, 16  ;;  %v7094_v30 = vld [vmem:[%s8347_s1 + $0x238] sm:$0xff]  }
  0xc6   : > { %6359 = vmatmul.mubr.bf16.gmra.mrb[16].mxu1 %v5373_v29  ;;  %v903_v29 = vld [vmem:[%s7188_s6 + $0xb0] sm:$0x1]  ;;  %v1240_v43 = vrot.slane %v1239_v33, 4  ;;  %v1235_v40 = vsel %vm7263_vm2, %v1230_v36, %v1234_v20  ;;  %v1274_v56 = vshll.u32 %v904_v47, 16  ;;  %v1280_v57 = vshll.u32 %v905_v50, 16  ;;  %v7084_v20 = vld [vmem:[%s8347_s1 + $0x228] sm:$0xff]  }
  0xc7   : > { %6362 = vmatprep.mubr.bf16.mxu1 %v5374_v53  ;;  %v1211_v22 = vsel %vm7263_vm2, %v1206_v14, %v1210_v2  ;;  %v1221_v26 = vsel %vm7263_vm2, %v1216_v18, %v1220_v7  ;;  %v1266_v41 = vshll.u32 %v903_v29, 16  ;;  %v1273_v61 = vrot.slane %v1271_v52, 4  ;;  %v7076_v14 = vld [vmem:[%s7188_s6 + $0x138] sm:$0xff]   ;;  %v7085_v29 = vld [vmem:[%s7188_s6 + $0x1c8] sm:$0xff]   ;;  %v5765_v33 = vld [vmem:[%s7188_s6 + $0x10] sm:$0xf] }
  0xc8   : > { %6583 = vmatmul.mubr.bf16.vlgmr.msra.gmra.mrb[0].mxu0 %v7061_v24  ;;  %v1244_v24 = vrot.slane %v1242_v17, 5  ;;  %v5376_v32 = vcombine.low %v1211_v22, %v1221_v26  ;;  %v1284_v63 = vshrl.u32 %v905_v50, 16  ;;  %v1276_v3 = vrot.slane %v1274_v56, 5  ;;  %v7075_v18 = vld [vmem:[%s7188_s6 + $0x198] sm:$0xff]   ;;  %v7078_v22 = vld [vmem:[%s7188_s6 + $0x144] sm:$0xff]  }
  0xc9   : > { %6615 = vmatpush3.bf16.msra.mxu0 %v7590_v54  ;;  %6586 = vmatprep.mubr.bf16.mxu0 %v7063_v31  ;;  %v1197_v54 = vsel %vm7263_vm2, %v1192_v59, %v1196_v45  ;;  %v1250_v31 = vshll.u32 %v901_v25, 16  ;;  %v1262_v45 = vrot.slane %v1260_v35, 4  ;;  %v1268_v49 = vrot.slane %v1266_v41, 5  ;;  %v7089_v25 = vld [vmem:[%s8347_s1 + $0x230] sm:$0xff]   ;;  %v7082_v26 = vld [vmem:[%s7188_s6 + $0x1bc] sm:$0xff]  }
  0xca   : > { %6616 = vmatprep.subr.bf16.mxu0 %v7066_v42  ;;  %v5375_v11 = vcombine.low %v1187_v0, %v1197_v54  ;;  %v1245_v53 = vsel %vm7263_vm2, %v1240_v43, %v1244_v24  ;;  %v7074_v0 = vld [vmem:[%s8347_s1 + $0x218] sm:$0xff]   ;;  %v1282_v4 = vrot.slane %v1280_v57, 5  ;;  %v1290_v5 = vshll.u32 %v906_v51, 16  ;;  %v7080_v24 = vld [vmem:[%s7188_s6 + $0x1b0] sm:$0xff]   ;;  %v5769_v51 = vld [vmem:[%s7188_s6 + $0x20] sm:$0x1] }
  0xcb   : > { %v1252_v39 = vrot.slane %v1250_v31, 5  ;;  %v1263_v55 = vor.u32 %v1262_v45, %v1258_v44  ;;  %v5377_v59 = vcombine.low %v1235_v40, %v1245_v53  ;;  %v1286_v6 = vrot.slane %v1284_v63, 4  ;;  %v7086_v31 = vld [vmem:[%s7188_s6 + $0x168] sm:$0xff]   ;;  %v5766_v34 = vld [vmem:[%s7188_s6 + $0x14] sm:$0x1]  ;;  %v7091_v57 = vld [vmem:[%s7188_s6 + $0x180] sm:$0xff]  }
  0xcc   : > { %v1292_v9 = vrot.slane %v1290_v5, 5  ;;  %v3998_v41 = vshll.u32 %v5766_v34, 16  ;;  %v5768_v40 = vld [vmem:[%s7188_s6 + $0x1c] sm:$0xf]  ;;  %v7087_v56 = vld [vmem:[%s7188_s6 + $0x1d4] sm:$0xff]   ;;  %v4022_v63 = vshll.u32 %v5769_v51, 16 }
  0xcd   : > { %6617 = vmatpush3.bf16.msra.mxu0 %v7066_v42  ;;  %v7072_v42 = vld [vmem:[%s8347_s1 + $0xf8] sm:$0xff]   ;;  %v1253_v48 = vor.u32 %v1252_v39, %v1249_v38  ;;  %v1264_v2 = vrot.slane %v1263_v55, 4  ;;  %v3988_v38 = vshll.u32 %v5765_v33, 16  ;;  %v3992_v39 = vshrl.u32 %v5765_v33, 16  ;;  %v7093_v33 = vld [vmem:[%s7188_s6 + $0x18c] sm:$0xff]  }
  0xce   : > { %6363 = vmatmul.mubr.bf16.gmra.mrb[20].mxu1 %v5375_v11  ;;  %6618 = vmatprep.subr.bf16.mxu0 %v7070_v21  ;;  %v1287_v11 = vor.u32 %v1286_v6, %v1282_v4  ;;  %v4000_v47 = vrot.slane %v3998_v41, 5  ;;  %v4012_v53 = vshll.u32 %v5768_v40, 16  ;;  %v4016_v55 = vshrl.u32 %v5768_v40, 16  ;;  %v5771_v6 = vld [vmem:[%s7188_s6 + $0x28] sm:$0xf] }
  0xcf   : > { %6366 = vmatprep.mubr.bf16.mxu1 %v5376_v32  ;;  %6388 = vmatprep.subr.bf16.mxu1 %v7072_v42  ;;  %v1254_v60 = vrot.slane %v1253_v48, 4  ;;  %v1269_v7 = vsel %vm7263_vm2, %v1264_v2, %v1268_v49  ;;  %v5764_v32 = vld [vmem:[%s7188_s6 + $0xc] sm:$0xf]  ;;  %v3990_v45 = vrot.slane %v3988_v38, 5  ;;  %v7088_v49 = vld [vmem:[%s7188_s6 + $0x174] sm:$0xff]  }
  0xd0   : > { %6587 = vmatmul.mubr.bf16.gmra.mrb[4].mxu0 %v7065_v1  ;;  %6389 = vmatpush3.bf16.msra.mxu1 %v7072_v42  ;;  %v7113_v1 = vld [vmem:[%s8347_s1 + $0x100] sm:$0xff]   ;;  %v1288_v62 = vrot.slane %v1287_v11, 4  ;;  %v3979_v35 = vshrl.u32 %v5764_v32, 16  ;;  %v3982_v36 = vshll.u32 %v5764_v32, 16  ;;  %v4014_v2 = vrot.slane %v4012_v53, 5  ;;  %v7092_v32 = vld [vmem:[%s7188_s6 + $0x1ec] sm:$0xff]  }
  0xd1   : > { %6590 = vmatprep.mubr.bf16.mxu0 %v7067_v8  ;;  %6619 = vmatpush3.bf16.msra.mxu0 %v7070_v21  ;;  %v1259_v54 = vsel %vm7263_vm2, %v1254_v60, %v1258_v44  ;;  %v1277_v8 = vor.u32 %v1276_v3, %v1273_v61  ;;  %v7077_v21 = vld [vmem:[%s7188_s6 + $0x1a4] sm:$0xff]   ;;  %v5767_v44 = vld [vmem:[%s7188_s6 + $0x18] sm:$0xf]  ;;  %v4018_v3 = vrot.slane %v4016_v55, 4 }
  0xd2   : > { %6662 = vmatprep.subr.bf16.mxu1 %v7113_v1  ;;  %6620 = vmatprep.subr.bf16.mxu0 %v7074_v0  ;;  %v5378_v10 = vcombine.low %v1259_v54, %v1269_v7  ;;  %v1293_v17 = vsel %vm7263_vm2, %v1288_v62, %v1292_v9  ;;  %v3981_v42 = vrot.slane %v3979_v35, 4  ;;  %v3984_v43 = vrot.slane %v3982_v36, 5  ;;  %v5772_v7 = vld [vmem:[%s7188_s6 + $0x2c] sm:$0x1]  ;;  %v7117_v62 = vld [vmem:[%s8347_s1 + $0x120] sm:$0xff]  }
  0xd3   : > { %v1278_v12 = vrot.slane %v1277_v8, 4  ;;  %v4003_v48 = vshrl.u32 %v5767_v44, 16  ;;  %v4006_v52 = vshll.u32 %v5767_v44, 16  ;;  %v4024_v54 = vrot.slane %v4022_v63, 5  ;;  %v7090_v8 = vld [vmem:[%s7188_s6 + $0x1e0] sm:$0xff]   ;;  %v7118_v38 = vld [vmem:[%s8347_s1 + $0x128] sm:$0xff]  }
  0xd4   : > { %v3985_v50 = vor.u32 %v3984_v43, %v3981_v42  ;;  %v4019_v11 = vor.u32 %v4018_v3, %v4014_v2  ;;  %v5779_v63 = vld [vmem:[%s7188_s6 + $0x48] sm:$0xf] }
  0xd5   : > { %6621 = vmatpush3.bf16.msra.mxu0 %v7074_v0  ;;  %v1283_v15 = vsel %vm7263_vm2, %v1278_v12, %v1282_v4  ;;  %v4005_v61 = vrot.slane %v4003_v48, 4  ;;  %v5770_v4 = vld [vmem:[%s7188_s6 + $0x24] sm:$0xf] }
  0xd6   : > { %6367 = vmatmul.mubr.bf16.gmra.mrb[24].mxu1 %v5377_v59  ;;  %v5379_v19 = vcombine.low %v1283_v15, %v1293_v17  ;;  %6622 = vmatprep.subr.bf16.mxu0 %v7079_v16  ;;  %v7116_v59 = vld [vmem:[%s8347_s1 + $0x118] sm:$0xff]   ;;  %v3986_v0 = vrot.slane %v3985_v50, 4  ;;  %v4027_v12 = vshrl.u32 %v5770_v4, 16  ;;  %v4036_v15 = vshll.u32 %v5771_v6, 16  ;;  %v5773_v17 = vld [vmem:[%s7188_s6 + $0x30] sm:$0xf] }
  0xd7   : > { %6370 = vmatprep.mubr.bf16.mxu1 %v5378_v10  ;;  %v7095_v50 = vld [vmem:[%s7188_s6 + $0x1f8] sm:$0xff]  }
  0xd8   : > { %6591 = vmatmul.mubr.bf16.gmra.mrb[8].mxu0 %v7069_v37  ;;  %v7115_v37 = vld [vmem:[%s8347_s1 + $0x110] sm:$0xff]   ;;  %v3991_v9 = vsel %vm7263_vm2, %v3986_v0, %v3990_v45 }
  0xd9   : > { %6594 = vmatprep.mubr.bf16.mxu0 %v7071_v46  ;;  %6623 = vmatpush3.bf16.msra.mxu0 %v7079_v16  ;;  %v3994_v46 = vrot.slane %v3992_v39, 4  ;;  %v4040_v16 = vshrl.u32 %v5771_v6, 16  ;;  %v5776_v39 = vld [vmem:[%s7188_s6 + $0x3c] sm:$0xf] }
  0xda   : > { %6624 = vmatprep.subr.bf16.mxu0 %v7084_v20  ;;  %v4078_v55 = vshll.u32 %v5776_v39, 16 }
  0xdb   : > { %v3995_v60 = vor.u32 %v3994_v46, %v3990_v45  ;;  %v5777_v45 = vld [vmem:[%s7188_s6 + $0x40] sm:$0xf]  ;;  %v5778_v46 = vld [vmem:[%s7188_s6 + $0x44] sm:$0x1] }
  0xdc   : > { %v4080_v3 = vrot.slane %v4078_v55, 5  ;;  %v4094_v6 = vshll.u32 %v5778_v46, 16 }
  0xdd   : > { %6625 = vmatpush3.bf16.msra.mxu0 %v7084_v20  ;;  %v3996_v5 = vrot.slane %v3995_v60, 4  ;;  %v4020_v20 = vrot.slane %v4019_v11, 4  ;;  %v5781_v11 = vld [vmem:[%s7188_s6 + $0x50] sm:$0x1] }
  0xde   : > { %6371 = vmatmul.mubr.bf16.gmra.mrb[28].mxu1 %v5379_v19  ;;  %6626 = vmatprep.subr.bf16.mxu0 %v7089_v25 }
  0xdf   : > { %6390 = vmatprep.mubr.bf16.mxu1 %v7075_v18 }
  0xe0   : > { %6595 = vmatmul.mubr.bf16.gmra.mrb[12].mxu0 %v7073_v13  ;;  %v4001_v13 = vsel %vm7263_vm2, %v3996_v5, %v4000_v47  ;;  %v4084_v5 = vshll.u32 %v5777_v45, 16 }
  0xe1   : > { %6598 = vmatprep.mubr.bf16.mxu0 %v7076_v14  ;;  %6627 = vmatpush3.bf16.msra.mxu0 %v7089_v25  ;;  %v4030_v14 = vshll.u32 %v5770_v4, 16  ;;  %v5828_v18 = vcombine.low %v3991_v9, %v4001_v13  ;;  %v4042_v25 = vrot.slane %v4040_v16, 4  ;;  %v5780_v4 = vld [vmem:[%s7188_s6 + $0x4c] sm:$0xf]  ;;  %v7096_v13 = vld [vmem:[%s7188_s6 + $0x204] sm:$0xff]  }
  0xe2   : > { %6628 = vmatprep.subr.bf16.mxu0 %v7094_v30 }
  0xe5   : > { %6629 = vmatpush3.bf16.msra.mxu0 %v7094_v30  ;;  %v4051_v30 = vshrl.u32 %v5773_v17, 16 }
  0xe6   : > { %6391 = vmatmul.mubr.bf16.vlgmr.msra.gmra.mrb[0].mxu1 %v7077_v21  ;;  %v4029_v21 = vrot.slane %v4027_v12, 4  ;;  %v4102_v12 = vshll.u32 %v5779_v63, 16 }
  0xe7   : > { %6670 = vmatpush3.bf16.msra.mxu1 %v7113_v1  ;;  %6394 = vmatprep.mubr.bf16.mxu1 %v7080_v24  ;;  %v4008_v1 = vrot.slane %v4006_v52, 5  ;;  %v4038_v24 = vrot.slane %v4036_v15, 5  ;;  %v4053_v41 = vrot.slane %v4051_v30, 4  ;;  %v4096_v15 = vrot.slane %v4094_v6, 5  ;;  %v7099_v6 = vld [vmem:[%s7188_s6 + $0x228] sm:$0xff]  }
  0xe8   : > { %6599 = vmatmul.mubr.bf16.gmra.mrb[16].mxu0 %v7078_v22  ;;  %6663 = vmatprep.subr.bf16.mxu1 %v7114_v27  ;;  %v5774_v22 = vld [vmem:[%s7188_s6 + $0x34] sm:$0xf] }
  0xe9   : > { %6602 = vmatprep.mubr.bf16.mxu0 %v7081_v23  ;;  %v4009_v10 = vor.u32 %v4008_v1, %v4005_v61  ;;  %v4032_v23 = vrot.slane %v4030_v14, 5  ;;  %v4043_v36 = vor.u32 %v4042_v25, %v4038_v24  ;;  %v4060_v43 = vshll.u32 %v5774_v22, 16  ;;  %v7119_v61 = vld [vmem:[%s8347_s1 + $0x130] sm:$0xff]  }
  0xea   : > { %v4064_v44 = vshrl.u32 %v5774_v22, 16  ;;  %v4104_v22 = vrot.slane %v4102_v12, 5 }
  0xeb   : > { %6671 = vmatpush3.bf16.msra.mxu1 %v7114_v27  ;;  %v4010_v19 = vrot.slane %v4009_v10, 4  ;;  %v5775_v27 = vld [vmem:[%s7188_s6 + $0x38] sm:$0x1]  ;;  %v4033_v35 = vor.u32 %v4032_v23, %v4029_v21  ;;  %v4044_v40 = vrot.slane %v4043_v36, 4  ;;  %v4062_v52 = vrot.slane %v4060_v43, 5 }
  0xec   : > { %6664 = vmatprep.subr.bf16.mxu1 %v7115_v37  ;;  %v4070_v48 = vshll.u32 %v5775_v27, 16  ;;  %v4066_v53 = vrot.slane %v4064_v44, 4  ;;  %v4108_v23 = vshll.u32 %v5780_v4, 16  ;;  %v4118_v27 = vshll.u32 %v5781_v11, 16 }
  0xed   : > { %v4034_v47 = vrot.slane %v4033_v35, 4  ;;  %v5785_v35 = vld [vmem:[%s7188_s6 + $0x60] sm:$0xf] }
  0xee   : > { %6395 = vmatmul.mubr.bf16.gmra.mrb[4].mxu1 %v7082_v26  ;;  %v4046_v26 = vshll.u32 %v5772_v7, 16  ;;  %v4099_v7 = vshrl.u32 %v5779_v63, 16 }
  0xef   : > { %6398 = vmatprep.mubr.bf16.mxu1 %v7085_v29  ;;  %6672 = vmatpush3.bf16.msra.mxu1 %v7115_v37  ;;  %v4025_v29 = vsel %vm7263_vm2, %v4020_v20, %v4024_v54  ;;  %v4088_v54 = vshrl.u32 %v5777_v45, 16 }
  0xf0   : > { %6603 = vmatmul.mubr.bf16.gmra.mrb[20].mxu0 %v7083_v28  ;;  %6665 = vmatprep.subr.bf16.mxu1 %v7116_v59  ;;  %v4015_v28 = vsel %vm7263_vm2, %v4010_v19, %v4014_v2  ;;  %v4048_v37 = vrot.slane %v4046_v26, 5  ;;  %v4067_v2 = vor.u32 %v4066_v53, %v4062_v52  ;;  %v4101_v16 = vrot.slane %v4099_v7, 4  ;;  %v7097_v19 = vld [vmem:[%s7188_s6 + $0x210] sm:$0xff]  }
  0xf1   : > { %6606 = vmatprep.mubr.bf16.mxu0 %v7086_v31  ;;  %v4054_v31 = vshll.u32 %v5773_v17, 16  ;;  %v7733_v34 = vcombine.low %v4015_v28, %v4025_v29  ;;  %v4090_v14 = vrot.slane %v4088_v54, 4  ;;  %v5782_v17 = vld [vmem:[%s7188_s6 + $0x54] sm:$0xf]  ;;  %v4112_v26 = vshrl.u32 %v5780_v4, 16 }
  0xf2   : > { %v4068_v9 = vrot.slane %v4067_v2, 4  ;;  %v5783_v28 = vld [vmem:[%s7188_s6 + $0x58] sm:$0xf]  ;;  %v4105_v30 = vor.u32 %v4104_v22, %v4101_v16  ;;  %v5789_v54 = vld [vmem:[%s7188_s6 + $0x70] sm:$0xf] }
  0xf3   : > { %6673 = vmatpush3.bf16.msra.mxu1 %v7116_v59  ;;  %v4056_v42 = vrot.slane %v4054_v31, 5  ;;  %v4072_v59 = vrot.slane %v4070_v48, 5  ;;  %v4110_v31 = vrot.slane %v4108_v23, 5  ;;  %v4132_v43 = vshll.u32 %v5783_v28, 16  ;;  %v5786_v48 = vld [vmem:[%s7188_s6 + $0x64] sm:$0xf] }
  0xf4   : > { %6666 = vmatprep.subr.bf16.mxu1 %v7117_v62  ;;  %v4136_v44 = vshrl.u32 %v5783_v28, 16  ;;  %v4160_v63 = vshrl.u32 %v5786_v48, 16  ;;  %v4184_v22 = vshrl.u32 %v5789_v54, 16  ;;  %v5792_v23 = vld [vmem:[%s7188_s6 + $0x7c] sm:$0xf] }
  0xf5   : > { %v4057_v51 = vor.u32 %v4056_v42, %v4053_v41  ;;  %v4073_v20 = vsel %vm7263_vm2, %v4068_v9, %v4072_v59  ;;  %v4106_v41 = vrot.slane %v4105_v30, 4  ;;  %v5793_v28 = vld [vmem:[%s7188_s6 + $0x80] sm:$0x1] }
  0xf6   : > { %6399 = vmatmul.mubr.bf16.gmra.mrb[8].mxu1 %v7087_v56  ;;  %v4039_v56 = vsel %vm7263_vm2, %v4034_v47, %v4038_v24  ;;  %v4186_v30 = vrot.slane %v4184_v22, 4 }
  0xf7   : > { %6402 = vmatprep.mubr.bf16.mxu1 %v7090_v8  ;;  %6674 = vmatpush3.bf16.msra.mxu1 %v7117_v62  ;;  %v4058_v1 = vrot.slane %v4057_v51, 4  ;;  %v4086_v62 = vrot.slane %v4084_v5, 5  ;;  %v4138_v51 = vrot.slane %v4136_v44, 4 }
  0xf8   : > { %6607 = vmatmul.mubr.bf16.gmra.mrb[24].mxu0 %v7088_v49  ;;  %6667 = vmatprep.subr.bf16.mxu1 %v7118_v38  ;;  %v4075_v49 = vshrl.u32 %v5776_v39, 16  ;;  %v4126_v39 = vshll.u32 %v5782_v17, 16 }
  0xf9   : > { %6610 = vmatprep.mubr.bf16.mxu0 %v7091_v57  ;;  %v4049_v57 = vsel %vm7263_vm2, %v4044_v40, %v4048_v37  ;;  %v4063_v8 = vsel %vm7263_vm2, %v4058_v1, %v4062_v52  ;;  %v4091_v25 = vor.u32 %v4090_v14, %v4086_v62  ;;  %v4114_v37 = vrot.slane %v4112_v26, 4  ;;  %v5787_v52 = vld [vmem:[%s7188_s6 + $0x68] sm:$0x1]  ;;  %v7098_v1 = vld [vmem:[%s7188_s6 + $0x21c] sm:$0xff]   ;;  %v5791_v14 = vld [vmem:[%s7188_s6 + $0x78] sm:$0xf] }
  0xfa   : > { %v4077_v60 = vrot.slane %v4075_v49, 4  ;;  %v5830_v0 = vcombine.low %v4039_v56, %v4049_v57  ;;  %v5831_v24 = vcombine.low %v4063_v8, %v4073_v20  ;;  %v4128_v47 = vrot.slane %v4126_v39, 5  ;;  %v5795_v39 = vld [vmem:[%s7188_s6 + $0x88] sm:$0xf] }
  0xfb   : > { %6675 = vmatpush3.bf16.msra.mxu1 %v7118_v38  ;;  %v4092_v36 = vrot.slane %v4091_v25, 4  ;;  %v4120_v38 = vrot.slane %v4118_v27, 5  ;;  %v4115_v46 = vor.u32 %v4114_v37, %v4110_v31  ;;  %v4147_v57 = vshrl.u32 %v5785_v35, 16 }
  0xfc   : > { %6668 = vmatprep.subr.bf16.mxu1 %v7119_v61  ;;  %v4081_v10 = vor.u32 %v4080_v3, %v4077_v60  ;;  %v4150_v60 = vshll.u32 %v5785_v35, 16  ;;  %v4166_v5 = vshll.u32 %v5787_v52, 16  ;;  %v4204_v37 = vshll.u32 %v5792_v23, 16  ;;  %v5796_v52 = vld [vmem:[%s7188_s6 + $0x8c] sm:$0x1] }
  0xfd   : > { %v4097_v45 = vsel %vm7263_vm2, %v4092_v36, %v4096_v15  ;;  %v4116_v53 = vrot.slane %v4115_v46, 4  ;;  %v4149_v4 = vrot.slane %v4147_v57, 4  ;;  %v7101_v46 = vld [vmem:[%s7188_s6 + $0x240] sm:$0xff]  }
  0xfe   : > { %6403 = vmatmul.mubr.bf16.gmra.mrb[12].mxu1 %v7092_v32  ;;  %v4082_v21 = vrot.slane %v4081_v10, 4  ;;  %v5784_v32 = vld [vmem:[%s7188_s6 + $0x5c] sm:$0x1]  ;;  %v4152_v8 = vrot.slane %v4150_v60, 5  ;;  %v5790_v10 = vld [vmem:[%s7188_s6 + $0x74] sm:$0x1] }
  0xff   : > { %6406 = vmatprep.mubr.bf16.mxu1 %v7095_v50  ;;  %6676 = vmatpush3.bf16.msra.mxu1 %v7119_v61  ;;  %v4142_v40 = vshll.u32 %v5784_v32, 16  ;;  %v4134_v50 = vrot.slane %v4132_v43, 5  ;;  %v4156_v61 = vshll.u32 %v5786_v48, 16  ;;  %v4121_v2 = vsel %vm7263_vm2, %v4116_v53, %v4120_v38  ;;  %v5794_v38 = vld [vmem:[%s7188_s6 + $0x84] sm:$0xf] }
 0x100   : > { %6611 = vmatmul.mubr.bf16.gmra.mrb[28].mxu0 %v7093_v33  ;;  %v4087_v29 = vsel %vm7263_vm2, %v4082_v21, %v4086_v62  ;;  %v4123_v33 = vshrl.u32 %v5782_v17, 16  ;;  %v4153_v15 = vor.u32 %v4152_v8, %v4149_v4  ;;  %v4168_v16 = vrot.slane %v4166_v5, 5  ;;  %v5797_v60 = vld [vmem:[%s7188_s6 + $0x90] sm:$0xf] }
 0x101   : > { %6630 = vmatprep.mubr.bf16.mxu0 %v5828_v18  ;;  %v7120_v18 = vld [vmem:[%s8347_s1 + $0x138] sm:$0xff]   ;;  %v5832_v49 = vcombine.low %v4087_v29, %v4097_v45  ;;  %v4144_v56 = vrot.slane %v4142_v40, 5  ;;  %v4139_v59 = vor.u32 %v4138_v51, %v4134_v50  ;;  %v4158_v9 = vrot.slane %v4156_v61, 5 }
 0x102   : > { %6669 = vmatprep.subr.bf16.mxu1 %v7120_v18  ;;  %v4125_v42 = vrot.slane %v4123_v33, 4  ;;  %v4154_v25 = vrot.slane %v4153_v15, 4  ;;  %v4190_v27 = vshll.u32 %v5790_v10, 16  ;;  %v4198_v32 = vshll.u32 %v5791_v14, 16  ;;  %v5800_v15 = vld [vmem:[%s7188_s6 + $0x9c] sm:$0xf] }
 0x103   : > { %6677 = vmatpush3.bf16.msra.mxu1 %v7120_v18  ;;  %v4140_v7 = vrot.slane %v4139_v59, 4  ;;  %v4180_v18 = vshll.u32 %v5789_v54, 16  ;;  %v7796_v48 = vrot.slane %v4204_v37, 5  ;;  %v4214_v51 = vshll.u32 %v5793_v28, 16 }
 0x104   : > { %v4129_v55 = vor.u32 %v4128_v47, %v4125_v42  ;;  %v4159_v35 = vsel %vm7263_vm2, %v4154_v25, %v4158_v9  ;;  %v4192_v43 = vrot.slane %v4190_v27, 5  ;;  %v4200_v45 = vrot.slane %v4198_v32, 5  ;;  %v5802_v32 = vld [vmem:[%s7188_s6 + $0xa4] sm:$0x1] }
 0x105   : > { %v4182_v26 = vrot.slane %v4180_v18, 5  ;;  %v4219_v53 = vshrl.u32 %v5794_v38, 16  ;;  %v4222_v57 = vshll.u32 %v5794_v38, 16  ;;  %v4228_v59 = vshll.u32 %v5795_v39, 16 }
 0x106   : > { %6407 = vmatmul.mubr.bf16.gmra.mrb[16].mxu1 %v7096_v13  ;;  %v4130_v3 = vrot.slane %v4129_v55, 4  ;;  %v4162_v13 = vrot.slane %v4160_v63, 4  ;;  %v4216_v5 = vrot.slane %v4214_v51, 5  ;;  %v4238_v8 = vshll.u32 %v5796_v52, 16 }
 0x107   : > { %6410 = vmatprep.mubr.bf16.mxu1 %v7097_v19  ;;  %v4145_v19 = vsel %vm7263_vm2, %v4140_v7, %v4144_v56  ;;  %v4187_v42 = vor.u32 %v4186_v30, %v4182_v26  ;;  %v4224_v54 = vrot.slane %v4222_v57, 5  ;;  %v4232_v7 = vshrl.u32 %v5795_v39, 16 }
 0x108   : > { %6631 = vmatmul.mubr.bf16.vlgmr.msra.gmra.mrb[0].mxu0 %v7733_v34  ;;  %v4111_v34 = vsel %vm7263_vm2, %v4106_v41, %v4110_v31  ;;  %v4135_v12 = vsel %vm7263_vm2, %v4130_v3, %v4134_v50  ;;  %v4163_v20 = vor.u32 %v4162_v13, %v4158_v9  ;;  %v4195_v31 = vshrl.u32 %v5791_v14, 16  ;;  %v7100_v41 = vld [vmem:[%s7188_s6 + $0x234] sm:$0xff]  }
 0x109   : > { %6634 = vmatprep.mubr.bf16.mxu0 %v5830_v0  ;;  %v5788_v0 = vld [vmem:[%s7188_s6 + $0x6c] sm:$0xf]  ;;  %v5833_v11 = vcombine.low %v4111_v34, %v4121_v2  ;;  %v5834_v33 = vcombine.low %v4135_v12, %v4145_v19  ;;  %v4188_v34 = vrot.slane %v4187_v42, 4  ;;  %v5798_v2 = vld [vmem:[%s7188_s6 + $0x94] sm:$0xf]  ;;  %v4243_v10 = vshrl.u32 %v5797_v60, 16 }
 0x10a   : > { %v4171_v62 = vshrl.u32 %v5788_v0, 16  ;;  %v4174_v17 = vshll.u32 %v5788_v0, 16  ;;  %v4164_v29 = vrot.slane %v4163_v20, 4  ;;  %v4197_v44 = vrot.slane %v4195_v31, 4  ;;  %v5799_v9 = vld [vmem:[%s7188_s6 + $0x98] sm:$0x1] }
 0x10b   : > { %v4193_v63 = vsel %vm7263_vm2, %v4188_v34, %v4192_v43  ;;  %v4252_v14 = vshll.u32 %v5798_v2, 16  ;;  %v4234_v18 = vrot.slane %v4232_v7, 4  ;;  %v4245_v19 = vrot.slane %v4243_v10, 4  ;;  %v5807_v7 = vld [vmem:[%s7188_s6 + $0xb8] sm:$0xf] }
 0x10c   : > { %v4173_v21 = vrot.slane %v4171_v62, 4  ;;  %v4169_v47 = vsel %vm7263_vm2, %v4164_v29, %v4168_v16  ;;  %v4201_v50 = vor.u32 %v4200_v45, %v4197_v44  ;;  %v4246_v62 = vshll.u32 %v5797_v60, 16  ;;  %v7103_v16 = vld [vmem:[%s7188_s6 + $0x2c4] sm:$0xff]  }
 0x10d   : > { %v5835_v61 = vcombine.low %v4159_v35, %v4169_v47  ;;  %v4256_v20 = vshrl.u32 %v5798_v2, 16  ;;  %v4262_v29 = vshll.u32 %v5799_v9, 16  ;;  %v4270_v35 = vshll.u32 %v5800_v15, 16 }
 0x10e   : > { %6411 = vmatmul.mubr.bf16.gmra.mrb[20].mxu1 %v7098_v1  ;;  %v4202_v0 = vrot.slane %v4201_v50, 4  ;;  %v4221_v1 = vrot.slane %v4219_v53, 4  ;;  %v4248_v25 = vrot.slane %v4246_v62, 5  ;;  %v5805_v53 = vld [vmem:[%s7188_s6 + $0xb0] sm:$0x1] }
 0x10f   : > { %6414 = vmatprep.mubr.bf16.mxu1 %v7099_v6  ;;  %v4230_v6 = vrot.slane %v4228_v59, 5  ;;  %v4258_v28 = vrot.slane %v4256_v20, 4  ;;  %v4264_v39 = vrot.slane %v4262_v29, 5  ;;  %v4272_v44 = vrot.slane %v4270_v35, 5 }
 0x110   : > { %6635 = vmatmul.mubr.bf16.gmra.mrb[4].mxu0 %v5831_v24  ;;  %v4176_v24 = vrot.slane %v4174_v17, 5  ;;  %v4225_v13 = vor.u32 %v4224_v54, %v4221_v1  ;;  %v4207_v17 = vsel %vm7263_vm2, %v4202_v0, %v7796_v48  ;;  %v4249_v31 = vor.u32 %v4248_v25, %v4245_v19 }
 0x111   : > { %6638 = vmatprep.mubr.bf16.mxu0 %v5832_v49  ;;  %v4208_v49 = vshrl.u32 %v5792_v23, 16  ;;  %v4240_v23 = vrot.slane %v4238_v8, 5  ;;  %v4235_v27 = vor.u32 %v4234_v18, %v4230_v6  ;;  %v4324_v19 = vshll.u32 %v5807_v7, 16 }
 0x112   : > { %v4177_v36 = vor.u32 %v4176_v24, %v4173_v21  ;;  %v5801_v21 = vld [vmem:[%s7188_s6 + $0xa0] sm:$0xf]  ;;  %v4226_v22 = vrot.slane %v4225_v13, 4  ;;  %v4254_v24 = vrot.slane %v4252_v14, 5  ;;  %v4250_v42 = vrot.slane %v4249_v31, 4 }
 0x113   : > { %v4210_v56 = vrot.slane %v4208_v49, 4  ;;  %v4236_v37 = vrot.slane %v4235_v27, 4  ;;  %v4280_v45 = vshrl.u32 %v5801_v21, 16  ;;  %v5804_v49 = vld [vmem:[%s7188_s6 + $0xac] sm:$0xf]  ;;  %v4328_v20 = vshrl.u32 %v5807_v7, 16 }
 0x114   : > { %v4178_v40 = vrot.slane %v4177_v36, 4  ;;  %v4231_v30 = vsel %vm7263_vm2, %v4226_v22, %v4230_v6  ;;  %v5803_v36 = vld [vmem:[%s7188_s6 + $0xa8] sm:$0xf]  ;;  %v4259_v38 = vor.u32 %v4258_v28, %v4254_v24  ;;  %v4304_v54 = vshrl.u32 %v5804_v49, 16  ;;  %v5808_v14 = vld [vmem:[%s7188_s6 + $0xbc] sm:$0x1] }
 0x115   : > { %v4211_v4 = vor.u32 %v4210_v56, %v7796_v48  ;;  %v4286_v48 = vshll.u32 %v5802_v32, 16  ;;  %v4282_v52 = vrot.slane %v4280_v45, 4  ;;  %v4255_v56 = vsel %vm7263_vm2, %v4250_v42, %v4254_v24  ;;  %v5810_v24 = vld [vmem:[%s7188_s6 + $0xc4] sm:$0xf] }
 0x116   : > { %v4183_v55 = vsel %vm7263_vm2, %v4178_v40, %v4182_v26  ;;  %6415 = vmatmul.mubr.bf16.gmra.mrb[24].mxu1 %v7100_v41  ;;  %v4276_v41 = vshll.u32 %v5801_v21, 16  ;;  %v4260_v47 = vrot.slane %v4259_v38, 4  ;;  %v4291_v59 = vshrl.u32 %v5803_v36, 16 }
 0x117   : > { %6418 = vmatprep.mubr.bf16.mxu1 %v7101_v46  ;;  %v5836_v3 = vcombine.low %v4183_v55, %v4193_v63  ;;  %v4212_v12 = vrot.slane %v4211_v4, 4  ;;  %v4241_v46 = vsel %vm7263_vm2, %v4236_v37, %v4240_v23  ;;  %v7104_v55 = vld [vmem:[%s7188_s6 + $0x2d0] sm:$0xff]   ;;  %v4294_v60 = vshll.u32 %v5803_v36, 16  ;;  %v7105_v63 = vld [vmem:[%s7188_s6 + $0x2dc] sm:$0xff]  }
 0x118   : > { %6639 = vmatmul.mubr.bf16.gmra.mrb[8].mxu0 %v5833_v11  ;;  %v7102_v11 = vld [vmem:[%s7188_s6 + $0x24c] sm:$0xff]   ;;  %v4278_v40 = vrot.slane %v4276_v41, 5  ;;  %v5838_v50 = vcombine.low %v4231_v30, %v4241_v46  ;;  %v4265_v57 = vsel %vm7263_vm2, %v4260_v47, %v4264_v39  ;;  %v4288_v2 = vrot.slane %v4286_v48, 5  ;;  %v7107_v36 = vld [vmem:[%s7188_s6 + $0x2f4] sm:$0xff]   ;;  %v5811_v39 = vld [vmem:[%s7188_s6 + $0xc8] sm:$0x1] }
 0x119   : > { %6642 = vmatprep.mubr.bf16.mxu0 %v5834_v33  ;;  %v4217_v26 = vsel %vm7263_vm2, %v4212_v12, %v4216_v5  ;;  %v4267_v33 = vshrl.u32 %v5800_v15, 16  ;;  %v4293_v4 = vrot.slane %v4291_v59, 4  ;;  %v4296_v5 = vrot.slane %v4294_v60, 5  ;;  %v7106_v30 = vld [vmem:[%s7188_s6 + $0x2e8] sm:$0xff]  }
 0x11a   : > { %v5837_v34 = vcombine.low %v4207_v17, %v4217_v26  ;;  %v4283_v1 = vor.u32 %v4282_v52, %v4278_v40  ;;  %v4310_v6 = vshll.u32 %v5805_v53, 16  ;;  %v5839_v8 = vcombine.low %v4255_v56, %v4265_v57  ;;  %v7108_v56 = vld [vmem:[%s7188_s6 + $0x300] sm:$0xff]  }
 0x11b   : > { %v4269_v43 = vrot.slane %v4267_v33, 4  ;;  %v4297_v13 = vor.u32 %v4296_v5, %v4293_v4  ;;  %v4306_v62 = vrot.slane %v4304_v54, 4  ;;  %v4326_v26 = vrot.slane %v4324_v19, 5 }
 0x11c   : > { %v4284_v9 = vrot.slane %v4283_v1, 4  ;;  %v4312_v23 = vrot.slane %v4310_v6, 5  ;;  %v4330_v27 = vrot.slane %v4328_v20, 4  ;;  %v4334_v28 = vshll.u32 %v5808_v14, 16 }
 0x11d   : > { %v4273_v51 = vor.u32 %v4272_v44, %v4269_v43  ;;  %v4298_v21 = vrot.slane %v4297_v13, 4  ;;  %v4348_v42 = vshll.u32 %v5810_v24, 16  ;;  %v4352_v45 = vshrl.u32 %v5810_v24, 16 }
 0x11e   : > { %6419 = vmatmul.mubr.bf16.gmra.mrb[28].mxu1 %v7102_v11  ;;  %v4289_v17 = vsel %vm7263_vm2, %v4284_v9, %v4288_v2  ;;  %v4331_v37 = vor.u32 %v4330_v27, %v4326_v26  ;;  %v4336_v38 = vrot.slane %v4334_v28, 5 }
 0x11f   : > { %6454 = vmatprep.mubr.bf16.mxu1 %v7103_v16  ;;  %v4274_v0 = vrot.slane %v4273_v51, 4  ;;  %v5809_v16 = vld [vmem:[%s7188_s6 + $0xc0] sm:$0xf] }
 0x120   : > { %6643 = vmatmul.mubr.bf16.gmra.mrb[12].mxu0 %v5835_v61  ;;  %v5806_v61 = vld [vmem:[%s7188_s6 + $0xb4] sm:$0xf]  ;;  %v4339_v29 = vshrl.u32 %v5809_v16, 16  ;;  %v4342_v35 = vshll.u32 %v5809_v16, 16  ;;  %v4332_v47 = vrot.slane %v4331_v37, 4 }
 0x121   : > { %6646 = vmatprep.mubr.bf16.mxu0 %v5836_v3  ;;  %v4300_v3 = vshll.u32 %v5804_v49, 16  ;;  %v4315_v11 = vshrl.u32 %v5806_v61, 16  ;;  %v4279_v12 = vsel %vm7263_vm2, %v4274_v0, %v4278_v40  ;;  %v4318_v15 = vshll.u32 %v5806_v61, 16 }
 0x122   : > { %v5840_v31 = vcombine.low %v4279_v12, %v4289_v17  ;;  %v4341_v41 = vrot.slane %v4339_v29, 4  ;;  %v4344_v44 = vrot.slane %v4342_v35, 5  ;;  %v4350_v40 = vrot.slane %v4348_v42, 5 }
 0x123   : > { %v4302_v10 = vrot.slane %v4300_v3, 5  ;;  %v4317_v18 = vrot.slane %v4315_v11, 4  ;;  %v4320_v25 = vrot.slane %v4318_v15, 5  ;;  %v4337_v52 = vsel %vm7263_vm2, %v4332_v47, %v4336_v38  ;;  %v7110_v3 = vld [vmem:[%s7188_s6 + $0x318] sm:$0xff]  }
 0x124   : > { %v4345_v49 = vor.u32 %v4344_v44, %v4341_v41 }
 0x125   : > { %v4307_v22 = vor.u32 %v4306_v62, %v4302_v10  ;;  %v4321_v33 = vor.u32 %v4320_v25, %v4317_v18  ;;  %v4303_v46 = vsel %vm7263_vm2, %v4298_v21, %v4302_v10 }
 0x126   : > { %6455 = vmatmul.mubr.bf16.vlgmr.msra.gmra.mrb[16].mxu1 %v7104_v55  ;;  %v4346_v59 = vrot.slane %v4345_v49, 4 }
 0x127   : > { %6458 = vmatprep.mubr.bf16.mxu1 %v7105_v63  ;;  %v4308_v32 = vrot.slane %v4307_v22, 4  ;;  %v4322_v43 = vrot.slane %v4321_v33, 4  ;;  %v7109_v63 = vld [vmem:[%s7188_s6 + $0x30c] sm:$0xff]   ;;  %s5886_s6 = sshll.u32 %s8366_s10, 7 }
 0x128   : > { %6647 = vmatmul.mubr.bf16.gmra.mrb[16].mxu0 %v5837_v34  ;;  %v4354_v34 = vrot.slane %v4352_v45, 4  ;;  %v4351_v0 = vsel %vm7263_vm2, %v4346_v59, %v4350_v40  ;;  %s8305_s25 = scalar_lea.vmem %s8348_s2, %s5886_s6 }
 0x129   : > { %6650 = vmatprep.mubr.bf16.mxu0 %v5838_v50  ;;  %v4313_v48 = vsel %vm7263_vm2, %v4308_v32, %v4312_v23  ;;  %v4358_v50 = vshll.u32 %v5811_v39, 16  ;;  %v4327_v51 = vsel %vm7263_vm2, %v4322_v43, %v4326_v26 }
 0x12a   : > { %v4355_v53 = vor.u32 %v4354_v34, %v4350_v40  ;;  %v5841_v55 = vcombine.low %v4303_v46, %v4313_v48  ;;  %v5842_v57 = vcombine.low %v4327_v51, %v4337_v52 }
 0x12b   : > { %v4360_v61 = vrot.slane %v4358_v50, 5 }
 0x12c   : > { %v4356_v60 = vrot.slane %v4355_v53, 4 }
 0x12e   : > { %6459 = vmatmul.mubr.bf16.gmra.mrb[20].mxu1 %v7106_v30  ;;  %v4361_v1 = vsel %vm7263_vm2, %v4356_v60, %v4360_v61 }
 0x12f   : > { %6462 = vmatprep.mubr.bf16.mxu1 %v7107_v36  ;;  %v5843_v2 = vcombine.low %v4351_v0, %v4361_v1 }
 0x130   : > { %6651 = vmatmul.mubr.bf16.gmra.mrb[20].mxu0 %v5839_v8 }
 0x131   : > { %6654 = vmatprep.mubr.bf16.mxu0 %v5840_v31 }
 0x136   : > { %6463 = vmatmul.mubr.bf16.gmra.mrb[24].mxu1 %v7108_v56 }
 0x137   : > { %6466 = vmatprep.mubr.bf16.mxu1 %v7109_v63 }
 0x138   : > { %6655 = vmatmul.mubr.bf16.gmra.mrb[24].mxu0 %v5841_v55 }
 0x139   : > { %6658 = vmatprep.mubr.bf16.mxu0 %v5842_v57 }
 0x13e   : > { %6467 = vmatmul.mubr.bf16.gmra.mrb[28].mxu1 %v7110_v3 }
 0x140   : > { %6659 = vmatmul.mubr.bf16.gmra.mrb[28].mxu0 %v5843_v2 }
 0x1b9   : > { %v6392_v4 = vpop.f32.mrb[0].mxu1 }
 0x1ba   : > { %v1847_v5 = vpop.f32.mrb[1].mxu1 }
 0x1bb   : > { %v6393_v54 = vpop.f32.mrb[2].mxu1 }
 0x1bc   : > { %v1850_v6 = vpop.f32.mrb[3].mxu1 }
 0x1c1   : > { %v6396_v7 = vpop.f32.mrb[4].mxu1 }
 0x1c2   : > { %v1863_v8 = vpop.f32.mrb[5].mxu1 }
 0x1c3   : > { %v6397_v9 = vpop.f32.mrb[6].mxu1 }
 0x1c4   : > { %v1866_v10 = vpop.f32.mrb[7].mxu1 }
 0x1c9   : > { %v6400_v11 = vpop.f32.mrb[8].mxu1 }
 0x1ca   : > { %v1879_v12 = vpop.f32.mrb[9].mxu1 }
 0x1cb   : > { %v6401_v13 = vpop.f32.mrb[10].mxu1 }
 0x1cc   : > { %v1882_v62 = vpop.f32.mrb[11].mxu1 }
 0x1d1   : > { %v6404_v14 = vpop.f32.mrb[12].mxu1 }
 0x1d2   : > { %v1895_v58 = vpop.f32.mrb[13].mxu1 }
 0x1d3   : > { %v7857_v15 = vpop.f32.mrb[14].mxu1 }
 0x1d4   : > { %v7859_v16 = vpop.f32.mrb[15].mxu1 }
 0x1db   : > { %v6632_v17 = vpop.f32.mrb[0].mxu0 }
 0x1dc   : > { %v7861_v18 = vadd.f32 %v6632_v17, %v6392_v4  ;;  %v4525_v19 = vpop.f32.mrb[1].mxu0 }
 0x1dd   : > { %v7863_v20 = vadd.f32 %v4525_v19, %v1847_v5  ;;  %v6633_v21 = vpop.f32.mrb[2].mxu0 }
 0x1de   : > { %v7865_v22 = vadd.f32 %v6633_v21, %v6393_v54  ;;  %v4528_v23 = vpop.f32.mrb[3].mxu0  ;;  %v4756_v28 = vmul.f32 %v7861_v18, %v7861_v18 }
 0x1df   : > { %v7867_v25 = vadd.f32 %v4528_v23, %v1850_v6  ;;  %v4754_v24 = vmul.f32 %v7863_v20, %v7863_v20 }
 0x1e0   : > { %v4757_v35 = vmul.f32 %v7865_v22, %v7865_v22 }
 0x1e1   : > { %v4716_v26 = vadd.f32 %v7867_v25, %v7863_v20  ;;  %v4755_v27 = vmul.f32 %v7867_v25, %v7867_v25 }
 0x1e3   : > { %v4717_v29 = vadd.f32 %v7861_v18, %v4716_v26  ;;  %v4786_v30 = vadd.f32 %v4755_v27, %v4754_v24  ;;  %v6636_v31 = vpop.f32.mrb[4].mxu0 }
 0x1e4   : > { %v7878_v32 = vadd.f32 %v6636_v31, %v6396_v7  ;;  %v4541_v33 = vpop.f32.mrb[5].mxu0 }
 0x1e5   : > { %v4787_v36 = vadd.f32 %v4786_v30, %v4756_v28  ;;  %v7882_v37 = vadd.f32 %v4541_v33, %v1863_v8  ;;  %v4718_v38 = vadd.f32 %v7865_v22, %v4717_v29  ;;  %v6637_v39 = vpop.f32.mrb[6].mxu0 }
 0x1e6   : > { %v7885_v41 = vadd.f32 %v6637_v39, %v6397_v9  ;;  %v4544_v42 = vpop.f32.mrb[7].mxu0  ;;  %v4760_v49 = vmul.f32 %v7878_v32, %v7878_v32 }
 0x1e7   : > { %v4719_v43 = vadd.f32 %v7882_v37, %v4718_v38  ;;  %v4758_v44 = vmul.f32 %v7882_v37, %v7882_v37  ;;  %v4788_v45 = vadd.f32 %v4787_v36, %v4757_v35  ;;  %v7890_v46 = vadd.f32 %v4544_v42, %v1866_v10 }
 0x1e8   : > { %v4761_v55 = vmul.f32 %v7885_v41, %v7885_v41 }
 0x1e9   : > { %v4789_v47 = vadd.f32 %v4788_v45, %v4758_v44  ;;  %v4720_v40 = vadd.f32 %v7890_v46, %v4719_v43  ;;  %v4759_v48 = vmul.f32 %v7890_v46, %v7890_v46 }
 0x1eb   : > { %v4721_v34 = vadd.f32 %v7878_v32, %v4720_v40  ;;  %v4790_v50 = vadd.f32 %v4789_v47, %v4759_v48  ;;  %v6640_v51 = vpop.f32.mrb[8].mxu0 }
 0x1ec   : > { %v7898_v52 = vadd.f32 %v6640_v51, %v6400_v11  ;;  %v4557_v53 = vpop.f32.mrb[9].mxu0 }
 0x1ed   : > { %v4791_v56 = vadd.f32 %v4790_v50, %v4760_v49  ;;  %v7902_v57 = vadd.f32 %v4557_v53, %v1879_v12  ;;  %v4722_v59 = vadd.f32 %v7885_v41, %v4721_v34  ;;  %v6641_v60 = vpop.f32.mrb[10].mxu0 }
 0x1ee   : > { %v7905_v61 = vadd.f32 %v6641_v60, %v6401_v13  ;;  %v4560_v63 = vpop.f32.mrb[11].mxu0  ;;  %v4764_v6 = vmul.f32 %v7898_v52, %v7898_v52 }
 0x1ef   : > { %v4723_v0 = vadd.f32 %v7902_v57, %v4722_v59  ;;  %v4762_v1 = vmul.f32 %v7902_v57, %v7902_v57  ;;  %v4792_v2 = vadd.f32 %v4791_v56, %v4761_v55  ;;  %v7910_v3 = vadd.f32 %v4560_v63, %v1882_v62 }
 0x1f0   : > { %v4765_v12 = vmul.f32 %v7905_v61, %v7905_v61 }
 0x1f1   : > { %v4793_v4 = vadd.f32 %v4792_v2, %v4762_v1  ;;  %v4724_v5 = vadd.f32 %v7910_v3, %v4723_v0  ;;  %v4763_v54 = vmul.f32 %v7910_v3, %v7910_v3 }
 0x1f3   : > { %v4725_v7 = vadd.f32 %v7898_v52, %v4724_v5  ;;  %v4794_v8 = vadd.f32 %v4793_v4, %v4763_v54  ;;  %v6644_v9 = vpop.f32.mrb[12].mxu0 }
 0x1f4   : > { %v7918_v10 = vadd.f32 %v6644_v9, %v6404_v14  ;;  %v4573_v11 = vpop.f32.mrb[13].mxu0 }
 0x1f5   : > { %v4795_v13 = vadd.f32 %v4794_v8, %v4764_v6  ;;  %v7922_v62 = vadd.f32 %v4573_v11, %v1895_v58  ;;  %v4726_v17 = vadd.f32 %v7905_v61, %v4725_v7  ;;  %v6645_v19 = vpop.f32.mrb[14].mxu0 }
 0x1f6   : > { %v7926_v21 = vadd.f32 %v6645_v19, %v7857_v15  ;;  %v4576_v23 = vpop.f32.mrb[15].mxu0  ;;  %v4768_v15 = vmul.f32 %v7918_v10, %v7918_v10 }
 0x1f7   : > { %v4727_v24 = vadd.f32 %v7922_v62, %v4726_v17  ;;  %v4766_v14 = vmul.f32 %v7922_v62, %v7922_v62  ;;  %v4796_v26 = vadd.f32 %v4795_v13, %v4765_v12  ;;  %v7932_v27 = vadd.f32 %v4576_v23, %v7859_v16 }
 0x1f8   : > { %v4769_v38 = vmul.f32 %v7926_v21, %v7926_v21 }
 0x1f9   : > { %v4797_v28 = vadd.f32 %v4796_v26, %v4766_v14  ;;  %v4728_v58 = vadd.f32 %v7932_v27, %v4727_v24  ;;  %v4767_v29 = vmul.f32 %v7932_v27, %v7932_v27  ;;  %v6456_v35 = vpop.f32.mrb[16].mxu1 }
 0x1fa   : > { %v2301_v42 = vpop.f32.mrb[17].mxu1 }
 0x1fb   : > { %v4729_v30 = vadd.f32 %v7918_v10, %v4728_v58  ;;  %v4798_v31 = vadd.f32 %v4797_v28, %v4767_v29  ;;  %v6648_v33 = vpop.f32.mrb[16].mxu0  ;;  %v6457_v47 = vpop.f32.mrb[18].mxu1 }
 0x1fc   : > { %v4589_v36 = vpop.f32.mrb[17].mxu0  ;;  %v7942_v39 = vadd.f32 %v6648_v33, %v6456_v35  ;;  %v2304_v34 = vpop.f32.mrb[19].mxu1 }
 0x1fd   : > { %v4799_v16 = vadd.f32 %v4798_v31, %v4768_v15  ;;  %v4730_v43 = vadd.f32 %v7926_v21, %v4729_v30  ;;  %v6649_v44 = vpop.f32.mrb[18].mxu0  ;;  %v7945_v45 = vadd.f32 %v4589_v36, %v2301_v42 }
 0x1fe   : > { %v4592_v40 = vpop.f32.mrb[19].mxu0  ;;  %v7947_v49 = vadd.f32 %v6649_v44, %v6457_v47  ;;  %v4772_v63 = vmul.f32 %v7942_v39, %v7942_v39 }
 0x1ff   : > { %v4800_v48 = vadd.f32 %v4799_v16, %v4769_v38  ;;  %v4731_v50 = vadd.f32 %v7945_v45, %v4730_v43  ;;  %v4770_v51 = vmul.f32 %v7945_v45, %v7945_v45  ;;  %v7952_v53 = vadd.f32 %v4592_v40, %v2304_v34 }
 0x200   : > { %v4773_v7 = vmul.f32 %v7947_v49, %v7947_v49 }
 0x201   : > { %v4801_v55 = vadd.f32 %v4800_v48, %v4770_v51  ;;  %v4732_v56 = vadd.f32 %v7952_v53, %v4731_v50  ;;  %v4771_v59 = vmul.f32 %v7952_v53, %v7952_v53  ;;  %v6460_v2 = vpop.f32.mrb[20].mxu1 }
 0x202   : > { %v2317_v54 = vpop.f32.mrb[21].mxu1 }
 0x203   : > { %v6652_v60 = vpop.f32.mrb[20].mxu0  ;;  %v4733_v0 = vadd.f32 %v7942_v39, %v4732_v56  ;;  %v4802_v1 = vadd.f32 %v4801_v55, %v4771_v59  ;;  %v6461_v12 = vpop.f32.mrb[22].mxu1 }
 0x204   : > { %v4605_v4 = vpop.f32.mrb[21].mxu0  ;;  %v7960_v5 = vadd.f32 %v6652_v60, %v6460_v2  ;;  %v2320_v19 = vpop.f32.mrb[23].mxu1 }
 0x205   : > { %v6653_v6 = vpop.f32.mrb[22].mxu0  ;;  %v4803_v8 = vadd.f32 %v4802_v1, %v4772_v63  ;;  %v7964_v9 = vadd.f32 %v4605_v4, %v2317_v54  ;;  %v4734_v11 = vadd.f32 %v7947_v49, %v4733_v0 }
 0x206   : > { %v4608_v13 = vpop.f32.mrb[23].mxu0  ;;  %v7967_v17 = vadd.f32 %v6653_v6, %v6461_v12  ;;  %v4776_v30 = vmul.f32 %v7960_v5, %v7960_v5 }
 0x207   : > { %v4735_v23 = vadd.f32 %v7964_v9, %v4734_v11  ;;  %v4774_v24 = vmul.f32 %v7964_v9, %v7964_v9  ;;  %v4804_v14 = vadd.f32 %v4803_v8, %v4773_v7  ;;  %v7972_v26 = vadd.f32 %v4608_v13, %v2320_v19 }
 0x208   : > { %v4777_v43 = vmul.f32 %v7967_v17, %v7967_v17 }
 0x209   : > { %v4805_v28 = vadd.f32 %v4804_v14, %v4774_v24  ;;  %v4736_v58 = vadd.f32 %v7972_v26, %v4735_v23  ;;  %v4775_v29 = vmul.f32 %v7972_v26, %v7972_v26  ;;  %v6464_v35 = vpop.f32.mrb[24].mxu1 }
 0x20a   : > { %v2333_v16 = vpop.f32.mrb[25].mxu1 }
 0x20b   : > { %v6656_v15 = vpop.f32.mrb[24].mxu0  ;;  %v4737_v31 = vadd.f32 %v7960_v5, %v4736_v58  ;;  %v4806_v33 = vadd.f32 %v4805_v28, %v4775_v29  ;;  %v6465_v48 = vpop.f32.mrb[26].mxu1 }
 0x20c   : > { %v4621_v36 = vpop.f32.mrb[25].mxu0  ;;  %v7980_v38 = vadd.f32 %v6656_v15, %v6464_v35  ;;  %v2336_v51 = vpop.f32.mrb[27].mxu1 }
 0x20d   : > { %v6657_v42 = vpop.f32.mrb[26].mxu0  ;;  %v4807_v44 = vadd.f32 %v4806_v33, %v4776_v30  ;;  %v7984_v47 = vadd.f32 %v4621_v36, %v2333_v16  ;;  %v4738_v40 = vadd.f32 %v7967_v17, %v4737_v31 }
 0x20e   : > { %v4624_v34 = vpop.f32.mrb[27].mxu0  ;;  %v7987_v50 = vadd.f32 %v6657_v42, %v6465_v48  ;;  %v4780_v4 = vmul.f32 %v7980_v38, %v7980_v38 }
 0x20f   : > { %v4739_v55 = vadd.f32 %v7984_v47, %v4738_v40  ;;  %v4778_v56 = vmul.f32 %v7984_v47, %v7984_v47  ;;  %v4808_v59 = vadd.f32 %v4807_v44, %v4777_v43  ;;  %v7992_v60 = vadd.f32 %v4624_v34, %v2336_v51 }
 0x210   : > { %v4781_v19 = vmul.f32 %v7987_v50, %v7987_v50 }
 0x211   : > { %v4809_v63 = vadd.f32 %v4808_v59, %v4778_v56  ;;  %v4740_v0 = vadd.f32 %v7992_v60, %v4739_v55  ;;  %v4779_v1 = vmul.f32 %v7992_v60, %v7992_v60  ;;  %v6468_v7 = vpop.f32.mrb[28].mxu1 }
 0x212   : > { %v2349_v12 = vpop.f32.mrb[29].mxu1 }
 0x213   : > { %v6660_v2 = vpop.f32.mrb[28].mxu0  ;;  %v4741_v54 = vadd.f32 %v7980_v38, %v4740_v0  ;;  %v4810_v6 = vadd.f32 %v4809_v63, %v4779_v1  ;;  %v6469_v28 = vpop.f32.mrb[30].mxu1 }
 0x214   : > { %v4637_v8 = vpop.f32.mrb[29].mxu0  ;;  %v8000_v11 = vadd.f32 %v6660_v2, %v6468_v7  ;;  %v2352_v15 = vpop.f32.mrb[31].mxu1 }
 0x215   : > { %v6661_v13 = vpop.f32.mrb[30].mxu0  ;;  %v4811_v23 = vadd.f32 %v4810_v6, %v4780_v4  ;;  %v8004_v24 = vadd.f32 %v4637_v8, %v2349_v12  ;;  %v4742_v14 = vadd.f32 %v7987_v50, %v4741_v54 }
 0x216   : > { %v4640_v58 = vpop.f32.mrb[31].mxu0  ;;  %v8007_v29 = vadd.f32 %v6661_v13, %v6469_v28  ;;  %v4784_v43 = vmul.f32 %v8000_v11, %v8000_v11 }
 0x217   : > { %v4743_v30 = vadd.f32 %v8004_v24, %v4742_v14  ;;  %v4782_v31 = vmul.f32 %v8004_v24, %v8004_v24  ;;  %v4812_v33 = vadd.f32 %v4811_v23, %v4781_v19  ;;  %v8012_v35 = vadd.f32 %v4640_v58, %v2352_v15 }
 0x218   : > { %v4785_v48 = vmul.f32 %v8007_v29, %v8007_v29 }
 0x219   : > { %v4813_v36 = vadd.f32 %v4812_v33, %v4782_v31  ;;  %v4744_v16 = vadd.f32 %v8012_v35, %v4743_v30  ;;  %v4783_v42 = vmul.f32 %v8012_v35, %v8012_v35 }
 0x21b   : > { %v4745_v44 = vadd.f32 %v8000_v11, %v4744_v16  ;;  %v4814_v40 = vadd.f32 %v4813_v36, %v4783_v42 }
 0x21d   : > { %v4746_v34 = vadd.f32 %v8007_v29, %v4745_v44  ;;  %v4815_v51 = vadd.f32 %v4814_v40, %v4784_v43 }
 0x21f   : > { %v4747_v55 = vrot.slane %v4746_v34, 4  ;;  %v4816_v56 = vadd.f32 %v4815_v51, %v4785_v48 }
 0x221   : > { %v4748_v59 = vadd.f32 %v4747_v55, %v4746_v34  ;;  %v4817_v63 = vrot.slane %v4816_v56, 4 }
 0x223   : > { %v4749_v0 = vrot.slane %v4748_v59, 2  ;;  %v4818_v1 = vadd.f32 %v4817_v63, %v4816_v56 }
 0x225   : > { %v4750_v2 = vadd.f32 %v4749_v0, %v4748_v59  ;;  %v4819_v4 = vrot.slane %v4818_v1, 2 }
 0x227   : > { %v4751_v54 = vrot.slane %v4750_v2, 1  ;;  %v4820_v6 = vadd.f32 %v4819_v4, %v4818_v1 }
 0x229   : > { %v4752_v7 = vadd.f32 %v4751_v54, %v4750_v2  ;;  %v4821_v8 = vrot.slane %v4820_v6, 1 }
 0x22b   : > { %v4822_v12 = vadd.f32 %v4821_v8, %v4820_v6  ;;  %v8023_v13 = vmul.f32 0.00390625, %v4752_v7 }
 0x22d   : > { %v4826_v19 = vmul.f32 0.00390625, %v4822_v12  ;;  %v4827_v23 = vmul.f32 %v8023_v13, %v8023_v13  ;;  %v4873_v28 = vsub.f32 %v7910_v3, %v8023_v13  ;;  %v4876_v58 = vsub.f32 %v7922_v62, %v8023_v13 }
 0x22e   : > { %v4877_v30 = vsub.f32 %v7932_v27, %v8023_v13  ;;  %v4878_v31 = vsub.f32 %v7918_v10, %v8023_v13  ;;  %v4879_v33 = vsub.f32 %v7926_v21, %v8023_v13  ;;  %v4880_v36 = vsub.f32 %v7945_v45, %v8023_v13 }
 0x22f   : > { %v4828_v14 = vsub.f32 %v4826_v19, %v4827_v23  ;;  %v4881_v16 = vsub.f32 %v7952_v53, %v8023_v13  ;;  %v4882_v3 = vsub.f32 %v7942_v39, %v8023_v13  ;;  %v4883_v62 = vsub.f32 %v7947_v49, %v8023_v13 }
 0x230   : > { %v4884_v27 = vsub.f32 %v7964_v9, %v8023_v13  ;;  %v4885_v10 = vsub.f32 %v7972_v26, %v8023_v13  ;;  %v4886_v21 = vsub.f32 %v7960_v5, %v8023_v13  ;;  %v4887_v45 = vsub.f32 %v7967_v17, %v8023_v13 }
 0x231   : > { %v4829_v15 = vmax.f32 %v4828_v14, 0.0  ;;  %v4888_v53 = vsub.f32 %v7984_v47, %v8023_v13  ;;  %v4889_v39 = vsub.f32 %v7992_v60, %v8023_v13  ;;  %v4890_v49 = vsub.f32 %v7980_v38, %v8023_v13 }
 0x232   : > { %v4891_v9 = vsub.f32 %v7987_v50, %v8023_v13  ;;  %v4892_v26 = vsub.f32 %v8004_v24, %v8023_v13  ;;  %v4893_v5 = vsub.f32 %v8012_v35, %v8023_v13  ;;  %v4894_v17 = vsub.f32 %v8000_v11, %v8023_v13 }
 0x233   : > { %v4830_v42 = vadd.f32 1e-05, %v4829_v15  ;;  %v4895_v47 = vsub.f32 %v8007_v29, %v8023_v13  ;;  %v4864_v60 = vsub.f32 %v7863_v20, %v8023_v13  ;;  %v4865_v38 = vsub.f32 %v7867_v25, %v8023_v13 }
 0x234   : > { %v4866_v50 = vsub.f32 %v7861_v18, %v8023_v13  ;;  %v4867_v24 = vsub.f32 %v7865_v22, %v8023_v13  ;;  %v4868_v35 = vsub.f32 %v7882_v37, %v8023_v13  ;;  %v4869_v11 = vsub.f32 %v7890_v46, %v8023_v13 }
 0x235   : > { %7111 = vrsqrt.f32 %v4830_v42  ;;  %v4870_v29 = vsub.f32 %v7878_v32, %v8023_v13  ;;  %v4871_v20 = vsub.f32 %v7885_v41, %v8023_v13  ;;  %v4872_v25 = vsub.f32 %v7902_v57, %v8023_v13 }
 0x236   : > { %v4874_v18 = vsub.f32 %v7898_v52, %v8023_v13  ;;  %v4875_v22 = vsub.f32 %v7905_v61, %v8023_v13 }
 0x23f   : > { %v7112_v43 = vpop.eup %7111 }
 0x240   : > { %v8091_v37 = vmul.f32 %v7112_v43, %v4864_v60  ;;  %v8093_v44 = vmul.f32 %v7112_v43, %v4865_v38  ;;  %v8095_v46 = vmul.f32 %v7112_v43, %v4866_v50  ;;  %v8097_v32 = vmul.f32 %v7112_v43, %v4867_v24 }
 0x241   : > { %v8099_v40 = vmul.f32 %v7112_v43, %v4868_v35  ;;  %v8101_v41 = vmul.f32 %v7112_v43, %v4869_v11  ;;  %v8103_v48 = vmul.f32 %v7112_v43, %v4870_v29  ;;  %v8105_v57 = vmul.f32 %v7112_v43, %v4871_v20 }
 0x242   : > { %v8107_v52 = vmul.f32 %v7112_v43, %v4872_v25  ;;  %v8109_v34 = vmul.f32 %v7112_v43, %v4873_v28  ;;  %v8111_v61 = vmul.f32 %v7112_v43, %v4874_v18  ;;  %v8113_v51 = vmul.f32 %v7112_v43, %v4875_v22 }
 0x243   : > { %v8115_v55 = vmul.f32 %v7112_v43, %v4876_v58  ;;  %v8117_v56 = vmul.f32 %v7112_v43, %v4877_v30  ;;  %v8119_v59 = vmul.f32 %v7112_v43, %v4878_v31  ;;  %v8121_v63 = vmul.f32 %v7112_v43, %v4879_v33 }
 0x244   : > { %v8123_v0 = vmul.f32 %v7112_v43, %v4880_v36  ;;  %v8125_v1 = vmul.f32 %v7112_v43, %v4881_v16  ;;  %v8127_v2 = vmul.f32 %v7112_v43, %v4882_v3  ;;  %v8129_v4 = vmul.f32 %v7112_v43, %v4883_v62 }
 0x245   : > { %v8131_v54 = vmul.f32 %v7112_v43, %v4884_v27  ;;  %v8133_v6 = vmul.f32 %v7112_v43, %v4885_v10  ;;  %v8135_v7 = vmul.f32 %v7112_v43, %v4886_v21  ;;  %v8137_v8 = vmul.f32 %v7112_v43, %v4887_v45 }
 0x246   : > { %v8139_v12 = vmul.f32 %v7112_v43, %v4888_v53  ;;  %v8141_v13 = vmul.f32 %v7112_v43, %v4889_v39  ;;  %v8143_v19 = vmul.f32 %v7112_v43, %v4890_v49  ;;  %v8145_v23 = vmul.f32 %v7112_v43, %v4891_v9 }
 0x247   : > { %v8147_v14 = vmul.f32 %v7112_v43, %v4892_v26  ;;  %v8149_v28 = vmul.f32 %v7112_v43, %v4893_v5  ;;  %v8151_v58 = vmul.f32 %v7112_v43, %v4894_v17  ;;  %v8153_v15 = vmul.f32 %v7112_v43, %v4895_v47 }
 0x248   : > { %vm4928_vm3 = vcmp.ge.f32.partialorder %v8091_v37, 0.0  ;;  %vm4929_vm4 = vcmp.ge.f32.partialorder %v8093_v44, 0.0  ;;  %vm4930_vm5 = vcmp.ge.f32.partialorder %v8095_v46, 0.0  ;;  %vm4931_vm6 = vcmp.ge.f32.partialorder %v8097_v32, 0.0 }
 0x249   : > { %vm4932_vm7 = vcmp.ge.f32.partialorder %v8099_v40, 0.0  ;;  %vm4933_vm8 = vcmp.ge.f32.partialorder %v8101_v41, 0.0  ;;  %vm4934_vm9 = vcmp.ge.f32.partialorder %v8103_v48, 0.0  ;;  %vm4935_vm10 = vcmp.ge.f32.partialorder %v8105_v57, 0.0 }
 0x24a   : > { %vm4936_vm11 = vcmp.ge.f32.partialorder %v8107_v52, 0.0  ;;  %v4960_v30 = vmul.f32 0.2, %v8091_v37  ;;  %v4961_v31 = vmul.f32 0.2, %v8093_v44  ;;  %vm4943_vm2 = vcmp.ge.f32.partialorder %v8121_v63, 0.0 }
 0x24b   : > { %v4962_v33 = vmul.f32 0.2, %v8095_v46  ;;  %vm4944_vm12 = vcmp.ge.f32.partialorder %v8123_v0, 0.0  ;;  %v4963_v36 = vmul.f32 0.2, %v8097_v32  ;;  %vm4949_vm1 = vcmp.ge.f32.partialorder %v8133_v6, 0.0 }
 0x24c   : > { %v4964_v16 = vmul.f32 0.2, %v8099_v40  ;;  %v4965_v3 = vmul.f32 0.2, %v8101_v41  ;;  %v4966_v62 = vmul.f32 0.2, %v8103_v48  ;;  %v8189_v10 = vsel %vm4928_vm3, %v8091_v37, %v4960_v30 }
 0x24d   : > { %v4967_v42 = vmul.f32 0.2, %v8105_v57  ;;  %v4968_v27 = vmul.f32 0.2, %v8107_v52  ;;  %vm4953_vm14 = vcmp.ge.f32.partialorder %v8141_v13, 0.0  ;;  %v8201_v39 = vsel %vm4929_vm4, %v8093_v44, %v4961_v31 }
 0x24e   : > { %v4969_v21 = vmul.f32 0.2, %v8109_v34  ;;  %v4970_v45 = vmul.f32 0.2, %v8111_v61  ;;  %v4971_v53 = vmul.f32 0.2, %v8113_v51  ;;  %v4994_v5 = vsel %vm4930_vm5, %v8095_v46, %v4962_v33 }
 0x24f   : > { %vm4955_vm13 = vcmp.ge.f32.partialorder %v8145_v23, 0.0  ;;  %vm4956_vm0 = vcmp.ge.f32.partialorder %v8147_v14, 0.0  ;;  %vm4957_vm15 = vcmp.ge.f32.partialorder %v8149_v28, 0.0  ;;  %v4972_v49 = vmul.f32 0.2, %v8115_v55 }
 0x250   : > { %v4973_v9 = vmul.f32 0.2, %v8117_v56  ;;  %v4974_v26 = vmul.f32 0.2, %v8119_v59  ;;  %vm4958_vm4 = vcmp.ge.f32.partialorder %v8151_v58, 0.0  ;;  %vm4959_vm3 = vcmp.ge.f32.partialorder %v8153_v15, 0.0 }
 0x251   : > { %v4975_v17 = vmul.f32 0.2, %v8121_v63  ;;  %v4976_v47 = vmul.f32 0.2, %v8123_v0  ;;  %v4977_v60 = vmul.f32 0.2, %v8125_v1  ;;  %v4995_v38 = vsel %vm4931_vm6, %v8097_v32, %v4963_v36 }
 0x252   : > { %v4978_v50 = vmul.f32 0.2, %v8127_v2  ;;  %v4979_v24 = vmul.f32 0.2, %v8129_v4  ;;  %v4980_v35 = vmul.f32 0.2, %v8131_v54  ;;  %v4996_v11 = vsel %vm4932_vm7, %v8099_v40, %v4964_v16 }
 0x253   : > { %v4981_v29 = vmul.f32 0.2, %v8133_v6  ;;  %v4982_v43 = vmul.f32 0.2, %v8135_v7  ;;  %v4983_v20 = vmul.f32 0.2, %v8137_v8  ;;  %v4997_v25 = vsel %vm4933_vm8, %v8101_v41, %v4965_v3 }
 0x254   : > { %v4984_v18 = vmul.f32 0.2, %v8139_v12  ;;  %v4985_v22 = vmul.f32 0.2, %v8141_v13  ;;  %v4986_v37 = vmul.f32 0.2, %v8143_v19  ;;  %v4998_v44 = vsel %vm4934_vm9, %v8103_v48, %v4966_v62 }
 0x255   : > { %v4987_v46 = vmul.f32 0.2, %v8145_v23  ;;  %v4988_v32 = vmul.f32 0.2, %v8147_v14  ;;  %v4989_v40 = vmul.f32 0.2, %v8149_v28  ;;  %v4999_v41 = vsel %vm4935_vm10, %v8105_v57, %v4967_v42 }
 0x256   : > { %v4990_v30 = vmul.f32 0.2, %v8151_v58  ;;  %v4991_v31 = vmul.f32 0.2, %v8153_v15  ;;  %v5000_v33 = vsel %vm4936_vm11, %v8107_v52, %v4968_v27  ;;  %vm8351_vm5 = vcmp.ge.f32.partialorder %v8109_v34, 0.0 }
 0x257   : > { %v5001_v48 = vsel %vm8351_vm5, %v8109_v34, %v4969_v21  ;;  %vm8352_vm6 = vcmp.ge.f32.partialorder %v8111_v61, 0.0  ;;  %vm8353_vm7 = vcmp.ge.f32.partialorder %v8113_v51, 0.0  ;;  %vm8354_vm8 = vcmp.ge.f32.partialorder %v8115_v55, 0.0 }
 0x258   : > { %v5002_v36 = vsel %vm8352_vm6, %v8111_v61, %v4970_v45  ;;  %v5003_v57 = vsel %vm8353_vm7, %v8113_v51, %v4971_v53  ;;  %v5004_v16 = vsel %vm8354_vm8, %v8115_v55, %v4972_v49  ;;  %vm8355_vm9 = vcmp.ge.f32.partialorder %v8117_v56, 0.0 }
 0x259   : > { %v5005_v52 = vsel %vm8355_vm9, %v8117_v56, %v4973_v9  ;;  %vm8356_vm10 = vcmp.ge.f32.partialorder %v8119_v59, 0.0  ;;  %v5007_v61 = vsel %vm4943_vm2, %v8121_v63, %v4975_v17  ;;  %v5008_v51 = vsel %vm4944_vm12, %v8123_v0, %v4976_v47 }
 0x25a   : > { %v5006_v34 = vsel %vm8356_vm10, %v8119_v59, %v4974_v26  ;;  %vm8357_vm11 = vcmp.ge.f32.partialorder %v8125_v1, 0.0  ;;  %vm8358_vm5 = vcmp.ge.f32.partialorder %v8127_v2, 0.0  ;;  %vm8359_vm6 = vcmp.ge.f32.partialorder %v8129_v4, 0.0 }
 0x25b   : > { %v5009_v55 = vsel %vm8357_vm11, %v8125_v1, %v4977_v60  ;;  %v5010_v56 = vsel %vm8358_vm5, %v8127_v2, %v4978_v50  ;;  %v5011_v59 = vsel %vm8359_vm6, %v8129_v4, %v4979_v24  ;;  %vm8360_vm7 = vcmp.ge.f32.partialorder %v8131_v54, 0.0 }
 0x25c   : > { %v5012_v63 = vsel %vm8360_vm7, %v8131_v54, %v4980_v35  ;;  %v5013_v0 = vsel %vm4949_vm1, %v8133_v6, %v4981_v29  ;;  %vm8361_vm12 = vcmp.ge.f32.partialorder %v8135_v7, 0.0  ;;  %vm8362_vm2 = vcmp.ge.f32.partialorder %v8137_v8, 0.0 }
 0x25d   : > { %v5014_v1 = vsel %vm8361_vm12, %v8135_v7, %v4982_v43  ;;  %v5015_v2 = vsel %vm8362_vm2, %v8137_v8, %v4983_v20  ;;  %vm8363_vm8 = vcmp.ge.f32.partialorder %v8139_v12, 0.0  ;;  %v5017_v54 = vsel %vm4953_vm14, %v8141_v13, %v4985_v22 }
 0x25e   : > { %v5016_v4 = vsel %vm8363_vm8, %v8139_v12, %v4984_v18  ;;  %vm8364_vm1 = vcmp.ge.f32.partialorder %v8143_v19, 0.0  ;;  %v5019_v7 = vsel %vm4955_vm13, %v8145_v23, %v4987_v46  ;;  %v5020_v8 = vsel %vm4956_vm0, %v8147_v14, %v4988_v32 }
 0x25f   : > { %v5018_v6 = vsel %vm8364_vm1, %v8143_v19, %v4986_v37  ;;  %v5021_v12 = vsel %vm4957_vm15, %v8149_v28, %v4989_v40  ;;  %v5022_v13 = vsel %vm4958_vm4, %v8151_v58, %v4990_v30  ;;  %v5023_v19 = vsel %vm4959_vm3, %v8153_v15, %v4991_v31 }
 0x260   : > { %v5922_v23 = vpack.c.bf16 %v8201_v39, %v8189_v10  ;;  %v5927_v14 = vpack.c.bf16 %v4995_v38, %v4994_v5  ;;  %v5932_v3 = vpack.c.bf16 %v4997_v25, %v4996_v11  ;;  %v5937_v62 = vpack.c.bf16 %v4999_v41, %v4998_v44 }
 0x261   : > { %v5942_v42 = vpack.c.bf16 %v5001_v48, %v5000_v33  ;;  %v5947_v28 = vpack.c.bf16 %v5003_v57, %v5002_v36  ;;  %v5952_v58 = vpack.c.bf16 %v5005_v52, %v5004_v16  ;;  %v5957_v27 = vpack.c.bf16 %v5007_v61, %v5006_v34 }
 0x262   : > { %5923 = vst [vmem:[%s8305_s25] sm:$0xff] %v5922_v23   ;;  %5999 = vst [vmem:[%s8305_s25 + $0x8] sm:$0xff] %v5927_v14   ;;  %v5962_v21 = vpack.c.bf16 %v5009_v55, %v5008_v51  ;;  %v5967_v15 = vpack.c.bf16 %v5011_v59, %v5010_v56  ;;  %v5972_v10 = vpack.c.bf16 %v5013_v0, %v5012_v63 }
 0x263   : > { %6000 = vst [vmem:[%s8305_s25 + $0x10] sm:$0xff] %v5932_v3   ;;  %6001 = vst [vmem:[%s8305_s25 + $0x18] sm:$0xff] %v5937_v62   ;;  %v5977_v45 = vpack.c.bf16 %v5015_v2, %v5014_v1  ;;  %v5982_v53 = vpack.c.bf16 %v5017_v54, %v5016_v4  ;;  %v5987_v39 = vpack.c.bf16 %v5019_v7, %v5018_v6 }
 0x264   : > { %6002 = vst [vmem:[%s8305_s25 + $0x20] sm:$0xff] %v5942_v42   ;;  %6003 = vst [vmem:[%s8305_s25 + $0x28] sm:$0xff] %v5947_v28   ;;  %v5992_v49 = vpack.c.bf16 %v5021_v12, %v5020_v8  ;;  %v5997_v9 = vpack.c.bf16 %v5023_v19, %v5022_v13 }
 0x265   : > { %6004 = vst [vmem:[%s8305_s25 + $0x30] sm:$0xff] %v5952_v58   ;;  %6005 = vst [vmem:[%s8305_s25 + $0x38] sm:$0xff] %v5957_v27  }
 0x266   : > { %6006 = vst [vmem:[%s8305_s25 + $0x40] sm:$0xff] %v5962_v21   ;;  %6007 = vst [vmem:[%s8305_s25 + $0x48] sm:$0xff] %v5967_v15  }
 0x267   : > { %6008 = vst [vmem:[%s8305_s25 + $0x50] sm:$0xff] %v5972_v10   ;;  %6009 = vst [vmem:[%s8305_s25 + $0x58] sm:$0xff] %v5977_v45  }
 0x268   : > { %6010 = vst [vmem:[%s8305_s25 + $0x60] sm:$0xff] %v5982_v53   ;;  %6011 = vst [vmem:[%s8305_s25 + $0x68] sm:$0xff] %v5987_v39  }
 0x269   : > { %6012 = vst [vmem:[%s8305_s25 + $0x70] sm:$0xff] %v5992_v49   ;;  %6013 = vst [vmem:[%s8305_s25 + $0x78] sm:$0xff] %v5997_v9  }
 0x26a PF: > { %s12_s9 = sadd.s32 1, %s7127_s9  }
 0x26b   : > { %p9_p4 = scmp.ge.s32.totalorder %s12_s9, 4  }
 0x26d   :  { %11 = sbr.rel (!%p9_p4) target bundleno = 1 (0x1), region = 72 }

// kernel: encoder_forward.12
= control target key start
LH: loop header
LB: loop body
LE: loop exit
PB: predicated region body
PF: predicated region fallthrough
CT: control target
= control target key end

     0   :  { %s6642_s12 = smov 0   ;;  %s7861_s0 = inlined_call_operand.vmem [shape: bf16[2,8,8,128], index: 0, kind: input, shape index: {}]   ;;  %s7862_s1 = inlined_call_operand.vmem [shape: bf16[9,128,128], index: 1, kind: input, shape index: {}]   ;;  %s7863_s2 = inlined_call_operand.vmem [shape: bf16[9,128,128], index: 2, kind: input, shape index: {}]   ;;  %s7864_s3 = inlined_call_operand.vmem [shape: bf16[2,8,8,128], index: 3, kind: output, shape index: {}]  }
   0x1 LB: > { %s5027_s13 = sadd.s32 4294967295, %s6620_s12   ;;  %p5031_p0 = scmp.ge.s32.totalorder %s6620_s12, 1  ;;  %s6620_s12 = sphi %s6642_s12, %s13_s12  }
   0x2   : > { %p137_p1 = scmp.lt.s32.totalorder %s6620_s12, 3 }
   0x4   : > { %p138_p2 = pnand %p5031_p0, %p137_p1 }
   0x5   : > { %v6442_v0 = vld [vmem:[%s7862_s1 + $0x40] sm:$0xff] (!%p138_p2)   ;;  %p161_p3 = scmp.lt.s32.totalorder (!%p138_p2), %s5027_s13, 1  ;;  %v6443_v1 = vld [vmem:[%s7862_s1 + $0x48] sm:$0xff] (!%p138_p2)   ;;  %v6444_v2 = vld [vmem:[%s7862_s1 + $0x50] sm:$0xff] (!%p138_p2)   ;;  %vm264_vm0 = vcmask (!%p138_p2), 1043456   ;;  %vm270_vm1 = vcmask (!%p138_p2), 1040384  }
   0x6   : > { %141 = sbr.rel (%p138_p2) target bundleno = 1171 (0x493), region = 32  ;;  %5874 = vmatprep.subr.bf16.mxu0 (!%p138_p2), %v6442_v0  ;;  %v6445_v3 = vld [vmem:[%s7862_s1 + $0x58] sm:$0xff] (!%p138_p2)   ;;  %vm265_vm2 = vsmask.f32 (!%p138_p2), 7938  ;;  %v6446_v10 = vld [vmem:[%s7862_s1 + $0x60] sm:$0xff] (!%p138_p2)   ;;  %v6447_v28 = vld [vmem:[%s7862_s1 + $0x68] sm:$0xff] (!%p138_p2)  }
   0x7   : > { %5875 = vmatpush3.bf16.msra.mxu0 (!%p138_p2), %v6442_v0  ;;  %vm271_vm3 = vsmask.f32 (!%p138_p2), 256  ;;  %vm6679_vm4 = vmand (!%p138_p2), %vm264_vm0, %vm265_vm2  ;;  %v267_v14 = vld [vmem:[#allocation3 + $0x8] sm:$0xf] (!%p138_p2)  ;;  %v273_v15 = vld [vmem:[#allocation3 + $0xc] sm:$0x1] (!%p138_p2) }
   0x8   : > { %5876 = vmatprep.subr.bf16.mxu0 (!%p138_p2), %v6443_v1  ;;  %vm6684_vm5 = vmand (!%p138_p2), %vm270_vm1, %vm271_vm3  ;;  %v276_v17 = vld [vmem:[#allocation3 + $0x10] sm:$0xf] (!%p138_p2)  ;;  %v279_v18 = vld [vmem:[#allocation3 + $0x14] sm:$0x1] (!%p138_p2)  ;;  %vm533_vm7 = vsmask.f32 (!%p138_p2), 3328 }
   0x9   : > { %v282_v31 = vld [vmem:[#allocation3 + $0x18] sm:$0xf] (!%p138_p2)  ;;  %v285_v33 = vld [vmem:[#allocation3 + $0x1c] sm:$0x1] (!%p138_p2)  ;;  %v6448_v34 = vld [vmem:[%s7862_s1 + $0x70] sm:$0xff] (!%p138_p2)   ;;  %vm955_vm10 = vcmask (!%p138_p2), 1042432  }
   0xa   : > { %v321_v39 = vld [vmem:[#allocation3] sm:$0xf] (!%p138_p2)  ;;  %v324_v40 = vld [vmem:[#allocation3 + $0x4] sm:$0x1] (!%p138_p2)  ;;  %v6449_v43 = vld [vmem:[%s7862_s1 + $0x78] sm:$0xff] (!%p138_p2)   ;;  %vm956_vm11 = vcmask (!%p138_p2), 1046532  }
   0xb   : > { %5877 = vmatpush3.bf16.msra.mxu0 (!%p138_p2), %v6443_v1  ;;  %v288_v51 = vld [vmem:[#allocation3 + $0x20] sm:$0xf] (!%p138_p2)  ;;  %v291_v52 = vld [vmem:[#allocation3 + $0x24] sm:$0x1] (!%p138_p2)  ;;  %vm6718_vm6 = vmand (!%p138_p2), %vm270_vm1, %vm265_vm2  ;;  %vm534_vm8 = vsmask.f32 (!%p138_p2), 7440 }
   0xc   : > { %5878 = vmatprep.subr.bf16.mxu0 (!%p138_p2), %v6444_v2  ;;  %v294_v60 = vld [vmem:[#allocation3 + $0x28] sm:$0xf] (!%p138_p2)  ;;  %v297_v61 = vld [vmem:[#allocation3 + $0x2c] sm:$0x1] (!%p138_p2)  ;;  %vm6804_vm9 = vmor (!%p138_p2), %vm533_vm7, %vm534_vm8 }
   0xd   : > { %s7876_s13 = smov (!%p161_p3, %s5027_s13), 1  ;;  %vm6909_vm12 = vmor %vm955_vm10, %vm956_vm11  ;;  %v6550_v16 = vld [vmem:[%s7863_s2 + $0xa0] sm:$0xff]   ;;  %v6555_v58 = vld [vmem:[%s7863_s2 + $0xc8] sm:$0xff]  }
   0xe   : > { %s5606_s20 = sshll.u32 %s7876_s13, 5 }
   0xf   : > { %s6667_s23 = scalar_lea.vmem %s7861_s0, %s5606_s20  ;;  %5879 = vmatpush3.bf16.msra.mxu0 %v6444_v2  ;;  %s170_s4 = scalar_lea.vmem %s7864_s3, %s5606_s20 }
  0x10   : > { %v172_v4 = vld [vmem:[%s6667_s23] sm:$0xf]  ;;  %v173_v5 = vld [vmem:[%s6667_s23 + $0x4] sm:$0xf]  ;;  %5880 = vmatprep.subr.bf16.mxu0 %v6445_v3  ;;  %v174_v23 = vld [vmem:[%s6667_s23 + $0x8] sm:$0xf] }
  0x11   : > { %v182_v6 = vshrl.u32 %v172_v4, 16  ;;  %v185_v7 = vshll.u32 %v172_v4, 16  ;;  %v190_v8 = vshrl.u32 %v173_v5, 16  ;;  %v193_v9 = vshll.u32 %v173_v5, 16  ;;  %v175_v37 = vld [vmem:[%s6667_s23 + $0xc] sm:$0xf] }
  0x12   : > { %v198_v29 = vshrl.u32 %v174_v23, 16  ;;  %v201_v30 = vshll.u32 %v174_v23, 16  ;;  %v176_v38 = vld [vmem:[%s6667_s23 + $0x10] sm:$0xf]  ;;  %v206_v41 = vshrl.u32 %v175_v37, 16  ;;  %v209_v46 = vshll.u32 %v175_v37, 16 }
  0x13   : > { %v184_v11 = vrot.slane %v182_v6, 7  ;;  %v192_v12 = vrot.slane %v190_v8, 7  ;;  %5881 = vmatpush3.bf16.msra.mxu0 %v6445_v3  ;;  %v214_v42 = vshrl.u32 %v176_v38, 16  ;;  %v217_v47 = vshll.u32 %v176_v38, 16  ;;  %v178_v23 = vld [vmem:[%s6667_s23 + $0x18] sm:$0xf] }
  0x14   : > { %5882 = vmatprep.subr.bf16.mxu0 %v6446_v10  ;;  %v200_v32 = vrot.slane %v198_v29, 7  ;;  %v208_v59 = vrot.slane %v206_v41, 7 }
  0x15   : > { %v187_v19 = vor.u32 %v185_v7, %v184_v11  ;;  %v188_v20 = vrot.slane %v184_v11, 4  ;;  %v195_v21 = vor.u32 %v193_v9, %v192_v12  ;;  %v196_v22 = vrot.slane %v192_v12, 4 }
  0x16   : > { %v203_v35 = vor.u32 %v201_v30, %v200_v32  ;;  %v204_v36 = vrot.slane %v200_v32, 4  ;;  %v216_v1 = vrot.slane %v214_v42, 7  ;;  %v211_v6 = vor.u32 %v209_v46, %v208_v59  ;;  %v303_v42 = vld [vmem:[#allocation3 + $0x34] sm:$0x1] }
  0x17   : > { %v268_v24 = vsel %vm6679_vm4, %v187_v19, %v267_v14  ;;  %v274_v25 = vsel %vm6684_vm5, %v188_v20, %v273_v15  ;;  %v277_v26 = vsel %vm6679_vm4, %v195_v21, %v276_v17  ;;  %v280_v27 = vsel %vm6684_vm5, %v196_v22, %v279_v18  ;;  %5883 = vmatpush3.bf16.msra.mxu0 %v6446_v10  ;;  %v6729_v14 = vld [vmem:[%s7862_s1] sm:$0xff]   ;;  %v177_v19 = vld [vmem:[%s6667_s23 + $0x14] sm:$0xf] }
  0x18   : > { %269 = vst [vmem:[#allocation3 + $0x8] sm:$0xf] %v268_v24  ;;  %275 = vst [vmem:[#allocation3 + $0xc] sm:$0x1] %v274_v25  ;;  %5884 = vmatprep.subr.bf16.mxu0 %v6447_v28  ;;  %v283_v44 = vsel %vm6679_vm4, %v203_v35, %v282_v31  ;;  %v286_v45 = vsel %vm6684_vm5, %v204_v36, %v285_v33  ;;  %v212_v7 = vrot.slane %v208_v59, 4  ;;  %v220_v12 = vrot.slane %v216_v1, 4 }
  0x19   : > { %278 = vst [vmem:[#allocation3 + $0x10] sm:$0xf] %v277_v26  ;;  %281 = vst [vmem:[#allocation3 + $0x14] sm:$0x1] %v280_v27  ;;  %v219_v11 = vor.u32 %v217_v47, %v216_v1  ;;  %v289_v17 = vsel %vm6679_vm4, %v211_v6, %v288_v51  ;;  %v222_v24 = vshrl.u32 %v177_v19, 16  ;;  %v225_v32 = vshll.u32 %v177_v19, 16 }
  0x1a   : > { %284 = vst [vmem:[#allocation3 + $0x18] sm:$0xf] %v283_v44  ;;  %287 = vst [vmem:[#allocation3 + $0x1c] sm:$0x1] %v286_v45  ;;  %v292_v18 = vsel %vm6684_vm5, %v212_v7, %v291_v52  ;;  %v298_v22 = vsel %vm6684_vm5, %v220_v12, %v297_v61  ;;  %v300_v33 = vld [vmem:[#allocation3 + $0x30] sm:$0xf] }
  0x1b   : > { %5885 = vmatpush3.bf16.msra.mxu0 %v6447_v28  ;;  %290 = vst [vmem:[#allocation3 + $0x20] sm:$0xf] %v289_v17  ;;  %293 = vst [vmem:[#allocation3 + $0x24] sm:$0x1] %v292_v18  ;;  %v295_v21 = vsel %vm6679_vm4, %v219_v11, %v294_v60  ;;  %v224_v31 = vrot.slane %v222_v24, 7  ;;  %v230_v46 = vshrl.u32 %v178_v23, 16 }
  0x1c   : > { %5886 = vmatprep.subr.bf16.mxu0 %v6448_v34  ;;  %296 = vst [vmem:[#allocation3 + $0x28] sm:$0xf] %v295_v21  ;;  %299 = vst [vmem:[#allocation3 + $0x2c] sm:$0x1] %v298_v22  ;;  %v233_v47 = vshll.u32 %v178_v23, 16 }
  0x1d   : > { %v227_v44 = vor.u32 %v225_v32, %v224_v31  ;;  %v228_v45 = vrot.slane %v224_v31, 4 }
  0x1f   : > { %v338_v50 = vld [vmem:[#allocation3 + $0x8] sm:$0x2]  ;;  %v390_v56 = vld [vmem:[#allocation3 + $0x8] sm:$0x1]  ;;  %v418_v57 = vld [vmem:[#allocation3 + $0x8] sm:$0x8]  ;;  %5887 = vmatpush3.bf16.msra.mxu0 %v6448_v34  ;;  %v301_v59 = vsel %vm6679_vm4, %v227_v44, %v300_v33  ;;  %v304_v60 = vsel %vm6684_vm5, %v228_v45, %v303_v42 }
  0x20   : > { %v319_v48 = vld [vmem:[#allocation3 + $0x10] sm:$0xf]  ;;  %v320_v49 = vld [vmem:[#allocation3 + $0x14] sm:$0x1]  ;;  %v5037_v55 = vrot.slane %v338_v50, 9  ;;  %v5047_v62 = vrot.slane %v418_v57, 11  ;;  %5888 = vmatprep.subr.bf16.mxu0 %v6449_v43 }
  0x21   : > { %v322_v53 = vsel %vm6679_vm4, %v319_v48, %v321_v39  ;;  %v325_v54 = vsel %vm6684_vm5, %v320_v49, %v324_v40  ;;  %v471_v63 = vld [vmem:[#allocation3 + $0xc] sm:$0x1]  ;;  %v339_v0 = vld [vmem:[#allocation3 + $0x10] sm:$0x2]  ;;  %v393_v4 = vld [vmem:[#allocation3 + $0x10] sm:$0x1] }
  0x22   : > { %323 = vst [vmem:[#allocation3] sm:$0xf] %v322_v53  ;;  %326 = vst [vmem:[#allocation3 + $0x4] sm:$0x1] %v325_v54  ;;  %v391_v2 = vsel %vm6684_vm5, %v5037_v55, %v390_v56  ;;  %v5038_v3 = vrot.slane %v339_v0, 9  ;;  %v472_v8 = vsel %vm6718_vm6, %v5047_v62, %v471_v63  ;;  %v6763_v57 = vrot.slane %v230_v46, 7 }
  0x23   : > { %v419_v5 = vld [vmem:[#allocation3 + $0x10] sm:$0x8]  ;;  %392 = vst [vmem:[#allocation3 + $0x8] sm:$0x1] %v391_v2  ;;  %v474_v10 = vld [vmem:[#allocation3 + $0x14] sm:$0x1]  ;;  %5889 = vmatpush3.bf16.msra.mxu0 %v6449_v43 }
  0x24   : > { %v5048_v9 = vrot.slane %v419_v5, 11  ;;  %473 = vst [vmem:[#allocation3 + $0xc] sm:$0x1] %v472_v8  ;;  %v394_v15 = vsel %vm6684_vm5, %v5038_v3, %v393_v4  ;;  %v340_v25 = vld [vmem:[#allocation3 + $0x18] sm:$0x2]  ;;  %5898 = vmatprep.subr.bf16.mxu0 %v6729_v14  ;;  %v235_v5 = vor.u32 %v233_v47, %v6763_v57 }
  0x25   : > { %395 = vst [vmem:[#allocation3 + $0x10] sm:$0x1] %v394_v15  ;;  %v396_v26 = vld [vmem:[#allocation3 + $0x18] sm:$0x1]  ;;  %v420_v27 = vld [vmem:[#allocation3 + $0x18] sm:$0x8] }
  0x26   : > { %v475_v20 = vsel %vm6718_vm6, %v5048_v9, %v474_v10  ;;  %v5039_v28 = vrot.slane %v340_v25, 9  ;;  %v5049_v29 = vrot.slane %v420_v27, 11  ;;  %v477_v30 = vld [vmem:[#allocation3 + $0x1c] sm:$0x1]  ;;  %v306_v53 = vld [vmem:[#allocation3 + $0x38] sm:$0xf] }
  0x27   : > { %476 = vst [vmem:[#allocation3 + $0x14] sm:$0x1] %v475_v20  ;;  %v341_v56 = vld [vmem:[#allocation3 + $0x20] sm:$0x2]  ;;  %302 = vst [vmem:[#allocation3 + $0x30] sm:$0xf] %v301_v59  ;;  %v307_v19 = vsel %vm6679_vm4, %v235_v5, %v306_v53 }
  0x28   : > { %v397_v40 = vsel %vm6684_vm5, %v5039_v28, %v396_v26  ;;  %v478_v41 = vsel %vm6718_vm6, %v5049_v29, %v477_v30  ;;  %305 = vst [vmem:[#allocation3 + $0x34] sm:$0x1] %v304_v60  ;;  %v342_v3 = vld [vmem:[#allocation3 + $0x28] sm:$0x2]  ;;  %v5040_v4 = vrot.slane %v341_v56, 9  ;;  %v236_v25 = vrot.slane %v6763_v57, 4 }
  0x29   : > { %v337_v34 = vld [vmem:[#allocation3] sm:$0x2]  ;;  %v387_v35 = vld [vmem:[#allocation3] sm:$0x1]  ;;  %v417_v36 = vld [vmem:[#allocation3] sm:$0x8] }
  0x2a   : > { %v5036_v37 = vrot.slane %v337_v34, 9  ;;  %v5046_v38 = vrot.slane %v417_v36, 11  ;;  %v468_v39 = vld [vmem:[#allocation3 + $0x4] sm:$0x1]  ;;  %v6750_v43 = vld [vmem:[#allocation3 + $0x8] sm:$0xf] }
  0x2b   : > { %398 = vst [vmem:[#allocation3 + $0x18] sm:$0x1] %v397_v40  ;;  %479 = vst [vmem:[#allocation3 + $0x1c] sm:$0x1] %v478_v41  ;;  %v6756_v50 = vld [vmem:[#allocation3 + $0xc] sm:$0x1] }
  0x2c   : > { %v388_v48 = vsel %vm6684_vm5, %v5036_v37, %v387_v35  ;;  %v469_v49 = vsel %vm6718_vm6, %v5046_v38, %v468_v39  ;;  %v551_v51 = vshrl.u32 %v6750_v43, 16  ;;  %v554_v52 = vshll.u32 %v6750_v43, 16  ;;  %v6761_v55 = vld [vmem:[#allocation3 + $0x10] sm:$0xf]  ;;  %v399_v10 = vld [vmem:[#allocation3 + $0x20] sm:$0x1] }
  0x2d   : > { %389 = vst [vmem:[#allocation3] sm:$0x1] %v388_v48  ;;  %470 = vst [vmem:[#allocation3 + $0x4] sm:$0x1] %v469_v49  ;;  %v560_v54 = vshll.u32 %v6756_v50, 16  ;;  %v565_v0 = vshrl.u32 %v6761_v55, 16  ;;  %v400_v15 = vsel %vm6684_vm5, %v5040_v4, %v399_v10 }
  0x2e   : > { %v553_v61 = vrot.slane %v551_v51, 4  ;;  %v556_v62 = vrot.slane %v554_v52, 5  ;;  %v6769_v63 = vld [vmem:[#allocation3 + $0x14] sm:$0x1]  ;;  %v568_v1 = vshll.u32 %v6761_v55, 16  ;;  %v5041_v9 = vrot.slane %v342_v3, 9 }
  0x2f   : > { %v574_v2 = vshll.u32 %v6769_v63, 16  ;;  %v567_v7 = vrot.slane %v565_v0, 4  ;;  %v6775_v11 = vrot.slane %v560_v54, 5  ;;  %v402_v17 = vld [vmem:[#allocation3 + $0x28] sm:$0x1] }
  0x30   : > { %v557_v6 = vor.u32 %v556_v62, %v553_v61  ;;  %v570_v8 = vrot.slane %v568_v1, 5  ;;  %v421_v18 = vld [vmem:[#allocation3 + $0x20] sm:$0x8]  ;;  %401 = vst [vmem:[#allocation3 + $0x20] sm:$0x1] %v400_v15  ;;  %v403_v23 = vsel %vm6684_vm5, %v5041_v9, %v402_v17  ;;  %v6607_v40 = vld [vmem:[%s7863_s2 + $0x228] sm:$0xff]  }
  0x31   : > { %v6777_v12 = vrot.slane %v574_v2, 5  ;;  %v5050_v24 = vrot.slane %v421_v18, 11  ;;  %308 = vst [vmem:[#allocation3 + $0x38] sm:$0xf] %v307_v19  ;;  %404 = vst [vmem:[#allocation3 + $0x28] sm:$0x1] %v403_v23 }
  0x32   : > { %v6783_v20 = vld [vmem:[#allocation3 + $0x18] sm:$0xf]  ;;  %v6785_v21 = vld [vmem:[#allocation3 + $0x1c] sm:$0x1]  ;;  %v571_v22 = vor.u32 %v570_v8, %v567_v7  ;;  %v6790_v26 = vrot.slane %v557_v6, 4 }
  0x33   : > { %v579_v27 = vshrl.u32 %v6783_v20, 16  ;;  %v582_v28 = vshll.u32 %v6783_v20, 16  ;;  %v588_v29 = vshll.u32 %v6785_v21, 16  ;;  %v422_v30 = vld [vmem:[#allocation3 + $0x28] sm:$0x8] }
  0x34   : > { %v6795_v31 = vld [vmem:[#allocation3] sm:$0xf]  ;;  %v6797_v32 = vld [vmem:[#allocation3 + $0x4] sm:$0x1]  ;;  %v572_v33 = vrot.slane %v571_v22, 4  ;;  %v5051_v34 = vrot.slane %v422_v30, 11  ;;  %v563_v60 = vsel %vm6804_vm9, %v6790_v26, %v6775_v11 }
  0x35   : > { %v537_v35 = vshrl.u32 %v6795_v31, 16  ;;  %v540_v36 = vshll.u32 %v6795_v31, 16  ;;  %v546_v37 = vshll.u32 %v6797_v32, 16  ;;  %v581_v38 = vrot.slane %v579_v27, 4  ;;  %v480_v39 = vld [vmem:[#allocation3 + $0x24] sm:$0x1] }
  0x36   : > { %v584_v41 = vrot.slane %v582_v28, 5  ;;  %v481_v42 = vsel %vm6718_vm6, %v5050_v24, %v480_v39  ;;  %v483_v44 = vld [vmem:[#allocation3 + $0x2c] sm:$0x1]  ;;  %v309_v45 = vld [vmem:[#allocation3 + $0x3c] sm:$0x1]  ;;  %v590_v48 = vrot.slane %v588_v29, 5  ;;  %v577_v61 = vsel %vm6804_vm9, %v572_v33, %v6777_v12 }
  0x37   : > { %v539_v46 = vrot.slane %v537_v35, 4  ;;  %v542_v47 = vrot.slane %v540_v36, 5  ;;  %482 = vst [vmem:[#allocation3 + $0x24] sm:$0x1] %v481_v42  ;;  %v484_v49 = vsel %vm6718_vm6, %v5051_v34, %v483_v44  ;;  %v343_v51 = vld [vmem:[#allocation3 + $0x30] sm:$0x2]  ;;  %v310_v54 = vsel %vm6684_vm5, %v236_v25, %v309_v45 }
  0x38   : > { %v548_v52 = vrot.slane %v546_v37, 5  ;;  %v585_v53 = vor.u32 %v584_v41, %v581_v38  ;;  %485 = vst [vmem:[#allocation3 + $0x2c] sm:$0x1] %v484_v49  ;;  %v5042_v56 = vrot.slane %v343_v51, 9  ;;  %v405_v57 = vld [vmem:[#allocation3 + $0x30] sm:$0x1] }
  0x39   : > { %v543_v59 = vor.u32 %v542_v47, %v539_v46  ;;  %v6821_v62 = vld [vmem:[#allocation3 + $0x20] sm:$0xf]  ;;  %311 = vst [vmem:[#allocation3 + $0x3c] sm:$0x1] %v310_v54  ;;  %v6823_v0 = vld [vmem:[#allocation3 + $0x38] sm:$0xf] }
  0x3a   : > { %v344_v1 = vld [vmem:[#allocation3 + $0x38] sm:$0x2]  ;;  %v423_v2 = vld [vmem:[#allocation3 + $0x30] sm:$0x8]  ;;  %v586_v3 = vrot.slane %v585_v53, 4  ;;  %v593_v5 = vshrl.u32 %v6821_v62, 16  ;;  %v406_v11 = vsel %vm6684_vm5, %v5042_v56, %v405_v57 }
  0x3b   : > { %v6825_v4 = vld [vmem:[#allocation3 + $0x28] sm:$0xf]  ;;  %v596_v6 = vshll.u32 %v6821_v62, 16  ;;  %v5043_v7 = vrot.slane %v344_v1, 9  ;;  %v544_v8 = vrot.slane %v543_v59, 4  ;;  %v5052_v33 = vrot.slane %v423_v2, 11 }
  0x3c   : > { %v607_v9 = vshrl.u32 %v6825_v4, 16  ;;  %v610_v10 = vshll.u32 %v6825_v4, 16  ;;  %v408_v12 = vld [vmem:[#allocation3 + $0x38] sm:$0x1]  ;;  %v591_v15 = vsel %vm6804_vm9, %v586_v3, %v590_v48  ;;  %v595_v17 = vrot.slane %v593_v5, 4  ;;  %v6451_v35 = vld [vmem:[%s7862_s1 + $0x8] sm:$0xff]  }
  0x3d   : > { %v598_v18 = vrot.slane %v596_v6, 5  ;;  %407 = vst [vmem:[#allocation3 + $0x30] sm:$0x1] %v406_v11  ;;  %v409_v19 = vsel %vm6684_vm5, %v5043_v7, %v408_v12  ;;  %v424_v22 = vld [vmem:[#allocation3 + $0x38] sm:$0x8]  ;;  %v549_v24 = vsel %vm6804_vm9, %v544_v8, %v548_v52  ;;  %v5073_v25 = vcombine.low %v577_v61, %v591_v15  ;;  %v6452_v49 = vld [vmem:[%s7862_s1 + $0x10] sm:$0xff]  }
  0x3e   : > { %v486_v23 = vld [vmem:[#allocation3 + $0x34] sm:$0x1]  ;;  %v609_v26 = vrot.slane %v607_v9, 4  ;;  %v612_v27 = vrot.slane %v610_v10, 5  ;;  %410 = vst [vmem:[#allocation3 + $0x38] sm:$0x1] %v409_v19  ;;  %v5072_v28 = vcombine.low %v549_v24, %v563_v60 }
  0x3f   : > { %v6839_v29 = vld [vmem:[#allocation3 + $0x24] sm:$0x1]  ;;  %v599_v30 = vor.u32 %v598_v18, %v595_v17  ;;  %v5053_v34 = vrot.slane %v424_v22, 11  ;;  %v6844_v36 = vld [vmem:[#allocation3 + $0x2c] sm:$0x1]  ;;  %v487_v44 = vsel %vm6718_vm6, %v5052_v33, %v486_v23  ;;  %v6453_v59 = vld [vmem:[%s7862_s1 + $0x18] sm:$0xff]  }
  0x40   : > { %v602_v37 = vshll.u32 %v6839_v29, 16  ;;  %v613_v38 = vor.u32 %v612_v27, %v609_v26  ;;  %5890 = vmatprep.mubr.bf16.mxu0 %v5072_v28  ;;  %v616_v41 = vshll.u32 %v6844_v36, 16  ;;  %v6848_v42 = vld [vmem:[#allocation3 + $0x3c] sm:$0x1]  ;;  %488 = vst [vmem:[#allocation3 + $0x34] sm:$0x1] %v487_v44 }
  0x41   : > { %v600_v39 = vrot.slane %v599_v30, 4  ;;  %v489_v45 = vld [vmem:[#allocation3 + $0x3c] sm:$0x1]  ;;  %5891 = vmatmul.mubr.bf16.vlgmr.msra.gmra.mrb[0].mxu0 %v5073_v25  ;;  %v6454_v17 = vld [vmem:[%s7862_s1 + $0x20] sm:$0xff]   ;;  %v5084_v25 = vcombine.low %v6795_v31, %v6750_v43  ;;  %v6455_v26 = vld [vmem:[%s7862_s1 + $0x28] sm:$0xff]   ;;  %v964_v44 = vrot.slane %v6756_v50, 5 }
  0x42   : > { %v604_v46 = vrot.slane %v602_v37, 5  ;;  %v614_v47 = vrot.slane %v613_v38, 4  ;;  %v490_v48 = vsel %vm6718_vm6, %v5053_v34, %v489_v45  ;;  %5899 = vmatpush3.bf16.msra.mxu0 %v6729_v14  ;;  %v618_v51 = vrot.slane %v616_v41, 5  ;;  %v6456_v28 = vld [vmem:[%s7862_s1 + $0x30] sm:$0xff]   ;;  %v6457_v43 = vld [vmem:[%s7862_s1 + $0x38] sm:$0xff]   ;;  %v6459_v31 = vld [vmem:[%s7862_s1 + $0x80] sm:$0xff]  }
  0x43   : > { %491 = vst [vmem:[#allocation3 + $0x3c] sm:$0x1] %v490_v48  ;;  %5900 = vmatprep.subr.bf16.mxu0 %v6451_v35  ;;  %v931_v30 = vld [vmem:[#allocation3] sm:$0xe]  ;;  %v932_v33 = vld [vmem:[#allocation3 + $0x8] sm:$0xe]  ;;  %v5085_v34 = vcombine.low %v6761_v55, %v6783_v20  ;;  %v5086_v37 = vcombine.low %v6821_v62, %v6825_v4 }
  0x44   : > { %v605_v52 = vsel %vm6804_vm9, %v600_v39, %v604_v46  ;;  %v6860_v53 = vld [vmem:[#allocation3 + $0x30] sm:$0xf]  ;;  %v619_v54 = vsel %vm6804_vm9, %v614_v47, %v618_v51  ;;  %v5096_v38 = vrot.slane %v931_v30, 9  ;;  %v960_v39 = vrot.slane %v6797_v32, 5  ;;  %v179_v55 = vld [vmem:[%s6667_s23 + $0x1c] sm:$0xf] }
  0x45   : > { %v6864_v56 = vld [vmem:[#allocation3 + $0x38] sm:$0xf]  ;;  %v621_v57 = vshrl.u32 %v6860_v53, 16  ;;  %v624_v14 = vshll.u32 %v6860_v53, 16  ;;  %v5074_v60 = vcombine.low %v605_v52, %v619_v54  ;;  %v5097_v41 = vrot.slane %v932_v33, 9  ;;  %v6462_v62 = vld [vmem:[%s7862_s1 + $0x90] sm:$0xff]  }
  0x46   : > { %v635_v61 = vshrl.u32 %v6864_v56, 16  ;;  %v638_v1 = vshll.u32 %v6864_v56, 16  ;;  %5901 = vmatpush3.bf16.msra.mxu0 %v6451_v35  ;;  %v6461_v35 = vld [vmem:[%s7862_s1 + $0x88] sm:$0xff]   ;;  %v238_v20 = vshrl.u32 %v179_v55, 16  ;;  %v241_v46 = vshll.u32 %v179_v55, 16  ;;  %v6463_v52 = vld [vmem:[%s7862_s1 + $0x98] sm:$0xff]  }
  0x47   : > { %v623_v2 = vrot.slane %v621_v57, 4  ;;  %v626_v3 = vrot.slane %v624_v14, 5  ;;  %5902 = vmatprep.subr.bf16.mxu0 %v6452_v49  ;;  %5894 = vmatprep.mubr.bf16.mxu0 %v5074_v60  ;;  %v6873_v7 = vld [vmem:[#allocation3 + $0x34] sm:$0x1]  ;;  %v961_v32 = vsel %vm6909_vm12, %v5096_v38, %v960_v39  ;;  %v965_v50 = vsel %vm6909_vm12, %v5097_v41, %v964_v44  ;;  %v312_v47 = vld [vmem:[#allocation3 + $0x40] sm:$0xf] }
  0x48   : > { %v637_v5 = vrot.slane %v635_v61, 4  ;;  %v640_v6 = vrot.slane %v638_v1, 5  ;;  %v630_v10 = vshll.u32 %v6873_v7, 16  ;;  %v240_v4 = vrot.slane %v238_v20, 7  ;;  %v6467_v61 = vld [vmem:[%s7862_s1 + $0xb0] sm:$0xff]   ;;  %v6471_v33 = vld [vmem:[%s7862_s1 + $0xc8] sm:$0xff]  }
  0x49   : > { %v627_v8 = vor.u32 %v626_v3, %v623_v2  ;;  %v5087_v48 = vcombine.low %v6860_v53, %v6864_v56  ;;  %v5120_v51 = vcombine.low %v961_v32, %v965_v50  ;;  %v6464_v53 = vld [vmem:[%s7862_s1 + $0xa0] sm:$0xff]   ;;  %v6465_v56 = vld [vmem:[%s7862_s1 + $0xa8] sm:$0xff]   ;;  %v933_v2 = vld [vmem:[#allocation3 + $0x10] sm:$0xe] }
  0x4a   : > { %v6875_v9 = vld [vmem:[#allocation3 + $0x3c] sm:$0x1]  ;;  %v641_v11 = vor.u32 %v640_v6, %v637_v5  ;;  %5903 = vmatpush3.bf16.msra.mxu0 %v6452_v49  ;;  %v632_v18 = vrot.slane %v630_v10, 5  ;;  %v243_v49 = vor.u32 %v241_v46, %v240_v4  ;;  %v934_v3 = vld [vmem:[#allocation3 + $0x18] sm:$0xe]  ;;  %v6475_v50 = vld [vmem:[%s7862_s1 + $0xe8] sm:$0xff]  }
  0x4b   : > { %v628_v12 = vrot.slane %v627_v8, 4  ;;  %v644_v15 = vshll.u32 %v6875_v9, 16  ;;  %5904 = vmatprep.subr.bf16.mxu0 %v6453_v59  ;;  %v315_v5 = vld [vmem:[#allocation3 + $0x44] sm:$0x1]  ;;  %v935_v6 = vld [vmem:[#allocation3 + $0x20] sm:$0xe] }
  0x4c   : > { %v642_v19 = vrot.slane %v641_v11, 4  ;;  %v313_v54 = vsel %vm6679_vm4, %v243_v49, %v312_v47  ;;  %v936_v8 = vld [vmem:[#allocation3 + $0x28] sm:$0xe]  ;;  %v6469_v11 = vld [vmem:[%s7862_s1 + $0xb8] sm:$0xff]  }
  0x4d   : > { %v646_v22 = vrot.slane %v644_v15, 5  ;;  %v633_v23 = vsel %vm6804_vm9, %v628_v12, %v632_v18  ;;  %314 = vst [vmem:[#allocation3 + $0x40] sm:$0xf] %v313_v54  ;;  %v968_v12 = vrot.slane %v6769_v63, 5  ;;  %v972_v15 = vrot.slane %v6785_v21, 5  ;;  %v6470_v63 = vld [vmem:[%s7862_s1 + $0xc0] sm:$0xff]  }
  0x4e   : > { %5905 = vmatpush3.bf16.msra.mxu0 %v6453_v59  ;;  %v244_v59 = vrot.slane %v240_v4, 4  ;;  %v5099_v18 = vrot.slane %v934_v3, 9  ;;  %v6478_v20 = vld [vmem:[#allocation3 + $0x8] ss:$8 sps:$4 sm:$0xff]   ;;  %v6473_v46 = vld [vmem:[%s7862_s1 + $0xd8] sm:$0xff]  }
  0x4f   : > { %v647_v24 = vsel %vm6804_vm9, %v642_v19, %v646_v22  ;;  %5906 = vmatprep.subr.bf16.mxu0 %v6454_v17  ;;  %v5100_v22 = vrot.slane %v935_v6, 9  ;;  %v1314_v32 = vld [vmem:[#allocation3 + $0x8] sm:$0xf]  ;;  %v1316_v4 = vld [vmem:[#allocation3 + $0x10] sm:$0xf] }
  0x50   : > { %v5075_v27 = vcombine.low %v633_v23, %v647_v24  ;;  %v316_v10 = vsel %vm6684_vm5, %v244_v59, %v315_v5  ;;  %v976_v23 = vrot.slane %v6839_v29, 5  ;;  %v5101_v24 = vrot.slane %v936_v8, 9  ;;  %v331_v49 = vld [vmem:[#allocation3 + $0x48] sm:$0xf]  ;;  %v1318_v8 = vld [vmem:[#allocation3 + $0x18] sm:$0xf] }
  0x51   : > { %317 = vst [vmem:[#allocation3 + $0x44] sm:$0x1] %v316_v10  ;;  %v1331_v47 = vshrl.u32 %v1314_v32, 16  ;;  %v1345_v54 = vshrl.u32 %v1316_v4, 16  ;;  %v6479_v10 = vld [vmem:[%s7862_s1 + $0x100] sm:$0xff]  }
  0x52   : > { %5895 = vmatmul.mubr.bf16.gmra.mrb[4].mxu0 %v5075_v27  ;;  %v973_v27 = vsel %vm6909_vm12, %v5099_v18, %v972_v15  ;;  %v1320_v15 = vld [vmem:[#allocation3 + $0x20] sm:$0xf] }
  0x53   : > { %5907 = vmatpush3.bf16.msra.mxu0 %v6454_v17  ;;  %5914 = vmatprep.mubr.bf16.mxu0 %v5084_v25  ;;  %v5098_v17 = vrot.slane %v933_v2, 9  ;;  %v980_v25 = vrot.slane %v6844_v36, 5  ;;  %v937_v36 = vld [vmem:[#allocation3 + $0x30] sm:$0xe]  ;;  %v6480_v18 = vld [vmem:[#allocation3 + $0x18] ss:$8 sps:$4 sm:$0xff]  }
  0x54   : > { %5908 = vmatprep.subr.bf16.mxu0 %v6455_v26  ;;  %v345_v57 = vld [vmem:[#allocation3 + $0x40] sm:$0x2]  ;;  %v411_v14 = vld [vmem:[#allocation3 + $0x40] sm:$0x1]  ;;  %v425_v19 = vld [vmem:[#allocation3 + $0x40] sm:$0x8] }
  0x55   : > { %v5044_v60 = vrot.slane %v345_v57, 9  ;;  %v969_v21 = vsel %vm6909_vm12, %v5098_v17, %v968_v12  ;;  %v981_v29 = vsel %vm6909_vm12, %v5101_v24, %v980_v25  ;;  %v5102_v39 = vrot.slane %v937_v36, 9  ;;  %v6991_v57 = vld [vmem:[#allocation3 + $0xc] sm:$0x1]  ;;  %v6482_v36 = vld [vmem:[%s7862_s1 + $0x110] sm:$0xff]  }
  0x56   : > { %v5121_v30 = vcombine.low %v969_v21, %v973_v27  ;;  %v1340_v5 = vshll.u32 %v6991_v57, 16 }
  0x57   : > { %5909 = vmatpush3.bf16.msra.mxu0 %v6455_v26  ;;  %v412_v1 = vsel %vm6684_vm5, %v5044_v60, %v411_v14  ;;  %v5054_v26 = vrot.slane %v425_v19, 11  ;;  %v6993_v14 = vld [vmem:[#allocation3 + $0x14] sm:$0x1]  ;;  %v1347_v60 = vrot.slane %v1345_v54, 4  ;;  %v6481_v19 = vld [vmem:[%s7862_s1 + $0x108] sm:$0xff]  }
  0x58   : > { %5910 = vmatprep.subr.bf16.mxu0 %v6456_v28  ;;  %413 = vst [vmem:[#allocation3 + $0x40] sm:$0x1] %v412_v1  ;;  %v1354_v6 = vshll.u32 %v6993_v14, 16  ;;  %v1342_v24 = vrot.slane %v1340_v5, 5 }
  0x5a   : > { %v1356_v25 = vrot.slane %v1354_v6, 5 }
  0x5b   : > { %5911 = vmatpush3.bf16.msra.mxu0 %v6456_v28  ;;  %v977_v28 = vsel %vm6909_vm12, %v5100_v22, %v976_v23  ;;  %v6486_v22 = vld [vmem:[#allocation3 + $0x28] ss:$8 sps:$4 sm:$0xff]   ;;  %v1359_v23 = vshrl.u32 %v1318_v8, 16 }
  0x5c   : > { %5912 = vmatprep.subr.bf16.mxu0 %v6457_v43  ;;  %v5122_v38 = vcombine.low %v977_v28, %v981_v29  ;;  %v334_v28 = vld [vmem:[#allocation3 + $0x4c] sm:$0x1] }
  0x5d   : > { %v335_v29 = vsel %vm6684_vm5, %v6848_v42, %v334_v28  ;;  %v1322_v42 = vld [vmem:[#allocation3 + $0x28] sm:$0xf] }
  0x5e   : > { %336 = vst [vmem:[#allocation3 + $0x4c] sm:$0x1] %v335_v29 }
  0x5f   : > { %5913 = vmatpush3.bf16.msra.mxu0 %v6457_v43  ;;  %v938_v43 = vld [vmem:[#allocation3 + $0x38] sm:$0xe] }
  0x60   : > { %5922 = vmatprep.subr.bf16.mxu0 %v6459_v31  ;;  %v5103_v41 = vrot.slane %v938_v43, 9  ;;  %v1361_v43 = vrot.slane %v1359_v23, 4 }
  0x62   : > { %5915 = vmatmul.mubr.bf16.vlgmr.msra.gmra.mrb[0].mxu0 %v5085_v34  ;;  %v984_v34 = vrot.slane %v6873_v7, 5 }
  0x63   : > { %5923 = vmatpush3.bf16.msra.mxu0 %v6459_v31  ;;  %5918 = vmatprep.mubr.bf16.mxu0 %v5086_v37  ;;  %v492_v31 = vld [vmem:[#allocation3 + $0x44] sm:$0x1] }
  0x64   : > { %5924 = vmatprep.subr.bf16.mxu0 %v6461_v35  ;;  %v493_v37 = vsel %vm6718_vm6, %v5054_v26, %v492_v31  ;;  %v985_v44 = vsel %vm6909_vm12, %v5102_v39, %v984_v34  ;;  %v1362_v26 = vshll.u32 %v1318_v8, 16  ;;  %v1376_v31 = vshll.u32 %v1320_v15, 16  ;;  %v1324_v39 = vld [vmem:[#allocation3 + $0x30] sm:$0xf]  ;;  %v7038_v8 = vld [vmem:[#allocation3 + $0x3c] sm:$0x1] }
  0x65   : > { %494 = vst [vmem:[#allocation3 + $0x44] sm:$0x1] %v493_v37  ;;  %v6488_v37 = vld [vmem:[#allocation3 + $0x38] ss:$8 sps:$4 sm:$0xff]  }
  0x67   : > { %5925 = vmatpush3.bf16.msra.mxu0 %v6461_v35  ;;  %v988_v35 = vrot.slane %v6875_v9, 5  ;;  %v6472_v9 = vld [vmem:[%s7862_s1 + $0xd0] sm:$0xff]  }
  0x68   : > { %5926 = vmatprep.subr.bf16.mxu0 %v6462_v62 }
  0x69   : > { %v989_v7 = vsel %vm6909_vm12, %v5103_v41, %v988_v35 }
  0x6a   : > { %5919 = vmatmul.mubr.bf16.gmra.mrb[4].mxu0 %v5087_v48  ;;  %v5123_v55 = vcombine.low %v985_v44, %v989_v7  ;;  %v1334_v48 = vshll.u32 %v1314_v32, 16  ;;  %v1378_v44 = vrot.slane %v1376_v31, 5  ;;  %v1387_v7 = vshrl.u32 %v1322_v42, 16  ;;  %v495_v32 = vld [vmem:[#allocation3 + $0x4c] sm:$0x1] }
  0x6b   : > { %5927 = vmatpush3.bf16.msra.mxu0 %v6462_v62  ;;  %5938 = vmatprep.mubr.bf16.mxu0 %v5120_v51  ;;  %v6474_v62 = vld [vmem:[%s7862_s1 + $0xe0] sm:$0xff]   ;;  %v332_v51 = vsel %vm6679_vm4, %v6823_v0, %v331_v49  ;;  %v1333_v0 = vrot.slane %v1331_v47, 4  ;;  %v1401_v47 = vshrl.u32 %v1324_v39, 16  ;;  %v7027_v49 = vld [vmem:[#allocation3 + $0x2c] sm:$0x1] }
  0x6c   : > { %5928 = vmatprep.subr.bf16.mxu0 %v6463_v52  ;;  %333 = vst [vmem:[#allocation3 + $0x48] sm:$0xf] %v332_v51  ;;  %v1336_v59 = vrot.slane %v1334_v48, 5  ;;  %v1404_v48 = vshll.u32 %v1324_v39, 16  ;;  %v7029_v51 = vld [vmem:[#allocation3 + $0x34] sm:$0x1] }
  0x6d   : > { %v1396_v5 = vshll.u32 %v7027_v49, 16  ;;  %v1410_v6 = vshll.u32 %v7029_v51, 16  ;;  %v7047_v31 = vld [vmem:[#allocation3 + $0x44] sm:$0x1] }
  0x6f   : > { %5929 = vmatpush3.bf16.msra.mxu0 %v6463_v52  ;;  %v6476_v52 = vld [vmem:[%s7862_s1 + $0xf0] sm:$0xff]  }
  0x70   : > { %5930 = vmatprep.subr.bf16.mxu0 %v6464_v53 }
  0x73   : > { %5931 = vmatpush3.bf16.msra.mxu0 %v6464_v53  ;;  %v1348_v53 = vshll.u32 %v1316_v4, 16  ;;  %v346_v1 = vld [vmem:[#allocation3 + $0x48] sm:$0x2]  ;;  %v414_v2 = vld [vmem:[#allocation3 + $0x48] sm:$0x1] }
  0x74   : > { %5932 = vmatprep.subr.bf16.mxu0 %v6465_v56  ;;  %v5045_v3 = vrot.slane %v346_v1, 9  ;;  %v1406_v1 = vrot.slane %v1404_v48, 5 }
  0x76   : > { %v415_v17 = vsel %vm6684_vm5, %v5045_v3, %v414_v2  ;;  %v6485_v2 = vld [vmem:[%s7862_s1 + $0x128] sm:$0xff]  }
  0x77   : > { %5933 = vmatpush3.bf16.msra.mxu0 %v6465_v56  ;;  %v6477_v56 = vld [vmem:[%s7862_s1 + $0xf8] sm:$0xff]   ;;  %416 = vst [vmem:[#allocation3 + $0x48] sm:$0x1] %v415_v17 }
  0x78   : > { %5934 = vmatprep.subr.bf16.mxu0 %v6467_v61 }
  0x7b   : > { %5935 = vmatpush3.bf16.msra.mxu0 %v6467_v61  ;;  %v1350_v61 = vrot.slane %v1348_v53, 5 }
  0x7c   : > { %5936 = vmatprep.subr.bf16.mxu0 %v6469_v11 }
  0x7d   : > { %v1351_v12 = vor.u32 %v1350_v61, %v1347_v60  ;;  %v1403_v61 = vrot.slane %v1401_v47, 4 }
  0x7f   : > { %5937 = vmatpush3.bf16.msra.mxu0 %v6469_v11  ;;  %v1337_v11 = vor.u32 %v1336_v59, %v1333_v0  ;;  %v1352_v27 = vrot.slane %v1351_v12, 4  ;;  %v1328_v0 = vld [vmem:[#allocation3 + $0x40] sm:$0xf]  ;;  %v1389_v59 = vrot.slane %v1387_v7, 4  ;;  %v1622_v7 = vrot.slane %v6991_v57, 5 }
  0x80   : > { %5946 = vmatprep.subr.bf16.mxu0 %v6470_v63  ;;  %v1429_v12 = vshrl.u32 %v1328_v0, 16 }
  0x81   : > { %v1338_v21 = vrot.slane %v1337_v11, 4  ;;  %v1357_v35 = vsel %vm6804_vm9, %v1352_v27, %v1356_v25 }
  0x82   : > { %5939 = vmatmul.mubr.bf16.vlgmr.msra.gmra.mrb[0].mxu0 %v5121_v30  ;;  %v1364_v30 = vrot.slane %v1362_v26, 5  ;;  %v1398_v26 = vrot.slane %v1396_v5, 5  ;;  %v1431_v29 = vrot.slane %v1429_v12, 4  ;;  %v6492_v12 = vld [vmem:[%s7862_s1 + $0x150] sm:$0xff]  }
  0x83   : > { %5947 = vmatpush3.bf16.msra.mxu0 %v6470_v63  ;;  %5942 = vmatprep.mubr.bf16.mxu0 %v5122_v38  ;;  %v1373_v63 = vshrl.u32 %v1320_v15, 16  ;;  %v1343_v34 = vsel %vm6804_vm9, %v1338_v21, %v1342_v24  ;;  %v6483_v38 = vld [vmem:[%s7862_s1 + $0x118] sm:$0xff]   ;;  %v1432_v15 = vshll.u32 %v1328_v0, 16  ;;  %v1407_v24 = vor.u32 %v1406_v1, %v1403_v61 }
  0x84   : > { %5948 = vmatprep.subr.bf16.mxu0 %v6471_v33  ;;  %v5176_v41 = vcombine.low %v1343_v34, %v1357_v35  ;;  %v1424_v21 = vshll.u32 %v7038_v8, 16  ;;  %v1596_v34 = vld [vmem:[#allocation3 + $0x8] sm:$0xe]  ;;  %v1597_v35 = vld [vmem:[#allocation3 + $0x10] sm:$0xe] }
  0x85   : > { %v5189_v48 = vrot.slane %v1597_v35, 9  ;;  %v1602_v1 = vld [vmem:[#allocation3 + $0x38] sm:$0xe] }
  0x87   : > { %5949 = vmatpush3.bf16.msra.mxu0 %v6471_v33  ;;  %v1375_v33 = vrot.slane %v1373_v63, 4  ;;  %v1412_v63 = vrot.slane %v1410_v6, 5 }
  0x88   : > { %5950 = vmatprep.subr.bf16.mxu0 %v6472_v9 }
  0x89   : > { %v1379_v3 = vor.u32 %v1378_v44, %v1375_v33  ;;  %v1408_v33 = vrot.slane %v1407_v24, 4  ;;  %v6493_v24 = vld [vmem:[%s7862_s1 + $0x158] sm:$0xff]  }
  0x8a   : > { %5943 = vmatmul.mubr.bf16.gmra.mrb[4].mxu0 %v5123_v55  ;;  %v1390_v55 = vshll.u32 %v1322_v42, 16  ;;  %v7049_v42 = vld [vmem:[#allocation3 + $0x18] sm:$0xe] }
  0x8b   : > { %5951 = vmatpush3.bf16.msra.mxu0 %v6472_v9  ;;  %5962 = vmatprep.mubr.bf16.mxu0 %v6478_v20  ;;  %v426_v9 = vld [vmem:[#allocation3 + $0x48] sm:$0x8]  ;;  %v1380_v25 = vrot.slane %v1379_v3, 4  ;;  %v5190_v57 = vrot.slane %v7049_v42, 9  ;;  %v6500_v42 = vld [vmem:[%s7862_s1 + $0x190] sm:$0xff]  }
  0x8c   : > { %5952 = vmatprep.subr.bf16.mxu0 %v6473_v46  ;;  %v5055_v20 = vrot.slane %v426_v9, 11  ;;  %v1392_v60 = vrot.slane %v1390_v55, 5  ;;  %v1626_v9 = vrot.slane %v6993_v14, 5  ;;  %v6490_v55 = vld [vmem:[%s7862_s1 + $0x140] sm:$0xff]  }
  0x8e   : > { %v496_v4 = vsel %vm6718_vm6, %v5055_v20, %v495_v32  ;;  %v1393_v23 = vor.u32 %v1392_v60, %v1389_v59  ;;  %v1413_v32 = vsel %vm6804_vm9, %v1408_v33, %v1412_v63  ;;  %v1600_v59 = vld [vmem:[#allocation3 + $0x28] sm:$0xe]  ;;  %v1601_v60 = vld [vmem:[#allocation3 + $0x30] sm:$0xe]  ;;  %v6494_v63 = vld [vmem:[%s7862_s1 + $0x160] sm:$0xff]  }
  0x8f   : > { %5953 = vmatpush3.bf16.msra.mxu0 %v6473_v46  ;;  %v7018_v46 = vld [vmem:[#allocation3 + $0x1c] sm:$0x1]  ;;  %497 = vst [vmem:[#allocation3 + $0x4c] sm:$0x1] %v496_v4  ;;  %v5188_v4 = vrot.slane %v1596_v34, 9 }
  0x90   : > { %5954 = vmatprep.subr.bf16.mxu0 %v6474_v62  ;;  %v1368_v54 = vshll.u32 %v7018_v46, 16  ;;  %v1630_v14 = vrot.slane %v7018_v46, 5  ;;  %v1627_v46 = vsel %vm6909_vm12, %v5189_v48, %v1626_v9  ;;  %v1982_v9 = vld [vmem:[#allocation3 + $0x18] sm:$0xf] }
  0x91   : > { %v1623_v3 = vsel %vm6909_vm12, %v5188_v4, %v1622_v7  ;;  %v1980_v7 = vld [vmem:[#allocation3 + $0x10] sm:$0xf]  ;;  %v2014_v4 = vshll.u32 %v1982_v9, 16 }
  0x92   : > { %v1370_v17 = vrot.slane %v1368_v54, 5 }
  0x93   : > { %5955 = vmatpush3.bf16.msra.mxu0 %v6474_v62  ;;  %v7020_v62 = vld [vmem:[#allocation3 + $0x24] sm:$0x1] }
  0x94   : > { %5956 = vmatprep.subr.bf16.mxu0 %v6475_v50  ;;  %v1382_v53 = vshll.u32 %v7020_v62, 16 }
  0x97   : > { %5957 = vmatpush3.bf16.msra.mxu0 %v6475_v50  ;;  %v6484_v50 = vld [vmem:[%s7862_s1 + $0x120] sm:$0xff]  }
  0x98   : > { %5958 = vmatprep.subr.bf16.mxu0 %v6476_v52 }
  0x9b   : > { %5959 = vmatpush3.bf16.msra.mxu0 %v6476_v52  ;;  %v1365_v52 = vor.u32 %v1364_v30, %v1361_v43  ;;  %v6489_v43 = vld [vmem:[%s7862_s1 + $0x138] sm:$0xff]   ;;  %v1394_v30 = vrot.slane %v1393_v23, 4  ;;  %v1646_v23 = vrot.slane %v7038_v8, 5  ;;  %v6496_v8 = vld [vmem:[%s7862_s1 + $0x170] sm:$0xff]  }
  0x9c   : > { %5960 = vmatprep.subr.bf16.mxu0 %v6477_v56 }
  0x9d   : > { %v1399_v20 = vsel %vm6804_vm9, %v1394_v30, %v1398_v26  ;;  %v5212_v26 = vcombine.low %v1623_v3, %v1627_v46  ;;  %v6499_v30 = vld [vmem:[%s7862_s1 + $0x188] sm:$0xff]  }
  0x9e   : > { %v5178_v61 = vcombine.low %v1399_v20, %v1413_v32  ;;  %v1997_v20 = vshrl.u32 %v1980_v7, 16  ;;  %v2000_v32 = vshll.u32 %v1980_v7, 16  ;;  %v6509_v3 = vld [vmem:[%s7862_s1 + $0x1c8] sm:$0xff]   ;;  %v7171_v7 = vld [vmem:[#allocation3 + $0x3c] sm:$0x1] }
  0x9f   : > { %5961 = vmatpush3.bf16.msra.mxu0 %v6477_v56  ;;  %v1326_v56 = vld [vmem:[#allocation3 + $0x38] sm:$0xf] }
  0xa0   : > { %5970 = vmatprep.subr.bf16.mxu0 %v6479_v10  ;;  %v1418_v11 = vshll.u32 %v1326_v56, 16  ;;  %v1999_v48 = vrot.slane %v1997_v20, 4 }
  0xa2   : > { %5963 = vmatmul.mubr.bf16.vlgmr.msra.gmra.mrb[0].mxu0 %v6480_v18  ;;  %v6487_v18 = vld [vmem:[%s7862_s1 + $0x130] sm:$0xff]   ;;  %v1420_v28 = vrot.slane %v1418_v11, 5  ;;  %v1638_v11 = vrot.slane %v7027_v49, 5  ;;  %v1650_v49 = vrot.slane %v7047_v31, 5 }
  0xa3   : > { %5971 = vmatpush3.bf16.msra.mxu0 %v6479_v10  ;;  %5966 = vmatprep.mubr.bf16.mxu0 %v6486_v22  ;;  %v1415_v10 = vshrl.u32 %v1326_v56, 16  ;;  %v1384_v22 = vrot.slane %v1382_v53, 5  ;;  %v6491_v53 = vld [vmem:[%s7862_s1 + $0x148] sm:$0xff]  }
  0xa4   : > { %5972 = vmatprep.subr.bf16.mxu0 %v6481_v19 }
  0xa5   : > { %v1417_v27 = vrot.slane %v1415_v10, 4  ;;  %v1385_v44 = vsel %vm6804_vm9, %v1380_v25, %v1384_v22  ;;  %v1634_v10 = vrot.slane %v7020_v62, 5  ;;  %v5194_v22 = vrot.slane %v1602_v1, 9  ;;  %v6508_v1 = vld [vmem:[#allocation3 + $0x20] ss:$8 sps:$4 sm:$0xff]  }
  0xa7   : > { %5973 = vmatpush3.bf16.msra.mxu0 %v6481_v19  ;;  %v1366_v19 = vrot.slane %v1365_v52, 4  ;;  %v1599_v52 = vld [vmem:[#allocation3 + $0x20] sm:$0xe]  ;;  %v1647_v34 = vsel %vm6909_vm12, %v5194_v22, %v1646_v23  ;;  %v6511_v22 = vld [vmem:[%s7862_s1 + $0x1d8] sm:$0xff]   ;;  %v1986_v23 = vld [vmem:[#allocation3 + $0x28] sm:$0xf] }
  0xa8   : > { %5974 = vmatprep.subr.bf16.mxu0 %v6482_v36  ;;  %v5191_v6 = vrot.slane %v1599_v52, 9  ;;  %v2002_v52 = vrot.slane %v2000_v32, 5 }
  0xaa   : > { %5967 = vmatmul.mubr.bf16.gmra.mrb[4].mxu0 %v6488_v37  ;;  %v1421_v37 = vor.u32 %v1420_v28, %v1417_v27  ;;  %v6498_v27 = vld [vmem:[%s7862_s1 + $0x180] sm:$0xff]   ;;  %v1631_v28 = vsel %vm6909_vm12, %v5190_v57, %v1630_v14  ;;  %v2016_v14 = vrot.slane %v2014_v4, 5 }
  0xab   : > { %5975 = vmatpush3.bf16.msra.mxu0 %v6482_v36  ;;  %5986 = vmatprep.mubr.bf16.mxu0 %v5176_v41  ;;  %v1434_v36 = vrot.slane %v1432_v15, 5  ;;  %v1371_v41 = vsel %vm6804_vm9, %v1366_v19, %v1370_v17  ;;  %v5192_v17 = vrot.slane %v1600_v59, 9  ;;  %v1642_v19 = vrot.slane %v7029_v51, 5  ;;  %v6495_v51 = vld [vmem:[%s7862_s1 + $0x168] sm:$0xff]  }
  0xac   : > { %5976 = vmatprep.subr.bf16.mxu0 %v6483_v38  ;;  %v1422_v47 = vrot.slane %v1421_v37, 4  ;;  %v5177_v54 = vcombine.low %v1371_v41, %v1385_v44  ;;  %v6502_v41 = vld [vmem:[%s7862_s1 + $0x1a0] sm:$0xff]   ;;  %v6503_v44 = vld [vmem:[%s7862_s1 + $0x1a8] sm:$0xff]  }
  0xad   : > { %v1435_v39 = vor.u32 %v1434_v36, %v1431_v29  ;;  %v1635_v29 = vsel %vm6909_vm12, %v5191_v6, %v1634_v10  ;;  %v1639_v36 = vsel %vm6909_vm12, %v5192_v17, %v1638_v11  ;;  %v6510_v11 = vld [vmem:[%s7862_s1 + $0x1d0] sm:$0xff]   ;;  %v6516_v17 = vld [vmem:[#allocation3 + $0x40] ss:$8 sps:$4 sm:$0xff]  }
  0xaf   : > { %5977 = vmatpush3.bf16.msra.mxu0 %v6483_v38  ;;  %v1438_v38 = vshll.u32 %v7047_v31, 16  ;;  %v1436_v56 = vrot.slane %v1435_v39, 4  ;;  %v5213_v31 = vcombine.low %v1631_v28, %v1635_v29  ;;  %v6501_v39 = vld [vmem:[%s7862_s1 + $0x198] sm:$0xff]   ;;  %v6513_v29 = vld [vmem:[%s7862_s1 + $0x1e8] sm:$0xff]  }
  0xb0   : > { %5978 = vmatprep.subr.bf16.mxu0 %v6484_v50 }
  0xb1   : > { %v1440_v0 = vrot.slane %v1438_v38, 5  ;;  %v6506_v38 = vld [vmem:[#allocation3 + $0x10] ss:$8 sps:$4 sm:$0xff]  }
  0xb3   : > { %5979 = vmatpush3.bf16.msra.mxu0 %v6484_v50  ;;  %v1426_v50 = vrot.slane %v1424_v21, 5  ;;  %v1441_v15 = vsel %vm6804_vm9, %v1436_v56, %v1440_v0  ;;  %v6497_v21 = vld [vmem:[%s7862_s1 + $0x178] sm:$0xff]   ;;  %v6507_v56 = vld [vmem:[%s7862_s1 + $0x1c0] sm:$0xff]   ;;  %v2003_v0 = vor.u32 %v2002_v52, %v1999_v48  ;;  %v6515_v52 = vld [vmem:[%s7862_s1 + $0x1f0] sm:$0xff]  }
  0xb4   : > { %5980 = vmatprep.subr.bf16.mxu0 %v6485_v2 }
  0xb5   : > { %v1427_v5 = vsel %vm6804_vm9, %v1422_v47, %v1426_v50  ;;  %v2011_v50 = vshrl.u32 %v1982_v9, 16  ;;  %v6505_v47 = vld [vmem:[%s7862_s1 + $0x1b8] sm:$0xff]   ;;  %v2004_v46 = vrot.slane %v2003_v0, 4  ;;  %v2076_v0 = vshll.u32 %v7171_v7, 16 }
  0xb6   : > { %v5179_v25 = vcombine.low %v1427_v5, %v1441_v15 }
  0xb7   : > { %5981 = vmatpush3.bf16.msra.mxu0 %v6485_v2  ;;  %v1603_v2 = vld [vmem:[#allocation3 + $0x40] sm:$0xe]  ;;  %v2013_v57 = vrot.slane %v2011_v50, 4 }
  0xb8   : > { %5982 = vmatprep.subr.bf16.mxu0 %v6487_v18  ;;  %v5195_v62 = vrot.slane %v1603_v2, 9  ;;  %v6514_v2 = vld [vmem:[#allocation3 + $0x30] ss:$8 sps:$4 sm:$0xff]  }
  0xba   : > { %v1651_v35 = vsel %vm6909_vm12, %v5195_v62, %v1650_v49  ;;  %v1988_v62 = vld [vmem:[#allocation3 + $0x30] sm:$0xf]  ;;  %v1990_v49 = vld [vmem:[#allocation3 + $0x38] sm:$0xf] }
  0xbb   : > { %5983 = vmatpush3.bf16.msra.mxu0 %v6487_v18  ;;  %v5193_v18 = vrot.slane %v1601_v60, 9  ;;  %v5215_v37 = vcombine.low %v1647_v34, %v1651_v35  ;;  %v2017_v60 = vor.u32 %v2016_v14, %v2013_v57  ;;  %v2070_v28 = vshll.u32 %v1990_v49, 16  ;;  %v1992_v35 = vld [vmem:[#allocation3 + $0x40] sm:$0xf] }
  0xbc   : > { %5984 = vmatprep.subr.bf16.mxu0 %v6489_v43  ;;  %v2081_v20 = vshrl.u32 %v1992_v35, 16  ;;  %v2084_v32 = vshll.u32 %v1992_v35, 16 }
  0xbd   : > { %v2018_v6 = vrot.slane %v2017_v60, 4 }
  0xbf   : > { %5985 = vmatpush3.bf16.msra.mxu0 %v6489_v43  ;;  %v1643_v43 = vsel %vm6909_vm12, %v5193_v18, %v1642_v19  ;;  %v1984_v19 = vld [vmem:[#allocation3 + $0x20] sm:$0xf] }
  0xc0   : > { %5994 = vmatprep.subr.bf16.mxu0 %v6490_v55  ;;  %v5214_v33 = vcombine.low %v1639_v36, %v1643_v43  ;;  %v7165_v36 = vld [vmem:[#allocation3 + $0x24] sm:$0x1] }
  0xc2   : > { %5987 = vmatmul.mubr.bf16.vlgmr.msra.gmra.mrb[0].mxu0 %v5177_v54  ;;  %v7137_v54 = vld [vmem:[#allocation3 + $0x14] sm:$0x1] }
  0xc3   : > { %5995 = vmatpush3.bf16.msra.mxu0 %v6490_v55  ;;  %5990 = vmatprep.mubr.bf16.mxu0 %v5178_v61  ;;  %v6504_v55 = vld [vmem:[%s7862_s1 + $0x1b0] sm:$0xff]   ;;  %v2006_v59 = vshll.u32 %v7137_v54, 16  ;;  %v2288_v35 = vrot.slane %v7137_v54, 5 }
  0xc4   : > { %5996 = vmatprep.subr.bf16.mxu0 %v6491_v53 }
  0xc5   : > { %v2008_v5 = vrot.slane %v2006_v59, 5  ;;  %v6517_v59 = vld [vmem:[%s7862_s1 + $0x1f8] sm:$0xff]  }
  0xc7   : > { %5997 = vmatpush3.bf16.msra.mxu0 %v6491_v53  ;;  %v7139_v53 = vld [vmem:[#allocation3 + $0x1c] sm:$0x1] }
  0xc8   : > { %5998 = vmatprep.subr.bf16.mxu0 %v6492_v12  ;;  %v2020_v61 = vshll.u32 %v7139_v53, 16 }
  0xca   : > { %5991 = vmatmul.mubr.bf16.gmra.mrb[4].mxu0 %v5179_v25  ;;  %v2022_v10 = vrot.slane %v2020_v61, 5  ;;  %v2028_v25 = vshll.u32 %v1984_v19, 16 }
  0xcb   : > { %5999 = vmatpush3.bf16.msra.mxu0 %v6492_v12  ;;  %6010 = vmatprep.mubr.bf16.mxu0 %v5212_v26  ;;  %v2009_v12 = vsel %vm6804_vm9, %v2004_v46, %v2008_v5  ;;  %v2039_v26 = vshrl.u32 %v1986_v23, 16  ;;  %v7183_v5 = vld [vmem:[#allocation3 + $0x44] sm:$0x1] }
  0xcc   : > { %6000 = vmatprep.subr.bf16.mxu0 %v6493_v24  ;;  %v2023_v15 = vsel %vm6804_vm9, %v2018_v6, %v2022_v10 }
  0xcd   : > { %v5268_v18 = vcombine.low %v2009_v12, %v2023_v15 }
  0xcf   : > { %6001 = vmatpush3.bf16.msra.mxu0 %v6493_v24  ;;  %v2025_v24 = vshrl.u32 %v1984_v19, 16 }
  0xd0   : > { %6002 = vmatprep.subr.bf16.mxu0 %v6494_v63 }
  0xd1   : > { %v2027_v43 = vrot.slane %v2025_v24, 4 }
  0xd3   : > { %6003 = vmatpush3.bf16.msra.mxu0 %v6494_v63  ;;  %v2042_v63 = vshll.u32 %v1986_v23, 16 }
  0xd4   : > { %6004 = vmatprep.subr.bf16.mxu0 %v6495_v51 }
  0xd5   : > { %v2044_v34 = vrot.slane %v2042_v63, 5 }
  0xd7   : > { %6005 = vmatpush3.bf16.msra.mxu0 %v6495_v51  ;;  %v6512_v51 = vld [vmem:[%s7862_s1 + $0x1e0] sm:$0xff]  }
  0xd8   : > { %6006 = vmatprep.subr.bf16.mxu0 %v6496_v8 }
  0xdb   : > { %6007 = vmatpush3.bf16.msra.mxu0 %v6496_v8  ;;  %v2053_v8 = vshrl.u32 %v1988_v62, 16 }
  0xdc   : > { %6008 = vmatprep.subr.bf16.mxu0 %v6497_v21 }
  0xdf   : > { %6009 = vmatpush3.bf16.msra.mxu0 %v6497_v21  ;;  %v2056_v21 = vshll.u32 %v1988_v62, 16  ;;  %v2090_v62 = vshll.u32 %v7183_v5, 16 }
  0xe0   : > { %6018 = vmatprep.subr.bf16.mxu0 %v6498_v27 }
  0xe2   : > { %6011 = vmatmul.mubr.bf16.vlgmr.msra.gmra.mrb[0].mxu0 %v5213_v31  ;;  %v2030_v31 = vrot.slane %v2028_v25, 5  ;;  %v6518_v25 = vld [vmem:[%s7862_s1 + $0x200] sm:$0xff]  }
  0xe3   : > { %6019 = vmatpush3.bf16.msra.mxu0 %v6498_v27  ;;  %6014 = vmatprep.mubr.bf16.mxu0 %v5214_v33  ;;  %v2067_v27 = vshrl.u32 %v1990_v49, 16  ;;  %v2041_v33 = vrot.slane %v2039_v26, 4 }
  0xe4   : > { %6020 = vmatprep.subr.bf16.mxu0 %v6499_v30  ;;  %v2031_v9 = vor.u32 %v2030_v31, %v2027_v43 }
  0xe5   : > { %v2045_v50 = vor.u32 %v2044_v34, %v2041_v33  ;;  %v6519_v33 = vld [vmem:[%s7862_s1 + $0x208] sm:$0xff]  }
  0xe6   : > { %v2032_v60 = vrot.slane %v2031_v9, 4 }
  0xe7   : > { %6021 = vmatpush3.bf16.msra.mxu0 %v6499_v30  ;;  %v7167_v30 = vld [vmem:[#allocation3 + $0x2c] sm:$0x1] }
  0xe8   : > { %6022 = vmatprep.subr.bf16.mxu0 %v6500_v42  ;;  %v2048_v4 = vshll.u32 %v7167_v30, 16 }
  0xea   : > { %6015 = vmatmul.mubr.bf16.gmra.mrb[4].mxu0 %v5215_v37  ;;  %v2058_v37 = vrot.slane %v2056_v21, 5  ;;  %v2050_v46 = vrot.slane %v2048_v4, 5  ;;  %v6524_v4 = vld [vmem:[%s7862_s1 + $0x230] sm:$0xff]  }
  0xeb   : > { %6023 = vmatpush3.bf16.msra.mxu0 %v6500_v42  ;;  %6034 = vmatprep.mubr.bf16.mxu0 %v6506_v38  ;;  %v2055_v42 = vrot.slane %v2053_v8, 4  ;;  %v2069_v38 = vrot.slane %v2067_v27, 4  ;;  %v2263_v8 = vld [vmem:[#allocation3 + $0x18] sm:$0xe] }
  0xec   : > { %6024 = vmatprep.subr.bf16.mxu0 %v6501_v39 }
  0xed   : > { %v2059_v57 = vor.u32 %v2058_v37, %v2055_v42  ;;  %v5281_v42 = vrot.slane %v2263_v8, 9  ;;  %v2292_v37 = vrot.slane %v7139_v53, 5  ;;  %v7276_v8 = vld [vmem:[%s7863_s2] sm:$0xff]  }
  0xef   : > { %6025 = vmatpush3.bf16.msra.mxu0 %v6501_v39  ;;  %v2072_v39 = vrot.slane %v2070_v28, 5  ;;  %v2293_v53 = vsel %vm6909_vm12, %v5281_v42, %v2292_v37 }
  0xf0   : > { %6026 = vmatprep.subr.bf16.mxu0 %v6502_v41 }
  0xf3   : > { %6027 = vmatpush3.bf16.msra.mxu0 %v6502_v41  ;;  %v1994_v41 = vld [vmem:[#allocation3 + $0x48] sm:$0xf] }
  0xf4   : > { %6028 = vmatprep.subr.bf16.mxu0 %v6503_v44  ;;  %v2098_v48 = vshll.u32 %v1994_v41, 16 }
  0xf6   : > { %v2100_v10 = vrot.slane %v2098_v48, 5  ;;  %v2265_v48 = vld [vmem:[#allocation3 + $0x28] sm:$0xe] }
  0xf7   : > { %6029 = vmatpush3.bf16.msra.mxu0 %v6503_v44  ;;  %v7169_v44 = vld [vmem:[#allocation3 + $0x34] sm:$0x1] }
  0xf8   : > { %6030 = vmatprep.subr.bf16.mxu0 %v6504_v55  ;;  %v2062_v14 = vshll.u32 %v7169_v44, 16 }
  0xfa   : > { %v2064_v12 = vrot.slane %v2062_v14, 5 }
  0xfb   : > { %6031 = vmatpush3.bf16.msra.mxu0 %v6504_v55  ;;  %v2034_v55 = vshll.u32 %v7165_v36, 16 }
  0xfc   : > { %6032 = vmatprep.subr.bf16.mxu0 %v6505_v47 }
  0xfd   : > { %v2036_v61 = vrot.slane %v2034_v55, 5 }
  0xff   : > { %6033 = vmatpush3.bf16.msra.mxu0 %v6505_v47  ;;  %v2095_v47 = vshrl.u32 %v1994_v41, 16  ;;  %v2037_v19 = vsel %vm6804_vm9, %v2032_v60, %v2036_v61  ;;  %v6520_v41 = vld [vmem:[%s7862_s1 + $0x210] sm:$0xff]   ;;  %v6525_v60 = vld [vmem:[%s7862_s1 + $0x238] sm:$0xff]  }
 0x100   : > { %6042 = vmatprep.subr.bf16.mxu0 %v6507_v56 }
 0x101   : > { %v2097_v6 = vrot.slane %v2095_v47, 4  ;;  %v2264_v47 = vld [vmem:[#allocation3 + $0x20] sm:$0xe] }
 0x102   : > { %6035 = vmatmul.mubr.bf16.vlgmr.msra.gmra.mrb[0].mxu0 %v6508_v1  ;;  %v2083_v1 = vrot.slane %v2081_v20, 4  ;;  %v6521_v20 = vld [vmem:[%s7862_s1 + $0x218] sm:$0xff]   ;;  %v5282_v14 = vrot.slane %v2264_v47, 9 }
 0x103   : > { %6043 = vmatpush3.bf16.msra.mxu0 %v6507_v56  ;;  %6038 = vmatprep.mubr.bf16.mxu0 %v6514_v2  ;;  %v2073_v56 = vor.u32 %v2072_v39, %v2069_v38  ;;  %v2086_v2 = vrot.slane %v2084_v32, 5  ;;  %v2101_v49 = vor.u32 %v2100_v10, %v2097_v6  ;;  %v6522_v32 = vld [vmem:[%s7862_s1 + $0x220] sm:$0xff]  }
 0x104   : > { %6044 = vmatprep.subr.bf16.mxu0 %v6509_v3  ;;  %v2268_v6 = vld [vmem:[#allocation3 + $0x40] sm:$0xe] }
 0x105   : > { %v2074_v15 = vrot.slane %v2073_v56, 4  ;;  %v2102_v43 = vrot.slane %v2101_v49, 4  ;;  %v2296_v56 = vrot.slane %v7165_v36, 5  ;;  %v6526_v49 = vld [vmem:[%s7863_s2 + $0x40] sm:$0xff]  }
 0x106   : > { %6090 = vmatprep.subr.bf16.mxu1 %v6526_v49 }
 0x107   : > { %6045 = vmatpush3.bf16.msra.mxu0 %v6509_v3  ;;  %v2046_v3 = vrot.slane %v2045_v50, 4  ;;  %v6523_v50 = vld [vmem:[%s7862_s1 + $0x228] sm:$0xff]   ;;  %6091 = vmatpush3.bf16.msra.mxu1 %v6526_v49 }
 0x108   : > { %6046 = vmatprep.subr.bf16.mxu0 %v6510_v11 }
 0x109   : > { %v2051_v23 = vsel %vm6804_vm9, %v2046_v3, %v2050_v46  ;;  %v2308_v3 = vrot.slane %v7171_v7, 5  ;;  %v2297_v46 = vsel %vm6909_vm12, %v5282_v14, %v2296_v56 }
 0x10a   : > { %6039 = vmatmul.mubr.bf16.gmra.mrb[4].mxu0 %v6516_v17  ;;  %v2078_v17 = vrot.slane %v2076_v0, 5  ;;  %v5269_v21 = vcombine.low %v2037_v19, %v2051_v23  ;;  %v5283_v0 = vrot.slane %v2265_v48, 9 }
 0x10b   : > { %6047 = vmatpush3.bf16.msra.mxu0 %v6510_v11  ;;  %6058 = vmatprep.mubr.bf16.mxu0 %v5268_v18  ;;  %v2060_v11 = vrot.slane %v2059_v57, 4  ;;  %v7185_v18 = vld [vmem:[#allocation3 + $0x4c] sm:$0x1]  ;;  %v2267_v57 = vld [vmem:[#allocation3 + $0x38] sm:$0xe] }
 0x10c   : > { %6048 = vmatprep.subr.bf16.mxu0 %v6511_v22  ;;  %v2104_v24 = vshll.u32 %v7185_v18, 16  ;;  %v2079_v63 = vsel %vm6804_vm9, %v2074_v15, %v2078_v17  ;;  %v2312_v15 = vrot.slane %v7183_v5, 5  ;;  %v2316_v19 = vrot.slane %v7185_v18, 5  ;;  %v6527_v5 = vld [vmem:[%s7863_s2 + $0x48] sm:$0xff]   ;;  %v6528_v18 = vld [vmem:[%s7863_s2 + $0x50] sm:$0xff]  }
 0x10d   : > { %v2065_v26 = vsel %vm6804_vm9, %v2060_v11, %v2064_v12  ;;  %v2269_v11 = vld [vmem:[#allocation3 + $0x48] sm:$0xe]  ;;  %v5286_v12 = vrot.slane %v2268_v6, 9  ;;  %6092 = vmatprep.subr.bf16.mxu1 %v6527_v5 }
 0x10e   : > { %v5270_v28 = vcombine.low %v2065_v26, %v2079_v63  ;;  %v2106_v31 = vrot.slane %v2104_v24, 5  ;;  %v5287_v17 = vrot.slane %v2269_v11, 9  ;;  %6093 = vmatpush3.bf16.msra.mxu1 %v6527_v5  ;;  %v6529_v24 = vld [vmem:[%s7863_s2 + $0x58] sm:$0xff]   ;;  %v6531_v26 = vld [vmem:[%s7863_s2 + $0x68] sm:$0xff]   ;;  %v6532_v63 = vld [vmem:[%s7863_s2 + $0x70] sm:$0xff]  }
 0x10f   : > { %6049 = vmatpush3.bf16.msra.mxu0 %v6511_v22  ;;  %v2087_v22 = vor.u32 %v2086_v2, %v2083_v1  ;;  %v2304_v1 = vrot.slane %v7169_v44, 5  ;;  %v5285_v2 = vrot.slane %v2267_v57, 9  ;;  %6094 = vmatprep.subr.bf16.mxu1 %v6528_v18 }
 0x110   : > { %6050 = vmatprep.subr.bf16.mxu0 %v6512_v51  ;;  %v2107_v39 = vsel %vm6804_vm9, %v2102_v43, %v2106_v31  ;;  %v2317_v23 = vsel %vm6909_vm12, %v5287_v17, %v2316_v19 }
 0x111   : > { %v2088_v27 = vrot.slane %v2087_v22, 4  ;;  %v2309_v10 = vsel %vm6909_vm12, %v5285_v2, %v2308_v3  ;;  %v2313_v22 = vsel %vm6909_vm12, %v5286_v12, %v2312_v15 }
 0x112   : > { %6095 = vmatpush3.bf16.msra.mxu1 %v6528_v18 }
 0x113   : > { %6051 = vmatpush3.bf16.msra.mxu0 %v6512_v51  ;;  %v2262_v51 = vld [vmem:[#allocation3 + $0x10] sm:$0xe]  ;;  %6096 = vmatprep.subr.bf16.mxu1 %v6529_v24 }
 0x114   : > { %6052 = vmatprep.subr.bf16.mxu0 %v6513_v29  ;;  %v5280_v34 = vrot.slane %v2262_v51, 9  ;;  %v6533_v51 = vld [vmem:[%s7863_s2 + $0x78] sm:$0xff]  }
 0x116   : > { %v2289_v54 = vsel %vm6909_vm12, %v5280_v34, %v2288_v35  ;;  %6097 = vmatpush3.bf16.msra.mxu1 %v6529_v24 }
 0x117   : > { %6053 = vmatpush3.bf16.msra.mxu0 %v6513_v29  ;;  %v2092_v29 = vrot.slane %v2090_v62, 5  ;;  %v5304_v55 = vcombine.low %v2289_v54, %v2293_v53  ;;  %v5307_v62 = vcombine.low %v2313_v22, %v2317_v23 }
 0x118   : > { %6054 = vmatprep.subr.bf16.mxu0 %v6515_v52 }
 0x119   : > { %v2093_v38 = vsel %vm6804_vm9, %v2088_v27, %v2092_v29 }
 0x11a   : > { %v5271_v9 = vcombine.low %v2093_v38, %v2107_v39 }
 0x11b   : > { %6055 = vmatpush3.bf16.msra.mxu0 %v6515_v52  ;;  %v2266_v52 = vld [vmem:[#allocation3 + $0x30] sm:$0xe] }
 0x11c   : > { %6056 = vmatprep.subr.bf16.mxu0 %v6517_v59  ;;  %v5284_v61 = vrot.slane %v2266_v52, 9 }
 0x11f   : > { %6057 = vmatpush3.bf16.msra.mxu0 %v6517_v59  ;;  %v2300_v59 = vrot.slane %v7167_v30, 5  ;;  %v2305_v30 = vsel %vm6909_vm12, %v5284_v61, %v2304_v1 }
 0x120   : > { %6066 = vmatprep.subr.bf16.mxu0 %v6518_v25  ;;  %v5306_v7 = vcombine.low %v2305_v30, %v2309_v10 }
 0x121   : > { %v2301_v36 = vsel %vm6909_vm12, %v5283_v0, %v2300_v59 }
 0x122   : > { %6059 = vmatmul.mubr.bf16.vlgmr.msra.gmra.mrb[0].mxu0 %v5269_v21  ;;  %v5305_v44 = vcombine.low %v2297_v46, %v2301_v36 }
 0x123   : > { %6067 = vmatpush3.bf16.msra.mxu0 %v6518_v25  ;;  %6062 = vmatprep.mubr.bf16.mxu0 %v5270_v28  ;;  %v6530_v25 = vld [vmem:[%s7863_s2 + $0x60] sm:$0xff]  }
 0x124   : > { %6068 = vmatprep.subr.bf16.mxu0 %v6519_v33  ;;  %6098 = vmatprep.subr.bf16.mxu1 %v6530_v25 }
 0x125   : > { %6099 = vmatpush3.bf16.msra.mxu1 %v6530_v25 }
 0x126   : > { %6100 = vmatprep.subr.bf16.mxu1 %v6531_v26 }
 0x127   : > { %6069 = vmatpush3.bf16.msra.mxu0 %v6519_v33 }
 0x128   : > { %6070 = vmatprep.subr.bf16.mxu0 %v6520_v41 }
 0x129   : > { %6101 = vmatpush3.bf16.msra.mxu1 %v6531_v26 }
 0x12a   : > { %6063 = vmatmul.mubr.bf16.gmra.mrb[4].mxu0 %v5271_v9  ;;  %6102 = vmatprep.subr.bf16.mxu1 %v6532_v63 }
 0x12b   : > { %6071 = vmatpush3.bf16.msra.mxu0 %v6520_v41  ;;  %6082 = vmatprep.mubr.bf16.mxu0 %v5304_v55 }
 0x12c   : > { %6072 = vmatprep.subr.bf16.mxu0 %v6521_v20 }
 0x12d   : > { %6103 = vmatpush3.bf16.msra.mxu1 %v6532_v63 }
 0x12e   : > { %6104 = vmatprep.subr.bf16.mxu1 %v6533_v51 }
 0x12f   : > { %6073 = vmatpush3.bf16.msra.mxu0 %v6521_v20 }
 0x130   : > { %6074 = vmatprep.subr.bf16.mxu0 %v6522_v32 }
 0x131   : > { %6105 = vmatpush3.bf16.msra.mxu1 %v6533_v51 }
 0x132   : > { %6114 = vmatprep.subr.bf16.mxu1 %v7276_v8 }
 0x133   : > { %6075 = vmatpush3.bf16.msra.mxu0 %v6522_v32 }
 0x134   : > { %6076 = vmatprep.subr.bf16.mxu0 %v6523_v50 }
 0x137   : > { %6077 = vmatpush3.bf16.msra.mxu0 %v6523_v50 }
 0x138   : > { %6078 = vmatprep.subr.bf16.mxu0 %v6524_v4 }
 0x13b   : > { %6079 = vmatpush3.bf16.msra.mxu0 %v6524_v4 }
 0x13c   : > { %6080 = vmatprep.subr.bf16.mxu0 %v6525_v60 }
 0x13f   : > { %6081 = vmatpush3.bf16.msra.mxu0 %v6525_v60 }
 0x142   : > { %6083 = vmatmul.mubr.bf16.vlgmr.msra.gmra.mrb[0].mxu0 %v5305_v44 }
 0x143   : > { %6086 = vmatprep.mubr.bf16.mxu0 %v5306_v7 }
 0x14a   : > { %6087 = vmatmul.mubr.bf16.gmra.mrb[4].mxu0 %v5307_v62 }
 0x215   : > { %v6084_v21 = vpop.f32.mrb[0].mxu0 }
 0x216   : > { %v2433_v27 = vpop.f32.mrb[1].mxu0  ;;  %v2498_v34 = vmul.f32 %v6084_v21, %v6084_v21 }
 0x217   : > { %v6085_v28 = vpop.f32.mrb[2].mxu0  ;;  %v2496_v43 = vmul.f32 %v2433_v27, %v2433_v27 }
 0x218   : > { %v2436_v29 = vpop.f32.mrb[3].mxu0  ;;  %v2499_v37 = vmul.f32 %v6085_v28, %v6085_v28 }
 0x219   : > { %v2482_v31 = vadd.f32 %v2436_v29, %v2433_v27  ;;  %v2497_v33 = vmul.f32 %v2436_v29, %v2436_v29 }
 0x21b   : > { %v2483_v35 = vadd.f32 %v6084_v21, %v2482_v31  ;;  %v2504_v42 = vadd.f32 %v2497_v33, %v2496_v43 }
 0x21d   : > { %v2505_v38 = vadd.f32 %v2504_v42, %v2498_v34  ;;  %v6088_v39 = vpop.f32.mrb[4].mxu0  ;;  %v2484_v41 = vadd.f32 %v6085_v28, %v2483_v35 }
 0x21e   : > { %v2449_v54 = vpop.f32.mrb[5].mxu0  ;;  %v2502_v48 = vmul.f32 %v6088_v39, %v6088_v39 }
 0x21f   : > { %v2485_v53 = vadd.f32 %v2484_v41, %v2449_v54  ;;  %v2500_v9 = vmul.f32 %v2449_v54, %v2449_v54  ;;  %v2506_v55 = vadd.f32 %v2505_v38, %v2499_v37  ;;  %v6089_v20 = vpop.f32.mrb[6].mxu0 }
 0x220   : > { %v2452_v32 = vpop.f32.mrb[7].mxu0  ;;  %v2503_v14 = vmul.f32 %v6089_v20, %v6089_v20 }
 0x221   : > { %v2507_v50 = vadd.f32 %v2506_v55, %v2500_v9  ;;  %v2486_v4 = vadd.f32 %v2485_v53, %v2452_v32  ;;  %v2501_v47 = vmul.f32 %v2452_v32, %v2452_v32 }
 0x223   : > { %v2487_v52 = vadd.f32 %v6088_v39, %v2486_v4  ;;  %v2508_v57 = vadd.f32 %v2507_v50, %v2501_v47 }
 0x225   : > { %v2488_v56 = vadd.f32 %v6089_v20, %v2487_v52  ;;  %v2509_v0 = vadd.f32 %v2508_v57, %v2502_v48 }
 0x227   : > { %v2489_v59 = vrot.slane %v2488_v56, 4  ;;  %v2510_v60 = vadd.f32 %v2509_v0, %v2503_v14 }
 0x229   : > { %v2490_v61 = vadd.f32 %v2489_v59, %v2488_v56  ;;  %v2511_v1 = vrot.slane %v2510_v60, 4 }
 0x22b   : > { %v2491_v2 = vrot.slane %v2490_v61, 2  ;;  %v2512_v3 = vadd.f32 %v2511_v1, %v2510_v60 }
 0x22d   : > { %v2492_v46 = vadd.f32 %v2491_v2, %v2490_v61  ;;  %v2513_v36 = vrot.slane %v2512_v3, 2 }
 0x22f   : > { %v2493_v6 = vrot.slane %v2492_v46, 1  ;;  %v2514_v30 = vadd.f32 %v2513_v36, %v2512_v3 }
 0x231   : > { %v2494_v10 = vadd.f32 %v2493_v6, %v2492_v46  ;;  %v2515_v11 = vrot.slane %v2514_v30, 1 }
 0x233   : > { %v2516_v44 = vadd.f32 %v2515_v11, %v2514_v30  ;;  %v2519_v12 = vmul.f32 0.015625, %v2494_v10  ;;  %v2676_v10 = vld [vmem:[#allocation3 + $0x10] sm:$0xf] }
 0x235   : > { %v2520_v7 = vmul.f32 0.015625, %v2516_v44  ;;  %v2521_v15 = vmul.f32 %v2519_v12, %v2519_v12  ;;  %v2534_v17 = vsub.f32 %v2433_v27, %v2519_v12  ;;  %v2535_v19 = vsub.f32 %v2436_v29, %v2519_v12 }
 0x236   : > { %v2536_v22 = vsub.f32 %v6084_v21, %v2519_v12  ;;  %v2537_v23 = vsub.f32 %v6085_v28, %v2519_v12  ;;  %v2538_v62 = vsub.f32 %v2449_v54, %v2519_v12  ;;  %v2539_v49 = vsub.f32 %v2452_v32, %v2519_v12 }
 0x237   : > { %v2522_v5 = vsub.f32 %v2520_v7, %v2521_v15  ;;  %v2540_v18 = vsub.f32 %v6088_v39, %v2519_v12  ;;  %v2541_v24 = vsub.f32 %v6089_v20, %v2519_v12  ;;  %v2679_v15 = vld [vmem:[#allocation3 + $0x14] sm:$0x1] }
 0x239   : > { %v2523_v25 = vmax.f32 %v2522_v5, 0.0  ;;  %v2694_v5 = vld [vmem:[#allocation3 + $0x28] sm:$0xf] }
 0x23b   : > { %v2524_v26 = vadd.f32 1e-05, %v2523_v25 }
 0x23d   : > { %6610 = vrsqrt.f32 %v2524_v26 }
 0x247   : > { %v6611_v63 = vpop.eup %6610 }
 0x248   : > { %v2542_v51 = vmul.f32 %v6611_v63, %v2534_v17  ;;  %v2543_v43 = vmul.f32 %v6611_v63, %v2535_v19  ;;  %v2544_v31 = vmul.f32 %v6611_v63, %v2536_v22  ;;  %v2545_v33 = vmul.f32 %v6611_v63, %v2537_v23  ;;  %v2682_v17 = vld [vmem:[#allocation3 + $0x18] sm:$0xf] }
 0x249   : > { %v2546_v34 = vmul.f32 %v6611_v63, %v2538_v62  ;;  %v2547_v35 = vmul.f32 %v6611_v63, %v2539_v49  ;;  %v2548_v42 = vmul.f32 %v6611_v63, %v2540_v18  ;;  %v2549_v27 = vmul.f32 %v6611_v63, %v2541_v24  ;;  %v2688_v49 = vld [vmem:[#allocation3 + $0x20] sm:$0xf]  ;;  %v2700_v63 = vld [vmem:[#allocation3 + $0x30] sm:$0xf] }
 0x24a   : > { %v2550_v29 = vmax.f32 %v2542_v51, 0.0  ;;  %v2551_v21 = vmax.f32 %v2543_v43, 0.0  ;;  %v2552_v28 = vmax.f32 %v2544_v31, 0.0  ;;  %v2553_v37 = vmax.f32 %v2545_v33, 0.0 }
 0x24b   : > { %v2554_v38 = vmax.f32 %v2546_v34, 0.0  ;;  %v2555_v41 = vmax.f32 %v2547_v35, 0.0  ;;  %v2556_v39 = vmax.f32 %v2548_v42, 0.0  ;;  %v2557_v54 = vmax.f32 %v2549_v27, 0.0  ;;  %v2703_v34 = vld [vmem:[#allocation3 + $0x34] sm:$0x1] }
 0x24c   : > { %v5608_v53 = vpack.c.bf16 %v2550_v29, %v2550_v29  ;;  %v5609_v9 = vpack.c.bf16 %v2551_v21, %v2551_v21  ;;  %v5610_v55 = vpack.c.bf16 %v2552_v28, %v2552_v28  ;;  %v5611_v20 = vpack.c.bf16 %v2553_v37, %v2553_v37  ;;  %v2670_v35 = vld [vmem:[#allocation3 + $0x8] sm:$0xf]  ;;  %v2706_v28 = vld [vmem:[#allocation3 + $0x38] sm:$0xf]  ;;  %v2673_v37 = vld [vmem:[#allocation3 + $0xc] sm:$0x1] }
 0x24d   : > { %v5612_v32 = vpack.c.bf16 %v2554_v38, %v2554_v38  ;;  %v5613_v50 = vpack.c.bf16 %v2555_v41, %v2555_v41  ;;  %v7279_v4 = vpack.c.bf16 %v2556_v39, %v2556_v39  ;;  %v7281_v47 = vpack.c.bf16 %v2557_v54, %v2557_v54  ;;  %v2685_v38 = vld [vmem:[#allocation3 + $0x1c] sm:$0x1] }
 0x24e   : > { %v2591_v48 = vshrl.u32 %v5608_v53, 16  ;;  %v2594_v52 = vshll.u32 %v5608_v53, 16  ;;  %v2599_v57 = vshrl.u32 %v5609_v9, 16  ;;  %v2602_v14 = vshll.u32 %v5609_v9, 16  ;;  %v2691_v9 = vld [vmem:[#allocation3 + $0x24] sm:$0x1] }
 0x24f   : > { %v2607_v56 = vshrl.u32 %v5610_v55, 16  ;;  %v2610_v0 = vshll.u32 %v5610_v55, 16  ;;  %v2615_v59 = vshrl.u32 %v5611_v20, 16  ;;  %v2618_v60 = vshll.u32 %v5611_v20, 16  ;;  %v2697_v55 = vld [vmem:[#allocation3 + $0x2c] sm:$0x1] }
 0x250   : > { %v7283_v61 = vrot.slane %v2591_v48, 7  ;;  %v2601_v1 = vrot.slane %v2599_v57, 7  ;;  %v2623_v2 = vshrl.u32 %v5612_v32, 16  ;;  %v2626_v3 = vshll.u32 %v5612_v32, 16  ;;  %v2712_v48 = vld [vmem:[#allocation3 + $0x40] sm:$0xf] }
 0x251   : > { %v7285_v46 = vrot.slane %v2607_v56, 7  ;;  %v7287_v36 = vrot.slane %v2615_v59, 7  ;;  %v2631_v6 = vshrl.u32 %v5613_v50, 16  ;;  %v2634_v30 = vshll.u32 %v5613_v50, 16 }
 0x252   : > { %v2596_v11 = vor.u32 %v2594_v52, %v7283_v61  ;;  %v2597_v44 = vrot.slane %v7283_v61, 4  ;;  %v2604_v12 = vor.u32 %v2602_v14, %v2601_v1  ;;  %v2605_v7 = vrot.slane %v2601_v1, 4  ;;  %v2715_v52 = vld [vmem:[#allocation3 + $0x44] sm:$0x1] }
 0x253   : > { %v2612_v19 = vor.u32 %v2610_v0, %v7285_v46  ;;  %v2613_v22 = vrot.slane %v7285_v46, 4  ;;  %v2620_v23 = vor.u32 %v2618_v60, %v7287_v36  ;;  %v2621_v62 = vrot.slane %v7287_v36, 4  ;;  %v2720_v46 = vld [vmem:[#allocation3] sm:$0xf]  ;;  %v2723_v36 = vld [vmem:[#allocation3 + $0x4] sm:$0x1] }
 0x254   : > { %v2625_v18 = vrot.slane %v2623_v2, 7  ;;  %v2633_v24 = vrot.slane %v2631_v6, 7  ;;  %v2639_v25 = vshrl.u32 %v7279_v4, 16  ;;  %v2642_v26 = vshll.u32 %v7279_v4, 16  ;;  %v2709_v4 = vld [vmem:[#allocation3 + $0x3c] sm:$0x1] }
 0x255   : > { %v2647_v51 = vshrl.u32 %v7281_v47, 16  ;;  %v2650_v43 = vshll.u32 %v7281_v47, 16  ;;  %v2677_v31 = vsel %vm6679_vm4, %v2604_v12, %v2676_v10  ;;  %v2680_v33 = vsel %vm6684_vm5, %v2605_v7, %v2679_v15 }
 0x256   : > { %v2628_v42 = vor.u32 %v2626_v3, %v2625_v18  ;;  %v2629_v27 = vrot.slane %v2625_v18, 4  ;;  %v2636_v29 = vor.u32 %v2634_v30, %v2633_v24  ;;  %v2637_v21 = vrot.slane %v2633_v24, 4  ;;  %2681 = vst [vmem:[#allocation3 + $0x14] sm:$0x1] %v2680_v33  ;;  %2678 = vst [vmem:[#allocation3 + $0x10] sm:$0xf] %v2677_v31 }
 0x257   : > { %v2641_v41 = vrot.slane %v2639_v25, 7  ;;  %v2649_v39 = vrot.slane %v2647_v51, 7  ;;  %v2683_v54 = vsel %vm6679_vm4, %v2612_v19, %v2682_v17  ;;  %v2689_v53 = vsel %vm6679_vm4, %v2620_v23, %v2688_v49 }
 0x258   : > { %v2695_v20 = vsel %vm6679_vm4, %v2628_v42, %v2694_v5  ;;  %v2701_v32 = vsel %vm6679_vm4, %v2636_v29, %v2700_v63  ;;  %v2704_v50 = vsel %vm6684_vm5, %v2637_v21, %v2703_v34  ;;  %2684 = vst [vmem:[#allocation3 + $0x18] sm:$0xf] %v2683_v54  ;;  %2690 = vst [vmem:[#allocation3 + $0x20] sm:$0xf] %v2689_v53 }
 0x259   : > { %v2671_v47 = vsel %vm6679_vm4, %v2596_v11, %v2670_v35  ;;  %v2644_v57 = vor.u32 %v2642_v26, %v2641_v41  ;;  %v2645_v14 = vrot.slane %v2641_v41, 4  ;;  %v2652_v56 = vor.u32 %v2650_v43, %v2649_v39  ;;  %2702 = vst [vmem:[#allocation3 + $0x30] sm:$0xf] %v2701_v32  ;;  %2705 = vst [vmem:[#allocation3 + $0x34] sm:$0x1] %v2704_v50 }
 0x25a   : > { %v2653_v0 = vrot.slane %v2649_v39, 4  ;;  %2696 = vst [vmem:[#allocation3 + $0x28] sm:$0xf] %v2695_v20  ;;  %2672 = vst [vmem:[#allocation3 + $0x8] sm:$0xf] %v2671_v47  ;;  %v2674_v59 = vsel %vm6684_vm5, %v2597_v44, %v2673_v37  ;;  %v2686_v60 = vsel %vm6684_vm5, %v2613_v22, %v2685_v38  ;;  %v2692_v61 = vsel %vm6684_vm5, %v2621_v62, %v2691_v9 }
 0x25b   : > { %v2698_v1 = vsel %vm6684_vm5, %v2629_v27, %v2697_v55  ;;  %v2707_v2 = vsel %vm6679_vm4, %v2644_v57, %v2706_v28  ;;  %v2710_v3 = vsel %vm6684_vm5, %v2645_v14, %v2709_v4  ;;  %2675 = vst [vmem:[#allocation3 + $0xc] sm:$0x1] %v2674_v59  ;;  %2687 = vst [vmem:[#allocation3 + $0x1c] sm:$0x1] %v2686_v60  ;;  %v2731_v60 = vld [vmem:[#allocation3 + $0x4c] sm:$0x1] }
 0x25c   : > { %2693 = vst [vmem:[#allocation3 + $0x24] sm:$0x1] %v2692_v61  ;;  %2699 = vst [vmem:[#allocation3 + $0x2c] sm:$0x1] %v2698_v1  ;;  %v2713_v6 = vsel %vm6679_vm4, %v2652_v56, %v2712_v48  ;;  %v2716_v30 = vsel %vm6684_vm5, %v2653_v0, %v2715_v52  ;;  %v2728_v52 = vld [vmem:[#allocation3 + $0x48] sm:$0xf] }
 0x25d   : > { %2708 = vst [vmem:[#allocation3 + $0x38] sm:$0xf] %v2707_v2  ;;  %2711 = vst [vmem:[#allocation3 + $0x3c] sm:$0x1] %v2710_v3  ;;  %v2718_v10 = vld [vmem:[#allocation3 + $0x10] sm:$0xf] }
 0x25e   : > { %2714 = vst [vmem:[#allocation3 + $0x40] sm:$0xf] %v2713_v6  ;;  %2717 = vst [vmem:[#allocation3 + $0x44] sm:$0x1] %v2716_v30  ;;  %v2719_v11 = vld [vmem:[#allocation3 + $0x14] sm:$0x1]  ;;  %v2721_v12 = vsel %vm6679_vm4, %v2718_v10, %v2720_v46 }
 0x25f   : > { %v2736_v44 = vld [vmem:[#allocation3 + $0x10] sm:$0x2]  ;;  %v2724_v7 = vsel %vm6684_vm5, %v2719_v11, %v2723_v36  ;;  %v2790_v17 = vld [vmem:[#allocation3 + $0x10] sm:$0x1]  ;;  %2722 = vst [vmem:[#allocation3] sm:$0xf] %v2721_v12 }
 0x260   : > { %v5326_v15 = vrot.slane %v2736_v44, 9  ;;  %2725 = vst [vmem:[#allocation3 + $0x4] sm:$0x1] %v2724_v7  ;;  %v2737_v19 = vld [vmem:[#allocation3 + $0x18] sm:$0x2] }
 0x261   : > { %v2816_v22 = vld [vmem:[#allocation3 + $0x10] sm:$0x8]  ;;  %v2817_v23 = vld [vmem:[#allocation3 + $0x18] sm:$0x8]  ;;  %v2740_v62 = vld [vmem:[#allocation3 + $0x30] sm:$0x2] }
 0x262   : > { %v2802_v49 = vld [vmem:[#allocation3 + $0x30] sm:$0x1]  ;;  %v2820_v5 = vld [vmem:[#allocation3 + $0x30] sm:$0x8]  ;;  %v2791_v18 = vsel %vm6684_vm5, %v5326_v15, %v2790_v17  ;;  %v5330_v24 = vrot.slane %v2740_v62, 9  ;;  %v5327_v34 = vrot.slane %v2737_v19, 9 }
 0x263   : > { %v5340_v25 = vrot.slane %v2820_v5, 11  ;;  %v2882_v26 = vld [vmem:[#allocation3 + $0x34] sm:$0x1]  ;;  %v2735_v63 = vld [vmem:[#allocation3 + $0x8] sm:$0x2]  ;;  %v5336_v21 = vrot.slane %v2816_v22, 11 }
 0x264   : > { %2792 = vst [vmem:[#allocation3 + $0x10] sm:$0x1] %v2791_v18  ;;  %v2793_v51 = vld [vmem:[#allocation3 + $0x18] sm:$0x1]  ;;  %v5325_v43 = vrot.slane %v2735_v63, 9  ;;  %v2803_v35 = vsel %vm6684_vm5, %v5330_v24, %v2802_v49  ;;  %v5337_v41 = vrot.slane %v2817_v23, 11 }
 0x265   : > { %v2787_v31 = vld [vmem:[#allocation3 + $0x8] sm:$0x1]  ;;  %v2815_v33 = vld [vmem:[#allocation3 + $0x8] sm:$0x8]  ;;  %v2883_v42 = vsel %vm6718_vm6, %v5340_v25, %v2882_v26  ;;  %v2867_v29 = vld [vmem:[#allocation3 + $0xc] sm:$0x1]  ;;  %v2794_v38 = vsel %vm6684_vm5, %v5327_v34, %v2793_v51 }
 0x266   : > { %v5335_v27 = vrot.slane %v2815_v33, 11  ;;  %v2870_v28 = vld [vmem:[#allocation3 + $0x14] sm:$0x1]  ;;  %2804 = vst [vmem:[#allocation3 + $0x30] sm:$0x1] %v2803_v35  ;;  %v2788_v37 = vsel %vm6684_vm5, %v5325_v43, %v2787_v31 }
 0x267   : > { %2884 = vst [vmem:[#allocation3 + $0x34] sm:$0x1] %v2883_v42  ;;  %v2873_v39 = vld [vmem:[#allocation3 + $0x1c] sm:$0x1]  ;;  %v2738_v54 = vld [vmem:[#allocation3 + $0x20] sm:$0x2]  ;;  %v2871_v9 = vsel %vm6718_vm6, %v5336_v21, %v2870_v28 }
 0x268   : > { %2789 = vst [vmem:[#allocation3 + $0x8] sm:$0x1] %v2788_v37  ;;  %v2868_v53 = vsel %vm6718_vm6, %v5335_v27, %v2867_v29  ;;  %2795 = vst [vmem:[#allocation3 + $0x18] sm:$0x1] %v2794_v38  ;;  %v2739_v55 = vld [vmem:[#allocation3 + $0x28] sm:$0x2]  ;;  %v2874_v48 = vsel %vm6718_vm6, %v5337_v41, %v2873_v39 }
 0x269   : > { %v5328_v20 = vrot.slane %v2738_v54, 9  ;;  %v2796_v32 = vld [vmem:[#allocation3 + $0x20] sm:$0x1]  ;;  %v2734_v50 = vld [vmem:[#allocation3] sm:$0x2]  ;;  %v5329_v0 = vrot.slane %v2739_v55, 9 }
 0x26a   : > { %v2784_v4 = vld [vmem:[#allocation3] sm:$0x1]  ;;  %v2814_v47 = vld [vmem:[#allocation3] sm:$0x8]  ;;  %2869 = vst [vmem:[#allocation3 + $0xc] sm:$0x1] %v2868_v53 }
 0x26b   : > { %2872 = vst [vmem:[#allocation3 + $0x14] sm:$0x1] %v2871_v9  ;;  %v5324_v57 = vrot.slane %v2734_v50, 9  ;;  %v5334_v14 = vrot.slane %v2814_v47, 11  ;;  %v2864_v56 = vld [vmem:[#allocation3 + $0x4] sm:$0x1]  ;;  %v2797_v59 = vsel %vm6684_vm5, %v5328_v20, %v2796_v32 }
 0x26c   : > { %2875 = vst [vmem:[#allocation3 + $0x1c] sm:$0x1] %v2874_v48  ;;  %v7353_v61 = vld [vmem:[#allocation3 + $0x10] sm:$0xf]  ;;  %2798 = vst [vmem:[#allocation3 + $0x20] sm:$0x1] %v2797_v59 }
 0x26d   : > { %v2799_v1 = vld [vmem:[#allocation3 + $0x28] sm:$0x1]  ;;  %v2818_v2 = vld [vmem:[#allocation3 + $0x20] sm:$0x8]  ;;  %v2785_v3 = vsel %vm6684_vm5, %v5324_v57, %v2784_v4  ;;  %v2865_v46 = vsel %vm6718_vm6, %v5334_v14, %v2864_v56  ;;  %v2955_v36 = vshrl.u32 %v7353_v61, 16  ;;  %v2958_v6 = vshll.u32 %v7353_v61, 16 }
 0x26e   : > { %v2819_v30 = vld [vmem:[#allocation3 + $0x28] sm:$0x8]  ;;  %v2876_v10 = vld [vmem:[#allocation3 + $0x24] sm:$0x1]  ;;  %2786 = vst [vmem:[#allocation3] sm:$0x1] %v2785_v3  ;;  %v2800_v11 = vsel %vm6684_vm5, %v5329_v0, %v2799_v1 }
 0x26f   : > { %2866 = vst [vmem:[#allocation3 + $0x4] sm:$0x1] %v2865_v46  ;;  %v5338_v44 = vrot.slane %v2818_v2, 11  ;;  %v5339_v12 = vrot.slane %v2819_v30, 11  ;;  %v2879_v7 = vld [vmem:[#allocation3 + $0x2c] sm:$0x1] }
 0x270   : > { %v2726_v15 = vld [vmem:[#allocation3 + $0x38] sm:$0xf]  ;;  %v2957_v17 = vrot.slane %v2955_v36, 4  ;;  %v2960_v19 = vrot.slane %v2958_v6, 5  ;;  %2801 = vst [vmem:[#allocation3 + $0x28] sm:$0x1] %v2800_v11 }
 0x271   : > { %v2727_v22 = vld [vmem:[#allocation3 + $0x3c] sm:$0x1]  ;;  %v2741_v23 = vld [vmem:[#allocation3 + $0x38] sm:$0x2]  ;;  %v2729_v62 = vsel %vm6679_vm4, %v2726_v15, %v2728_v52  ;;  %v7365_v49 = vld [vmem:[#allocation3 + $0x8] sm:$0xf]  ;;  %v2877_v18 = vsel %vm6718_vm6, %v5338_v44, %v2876_v10  ;;  %v2880_v24 = vsel %vm6718_vm6, %v5339_v12, %v2879_v7 }
 0x272   : > { %v7367_v5 = vld [vmem:[#allocation3 + $0x18] sm:$0xf]  ;;  %v5331_v25 = vrot.slane %v2741_v23, 9  ;;  %2730 = vst [vmem:[#allocation3 + $0x48] sm:$0xf] %v2729_v62  ;;  %v2732_v26 = vsel %vm6684_vm5, %v2727_v22, %v2731_v60  ;;  %v2941_v13 = vshrl.u32 %v7365_v49, 16  ;;  %v2961_v31 = vor.u32 %v2960_v19, %v2957_v17 }
 0x273   : > { %v7375_v63 = vld [vmem:[#allocation3 + $0xc] sm:$0x1]  ;;  %v2944_v51 = vshll.u32 %v7365_v49, 16  ;;  %v7379_v43 = vld [vmem:[#allocation3 + $0x14] sm:$0x1]  ;;  %v2969_v35 = vshrl.u32 %v7367_v5, 16 }
 0x274   : > { %2878 = vst [vmem:[#allocation3 + $0x24] sm:$0x1] %v2877_v18  ;;  %2881 = vst [vmem:[#allocation3 + $0x2c] sm:$0x1] %v2880_v24  ;;  %v7381_v33 = vld [vmem:[#allocation3 + $0x1c] sm:$0x1] }
 0x275   : > { %2733 = vst [vmem:[#allocation3 + $0x4c] sm:$0x1] %v2732_v26  ;;  %v2964_v34 = vshll.u32 %v7379_v43, 16  ;;  %v2943_v42 = vrot.slane %v2941_v13, 4  ;;  %v2946_v27 = vrot.slane %v2944_v51, 5  ;;  %v2950_v29 = vshll.u32 %v7375_v63, 16 }
 0x276   : > { %v2972_v21 = vshll.u32 %v7367_v5, 16  ;;  %v2962_v28 = vrot.slane %v2961_v31, 4  ;;  %v2971_v37 = vrot.slane %v2969_v35, 4  ;;  %v2805_v38 = vld [vmem:[#allocation3 + $0x38] sm:$0x1]  ;;  %v2978_v9 = vshll.u32 %v7381_v33, 16 }
 0x277   : > { %v7387_v41 = vld [vmem:[#allocation3] sm:$0xf]  ;;  %v7389_v39 = vld [vmem:[#allocation3 + $0x4] sm:$0x1]  ;;  %v2947_v54 = vor.u32 %v2946_v27, %v2943_v42  ;;  %v2806_v55 = vsel %vm6684_vm5, %v5331_v25, %v2805_v38  ;;  %v2966_v50 = vrot.slane %v2964_v34, 5  ;;  %v2952_v48 = vrot.slane %v2950_v29, 5 }
 0x278   : > { %v2974_v53 = vrot.slane %v2972_v21, 5  ;;  %v2927_v20 = vshrl.u32 %v7387_v41, 16  ;;  %v2930_v32 = vshll.u32 %v7387_v41, 16  ;;  %v7396_v4 = vld [vmem:[#allocation3 + $0x20] sm:$0xf]  ;;  %v2936_v47 = vshll.u32 %v7389_v39, 16 }
 0x279   : > { %2807 = vst [vmem:[#allocation3 + $0x38] sm:$0x1] %v2806_v55  ;;  %v7399_v57 = vld [vmem:[#allocation3 + $0x28] sm:$0xf]  ;;  %v2948_v0 = vrot.slane %v2947_v54, 4  ;;  %v2967_v59 = vsel %vm6804_vm9, %v2962_v28, %v2966_v50  ;;  %v2980_v2 = vrot.slane %v2978_v9, 5 }
 0x27a   : > { %v2975_v52 = vor.u32 %v2974_v53, %v2971_v37  ;;  %v2929_v14 = vrot.slane %v2927_v20, 4  ;;  %v2932_v56 = vrot.slane %v2930_v32, 5  ;;  %v2983_v46 = vshrl.u32 %v7396_v4, 16  ;;  %v2821_v44 = vld [vmem:[#allocation3 + $0x38] sm:$0x8]  ;;  %v6535_v37 = vld [vmem:[%s7863_s2 + $0x8] sm:$0xff]  }
 0x27b   : > { %v7403_v60 = vld [vmem:[#allocation3 + $0x24] sm:$0x1]  ;;  %v7405_v3 = vld [vmem:[#allocation3 + $0x2c] sm:$0x1]  ;;  %v2986_v36 = vshll.u32 %v7396_v4, 16  ;;  %v2997_v10 = vshrl.u32 %v7399_v57, 16  ;;  %v2953_v23 = vsel %vm6804_vm9, %v2948_v0, %v2952_v48 }
 0x27c   : > { %v2976_v1 = vrot.slane %v2975_v52, 4  ;;  %v2933_v6 = vor.u32 %v2932_v56, %v2929_v14  ;;  %v2992_v30 = vshll.u32 %v7403_v60, 16  ;;  %v3000_v11 = vshll.u32 %v7399_v57, 16  ;;  %v7414_v19 = vld [vmem:[#allocation3 + $0x30] sm:$0xf] }
 0x27d   : > { %v2938_v12 = vrot.slane %v2936_v47, 5  ;;  %v2985_v15 = vrot.slane %v2983_v46, 4  ;;  %v2988_v17 = vrot.slane %v2986_v36, 5  ;;  %v2999_v62 = vrot.slane %v2997_v10, 4  ;;  %v2885_v35 = vld [vmem:[#allocation3 + $0x3c] sm:$0x1] }
 0x27e   : > { %v2981_v7 = vsel %vm6804_vm9, %v2976_v1, %v2980_v2  ;;  %v2934_v22 = vrot.slane %v2933_v6, 4  ;;  %v3006_v18 = vshll.u32 %v7405_v3, 16  ;;  %v3002_v26 = vrot.slane %v3000_v11, 5  ;;  %v7430_v53 = vld [vmem:[#allocation3 + $0x34] sm:$0x1] }
 0x27f   : > { %v5361_v24 = vcombine.low %v2967_v59, %v2981_v7  ;;  %v2989_v25 = vor.u32 %v2988_v17, %v2985_v15  ;;  %v5341_v13 = vrot.slane %v2821_v44, 11  ;;  %v2994_v34 = vrot.slane %v2992_v30, 5  ;;  %v3323_v48 = vld [vmem:[#allocation3 + $0x10] sm:$0xe]  ;;  %v3324_v52 = vld [vmem:[#allocation3 + $0x18] sm:$0xe] }
 0x280   : > { %v7419_v51 = vld [vmem:[#allocation3 + $0x38] sm:$0xf]  ;;  %v2939_v31 = vsel %vm6804_vm9, %v2934_v22, %v2938_v12  ;;  %v3011_v42 = vshrl.u32 %v7414_v19, 16  ;;  %v3014_v27 = vshll.u32 %v7414_v19, 16  ;;  %v3003_v28 = vor.u32 %v3002_v26, %v2999_v62  ;;  %v6536_v6 = vld [vmem:[%s7863_s2 + $0x10] sm:$0xff]  }
 0x281   : > { %v5360_v29 = vcombine.low %v2939_v31, %v2953_v23  ;;  %v2990_v21 = vrot.slane %v2989_v25, 4  ;;  %v2886_v38 = vsel %vm6718_vm6, %v5341_v13, %v2885_v35  ;;  %v3008_v54 = vrot.slane %v3006_v18, 5  ;;  %v3325_v10 = vld [vmem:[#allocation3 + $0x20] sm:$0xe]  ;;  %v3326_v11 = vld [vmem:[#allocation3 + $0x28] sm:$0xe] }
 0x282   : > { %2887 = vst [vmem:[#allocation3 + $0x3c] sm:$0x1] %v2886_v38  ;;  %v3013_v9 = vrot.slane %v3011_v42, 4  ;;  %v3016_v55 = vrot.slane %v3014_v27, 5  ;;  %v3025_v20 = vshrl.u32 %v7419_v51, 16  ;;  %v3004_v50 = vrot.slane %v3003_v28, 4 }
 0x283   : > { %6106 = vmatprep.mubr.bf16.mxu1 %v5360_v29  ;;  %v2995_v32 = vsel %vm6804_vm9, %v2990_v21, %v2994_v34  ;;  %v3028_v47 = vshll.u32 %v7419_v51, 16  ;;  %v3355_v14 = vrot.slane %v7379_v43, 5  ;;  %v3359_v56 = vrot.slane %v7381_v33, 5  ;;  %v2742_v31 = vld [vmem:[#allocation3 + $0x40] sm:$0x2] }
 0x284   : > { %6107 = vmatmul.mubr.bf16.vlgmr.msra.gmra.mrb[0].mxu1 %v5361_v24  ;;  %v3017_v0 = vor.u32 %v3016_v55, %v3013_v9  ;;  %v3027_v59 = vrot.slane %v3025_v20, 4  ;;  %v3009_v1 = vsel %vm6804_vm9, %v3004_v50, %v3008_v54  ;;  %v3020_v2 = vshll.u32 %v7430_v53, 16  ;;  %v6538_v24 = vld [vmem:[%s7863_s2 + $0x18] sm:$0xff]   ;;  %v2808_v29 = vld [vmem:[#allocation3 + $0x40] sm:$0x1]  ;;  %v6540_v54 = vld [vmem:[%s7863_s2 + $0x28] sm:$0xff]  }
 0x285   : > { %6115 = vmatpush3.bf16.msra.mxu1 %v7276_v8  ;;  %v3030_v46 = vrot.slane %v3028_v47, 5  ;;  %v5362_v36 = vcombine.low %v2995_v32, %v3009_v1  ;;  %v5386_v30 = vrot.slane %v3323_v48, 9  ;;  %v5387_v43 = vrot.slane %v3324_v52, 9  ;;  %v6541_v9 = vld [vmem:[%s7863_s2 + $0x30] sm:$0xff]   ;;  %v2822_v55 = vld [vmem:[#allocation3 + $0x40] sm:$0x8] }
 0x286   : > { %6116 = vmatprep.subr.bf16.mxu1 %v6535_v37  ;;  %v3018_v44 = vrot.slane %v3017_v0, 4  ;;  %v3022_v15 = vrot.slane %v3020_v2, 5  ;;  %v5388_v22 = vrot.slane %v3325_v10, 9  ;;  %v3363_v23 = vrot.slane %v7403_v60, 5  ;;  %v2888_v20 = vld [vmem:[#allocation3 + $0x44] sm:$0x1] }
 0x287   : > { %v3031_v33 = vor.u32 %v3030_v46, %v3027_v59  ;;  %6110 = vmatprep.mubr.bf16.mxu1 %v5362_v36  ;;  %v7447_v8 = vsel %vm6909_vm12, %v5386_v30, %v3355_v14  ;;  %v7451_v12 = vsel %vm6909_vm12, %v5387_v43, %v3359_v56  ;;  %v5389_v25 = vrot.slane %v3326_v11, 9  ;;  %v6544_v50 = vld [vmem:[%s7863_s2 + $0x80] sm:$0xff]   ;;  %v6546_v48 = vld [vmem:[%s7863_s2 + $0x88] sm:$0xff]   ;;  %v6552_v43 = vld [vmem:[%s7863_s2 + $0xb0] sm:$0xff]  }
 0x288   : > { %v5409_v17 = vcombine.low %v7447_v8, %v7451_v12  ;;  %v3367_v26 = vrot.slane %v7405_v3, 5  ;;  %v7465_v13 = vsel %vm6909_vm12, %v5388_v22, %v3363_v23  ;;  %v3023_v34 = vsel %vm6804_vm9, %v3018_v44, %v3022_v15  ;;  %v3321_v14 = vld [vmem:[#allocation3] sm:$0xe]  ;;  %v3322_v0 = vld [vmem:[#allocation3 + $0x8] sm:$0xe]  ;;  %v6553_v44 = vld [vmem:[%s7863_s2 + $0xb8] sm:$0xff]  }
 0x289   : > { %6117 = vmatpush3.bf16.msra.mxu1 %v6535_v37  ;;  %v7453_v7 = vld [vmem:[#allocation3 + $0x3c] sm:$0x1]  ;;  %v3032_v62 = vrot.slane %v3031_v33, 4  ;;  %v5332_v42 = vrot.slane %v2742_v31, 9  ;;  %v6539_v37 = vld [vmem:[%s7863_s2 + $0x20] sm:$0xff]   ;;  %v5372_v38 = vcombine.low %v7387_v41, %v7365_v49  ;;  %v5342_v41 = vrot.slane %v2822_v55, 11 }
 0x28a   : > { %6118 = vmatprep.subr.bf16.mxu1 %v6536_v6  ;;  %v3034_v18 = vshll.u32 %v7453_v7, 16  ;;  %v7471_v35 = vsel %vm6909_vm12, %v5389_v25, %v3367_v26  ;;  %v6542_v49 = vld [vmem:[%s7863_s2 + $0x38] sm:$0xff]   ;;  %v5373_v47 = vcombine.low %v7353_v61, %v7367_v5  ;;  %v5374_v52 = vcombine.low %v7396_v4, %v7399_v57  ;;  %v2743_v59 = vld [vmem:[#allocation3 + $0x48] sm:$0x2]  ;;  %v6548_v61 = vld [vmem:[%s7863_s2 + $0x90] sm:$0xff]  }
 0x28b   : > { %v5410_v27 = vcombine.low %v7465_v13, %v7471_v35  ;;  %v2809_v21 = vsel %vm6684_vm5, %v5332_v42, %v2808_v29  ;;  %v2889_v32 = vsel %vm6718_vm6, %v5342_v41, %v2888_v20  ;;  %v3347_v56 = vrot.slane %v7389_v39, 5  ;;  %v2811_v46 = vld [vmem:[#allocation3 + $0x48] sm:$0x1]  ;;  %v2891_v33 = vld [vmem:[#allocation3 + $0x4c] sm:$0x1]  ;;  %v6554_v15 = vld [vmem:[%s7863_s2 + $0xc0] sm:$0xff]  }
 0x28c   : > { %v3036_v60 = vrot.slane %v3034_v18, 5  ;;  %2810 = vst [vmem:[#allocation3 + $0x40] sm:$0x1] %v2809_v21  ;;  %2890 = vst [vmem:[#allocation3 + $0x44] sm:$0x1] %v2889_v32  ;;  %v3351_v1 = vrot.slane %v7375_v63, 5  ;;  %v5375_v36 = vcombine.low %v7414_v19, %v7419_v51 }
 0x28d   : > { %6119 = vmatpush3.bf16.msra.mxu1 %v6536_v6  ;;  %v5384_v5 = vrot.slane %v3321_v14, 9  ;;  %v5333_v2 = vrot.slane %v2743_v59, 9  ;;  %v5385_v57 = vrot.slane %v3322_v0, 9  ;;  %v6549_v6 = vld [vmem:[%s7863_s2 + $0x98] sm:$0xff]   ;;  %v6551_v19 = vld [vmem:[%s7863_s2 + $0xa8] sm:$0xff]   ;;  %v3375_v18 = vrot.slane %v7453_v7, 5 }
 0x28e   : > { %v3037_v3 = vsel %vm6804_vm9, %v3032_v62, %v3036_v60  ;;  %6120 = vmatprep.subr.bf16.mxu1 %v6538_v24  ;;  %v2823_v51 = vld [vmem:[#allocation3 + $0x48] sm:$0x8]  ;;  %v3327_v22 = vld [vmem:[#allocation3 + $0x30] sm:$0xe]  ;;  %v3328_v23 = vld [vmem:[#allocation3 + $0x38] sm:$0xe] }
 0x28f   : > { %v5363_v28 = vcombine.low %v3023_v34, %v3037_v3  ;;  %v3348_v4 = vsel %vm6909_vm12, %v5384_v5, %v3347_v56  ;;  %v2812_v39 = vsel %vm6684_vm5, %v5333_v2, %v2811_v46  ;;  %v3352_v63 = vsel %vm6909_vm12, %v5385_v57, %v3351_v1  ;;  %v6556_v26 = vld [vmem:[%s7863_s2 + $0xd0] sm:$0xff]   ;;  %v6558_v12 = vld [vmem:[%s7863_s2 + $0xd8] sm:$0xff]   ;;  %v6559_v13 = vld [vmem:[%s7863_s2 + $0xe0] sm:$0xff]  }
 0x290   : > { %2813 = vst [vmem:[#allocation3 + $0x48] sm:$0x1] %v2812_v39  ;;  %v5408_v30 = vcombine.low %v3348_v4, %v3352_v63  ;;  %v5343_v10 = vrot.slane %v2823_v51, 11  ;;  %v3371_v62 = vrot.slane %v7430_v53, 5  ;;  %v5391_v25 = vrot.slane %v3328_v23, 9  ;;  %v6560_v31 = vld [vmem:[%s7863_s2 + $0xe8] sm:$0xff]  }
 0x291   : > { %6111 = vmatmul.mubr.bf16.gmra.mrb[4].mxu1 %v5363_v28  ;;  %v3701_v34 = vld [vmem:[#allocation3 + $0x8] sm:$0xf]  ;;  %v3703_v60 = vld [vmem:[#allocation3 + $0x10] sm:$0xf]  ;;  %v6562_v21 = vld [vmem:[%s7863_s2 + $0xf8] sm:$0xff]  }
 0x292   : > { %6130 = vmatprep.mubr.bf16.mxu1 %v5372_v38  ;;  %6121 = vmatpush3.bf16.msra.mxu1 %v6538_v24  ;;  %v2892_v11 = vsel %vm6718_vm6, %v5343_v10, %v2891_v33  ;;  %v5390_v24 = vrot.slane %v3327_v22, 9  ;;  %v3376_v7 = vsel %vm6909_vm12, %v5391_v25, %v3375_v18  ;;  %v6561_v35 = vld [vmem:[%s7863_s2 + $0xf0] sm:$0xff]   ;;  %v3718_v42 = vshrl.u32 %v3701_v34, 16  ;;  %v7574_v55 = vld [vmem:[#allocation3 + $0xc] sm:$0x1]  ;;  %v6569_v4 = vld [vmem:[%s7863_s2 + $0x118] sm:$0xff]  }
 0x293   : > { %6122 = vmatprep.subr.bf16.mxu1 %v6539_v37  ;;  %2893 = vst [vmem:[#allocation3 + $0x4c] sm:$0x1] %v2892_v11  ;;  %v3732_v29 = vshrl.u32 %v3703_v60, 16  ;;  %v3735_v3 = vshll.u32 %v3703_v60, 16  ;;  %v6563_v32 = vld [vmem:[#allocation3 + $0x18] ss:$8 sps:$4 sm:$0xff]  }
 0x294   : > { %v3372_v53 = vsel %vm6909_vm12, %v5390_v24, %v3371_v62  ;;  %v3720_v28 = vrot.slane %v3718_v42, 4  ;;  %v6568_v0 = vld [vmem:[%s7863_s2 + $0x110] sm:$0xff]   ;;  %v6567_v2 = vld [vmem:[#allocation3 + $0x38] ss:$8 sps:$4 sm:$0xff]  }
 0x295   : > { %v5411_v8 = vcombine.low %v3372_v53, %v3376_v7  ;;  %v3734_v38 = vrot.slane %v3732_v29, 4  ;;  %v3705_v46 = vld [vmem:[#allocation3 + $0x18] sm:$0xf]  ;;  %v3707_v39 = vld [vmem:[#allocation3 + $0x20] sm:$0xf]  ;;  %v6572_v7 = vld [vmem:[%s7863_s2 + $0x130] sm:$0xff]  }
 0x296   : > { %6123 = vmatpush3.bf16.msra.mxu1 %v6539_v37  ;;  %v3711_v63 = vld [vmem:[#allocation3 + $0x30] sm:$0xf]  ;;  %v3763_v51 = vshll.u32 %v3707_v39, 16  ;;  %v3713_v62 = vld [vmem:[#allocation3 + $0x38] sm:$0xf] }
 0x297   : > { %6124 = vmatprep.subr.bf16.mxu1 %v6540_v54  ;;  %v3788_v33 = vshrl.u32 %v3711_v63, 16  ;;  %v3791_v11 = vshll.u32 %v3711_v63, 16  ;;  %v3715_v53 = vld [vmem:[#allocation3 + $0x40] sm:$0xf]  ;;  %v3802_v60 = vshrl.u32 %v3713_v62, 16 }
 0x298   : > { %v3765_v23 = vrot.slane %v3763_v51, 5  ;;  %v3816_v42 = vshrl.u32 %v3715_v53, 16 }
 0x299   : > { %v3790_v25 = vrot.slane %v3788_v33, 4  ;;  %v3984_v33 = vld [vmem:[#allocation3 + $0x10] sm:$0xe] }
 0x29a   : > { %6125 = vmatpush3.bf16.msra.mxu1 %v6540_v54  ;;  %v3737_v54 = vrot.slane %v3735_v3, 5 }
 0x29b   : > { %6126 = vmatprep.subr.bf16.mxu1 %v6541_v9 }
 0x29c   : > { %v3738_v20 = vor.u32 %v3737_v54, %v3734_v38 }
 0x29e   : > { %6127 = vmatpush3.bf16.msra.mxu1 %v6541_v9  ;;  %v6564_v9 = vld [vmem:[%s7863_s2 + $0x100] sm:$0xff]   ;;  %v3739_v56 = vrot.slane %v3738_v20, 4  ;;  %v3804_v20 = vrot.slane %v3802_v60, 4  ;;  %v6581_v60 = vld [vmem:[%s7863_s2 + $0x178] sm:$0xff]  }
 0x29f   : > { %6128 = vmatprep.subr.bf16.mxu1 %v6542_v49 }
 0x2a2   : > { %6129 = vmatpush3.bf16.msra.mxu1 %v6542_v49  ;;  %v7576_v49 = vld [vmem:[#allocation3 + $0x14] sm:$0x1] }
 0x2a3   : > { %6138 = vmatprep.subr.bf16.mxu1 %v6544_v50 }
 0x2a5   : > { %6131 = vmatmul.mubr.bf16.vlgmr.msra.gmra.mrb[0].mxu1 %v5373_v47  ;;  %v3727_v47 = vshll.u32 %v7574_v55, 16 }
 0x2a6   : > { %6134 = vmatprep.mubr.bf16.mxu1 %v5374_v52  ;;  %6139 = vmatpush3.bf16.msra.mxu1 %v6544_v50  ;;  %v6566_v50 = vld [vmem:[%s7863_s2 + $0x108] sm:$0xff]  }
 0x2a7   : > { %6140 = vmatprep.subr.bf16.mxu1 %v6546_v48  ;;  %v6565_v52 = vld [vmem:[#allocation3 + $0x28] ss:$8 sps:$4 sm:$0xff]   ;;  %v3729_v59 = vrot.slane %v3727_v47, 5 }
 0x2aa   : > { %6141 = vmatpush3.bf16.msra.mxu1 %v6546_v48  ;;  %v3741_v48 = vshll.u32 %v7576_v49, 16 }
 0x2ab   : > { %6142 = vmatprep.subr.bf16.mxu1 %v6548_v61 }
 0x2ac   : > { %v3743_v1 = vrot.slane %v3741_v48, 5 }
 0x2ad   : > { %6135 = vmatmul.mubr.bf16.gmra.mrb[4].mxu1 %v5375_v36  ;;  %v3709_v36 = vld [vmem:[#allocation3 + $0x28] sm:$0xf] }
 0x2ae   : > { %6143 = vmatpush3.bf16.msra.mxu1 %v6548_v61  ;;  %6154 = vmatprep.mubr.bf16.mxu1 %v5408_v30  ;;  %v3744_v5 = vsel %vm6804_vm9, %v3739_v56, %v3743_v1  ;;  %v3746_v30 = vshrl.u32 %v3705_v46, 16  ;;  %v3777_v10 = vshll.u32 %v3709_v36, 16 }
 0x2af   : > { %6144 = vmatprep.subr.bf16.mxu1 %v6549_v6 }
 0x2b0   : > { %v3779_v24 = vrot.slane %v3777_v10, 5  ;;  %v3983_v10 = vld [vmem:[#allocation3 + $0x8] sm:$0xe] }
 0x2b2   : > { %6145 = vmatpush3.bf16.msra.mxu1 %v6549_v6  ;;  %v6570_v6 = vld [vmem:[%s7863_s2 + $0x120] sm:$0xff]  }
 0x2b3   : > { %6146 = vmatprep.subr.bf16.mxu1 %v6550_v16 }
 0x2b6   : > { %6147 = vmatpush3.bf16.msra.mxu1 %v6550_v16  ;;  %v3749_v16 = vshll.u32 %v3705_v46, 16 }
 0x2b7   : > { %6148 = vmatprep.subr.bf16.mxu1 %v6551_v19 }
 0x2ba   : > { %6149 = vmatpush3.bf16.msra.mxu1 %v6551_v19  ;;  %v3760_v19 = vshrl.u32 %v3707_v39, 16 }
 0x2bb   : > { %6150 = vmatprep.subr.bf16.mxu1 %v6552_v43 }
 0x2bc   : > { %v3762_v22 = vrot.slane %v3760_v19, 4 }
 0x2be   : > { %6151 = vmatpush3.bf16.msra.mxu1 %v6552_v43  ;;  %v3774_v43 = vshrl.u32 %v3709_v36, 16 }
 0x2bf   : > { %6152 = vmatprep.subr.bf16.mxu1 %v6553_v44 }
 0x2c0   : > { %v3776_v18 = vrot.slane %v3774_v43, 4 }
 0x2c2   : > { %6153 = vmatpush3.bf16.msra.mxu1 %v6553_v44  ;;  %v6571_v44 = vld [vmem:[%s7863_s2 + $0x128] sm:$0xff]   ;;  %v3780_v29 = vor.u32 %v3779_v24, %v3776_v18 }
 0x2c3   : > { %6162 = vmatprep.subr.bf16.mxu1 %v6554_v15 }
 0x2c4   : > { %v3781_v48 = vrot.slane %v3780_v29, 4 }
 0x2c5   : > { %6155 = vmatmul.mubr.bf16.vlgmr.msra.gmra.mrb[0].mxu1 %v5409_v17  ;;  %v6557_v17 = vld [vmem:[#allocation3 + $0x8] ss:$8 sps:$4 sm:$0xff]  }
 0x2c6   : > { %6158 = vmatprep.mubr.bf16.mxu1 %v5410_v27  ;;  %6163 = vmatpush3.bf16.msra.mxu1 %v6554_v15  ;;  %v3721_v27 = vshll.u32 %v3701_v34, 16  ;;  %v3748_v15 = vrot.slane %v3746_v30, 4  ;;  %v7608_v34 = vld [vmem:[#allocation3 + $0x34] sm:$0x1] }
 0x2c7   : > { %6164 = vmatprep.subr.bf16.mxu1 %v6555_v58 }
 0x2c8   : > { %v3723_v37 = vrot.slane %v3721_v27, 5  ;;  %v3819_v27 = vshll.u32 %v3715_v53, 16 }
 0x2ca   : > { %6165 = vmatpush3.bf16.msra.mxu1 %v6555_v58  ;;  %v3724_v41 = vor.u32 %v3723_v37, %v3720_v28  ;;  %v3751_v58 = vrot.slane %v3749_v16, 5  ;;  %v6573_v37 = vld [vmem:[%s7863_s2 + $0x138] sm:$0xff]   ;;  %v3821_v47 = vrot.slane %v3819_v27, 5  ;;  %v6575_v16 = vld [vmem:[%s7863_s2 + $0x148] sm:$0xff]  }
 0x2cb   : > { %6166 = vmatprep.subr.bf16.mxu1 %v6556_v26 }
 0x2cc   : > { %v3725_v14 = vrot.slane %v3724_v41, 4  ;;  %v3797_v41 = vshll.u32 %v7608_v34, 16 }
 0x2cd   : > { %6159 = vmatmul.mubr.bf16.gmra.mrb[4].mxu1 %v5411_v8  ;;  %v7602_v8 = vld [vmem:[#allocation3 + $0x1c] sm:$0x1] }
 0x2ce   : > { %6167 = vmatpush3.bf16.msra.mxu1 %v6556_v26  ;;  %6178 = vmatprep.mubr.bf16.mxu1 %v6557_v17  ;;  %v3730_v61 = vsel %vm6804_vm9, %v3725_v14, %v3729_v59  ;;  %v3793_v26 = vrot.slane %v3791_v11, 5  ;;  %v3752_v17 = vor.u32 %v3751_v58, %v3748_v15  ;;  %v3799_v1 = vrot.slane %v3797_v41, 5 }
 0x2cf   : > { %6168 = vmatprep.subr.bf16.mxu1 %v6558_v12  ;;  %v5464_v57 = vcombine.low %v3730_v61, %v3744_v5  ;;  %v7620_v61 = vld [vmem:[#allocation3 + $0x3c] sm:$0x1]  ;;  %v7622_v5 = vld [vmem:[#allocation3 + $0x44] sm:$0x1]  ;;  %v4009_v11 = vrot.slane %v7574_v55, 5  ;;  %v4017_v27 = vrot.slane %v7602_v8, 5 }
 0x2d0   : > { %v3794_v3 = vor.u32 %v3793_v26, %v3790_v25  ;;  %v3753_v38 = vrot.slane %v3752_v17, 4  ;;  %v3811_v63 = vshll.u32 %v7620_v61, 16  ;;  %v6577_v26 = vld [vmem:[%s7863_s2 + $0x158] sm:$0xff]   ;;  %v6579_v17 = vld [vmem:[%s7863_s2 + $0x168] sm:$0xff]  }
 0x2d2   : > { %6169 = vmatpush3.bf16.msra.mxu1 %v6558_v12  ;;  %v7604_v12 = vld [vmem:[#allocation3 + $0x24] sm:$0x1]  ;;  %v3813_v15 = vrot.slane %v3811_v63, 5  ;;  %v4365_v63 = vld [vmem:[#allocation3 + $0x18] sm:$0xf] }
 0x2d3   : > { %6170 = vmatprep.subr.bf16.mxu1 %v6559_v13  ;;  %v3769_v28 = vshll.u32 %v7604_v12, 16  ;;  %v4021_v29 = vrot.slane %v7604_v12, 5 }
 0x2d5   : > { %v3771_v56 = vrot.slane %v3769_v28, 5 }
 0x2d6   : > { %6171 = vmatpush3.bf16.msra.mxu1 %v6559_v13  ;;  %v3766_v13 = vor.u32 %v3765_v23, %v3762_v22  ;;  %v6576_v22 = vld [vmem:[%s7863_s2 + $0x150] sm:$0xff]   ;;  %v5476_v23 = vrot.slane %v3983_v10, 9 }
 0x2d7   : > { %6172 = vmatprep.subr.bf16.mxu1 %v6560_v31 }
 0x2d8   : > { %v3767_v54 = vrot.slane %v3766_v13, 4  ;;  %v4010_v55 = vsel %vm6909_vm12, %v5476_v23, %v4009_v11  ;;  %v6580_v13 = vld [vmem:[%s7863_s2 + $0x170] sm:$0xff]  }
 0x2da   : > { %6173 = vmatpush3.bf16.msra.mxu1 %v6560_v31  ;;  %v7606_v31 = vld [vmem:[#allocation3 + $0x2c] sm:$0x1] }
 0x2db   : > { %6174 = vmatprep.subr.bf16.mxu1 %v6561_v35  ;;  %v4025_v28 = vrot.slane %v7606_v31, 5 }
 0x2de   : > { %6175 = vmatpush3.bf16.msra.mxu1 %v6561_v35  ;;  %v3805_v35 = vshll.u32 %v3713_v62, 16  ;;  %v5477_v62 = vrot.slane %v3984_v33, 9 }
 0x2df   : > { %6176 = vmatprep.subr.bf16.mxu1 %v6562_v21 }
 0x2e2   : > { %6177 = vmatpush3.bf16.msra.mxu1 %v6562_v21  ;;  %v3755_v21 = vshll.u32 %v7602_v8, 16 }
 0x2e3   : > { %6186 = vmatprep.subr.bf16.mxu1 %v6564_v9 }
 0x2e4   : > { %v3757_v14 = vrot.slane %v3755_v21, 5  ;;  %v3988_v21 = vld [vmem:[#allocation3 + $0x30] sm:$0xe] }
 0x2e5   : > { %6179 = vmatmul.mubr.bf16.vlgmr.msra.gmra.mrb[0].mxu1 %v6563_v32  ;;  %v3807_v32 = vrot.slane %v3805_v35, 5  ;;  %v3985_v35 = vld [vmem:[#allocation3 + $0x18] sm:$0xe] }
 0x2e6   : > { %6182 = vmatprep.mubr.bf16.mxu1 %v6565_v52  ;;  %6187 = vmatpush3.bf16.msra.mxu1 %v6564_v9  ;;  %v3783_v9 = vshll.u32 %v7606_v31, 16  ;;  %v3795_v52 = vrot.slane %v3794_v3, 4  ;;  %v3987_v3 = vld [vmem:[#allocation3 + $0x28] sm:$0xe] }
 0x2e7   : > { %6188 = vmatprep.subr.bf16.mxu1 %v6566_v50  ;;  %v5480_v41 = vrot.slane %v3987_v3, 9  ;;  %v4367_v3 = vld [vmem:[#allocation3 + $0x20] sm:$0xf] }
 0x2e8   : > { %v3785_v59 = vrot.slane %v3783_v9, 5  ;;  %v3800_v36 = vsel %vm6804_vm9, %v3795_v52, %v3799_v1  ;;  %v6582_v9 = vld [vmem:[%s7863_s2 + $0x180] sm:$0xff]   ;;  %v6584_v1 = vld [vmem:[%s7863_s2 + $0x190] sm:$0xff]  }
 0x2e9   : > { %v4026_v31 = vsel %vm6909_vm12, %v5480_v41, %v4025_v28  ;;  %v4371_v28 = vld [vmem:[#allocation3 + $0x30] sm:$0xf] }
 0x2ea   : > { %6189 = vmatpush3.bf16.msra.mxu1 %v6566_v50  ;;  %v3818_v50 = vrot.slane %v3816_v42, 4  ;;  %v3786_v39 = vsel %vm6804_vm9, %v3781_v48, %v3785_v59  ;;  %v3986_v42 = vld [vmem:[#allocation3 + $0x20] sm:$0xe] }
 0x2eb   : > { %6190 = vmatprep.subr.bf16.mxu1 %v6568_v0  ;;  %v5466_v19 = vcombine.low %v3786_v39, %v3800_v36  ;;  %v3990_v48 = vld [vmem:[#allocation3 + $0x40] sm:$0xe]  ;;  %v6588_v39 = vld [vmem:[%s7863_s2 + $0x1a8] sm:$0xff]   ;;  %v4363_v36 = vld [vmem:[#allocation3 + $0x10] sm:$0xf] }
 0x2ec   : > { %v3822_v46 = vor.u32 %v3821_v47, %v3818_v50  ;;  %v6583_v50 = vld [vmem:[%s7863_s2 + $0x188] sm:$0xff]   ;;  %v3989_v47 = vld [vmem:[#allocation3 + $0x38] sm:$0xe]  ;;  %v5483_v59 = vrot.slane %v3990_v48, 9 }
 0x2ed   : > { %6183 = vmatmul.mubr.bf16.gmra.mrb[4].mxu1 %v6567_v2  ;;  %v3758_v2 = vsel %vm6804_vm9, %v3753_v38, %v3757_v14  ;;  %v5478_v38 = vrot.slane %v3985_v35, 9  ;;  %v4033_v14 = vrot.slane %v7620_v61, 5 }
 0x2ee   : > { %6191 = vmatpush3.bf16.msra.mxu1 %v6568_v0  ;;  %6202 = vmatprep.mubr.bf16.mxu1 %v5464_v57  ;;  %v6574_v0 = vld [vmem:[%s7863_s2 + $0x140] sm:$0xff]   ;;  %v3808_v57 = vor.u32 %v3807_v32, %v3804_v20  ;;  %v3823_v43 = vrot.slane %v3822_v46, 4  ;;  %v5481_v20 = vrot.slane %v3988_v21, 9  ;;  %v4369_v21 = vld [vmem:[#allocation3 + $0x28] sm:$0xf] }
 0x2ef   : > { %6192 = vmatprep.subr.bf16.mxu1 %v6569_v4  ;;  %v4018_v8 = vsel %vm6909_vm12, %v5478_v38, %v4017_v27  ;;  %v6587_v46 = vld [vmem:[%s7863_s2 + $0x1a0] sm:$0xff]   ;;  %v6597_v27 = vld [vmem:[%s7863_s2 + $0x1d8] sm:$0xff]   ;;  %v4422_v41 = vshrl.u32 %v4369_v21, 16 }
 0x2f0   : > { %v3809_v51 = vrot.slane %v3808_v57, 4  ;;  %v6585_v57 = vld [vmem:[#allocation3 + $0x10] ss:$8 sps:$4 sm:$0xff]   ;;  %v6598_v38 = vld [vmem:[%s7863_s2 + $0x1e0] sm:$0xff]  }
 0x2f1   : > { %v4424_v48 = vrot.slane %v4422_v41, 4 }
 0x2f2   : > { %6193 = vmatpush3.bf16.msra.mxu1 %v6569_v4  ;;  %v3772_v4 = vsel %vm6804_vm9, %v3767_v54, %v3771_v56  ;;  %v3814_v18 = vsel %vm6804_vm9, %v3809_v51, %v3813_v15  ;;  %v5479_v54 = vrot.slane %v3986_v42, 9  ;;  %v4037_v56 = vrot.slane %v7622_v5, 5  ;;  %v6592_v15 = vld [vmem:[%s7863_s2 + $0x1c0] sm:$0xff]  }
 0x2f3   : > { %6194 = vmatprep.subr.bf16.mxu1 %v6570_v6  ;;  %v5465_v30 = vcombine.low %v3758_v2, %v3772_v4  ;;  %v4397_v51 = vshll.u32 %v4365_v63, 16  ;;  %v6595_v42 = vld [vmem:[#allocation3 + $0x40] ss:$8 sps:$4 sm:$0xff]  }
 0x2f4   : > { %v4022_v12 = vsel %vm6909_vm12, %v5479_v54, %v4021_v29  ;;  %v4038_v4 = vsel %vm6909_vm12, %v5483_v59, %v4037_v56  ;;  %v4408_v54 = vshrl.u32 %v4367_v3, 16 }
 0x2f5   : > { %v5501_v32 = vcombine.low %v4018_v8, %v4022_v12  ;;  %v4436_v8 = vshrl.u32 %v4371_v28, 16  ;;  %v4439_v12 = vshll.u32 %v4371_v28, 16 }
 0x2f6   : > { %6195 = vmatpush3.bf16.msra.mxu1 %v6570_v6  ;;  %v3825_v6 = vshll.u32 %v7622_v5, 16  ;;  %v6586_v5 = vld [vmem:[%s7863_s2 + $0x198] sm:$0xff]  }
 0x2f7   : > { %6196 = vmatprep.subr.bf16.mxu1 %v6571_v44  ;;  %v4441_v56 = vrot.slane %v4439_v12, 5  ;;  %v4646_v12 = vld [vmem:[#allocation3 + $0x18] sm:$0xe] }
 0x2f8   : > { %v3827_v58 = vrot.slane %v3825_v6, 5  ;;  %v6589_v6 = vld [vmem:[%s7863_s2 + $0x1b0] sm:$0xff]  }
 0x2fa   : > { %6197 = vmatpush3.bf16.msra.mxu1 %v6571_v44  ;;  %v4013_v44 = vrot.slane %v7576_v49, 5  ;;  %v3828_v24 = vsel %vm6804_vm9, %v3823_v43, %v3827_v58  ;;  %v6590_v43 = vld [vmem:[%s7863_s2 + $0x1b8] sm:$0xff]   ;;  %v7710_v58 = vld [vmem:[#allocation3 + $0x14] sm:$0x1] }
 0x2fb   : > { %6198 = vmatprep.subr.bf16.mxu1 %v6572_v7  ;;  %v5467_v25 = vcombine.low %v3814_v18, %v3828_v24  ;;  %v6591_v18 = vld [vmem:[#allocation3 + $0x20] ss:$8 sps:$4 sm:$0xff]  }
 0x2fc   : > { %v4014_v49 = vsel %vm6909_vm12, %v5477_v62, %v4013_v44  ;;  %v4399_v44 = vrot.slane %v4397_v51, 5  ;;  %v6594_v24 = vld [vmem:[%s7863_s2 + $0x1c8] sm:$0xff]  }
 0x2fd   : > { %v5500_v53 = vcombine.low %v4010_v55, %v4014_v49  ;;  %v4389_v55 = vshll.u32 %v7710_v58, 16 }
 0x2fe   : > { %6199 = vmatpush3.bf16.msra.mxu1 %v6572_v7  ;;  %v6578_v7 = vld [vmem:[%s7863_s2 + $0x160] sm:$0xff]  }
 0x2ff   : > { %6200 = vmatprep.subr.bf16.mxu1 %v6573_v37 }
 0x302   : > { %6201 = vmatpush3.bf16.msra.mxu1 %v6573_v37  ;;  %v4029_v37 = vrot.slane %v7608_v34, 5 }
 0x303   : > { %6210 = vmatprep.subr.bf16.mxu1 %v6574_v0 }
 0x304   : > { %v4030_v34 = vsel %vm6909_vm12, %v5481_v20, %v4029_v37  ;;  %v4373_v37 = vld [vmem:[#allocation3 + $0x38] sm:$0xf]  ;;  %v4425_v20 = vshll.u32 %v4369_v21, 16  ;;  %v7766_v21 = vld [vmem:[#allocation3 + $0x44] sm:$0x1] }
 0x305   : > { %6203 = vmatmul.mubr.bf16.vlgmr.msra.gmra.mrb[0].mxu1 %v5465_v30  ;;  %v5502_v52 = vcombine.low %v4026_v31, %v4030_v34  ;;  %v4380_v30 = vshrl.u32 %v4363_v36, 16  ;;  %v4450_v31 = vshrl.u32 %v4373_v37, 16  ;;  %v4453_v34 = vshll.u32 %v4373_v37, 16 }
 0x306   : > { %6206 = vmatprep.mubr.bf16.mxu1 %v5466_v19  ;;  %6211 = vmatpush3.bf16.msra.mxu1 %v6574_v0  ;;  %v5482_v0 = vrot.slane %v3989_v47, 9  ;;  %v4394_v19 = vshrl.u32 %v4365_v63, 16  ;;  %v4473_v41 = vshll.u32 %v7766_v21, 16 }
 0x307   : > { %6212 = vmatprep.subr.bf16.mxu1 %v6575_v16  ;;  %v4382_v10 = vrot.slane %v4380_v30, 4  ;;  %v4455_v59 = vrot.slane %v4453_v34, 5 }
 0x308   : > { %v4034_v2 = vsel %vm6909_vm12, %v5482_v0, %v4033_v14  ;;  %v4396_v11 = vrot.slane %v4394_v19, 4  ;;  %v4438_v14 = vrot.slane %v4436_v8, 4  ;;  %v4452_v0 = vrot.slane %v4450_v31, 4  ;;  %v4645_v8 = vld [vmem:[#allocation3 + $0x10] sm:$0xe] }
 0x309   : > { %v5503_v61 = vcombine.low %v4034_v2, %v4038_v4  ;;  %v7735_v2 = vld [vmem:[#allocation3 + $0x24] sm:$0x1]  ;;  %v6600_v4 = vld [vmem:[%s7863_s2 + $0x1f0] sm:$0xff]   ;;  %v4671_v31 = vrot.slane %v7710_v58, 5 }
 0x30a   : > { %6213 = vmatpush3.bf16.msra.mxu1 %v6575_v16  ;;  %v4383_v16 = vshll.u32 %v4363_v36, 16  ;;  %v4400_v62 = vor.u32 %v4399_v44, %v4396_v11  ;;  %v7744_v36 = vld [vmem:[#allocation3 + $0x3c] sm:$0x1]  ;;  %v4442_v30 = vor.u32 %v4441_v56, %v4438_v14  ;;  %v4417_v19 = vshll.u32 %v7735_v2, 16 }
 0x30b   : > { %6214 = vmatprep.subr.bf16.mxu1 %v6576_v22  ;;  %v4459_v44 = vshll.u32 %v7744_v36, 16  ;;  %v4475_v14 = vrot.slane %v4473_v41, 5 }
 0x30c   : > { %v4385_v33 = vrot.slane %v4383_v16, 5  ;;  %v4456_v16 = vor.u32 %v4455_v59, %v4452_v0 }
 0x30d   : > { %6207 = vmatmul.mubr.bf16.gmra.mrb[4].mxu1 %v5467_v25  ;;  %v6593_v25 = vld [vmem:[#allocation3 + $0x30] ss:$8 sps:$4 sm:$0xff]  }
 0x30e   : > { %6215 = vmatpush3.bf16.msra.mxu1 %v6576_v22  ;;  %6226 = vmatprep.mubr.bf16.mxu1 %v5500_v53  ;;  %v7712_v22 = vld [vmem:[#allocation3 + $0x1c] sm:$0x1]  ;;  %v4386_v23 = vor.u32 %v4385_v33, %v4382_v10  ;;  %v4401_v53 = vrot.slane %v4400_v62, 4 }
 0x30f   : > { %6216 = vmatprep.subr.bf16.mxu1 %v6577_v26  ;;  %v4403_v49 = vshll.u32 %v7712_v22, 16  ;;  %v6601_v33 = vld [vmem:[%s7863_s2 + $0x1f8] sm:$0xff]   ;;  %v4675_v34 = vrot.slane %v7712_v22, 5 }
 0x312   : > { %6217 = vmatpush3.bf16.msra.mxu1 %v6577_v26  ;;  %v4387_v26 = vrot.slane %v4386_v23, 4 }
 0x313   : > { %6218 = vmatprep.subr.bf16.mxu1 %v6578_v7 }
 0x316   : > { %6219 = vmatpush3.bf16.msra.mxu1 %v6578_v7  ;;  %v6596_v7 = vld [vmem:[%s7863_s2 + $0x1d0] sm:$0xff]  }
 0x317   : > { %6220 = vmatprep.subr.bf16.mxu1 %v6579_v17 }
 0x31a   : > { %6221 = vmatpush3.bf16.msra.mxu1 %v6579_v17  ;;  %v4391_v17 = vrot.slane %v4389_v55, 5  ;;  %v4457_v55 = vrot.slane %v4456_v16, 4 }
 0x31b   : > { %6222 = vmatprep.subr.bf16.mxu1 %v6580_v13 }
 0x31e   : > { %6223 = vmatpush3.bf16.msra.mxu1 %v6580_v13  ;;  %v4405_v13 = vrot.slane %v4403_v49, 5  ;;  %v4419_v49 = vrot.slane %v4417_v19, 5  ;;  %v4649_v19 = vld [vmem:[#allocation3 + $0x30] sm:$0xe] }
 0x31f   : > { %6224 = vmatprep.subr.bf16.mxu1 %v6581_v60 }
 0x320   : > { %v4406_v35 = vsel %vm6804_vm9, %v4401_v53, %v4405_v13  ;;  %v4461_v13 = vrot.slane %v4459_v44, 5  ;;  %v5572_v44 = vrot.slane %v4649_v19, 9 }
 0x322   : > { %6225 = vmatpush3.bf16.msra.mxu1 %v6581_v60  ;;  %v4392_v60 = vsel %vm6804_vm9, %v4387_v26, %v4391_v17 }
 0x323   : > { %6234 = vmatprep.subr.bf16.mxu1 %v6582_v9  ;;  %v5556_v29 = vcombine.low %v4392_v60, %v4406_v35  ;;  %v7756_v60 = vld [vmem:[#allocation3 + $0x4c] sm:$0x1] }
 0x324   : > { %v4487_v37 = vshll.u32 %v7756_v60, 16 }
 0x325   : > { %6227 = vmatmul.mubr.bf16.vlgmr.msra.gmra.mrb[0].mxu1 %v5501_v32  ;;  %v6599_v32 = vld [vmem:[%s7863_s2 + $0x1e8] sm:$0xff]  }
 0x326   : > { %6230 = vmatprep.mubr.bf16.mxu1 %v5502_v52  ;;  %6235 = vmatpush3.bf16.msra.mxu1 %v6582_v9  ;;  %v4411_v9 = vshll.u32 %v4367_v3, 16  ;;  %v4427_v52 = vrot.slane %v4425_v20, 5  ;;  %v4462_v3 = vsel %vm6804_vm9, %v4457_v55, %v4461_v13  ;;  %v4651_v55 = vld [vmem:[#allocation3 + $0x40] sm:$0xe] }
 0x327   : > { %6236 = vmatprep.subr.bf16.mxu1 %v6583_v50 }
 0x328   : > { %v4413_v47 = vrot.slane %v4411_v9, 5 }
 0x32a   : > { %6237 = vmatpush3.bf16.msra.mxu1 %v6583_v50  ;;  %v4410_v50 = vrot.slane %v4408_v54, 4  ;;  %v6603_v54 = vld [vmem:[%s7863_s2 + $0x208] sm:$0xff]  }
 0x32b   : > { %6238 = vmatprep.subr.bf16.mxu1 %v6584_v1 }
 0x32d   : > { %6231 = vmatmul.mubr.bf16.gmra.mrb[4].mxu1 %v5503_v61  ;;  %v7740_v61 = vld [vmem:[#allocation3 + $0x2c] sm:$0x1] }
 0x32e   : > { %6239 = vmatpush3.bf16.msra.mxu1 %v6584_v1  ;;  %6250 = vmatprep.mubr.bf16.mxu1 %v6585_v57  ;;  %v4377_v1 = vld [vmem:[#allocation3 + $0x48] sm:$0xf]  ;;  %v4414_v57 = vor.u32 %v4413_v47, %v4410_v50  ;;  %v4431_v51 = vshll.u32 %v7740_v61, 16  ;;  %v4489_v50 = vrot.slane %v4487_v37, 5  ;;  %v6604_v47 = vld [vmem:[%s7863_s2 + $0x210] sm:$0xff]   ;;  %v4683_v16 = vrot.slane %v7740_v61, 5 }
 0x32f   : > { %6240 = vmatprep.subr.bf16.mxu1 %v6586_v5  ;;  %v4478_v63 = vshrl.u32 %v4377_v1, 16 }
 0x331   : > { %v4480_v62 = vrot.slane %v4478_v63, 4  ;;  %v4647_v63 = vld [vmem:[#allocation3 + $0x20] sm:$0xe] }
 0x332   : > { %6241 = vmatpush3.bf16.msra.mxu1 %v6586_v5  ;;  %v4375_v5 = vld [vmem:[#allocation3 + $0x40] sm:$0xf] }
 0x333   : > { %6242 = vmatprep.subr.bf16.mxu1 %v6587_v46  ;;  %v4467_v10 = vshll.u32 %v4375_v5, 16 }
 0x335   : > { %v4469_v53 = vrot.slane %v4467_v10, 5  ;;  %v4691_v10 = vrot.slane %v7744_v36, 5 }
 0x336   : > { %6243 = vmatpush3.bf16.msra.mxu1 %v6587_v46  ;;  %v4428_v46 = vor.u32 %v4427_v52, %v4424_v48  ;;  %v5568_v48 = vrot.slane %v4645_v8, 9  ;;  %v5569_v52 = vrot.slane %v4646_v12, 9 }
 0x337   : > { %6244 = vmatprep.subr.bf16.mxu1 %v6588_v39 }
 0x338   : > { %v4429_v23 = vrot.slane %v4428_v46, 4  ;;  %v4672_v58 = vsel %vm6909_vm12, %v5568_v48, %v4671_v31  ;;  %v4676_v22 = vsel %vm6909_vm12, %v5569_v52, %v4675_v34  ;;  %v6609_v46 = vld [vmem:[%s7863_s2 + $0x238] sm:$0xff]  }
 0x33a   : > { %6245 = vmatpush3.bf16.msra.mxu1 %v6588_v39  ;;  %v7742_v39 = vld [vmem:[#allocation3 + $0x34] sm:$0x1] }
 0x33b   : > { %6246 = vmatprep.subr.bf16.mxu1 %v6589_v6  ;;  %v4445_v11 = vshll.u32 %v7742_v39, 16 }
 0x33d   : > { %v4447_v17 = vrot.slane %v4445_v11, 5 }
 0x33e   : > { %6247 = vmatpush3.bf16.msra.mxu1 %v6589_v6  ;;  %v4481_v6 = vshll.u32 %v4377_v1, 16  ;;  %v6605_v1 = vld [vmem:[%s7863_s2 + $0x218] sm:$0xff]  }
 0x33f   : > { %6248 = vmatprep.subr.bf16.mxu1 %v6590_v43 }
 0x342   : > { %6249 = vmatpush3.bf16.msra.mxu1 %v6590_v43  ;;  %v4464_v43 = vshrl.u32 %v4375_v5, 16  ;;  %v6606_v5 = vld [vmem:[%s7863_s2 + $0x220] sm:$0xff]  }
 0x343   : > { %6258 = vmatprep.subr.bf16.mxu1 %v6592_v15 }
 0x344   : > { %v4466_v26 = vrot.slane %v4464_v43, 4  ;;  %v4687_v43 = vrot.slane %v7742_v39, 5 }
 0x345   : > { %6251 = vmatmul.mubr.bf16.vlgmr.msra.gmra.mrb[0].mxu1 %v6591_v18  ;;  %v4483_v18 = vrot.slane %v4481_v6, 5  ;;  %v4648_v6 = vld [vmem:[#allocation3 + $0x28] sm:$0xe] }
 0x346   : > { %6254 = vmatprep.mubr.bf16.mxu1 %v6593_v25  ;;  %6259 = vmatpush3.bf16.msra.mxu1 %v6592_v15  ;;  %v4415_v15 = vrot.slane %v4414_v57, 4  ;;  %v4433_v25 = vrot.slane %v4431_v51, 5  ;;  %v4470_v28 = vor.u32 %v4469_v53, %v4466_v26  ;;  %v6608_v57 = vld [vmem:[%s7863_s2 + $0x230] sm:$0xff]   ;;  %v4650_v51 = vld [vmem:[#allocation3 + $0x38] sm:$0xe]  ;;  %v5571_v11 = vrot.slane %v4648_v6, 9 }
 0x347   : > { %6260 = vmatprep.subr.bf16.mxu1 %v6594_v24  ;;  %v4688_v61 = vsel %vm6909_vm12, %v5572_v44, %v4687_v43  ;;  %v5574_v26 = vrot.slane %v4651_v55, 9  ;;  %v5652_v55 = vld [vmem:[%s6667_s23 + $0x8] sm:$0xff]  }
 0x348   : > { %v4420_v35 = vsel %vm6804_vm9, %v4415_v15, %v4419_v49  ;;  %v5573_v15 = vrot.slane %v4650_v51, 9  ;;  %v4695_v49 = vrot.slane %v7766_v21, 5 }
 0x34a   : > { %6261 = vmatpush3.bf16.msra.mxu1 %v6594_v24  ;;  %v4443_v24 = vrot.slane %v4442_v30, 4  ;;  %v4679_v30 = vrot.slane %v7735_v2, 5  ;;  %v4684_v2 = vsel %vm6909_vm12, %v5571_v11, %v4683_v16  ;;  %v4692_v39 = vsel %vm6909_vm12, %v5573_v15, %v4691_v10 }
 0x34b   : > { %6262 = vmatprep.subr.bf16.mxu1 %v6596_v7 }
 0x34d   : > { %6255 = vmatmul.mubr.bf16.gmra.mrb[4].mxu1 %v6595_v42  ;;  %v4434_v42 = vsel %vm6804_vm9, %v4429_v23, %v4433_v25 }
 0x34e   : > { %6263 = vmatpush3.bf16.msra.mxu1 %v6596_v7  ;;  %6274 = vmatprep.mubr.bf16.mxu1 %v5556_v29  ;;  %v6602_v7 = vld [vmem:[%s7863_s2 + $0x200] sm:$0xff]   ;;  %v4448_v29 = vsel %vm6804_vm9, %v4443_v24, %v4447_v17  ;;  %v4699_v24 = vrot.slane %v7756_v60, 5 }
 0x34f   : > { %6264 = vmatprep.subr.bf16.mxu1 %v6597_v27  ;;  %v5558_v9 = vcombine.low %v4448_v29, %v4462_v3 }
 0x352   : > { %6265 = vmatpush3.bf16.msra.mxu1 %v6597_v27  ;;  %v4484_v27 = vor.u32 %v4483_v18, %v4480_v62  ;;  %v4652_v62 = vld [vmem:[#allocation3 + $0x48] sm:$0xe]  ;;  %v5594_v18 = vcombine.low %v4688_v61, %v4692_v39 }
 0x353   : > { %6266 = vmatprep.subr.bf16.mxu1 %v6598_v38  ;;  %v5575_v25 = vrot.slane %v4652_v62, 9 }
 0x354   : > { %v4485_v20 = vrot.slane %v4484_v27, 4 }
 0x355   : > { %v4700_v53 = vsel %vm6909_vm12, %v5575_v25, %v4699_v24  ;;  %v5617_v24 = vld [vmem:[%s6667_s23] sm:$0xff]   ;;  %v5654_v25 = vld [vmem:[%s6667_s23 + $0x18] sm:$0xff]  }
 0x356   : > { %6267 = vmatpush3.bf16.msra.mxu1 %v6598_v38  ;;  %v5557_v38 = vcombine.low %v4420_v35, %v4434_v42  ;;  %v4490_v56 = vsel %vm6804_vm9, %v4485_v20, %v4489_v50 }
 0x357   : > { %6268 = vmatprep.subr.bf16.mxu1 %v6599_v32 }
 0x35a   : > { %6269 = vmatpush3.bf16.msra.mxu1 %v6599_v32  ;;  %v4471_v32 = vrot.slane %v4470_v28, 4 }
 0x35b   : > { %6270 = vmatprep.subr.bf16.mxu1 %v6600_v4 }
 0x35c   : > { %v4476_v0 = vsel %vm6804_vm9, %v4471_v32, %v4475_v14 }
 0x35d   : > { %v5559_v59 = vcombine.low %v4476_v0, %v4490_v56 }
 0x35e   : > { %6271 = vmatpush3.bf16.msra.mxu1 %v6600_v4  ;;  %v5592_v4 = vcombine.low %v4672_v58, %v4676_v22 }
 0x35f   : > { %6272 = vmatprep.subr.bf16.mxu1 %v6601_v33 }
 0x362   : > { %6273 = vmatpush3.bf16.msra.mxu1 %v6601_v33  ;;  %v5570_v33 = vrot.slane %v4647_v63, 9 }
 0x363   : > { %6282 = vmatprep.subr.bf16.mxu1 %v6602_v7 }
 0x364   : > { %v4680_v23 = vsel %vm6909_vm12, %v5570_v33, %v4679_v30 }
 0x365   : > { %6275 = vmatmul.mubr.bf16.vlgmr.msra.gmra.mrb[0].mxu1 %v5557_v38  ;;  %v5593_v36 = vcombine.low %v4680_v23, %v4684_v2 }
 0x366   : > { %6278 = vmatprep.mubr.bf16.mxu1 %v5558_v9  ;;  %6283 = vmatpush3.bf16.msra.mxu1 %v6602_v7  ;;  %v4696_v7 = vsel %vm6909_vm12, %v5574_v26, %v4695_v49  ;;  %v5653_v49 = vld [vmem:[%s6667_s23 + $0x10] sm:$0xff]   ;;  %v5618_v26 = vunpack.c.l.bf16 %v5617_v24 }
 0x367   : > { %6284 = vmatprep.subr.bf16.mxu1 %v6603_v54  ;;  %v5595_v17 = vcombine.low %v4696_v7, %v4700_v53  ;;  %v5619_v53 = vunpack.c.h.bf16 %v5617_v24  ;;  %v5622_v7 = vunpack.c.l.bf16 %v5652_v55 }
 0x36a   : > { %6285 = vmatpush3.bf16.msra.mxu1 %v6603_v54 }
 0x36b   : > { %6286 = vmatprep.subr.bf16.mxu1 %v6604_v47 }
 0x36d   : > { %6279 = vmatmul.mubr.bf16.gmra.mrb[4].mxu1 %v5559_v59 }
 0x36e   : > { %6287 = vmatpush3.bf16.msra.mxu1 %v6604_v47  ;;  %6298 = vmatprep.mubr.bf16.mxu1 %v5592_v4 }
 0x36f   : > { %6288 = vmatprep.subr.bf16.mxu1 %v6605_v1 }
 0x372   : > { %6289 = vmatpush3.bf16.msra.mxu1 %v6605_v1 }
 0x373   : > { %6290 = vmatprep.subr.bf16.mxu1 %v6606_v5 }
 0x376   : > { %6291 = vmatpush3.bf16.msra.mxu1 %v6606_v5 }
 0x377   : > { %6292 = vmatprep.subr.bf16.mxu1 %v6607_v40 }
 0x37a   : > { %6293 = vmatpush3.bf16.msra.mxu1 %v6607_v40 }
 0x37b   : > { %6294 = vmatprep.subr.bf16.mxu1 %v6608_v57 }
 0x37e   : > { %6295 = vmatpush3.bf16.msra.mxu1 %v6608_v57 }
 0x37f   : > { %6296 = vmatprep.subr.bf16.mxu1 %v6609_v46 }
 0x382   : > { %6297 = vmatpush3.bf16.msra.mxu1 %v6609_v46 }
 0x385   : > { %6299 = vmatmul.mubr.bf16.vlgmr.msra.gmra.mrb[0].mxu1 %v5593_v36 }
 0x386   : > { %6302 = vmatprep.mubr.bf16.mxu1 %v5594_v18 }
 0x38d   : > { %6303 = vmatmul.mubr.bf16.gmra.mrb[4].mxu1 %v5595_v17  ;;  %v5623_v17 = vunpack.c.h.bf16 %v5652_v55 }
 0x458   : > { %v7819_v13 = vpop.f32.mrb[0].mxu1 }
 0x459   : > { %v7821_v35 = vpop.f32.mrb[1].mxu1  ;;  %v4879_v3 = vmul.f32 %v7819_v13, %v7819_v13 }
 0x45a   : > { %v7823_v60 = vpop.f32.mrb[2].mxu1  ;;  %v4877_v27 = vmul.f32 %v7821_v35, %v7821_v35 }
 0x45b   : > { %v7825_v42 = vpop.f32.mrb[3].mxu1  ;;  %v4880_v37 = vmul.f32 %v7823_v60, %v7823_v60 }
 0x45c   : > { %v4863_v29 = vadd.f32 %v7825_v42, %v7821_v35  ;;  %v4878_v45 = vmul.f32 %v7825_v42, %v7825_v42 }
 0x45e   : > { %v4864_v21 = vadd.f32 %v7819_v13, %v4863_v29  ;;  %v4885_v28 = vadd.f32 %v4878_v45, %v4877_v27  ;;  %v5631_v27 = vunpack.c.h.bf16 %v5654_v25 }
 0x460   : > { %v4886_v38 = vadd.f32 %v4885_v28, %v4879_v3  ;;  %v7838_v54 = vpop.f32.mrb[4].mxu1  ;;  %v4865_v9 = vadd.f32 %v7823_v60, %v4864_v21 }
 0x461   : > { %v4832_v41 = vpop.f32.mrb[5].mxu1  ;;  %v4883_v48 = vmul.f32 %v7838_v54, %v7838_v54 }
 0x462   : > { %v4866_v20 = vadd.f32 %v4865_v9, %v4832_v41  ;;  %v4881_v8 = vmul.f32 %v4832_v41, %v4832_v41  ;;  %v4887_v12 = vadd.f32 %v4886_v38, %v4880_v37  ;;  %v6305_v31 = vpop.f32.mrb[6].mxu1 }
 0x463   : > { %v4835_v34 = vpop.f32.mrb[7].mxu1  ;;  %v4884_v56 = vmul.f32 %v6305_v31, %v6305_v31 }
 0x464   : > { %v4888_v32 = vadd.f32 %v4887_v12, %v4881_v8  ;;  %v4867_v50 = vadd.f32 %v4866_v20, %v4835_v34  ;;  %v4882_v47 = vmul.f32 %v4835_v34, %v4835_v34 }
 0x466   : > { %v4868_v52 = vadd.f32 %v7838_v54, %v4867_v50  ;;  %v4889_v14 = vadd.f32 %v4888_v32, %v4882_v47 }
 0x468   : > { %v4869_v58 = vadd.f32 %v6305_v31, %v4868_v52  ;;  %v4890_v22 = vadd.f32 %v4889_v14, %v4883_v48 }
 0x46a   : > { %v4870_v0 = vrot.slane %v4869_v58, 4  ;;  %v4891_v59 = vadd.f32 %v4890_v22, %v4884_v56 }
 0x46c   : > { %v4871_v1 = vadd.f32 %v4870_v0, %v4869_v58  ;;  %v4892_v4 = vrot.slane %v4891_v59, 4 }
 0x46e   : > { %v4872_v5 = vrot.slane %v4871_v1, 2  ;;  %v4893_v40 = vadd.f32 %v4892_v4, %v4891_v59 }
 0x470   : > { %v4873_v57 = vadd.f32 %v4872_v5, %v4871_v1  ;;  %v4894_v46 = vrot.slane %v4893_v40, 2 }
 0x472   : > { %v4874_v63 = vrot.slane %v4873_v57, 1  ;;  %v4895_v6 = vadd.f32 %v4894_v46, %v4893_v40 }
 0x474   : > { %v4875_v30 = vadd.f32 %v4874_v63, %v4873_v57  ;;  %v4896_v16 = vrot.slane %v4895_v6, 1 }
 0x476   : > { %v4897_v19 = vadd.f32 %v4896_v16, %v4895_v6  ;;  %v4899_v51 = vmul.f32 0.015625, %v4875_v30 }
 0x478   : > { %v4900_v43 = vmul.f32 0.015625, %v4897_v19  ;;  %v4901_v10 = vmul.f32 %v4899_v51, %v4899_v51  ;;  %v4914_v33 = vsub.f32 %v7821_v35, %v4899_v51  ;;  %v4915_v11 = vsub.f32 %v7825_v42, %v4899_v51 }
 0x479   : > { %v4916_v44 = vsub.f32 %v7819_v13, %v4899_v51  ;;  %v4917_v15 = vsub.f32 %v7823_v60, %v4899_v51  ;;  %v4918_v23 = vsub.f32 %v4832_v41, %v4899_v51  ;;  %v4919_v2 = vsub.f32 %v4835_v34, %v4899_v51 }
 0x47a   : > { %v4902_v61 = vsub.f32 %v4900_v43, %v4901_v10  ;;  %v4920_v39 = vsub.f32 %v7838_v54, %v4899_v51  ;;  %v4921_v36 = vsub.f32 %v6305_v31, %v4899_v51  ;;  %v5626_v35 = vunpack.c.l.bf16 %v5653_v49 }
 0x47b   : > { %v5627_v60 = vunpack.c.h.bf16 %v5653_v49  ;;  %v5630_v42 = vunpack.c.l.bf16 %v5654_v25 }
 0x47c   : > { %v4903_v62 = vmax.f32 %v4902_v61, 0.0 }
 0x47e   : > { %v4904_v18 = vadd.f32 1e-05, %v4903_v62 }
 0x480   : > { %6612 = vrsqrt.f32 %v4904_v18 }
 0x48a   : > { %v6613_v13 = vpop.eup %6612 }
 0x48b   : > { %v4922_v29 = vmul.f32 %v6613_v13, %v4914_v33  ;;  %v4923_v45 = vmul.f32 %v6613_v13, %v4915_v11  ;;  %v4924_v3 = vmul.f32 %v6613_v13, %v4916_v44  ;;  %v4925_v21 = vmul.f32 %v6613_v13, %v4917_v15 }
 0x48c   : > { %v4926_v28 = vmul.f32 %v6613_v13, %v4918_v23  ;;  %v4927_v37 = vmul.f32 %v6613_v13, %v4919_v2  ;;  %v4928_v38 = vmul.f32 %v6613_v13, %v4920_v39  ;;  %v4929_v54 = vmul.f32 %v6613_v13, %v4921_v36 }
 0x48d   : > { %v4946_v9 = vadd.f32 %v5618_v26, %v4922_v29  ;;  %v4947_v41 = vadd.f32 %v5619_v53, %v4923_v45  ;;  %v4948_v20 = vadd.f32 %v5622_v7, %v4924_v3  ;;  %v4949_v8 = vadd.f32 %v5623_v17, %v4925_v21 }
 0x48e   : > { %v4950_v12 = vadd.f32 %v5626_v35, %v4926_v28  ;;  %v4951_v31 = vadd.f32 %v5627_v60, %v4927_v37  ;;  %v4952_v34 = vadd.f32 %v5630_v42, %v4928_v38  ;;  %v4953_v32 = vadd.f32 %v5631_v27, %v4929_v54 }
 0x48f   : > { %v5635_v50 = vpack.c.bf16 %v4947_v41, %v4946_v9  ;;  %v5640_v47 = vpack.c.bf16 %v4949_v8, %v4948_v20 }
 0x490   : > { %v5645_v48 = vpack.c.bf16 %v4951_v31, %v4950_v12  ;;  %v5650_v52 = vpack.c.bf16 %v4953_v32, %v4952_v34 }
 0x491   : > { %5636 = vst [vmem:[%s170_s4] sm:$0xff] %v5635_v50   ;;  %5655 = vst [vmem:[%s170_s4 + $0x8] sm:$0xff] %v5640_v47  }
 0x492   : > { %5656 = vst [vmem:[%s170_s4 + $0x10] sm:$0xff] %v5645_v48   ;;  %5657 = vst [vmem:[%s170_s4 + $0x18] sm:$0xff] %v5650_v52  }
 0x493 PF: > { %s13_s12 = sadd.s32 1, %s6620_s12  }
 0x494   : > { %p10_p4 = scmp.ge.s32.totalorder %s13_s12, 4  }
 0x496   :  { %12 = sbr.rel (!%p10_p4) target bundleno = 1 (0x1), region = 85 }

</bundles_post_ra>
